<compile_context>
chip_gen: v7x
topology: tpu7x:2x2x1
jax: 0.10.0
libtpu: 0.0.40
codegen_flags: <defaults>
</compile_context>

<pallas_src>
import jax
import jax.numpy as jnp
from jax import lax
from jax.experimental import pallas as pl
from jax.experimental.pallas import tpu as pltpu


# --------------------------- Pallas conv kernel ------------------------------
#
#   xs[n, I, J, (r*2+s)*C + c] = zero_pad(h)[n, 2I+r, 2J+s, c]
#   out[n, i, j, :] = sum_{dh,dw in {0,1}} xs[n, i+dh, j+dw, :] @ W2[dh*2+dw]
#
# with W2[t] of shape (4*C_in, C_out).

def _make_conv_kernel(ho, wo, k4, cout, fuse_lrelu, emit_stats):
    m = ho * wo

    def kernel(xs_ref, w_ref, bias_ref, *out_refs):
        # xs_ref: (1, ho+1, wo+1, k4) bf16 ; w_ref: (4, k4, cout) bf16
        acc = None
        for t, (dh, dw) in enumerate(((0, 0), (0, 1), (1, 0), (1, 1))):
            a = xs_ref[0, dh:dh + ho, dw:dw + wo, :].reshape(m, k4)
            d = jnp.dot(a, w_ref[t], preferred_element_type=jnp.float32)
            acc = d if acc is None else acc + d
        y = acc + bias_ref[...]                          # (m, cout) f32
        if fuse_lrelu:                                   # first block: no BN
            y = jnp.where(y >= 0, y, 0.2 * y)
        out_refs[0][0] = y.astype(out_refs[0].dtype)     # bf16 activation out
        if emit_stats:
            # BN batch stats from the f32 accumulator (per-image partial sums,
            # reduced over batch in JAX).  NOTE: var is later formed as
            # E[x^2]-E[x]^2; fine at this init (bias=0, SN'd weights) but
            # cancellation-prone if channel means grow large.
            s1 = jnp.sum(y, axis=0, keepdims=True)
            s2 = jnp.sum(y * y, axis=0, keepdims=True)
            out_refs[1][0] = jnp.concatenate([s1, s2], axis=0)

    return kernel


def conv4x4s2_block(xs, w_taps, bias, *, fuse_lrelu, emit_stats):
    """xs: (N, Ho+1, Wo+1, 4*Cin) bf16 space-to-depth input,
       w_taps: (4, 4*Cin, Cout), bias: (Cout,).
       Returns (N, Ho, Wo, Cout) bf16 [, (2, Cout) f32 sum/sumsq]."""
    n, hp, wp, k4 = xs.shape
    ho, wo = hp - 1, wp - 1
    cout = w_taps.shape[-1]
    m = ho * wo
    kernel = _make_conv_kernel(ho, wo, k4, cout, fuse_lrelu, emit_stats)

    if emit_stats:
        out_shape = (jax.ShapeDtypeStruct((n, m, cout), jnp.bfloat16),
                     jax.ShapeDtypeStruct((n, 2, cout), jnp.float32))
        out_specs = (pl.BlockSpec((1, m, cout), lambda i: (i, 0, 0)),
                     pl.BlockSpec((1, 2, cout), lambda i: (i, 0, 0)))
    else:
        out_shape = jax.ShapeDtypeStruct((n, m, cout), jnp.bfloat16)
        out_specs = pl.BlockSpec((1, m, cout), lambda i: (i, 0, 0))

    res = pl.pallas_call(
        kernel,
        out_shape=out_shape,
        grid_spec=pltpu.PrefetchScalarGridSpec(
            num_scalar_prefetch=0,
            grid=(n,),                                   # one image per step
            in_specs=[pl.BlockSpec((1, hp, wp, k4), lambda i: (i, 0, 0, 0)),
                      pl.BlockSpec((4, k4, cout), lambda i: (0, 0, 0)),
                      pl.BlockSpec((1, cout), lambda i: (0, 0))],
            out_specs=out_specs),
        # Whole-image tiles are <1 MiB each at these shapes -> far under the
        # scoped-VMEM default on v5e/v6e/v7x; batch axis "parallel" lets v7x's
        # 2 TensorCores split the work.
        compiler_params=pltpu.CompilerParams(dimension_semantics=("parallel",)),
    )(xs, w_taps.astype(jnp.bfloat16),
      bias.reshape(1, -1).astype(jnp.float32))

    if emit_stats:
        y, stats = res
        return y.reshape(n, ho, wo, cout), jnp.sum(stats, axis=0)
    return res.reshape(n, ho, wo, cout)


# ------------------------------ JAX glue --------------------------------------

def _space_to_depth_pad(h):
    # h: (N, H, W, C) bf16 -> zero-pad 1 -> (N, (H+2)//2, (W+2)//2, 4C),
    # depth ordering (r, s, c).  XLA fuses any preceding elementwise (BN affine
    # + LeakyReLU) into this single relayout pass.
    n, hh, ww, c = h.shape
    hp, wp = (hh + 2) // 2, (ww + 2) // 2
    xp = jnp.pad(h, ((0, 0), (1, 1), (1, 1), (0, 0)))
    xs = xp.reshape(n, hp, 2, wp, 2, c).transpose(0, 1, 3, 2, 4, 5)
    return xs.reshape(n, hp, wp, 4 * c)


def _conv_weight_to_taps(w_sn):
    # (Cout, Cin, kh, kw) -> (4 taps, 4*Cin, Cout); kh = 2*dh + r, kw = 2*dw + s,
    # K ordering (r, s, cin) to match the space-to-depth depth ordering.
    cout, cin = w_sn.shape[0], w_sn.shape[1]
    w6 = w_sn.reshape(cout, cin, 2, 2, 2, 2)        # (cout, cin, dh, r, dw, s)
    w6 = w6.transpose(2, 4, 3, 5, 1, 0)             # (dh, dw, r, s, cin, cout)
    return w6.reshape(4, 4 * cin, cout)


def spectral_normalize(w, u):
    # One power iteration (PyTorch nn.utils.spectral_norm, training mode).
    # TODO(synk): stateless -- does not return the updated `u` buffer like torch.
    w_mat = w.reshape(w.shape[0], -1)
    v = w_mat.T @ u
    v = v / (jnp.linalg.norm(v) + 1e-12)
    u_new = w_mat @ v
    u_new = u_new / (jnp.linalg.norm(u_new) + 1e-12)
    sigma = u_new @ (w_mat @ v)
    return w / sigma


def d_arch(ndf, img_dim):
    return {
        32: {'in_channels': [img_dim] + [ndf * m for m in [2, 4]],
             'out_channels': [ndf * m for m in [2, 4, 8]]},
        64: {'in_channels': [img_dim] + [ndf * m for m in [2, 4, 8]],
             'out_channels': [ndf * m for m in [2, 4, 8, 16]]},
        128: {'in_channels': [img_dim] + [ndf * m for m in [1, 2, 4, 8]],
              'out_channels': [ndf * m for m in [1, 2, 4, 8, 16]]},
    }


def init_params(key, ndf, img_dim, resolution, bottom_width, output_dim):
    arch = d_arch(ndf, img_dim)[resolution]
    blocks = []
    for idx, (cin, cout) in enumerate(zip(arch['in_channels'],
                                          arch['out_channels'])):
        key, kw, ku = jax.random.split(key, 3)
        p = {
            # init='N02': weights ~ N(0, 0.02); PyTorch layout (Cout, Cin, kh, kw)
            'w': 0.02 * jax.random.normal(kw, (cout, cin, 4, 4), jnp.float32),
            'b': jnp.zeros((cout,), jnp.float32),
            'u': jax.random.normal(ku, (cout,), jnp.float32),
        }
        p['u'] = p['u'] / (jnp.linalg.norm(p['u']) + 1e-12)
        if idx != 0:  # BatchNorm2d params (default init gamma=1, beta=0)
            p['gamma'] = jnp.ones((cout,), jnp.float32)
            p['beta'] = jnp.zeros((cout,), jnp.float32)
        blocks.append(p)
    key, kw = jax.random.split(key)
    in_feat = arch['out_channels'][-1] * bottom_width ** 2
    return {
        'blocks': blocks,
        'out_w': 0.02 * jax.random.normal(kw, (output_dim, in_feat), jnp.float32),
        'out_b': jnp.zeros((output_dim,), jnp.float32),
    }


def discriminator_forward(params, x):
    # x: (N, C, H, W) f32 (PyTorch convention) -> NHWC once, then stay NHWC.
    h = x.astype(jnp.float32).transpose(0, 2, 3, 1)
    n_b = h.shape[0]
    scale = shift = None
    for idx, p in enumerate(params['blocks']):
        w_sn = spectral_normalize(p['w'], p['u'])
        w_taps = _conv_weight_to_taps(w_sn)
        if scale is not None:
            # Previous block's BN affine + LeakyReLU, folded into the pad +
            # space-to-depth relayout feeding this conv (single fused pass).
            h = h.astype(jnp.float32) * scale + shift
            h = jnp.where(h >= 0, h, 0.2 * h)
        xs = _space_to_depth_pad(h.astype(jnp.bfloat16))
        if idx == 0:
            # SN-Conv + bias + LeakyReLU fully fused in the kernel epilogue.
            h = conv4x4s2_block(xs, w_taps, p['b'],
                                fuse_lrelu=True, emit_stats=False)
            scale = shift = None
        else:
            # SN-Conv + bias with fused BN batch statistics.
            h, sums = conv4x4s2_block(xs, w_taps, p['b'],
                                      fuse_lrelu=False, emit_stats=True)
            cnt = h.shape[0] * h.shape[1] * h.shape[2]
            mean = sums[0] / cnt
            var = sums[1] / cnt - mean * mean            # biased var (BN train)
            scale = p['gamma'] * lax.rsqrt(var + 1e-5)
            shift = p['beta'] - mean * scale
    if scale is not None:
        # Last block's BN affine + LeakyReLU (standalone; fuses into the
        # flatten + head GEMV).
        h = h.astype(jnp.float32) * scale + shift
        h = jnp.where(h >= 0, h, 0.2 * h)
    # Final linear. PyTorch flattens NCHW (c,h,w); our features are (h,w,c),
    # so permute the weight columns to keep identical semantics.
    bw = h.shape[1]
    c_last = h.shape[-1]
    out_dim = params['out_w'].shape[0]
    w_out = (params['out_w'].reshape(out_dim, c_last, bw, bw)
             .transpose(0, 2, 3, 1).reshape(out_dim, -1))
    flat = h.reshape(n_b, -1).astype(jnp.float32)
    # Tiny (N, in_feat) x (in_feat, 1) GEMV: plain dot per perf review.
    return flat @ w_out.T + params['out_b']


def reference_forward(params, x):
    # Pure-JAX reference with the same precision policy (bf16 activations /
    # weights on the conv path, f32 stats & affine) for a tight correctness check.
    h = x.astype(jnp.float32).transpose(0, 2, 3, 1)
    nblocks = len(params['blocks'])
    for idx, p in enumerate(params['blocks']):
        w_sn = spectral_normalize(p['w'], p['u'])
        w_hwio = w_sn.transpose(2, 3, 1, 0).astype(jnp.bfloat16)
        y = lax.conv_general_dilated(
            h.astype(jnp.bfloat16), w_hwio, window_strides=(2, 2),
            padding=((1, 1), (1, 1)),
            dimension_numbers=('NHWC', 'HWIO', 'NHWC'),
            preferred_element_type=jnp.float32) + p['b']
        if idx == 0:
            h = jnp.where(y >= 0, y, 0.2 * y).astype(jnp.bfloat16)
        else:
            mean = jnp.mean(y, axis=(0, 1, 2))
            var = jnp.mean(y * y, axis=(0, 1, 2)) - mean * mean
            scale = p['gamma'] * lax.rsqrt(var + 1e-5)
            shift = p['beta'] - mean * scale
            yb = y.astype(jnp.bfloat16).astype(jnp.float32)
            h = yb * scale + shift
            h = jnp.where(h >= 0, h, 0.2 * h)
            if idx != nblocks - 1:
                h = h.astype(jnp.bfloat16)
    n_b, bw, _, c_last = h.shape
    out_dim = params['out_w'].shape[0]
    w_out = (params['out_w'].reshape(out_dim, c_last, bw, bw)
             .transpose(0, 2, 3, 1).reshape(out_dim, -1))
    flat = h.reshape(n_b, -1).astype(jnp.float32)
    return flat @ w_out.T + params['out_b']


if __name__ == "__main__":
    key = jax.random.PRNGKey(0)
    # Small but architecture-consistent config: resolution 64 (4 stride-2 convs
    # -> bottom_width 4), ndf=8 keeps channel widths small.
    ndf, img_dim, resolution, bottom_width, output_dim = 8, 3, 64, 4, 1
    params = init_params(key, ndf, img_dim, resolution, bottom_width, output_dim)
    x = jax.random.normal(jax.random.fold_in(key, 999),
                          (2, img_dim, resolution, resolution), jnp.float32)

    fwd = jax.jit(discriminator_forward)
    out = jax.block_until_ready(fwd(params, x))
    assert out.shape == (2, output_dim)
    assert bool(jnp.all(jnp.isfinite(out)))

    ref = reference_forward(params, x)
    max_ref = float(jnp.max(jnp.abs(ref)))
    err = float(jnp.max(jnp.abs(out - ref)))
    assert err <= 3e-2 + 3e-2 * max_ref, f"mismatch: max|diff|={err}, max|ref|={max_ref}"
    print("KERNEL_OK")
</pallas_src>

<mosaic_0001>
module attributes {stable_mosaic.version = 11 : i64} {
  func.func @kernel(%arg0: i32, %arg1: memref<1x33x33x12xbf16, #tpu.memory_space<vmem>>, %arg2: memref<4x12x16xbf16, #tpu.memory_space<vmem>>, %arg3: memref<1x16xf32, #tpu.memory_space<vmem>>, %arg4: memref<1x1024x16xbf16, #tpu.memory_space<vmem>>) attributes {dimension_semantics = [#tpu.dimension_semantics<parallel>], iteration_bounds = array<i64: 2>, scalar_prefetch = 0 : i64, scratch_operands = 0 : i64, tpu.core_type = #tpu.core_type<tc>, window_params = [{transform_indices = @transform_0, window_bounds = array<i64: 1, 33, 33, 12>}, {pipeline_mode = #tpu.pipeline_mode<synchronous>, transform_indices = @transform_1, window_bounds = array<i64: 4, 12, 16>}, {pipeline_mode = #tpu.pipeline_mode<synchronous>, transform_indices = @transform_2, window_bounds = array<i64: 1, 16>}, {transform_indices = @transform_3, window_bounds = array<i64: 1, 1024, 16>}]} {
    %c0 = arith.constant 0 : index
    %c0_0 = arith.constant 0 : index
    %c0_1 = arith.constant 0 : index
    %c0_2 = arith.constant 0 : index
    %0 = vector.load %arg1[%c0, %c0_0, %c0_1, %c0_2] : memref<1x33x33x12xbf16, #tpu.memory_space<vmem>>, vector<1x32x32x12xbf16>
    %1 = vector.shape_cast %0 : vector<1x32x32x12xbf16> to vector<32x32x12xbf16>
    %2 = vector.shape_cast %1 : vector<32x32x12xbf16> to vector<1024x12xbf16>
    %c0_3 = arith.constant 0 : index
    %c0_4 = arith.constant 0 : index
    %c0_5 = arith.constant 0 : index
    %3 = vector.load %arg2[%c0_3, %c0_4, %c0_5] : memref<4x12x16xbf16, #tpu.memory_space<vmem>>, vector<1x12x16xbf16>
    %4 = vector.shape_cast %3 : vector<1x12x16xbf16> to vector<12x16xbf16>
    %cst = arith.constant dense<0.000000e+00> : vector<1024x16xf32>
    %5 = tpu.matmul %2, %4, %cst {dimension_numbers = #tpu.dot_dimension_numbers<[1], [0], [0], [1], [0, 0, 1, 1], [], []>} : vector<1024x12xbf16>, vector<12x16xbf16>, vector<1024x16xf32> -> vector<1024x16xf32>
    %c0_6 = arith.constant 0 : index
    %c0_7 = arith.constant 0 : index
    %c1 = arith.constant 1 : index
    %c0_8 = arith.constant 0 : index
    %6 = vector.load %arg1[%c0_6, %c0_7, %c1, %c0_8] : memref<1x33x33x12xbf16, #tpu.memory_space<vmem>>, vector<1x32x32x12xbf16>
    %7 = vector.shape_cast %6 : vector<1x32x32x12xbf16> to vector<32x32x12xbf16>
    %8 = vector.shape_cast %7 : vector<32x32x12xbf16> to vector<1024x12xbf16>
    %c1_9 = arith.constant 1 : index
    %c0_10 = arith.constant 0 : index
    %c0_11 = arith.constant 0 : index
    %9 = vector.load %arg2[%c1_9, %c0_10, %c0_11] : memref<4x12x16xbf16, #tpu.memory_space<vmem>>, vector<1x12x16xbf16>
    %10 = vector.shape_cast %9 : vector<1x12x16xbf16> to vector<12x16xbf16>
    %cst_12 = arith.constant dense<0.000000e+00> : vector<1024x16xf32>
    %11 = tpu.matmul %8, %10, %cst_12 {dimension_numbers = #tpu.dot_dimension_numbers<[1], [0], [0], [1], [0, 0, 1, 1], [], []>} : vector<1024x12xbf16>, vector<12x16xbf16>, vector<1024x16xf32> -> vector<1024x16xf32>
    %12 = arith.addf %5, %11 : vector<1024x16xf32>
    %c0_13 = arith.constant 0 : index
    %c1_14 = arith.constant 1 : index
    %c0_15 = arith.constant 0 : index
    %c0_16 = arith.constant 0 : index
    %13 = vector.load %arg1[%c0_13, %c1_14, %c0_15, %c0_16] : memref<1x33x33x12xbf16, #tpu.memory_space<vmem>>, vector<1x32x32x12xbf16>
    %14 = vector.shape_cast %13 : vector<1x32x32x12xbf16> to vector<32x32x12xbf16>
    %15 = vector.shape_cast %14 : vector<32x32x12xbf16> to vector<1024x12xbf16>
    %c2 = arith.constant 2 : index
    %c0_17 = arith.constant 0 : index
    %c0_18 = arith.constant 0 : index
    %16 = vector.load %arg2[%c2, %c0_17, %c0_18] : memref<4x12x16xbf16, #tpu.memory_space<vmem>>, vector<1x12x16xbf16>
    %17 = vector.shape_cast %16 : vector<1x12x16xbf16> to vector<12x16xbf16>
    %cst_19 = arith.constant dense<0.000000e+00> : vector<1024x16xf32>
    %18 = tpu.matmul %15, %17, %cst_19 {dimension_numbers = #tpu.dot_dimension_numbers<[1], [0], [0], [1], [0, 0, 1, 1], [], []>} : vector<1024x12xbf16>, vector<12x16xbf16>, vector<1024x16xf32> -> vector<1024x16xf32>
    %19 = arith.addf %12, %18 : vector<1024x16xf32>
    %c0_20 = arith.constant 0 : index
    %c1_21 = arith.constant 1 : index
    %c1_22 = arith.constant 1 : index
    %c0_23 = arith.constant 0 : index
    %20 = vector.load %arg1[%c0_20, %c1_21, %c1_22, %c0_23] : memref<1x33x33x12xbf16, #tpu.memory_space<vmem>>, vector<1x32x32x12xbf16>
    %21 = vector.shape_cast %20 : vector<1x32x32x12xbf16> to vector<32x32x12xbf16>
    %22 = vector.shape_cast %21 : vector<32x32x12xbf16> to vector<1024x12xbf16>
    %c3 = arith.constant 3 : index
    %c0_24 = arith.constant 0 : index
    %c0_25 = arith.constant 0 : index
    %23 = vector.load %arg2[%c3, %c0_24, %c0_25] : memref<4x12x16xbf16, #tpu.memory_space<vmem>>, vector<1x12x16xbf16>
    %24 = vector.shape_cast %23 : vector<1x12x16xbf16> to vector<12x16xbf16>
    %cst_26 = arith.constant dense<0.000000e+00> : vector<1024x16xf32>
    %25 = tpu.matmul %22, %24, %cst_26 {dimension_numbers = #tpu.dot_dimension_numbers<[1], [0], [0], [1], [0, 0, 1, 1], [], []>} : vector<1024x12xbf16>, vector<12x16xbf16>, vector<1024x16xf32> -> vector<1024x16xf32>
    %26 = arith.addf %19, %25 : vector<1024x16xf32>
    %c0_27 = arith.constant 0 : index
    %c0_28 = arith.constant 0 : index
    %27 = vector.load %arg3[%c0_27, %c0_28] : memref<1x16xf32, #tpu.memory_space<vmem>>, vector<1x16xf32>
    %28 = vector.broadcast %27 : vector<1x16xf32> to vector<1024x16xf32>
    %29 = arith.addf %26, %28 : vector<1024x16xf32>
    %cst_29 = arith.constant 0.000000e+00 : f32
    %30 = vector.broadcast %cst_29 : f32 to vector<1024x16xf32>
    %31 = arith.cmpf oge, %29, %30 : vector<1024x16xf32>
    %cst_30 = arith.constant 2.000000e-01 : f32
    %32 = vector.broadcast %cst_30 : f32 to vector<1024x16xf32>
    %33 = arith.mulf %32, %29 : vector<1024x16xf32>
    %34 = arith.select %31, %29, %33 : vector<1024x16xi1>, vector<1024x16xf32>
    %35 = arith.truncf %34 : vector<1024x16xf32> to vector<1024x16xbf16>
    %c0_31 = arith.constant 0 : index
    %c0_32 = arith.constant 0 : index
    %c0_33 = arith.constant 0 : index
    %36 = vector.load %arg4[%c0_31, %c0_32, %c0_33] : memref<1x1024x16xbf16, #tpu.memory_space<vmem>>, vector<1x1024x16xbf16>
    %37 = vector.shape_cast %36 : vector<1x1024x16xbf16> to vector<1024x16xbf16>
    %38 = vector.shape_cast %35 : vector<1024x16xbf16> to vector<1x1024x16xbf16>
    tpu.vector_store %arg4[%c0_31, %c0_32, %c0_33], %38 {strides = array<i32>} : memref<1x1024x16xbf16, #tpu.memory_space<vmem>>, vector<1x1024x16xbf16>,
    return
  }
  func.func @transform_0(%arg0: i32) -> (i32, i32, i32, i32) {
    %c0_i32 = arith.constant 0 : i32
    %c0_i32_0 = arith.constant 0 : i32
    %c0_i32_1 = arith.constant 0 : i32
    %c0_i32_2 = arith.constant 0 : i32
    return %arg0, %c0_i32, %c0_i32_0, %c0_i32_1 : i32, i32, i32, i32
  }
  func.func @transform_1(%arg0: i32) -> (i32, i32, i32) {
    %c0_i32 = arith.constant 0 : i32
    %c0_i32_0 = arith.constant 0 : i32
    %c0_i32_1 = arith.constant 0 : i32
    %c0_i32_2 = arith.constant 0 : i32
    return %c0_i32, %c0_i32_0, %c0_i32_1 : i32, i32, i32
  }
  func.func @transform_2(%arg0: i32) -> (i32, i32) {
    %c0_i32 = arith.constant 0 : i32
    %c0_i32_0 = arith.constant 0 : i32
    %c0_i32_1 = arith.constant 0 : i32
    return %c0_i32, %c0_i32_0 : i32, i32
  }
  func.func @transform_3(%arg0: i32) -> (i32, i32, i32) {
    %c0_i32 = arith.constant 0 : i32
    %c0_i32_0 = arith.constant 0 : i32
    %c0_i32_1 = arith.constant 0 : i32
    return %arg0, %c0_i32, %c0_i32_0 : i32, i32, i32
  }
}

module attributes {stable_mosaic.version = 11 : i64} {
  func.func @kernel(%arg0: i32, %arg1: memref<1x17x17x64xbf16, #tpu.memory_space<vmem>>, %arg2: memref<4x64x32xbf16, #tpu.memory_space<vmem>>, %arg3: memref<1x32xf32, #tpu.memory_space<vmem>>, %arg4: memref<1x256x32xbf16, #tpu.memory_space<vmem>>, %arg5: memref<1x2x32xf32, #tpu.memory_space<vmem>>) attributes {dimension_semantics = [#tpu.dimension_semantics<parallel>], iteration_bounds = array<i64: 2>, scalar_prefetch = 0 : i64, scratch_operands = 0 : i64, tpu.core_type = #tpu.core_type<tc>, window_params = [{transform_indices = @transform_0, window_bounds = array<i64: 1, 17, 17, 64>}, {pipeline_mode = #tpu.pipeline_mode<synchronous>, transform_indices = @transform_1, window_bounds = array<i64: 4, 64, 32>}, {pipeline_mode = #tpu.pipeline_mode<synchronous>, transform_indices = @transform_2, window_bounds = array<i64: 1, 32>}, {transform_indices = @transform_3, window_bounds = array<i64: 1, 256, 32>}, {transform_indices = @transform_4, window_bounds = array<i64: 1, 2, 32>}]} {
    %c0 = arith.constant 0 : index
    %c0_0 = arith.constant 0 : index
    %c0_1 = arith.constant 0 : index
    %c0_2 = arith.constant 0 : index
    %0 = vector.load %arg1[%c0, %c0_0, %c0_1, %c0_2] : memref<1x17x17x64xbf16, #tpu.memory_space<vmem>>, vector<1x16x16x64xbf16>
    %1 = vector.shape_cast %0 : vector<1x16x16x64xbf16> to vector<16x16x64xbf16>
    %2 = vector.shape_cast %1 : vector<16x16x64xbf16> to vector<256x64xbf16>
    %c0_3 = arith.constant 0 : index
    %c0_4 = arith.constant 0 : index
    %c0_5 = arith.constant 0 : index
    %3 = vector.load %arg2[%c0_3, %c0_4, %c0_5] : memref<4x64x32xbf16, #tpu.memory_space<vmem>>, vector<1x64x32xbf16>
    %4 = vector.shape_cast %3 : vector<1x64x32xbf16> to vector<64x32xbf16>
    %cst = arith.constant dense<0.000000e+00> : vector<256x32xf32>
    %5 = tpu.matmul %2, %4, %cst {dimension_numbers = #tpu.dot_dimension_numbers<[1], [0], [0], [1], [0, 0, 1, 1], [], []>} : vector<256x64xbf16>, vector<64x32xbf16>, vector<256x32xf32> -> vector<256x32xf32>
    %c0_6 = arith.constant 0 : index
    %c0_7 = arith.constant 0 : index
    %c1 = arith.constant 1 : index
    %c0_8 = arith.constant 0 : index
    %6 = vector.load %arg1[%c0_6, %c0_7, %c1, %c0_8] : memref<1x17x17x64xbf16, #tpu.memory_space<vmem>>, vector<1x16x16x64xbf16>
    %7 = vector.shape_cast %6 : vector<1x16x16x64xbf16> to vector<16x16x64xbf16>
    %8 = vector.shape_cast %7 : vector<16x16x64xbf16> to vector<256x64xbf16>
    %c1_9 = arith.constant 1 : index
    %c0_10 = arith.constant 0 : index
    %c0_11 = arith.constant 0 : index
    %9 = vector.load %arg2[%c1_9, %c0_10, %c0_11] : memref<4x64x32xbf16, #tpu.memory_space<vmem>>, vector<1x64x32xbf16>
    %10 = vector.shape_cast %9 : vector<1x64x32xbf16> to vector<64x32xbf16>
    %cst_12 = arith.constant dense<0.000000e+00> : vector<256x32xf32>
    %11 = tpu.matmul %8, %10, %cst_12 {dimension_numbers = #tpu.dot_dimension_numbers<[1], [0], [0], [1], [0, 0, 1, 1], [], []>} : vector<256x64xbf16>, vector<64x32xbf16>, vector<256x32xf32> -> vector<256x32xf32>
    %12 = arith.addf %5, %11 : vector<256x32xf32>
    %c0_13 = arith.constant 0 : index
    %c1_14 = arith.constant 1 : index
    %c0_15 = arith.constant 0 : index
    %c0_16 = arith.constant 0 : index
    %13 = vector.load %arg1[%c0_13, %c1_14, %c0_15, %c0_16] : memref<1x17x17x64xbf16, #tpu.memory_space<vmem>>, vector<1x16x16x64xbf16>
    %14 = vector.shape_cast %13 : vector<1x16x16x64xbf16> to vector<16x16x64xbf16>
    %15 = vector.shape_cast %14 : vector<16x16x64xbf16> to vector<256x64xbf16>
    %c2 = arith.constant 2 : index
    %c0_17 = arith.constant 0 : index
    %c0_18 = arith.constant 0 : index
    %16 = vector.load %arg2[%c2, %c0_17, %c0_18] : memref<4x64x32xbf16, #tpu.memory_space<vmem>>, vector<1x64x32xbf16>
    %17 = vector.shape_cast %16 : vector<1x64x32xbf16> to vector<64x32xbf16>
    %cst_19 = arith.constant dense<0.000000e+00> : vector<256x32xf32>
    %18 = tpu.matmul %15, %17, %cst_19 {dimension_numbers = #tpu.dot_dimension_numbers<[1], [0], [0], [1], [0, 0, 1, 1], [], []>} : vector<256x64xbf16>, vector<64x32xbf16>, vector<256x32xf32> -> vector<256x32xf32>
    %19 = arith.addf %12, %18 : vector<256x32xf32>
    %c0_20 = arith.constant 0 : index
    %c1_21 = arith.constant 1 : index
    %c1_22 = arith.constant 1 : index
    %c0_23 = arith.constant 0 : index
    %20 = vector.load %arg1[%c0_20, %c1_21, %c1_22, %c0_23] : memref<1x17x17x64xbf16, #tpu.memory_space<vmem>>, vector<1x16x16x64xbf16>
    %21 = vector.shape_cast %20 : vector<1x16x16x64xbf16> to vector<16x16x64xbf16>
    %22 = vector.shape_cast %21 : vector<16x16x64xbf16> to vector<256x64xbf16>
    %c3 = arith.constant 3 : index
    %c0_24 = arith.constant 0 : index
    %c0_25 = arith.constant 0 : index
    %23 = vector.load %arg2[%c3, %c0_24, %c0_25] : memref<4x64x32xbf16, #tpu.memory_space<vmem>>, vector<1x64x32xbf16>
    %24 = vector.shape_cast %23 : vector<1x64x32xbf16> to vector<64x32xbf16>
    %cst_26 = arith.constant dense<0.000000e+00> : vector<256x32xf32>
    %25 = tpu.matmul %22, %24, %cst_26 {dimension_numbers = #tpu.dot_dimension_numbers<[1], [0], [0], [1], [0, 0, 1, 1], [], []>} : vector<256x64xbf16>, vector<64x32xbf16>, vector<256x32xf32> -> vector<256x32xf32>
    %26 = arith.addf %19, %25 : vector<256x32xf32>
    %c0_27 = arith.constant 0 : index
    %c0_28 = arith.constant 0 : index
    %27 = vector.load %arg3[%c0_27, %c0_28] : memref<1x32xf32, #tpu.memory_space<vmem>>, vector<1x32xf32>
    %28 = vector.broadcast %27 : vector<1x32xf32> to vector<256x32xf32>
    %29 = arith.addf %26, %28 : vector<256x32xf32>
    %30 = arith.truncf %29 : vector<256x32xf32> to vector<256x32xbf16>
    %c0_29 = arith.constant 0 : index
    %c0_30 = arith.constant 0 : index
    %c0_31 = arith.constant 0 : index
    %31 = vector.load %arg4[%c0_29, %c0_30, %c0_31] : memref<1x256x32xbf16, #tpu.memory_space<vmem>>, vector<1x256x32xbf16>
    %32 = vector.shape_cast %31 : vector<1x256x32xbf16> to vector<256x32xbf16>
    %33 = vector.shape_cast %30 : vector<256x32xbf16> to vector<1x256x32xbf16>
    tpu.vector_store %arg4[%c0_29, %c0_30, %c0_31], %33 {strides = array<i32>} : memref<1x256x32xbf16, #tpu.memory_space<vmem>>, vector<1x256x32xbf16>,
    %cst_32 = arith.constant dense<0.000000e+00> : vector<32xf32>
    %34 = vector.multi_reduction <add>, %29, %cst_32 [0] : vector<256x32xf32> to vector<32xf32>
    %35 = vector.shape_cast %34 : vector<32xf32> to vector<1x32xf32>
    %36 = arith.mulf %29, %29 : vector<256x32xf32>
    %cst_33 = arith.constant dense<0.000000e+00> : vector<32xf32>
    %37 = vector.multi_reduction <add>, %36, %cst_33 [0] : vector<256x32xf32> to vector<32xf32>
    %38 = vector.shape_cast %37 : vector<32xf32> to vector<1x32xf32>
    %39 = tpu.concatenate %35, %38 in 0 : vector<1x32xf32>, vector<1x32xf32> -> vector<2x32xf32>
    %c0_34 = arith.constant 0 : index
    %c0_35 = arith.constant 0 : index
    %c0_36 = arith.constant 0 : index
    %40 = vector.load %arg5[%c0_34, %c0_35, %c0_36] : memref<1x2x32xf32, #tpu.memory_space<vmem>>, vector<1x2x32xf32>
    %41 = vector.shape_cast %40 : vector<1x2x32xf32> to vector<2x32xf32>
    %42 = vector.shape_cast %39 : vector<2x32xf32> to vector<1x2x32xf32>
    tpu.vector_store %arg5[%c0_34, %c0_35, %c0_36], %42 {strides = array<i32>} : memref<1x2x32xf32, #tpu.memory_space<vmem>>, vector<1x2x32xf32>,
    return
  }
  func.func @transform_0(%arg0: i32) -> (i32, i32, i32, i32) {
    %c0_i32 = arith.constant 0 : i32
    %c0_i32_0 = arith.constant 0 : i32
    %c0_i32_1 = arith.constant 0 : i32
    %c0_i32_2 = arith.constant 0 : i32
    return %arg0, %c0_i32, %c0_i32_0, %c0_i32_1 : i32, i32, i32, i32
  }
  func.func @transform_1(%arg0: i32) -> (i32, i32, i32) {
    %c0_i32 = arith.constant 0 : i32
    %c0_i32_0 = arith.constant 0 : i32
    %c0_i32_1 = arith.constant 0 : i32
    %c0_i32_2 = arith.constant 0 : i32
    return %c0_i32, %c0_i32_0, %c0_i32_1 : i32, i32, i32
  }
  func.func @transform_2(%arg0: i32) -> (i32, i32) {
    %c0_i32 = arith.constant 0 : i32
    %c0_i32_0 = arith.constant 0 : i32
    %c0_i32_1 = arith.constant 0 : i32
    return %c0_i32, %c0_i32_0 : i32, i32
  }
  func.func @transform_3(%arg0: i32) -> (i32, i32, i32) {
    %c0_i32 = arith.constant 0 : i32
    %c0_i32_0 = arith.constant 0 : i32
    %c0_i32_1 = arith.constant 0 : i32
    return %arg0, %c0_i32, %c0_i32_0 : i32, i32, i32
  }
  func.func @transform_4(%arg0: i32) -> (i32, i32, i32) {
    %c0_i32 = arith.constant 0 : i32
    %c0_i32_0 = arith.constant 0 : i32
    %c0_i32_1 = arith.constant 0 : i32
    return %arg0, %c0_i32, %c0_i32_0 : i32, i32, i32
  }
}

module attributes {stable_mosaic.version = 11 : i64} {
  func.func @kernel(%arg0: i32, %arg1: memref<1x9x9x128xbf16, #tpu.memory_space<vmem>>, %arg2: memref<4x128x64xbf16, #tpu.memory_space<vmem>>, %arg3: memref<1x64xf32, #tpu.memory_space<vmem>>, %arg4: memref<1x64x64xbf16, #tpu.memory_space<vmem>>, %arg5: memref<1x2x64xf32, #tpu.memory_space<vmem>>) attributes {dimension_semantics = [#tpu.dimension_semantics<parallel>], iteration_bounds = array<i64: 2>, scalar_prefetch = 0 : i64, scratch_operands = 0 : i64, tpu.core_type = #tpu.core_type<tc>, window_params = [{transform_indices = @transform_0, window_bounds = array<i64: 1, 9, 9, 128>}, {pipeline_mode = #tpu.pipeline_mode<synchronous>, transform_indices = @transform_1, window_bounds = array<i64: 4, 128, 64>}, {pipeline_mode = #tpu.pipeline_mode<synchronous>, transform_indices = @transform_2, window_bounds = array<i64: 1, 64>}, {transform_indices = @transform_3, window_bounds = array<i64: 1, 64, 64>}, {transform_indices = @transform_4, window_bounds = array<i64: 1, 2, 64>}]} {
    %c0 = arith.constant 0 : index
    %c0_0 = arith.constant 0 : index
    %c0_1 = arith.constant 0 : index
    %c0_2 = arith.constant 0 : index
    %0 = vector.load %arg1[%c0, %c0_0, %c0_1, %c0_2] : memref<1x9x9x128xbf16, #tpu.memory_space<vmem>>, vector<1x8x8x128xbf16>
    %1 = vector.shape_cast %0 : vector<1x8x8x128xbf16> to vector<8x8x128xbf16>
    %2 = vector.shape_cast %1 : vector<8x8x128xbf16> to vector<64x128xbf16>
    %c0_3 = arith.constant 0 : index
    %c0_4 = arith.constant 0 : index
    %c0_5 = arith.constant 0 : index
    %3 = vector.load %arg2[%c0_3, %c0_4, %c0_5] : memref<4x128x64xbf16, #tpu.memory_space<vmem>>, vector<1x128x64xbf16>
    %4 = vector.shape_cast %3 : vector<1x128x64xbf16> to vector<128x64xbf16>
    %cst = arith.constant dense<0.000000e+00> : vector<64x64xf32>
    %5 = tpu.matmul %2, %4, %cst {dimension_numbers = #tpu.dot_dimension_numbers<[1], [0], [0], [1], [0, 0, 1, 1], [], []>} : vector<64x128xbf16>, vector<128x64xbf16>, vector<64x64xf32> -> vector<64x64xf32>
    %c0_6 = arith.constant 0 : index
    %c0_7 = arith.constant 0 : index
    %c1 = arith.constant 1 : index
    %c0_8 = arith.constant 0 : index
    %6 = vector.load %arg1[%c0_6, %c0_7, %c1, %c0_8] : memref<1x9x9x128xbf16, #tpu.memory_space<vmem>>, vector<1x8x8x128xbf16>
    %7 = vector.shape_cast %6 : vector<1x8x8x128xbf16> to vector<8x8x128xbf16>
    %8 = vector.shape_cast %7 : vector<8x8x128xbf16> to vector<64x128xbf16>
    %c1_9 = arith.constant 1 : index
    %c0_10 = arith.constant 0 : index
    %c0_11 = arith.constant 0 : index
    %9 = vector.load %arg2[%c1_9, %c0_10, %c0_11] : memref<4x128x64xbf16, #tpu.memory_space<vmem>>, vector<1x128x64xbf16>
    %10 = vector.shape_cast %9 : vector<1x128x64xbf16> to vector<128x64xbf16>
    %cst_12 = arith.constant dense<0.000000e+00> : vector<64x64xf32>
    %11 = tpu.matmul %8, %10, %cst_12 {dimension_numbers = #tpu.dot_dimension_numbers<[1], [0], [0], [1], [0, 0, 1, 1], [], []>} : vector<64x128xbf16>, vector<128x64xbf16>, vector<64x64xf32> -> vector<64x64xf32>
    %12 = arith.addf %5, %11 : vector<64x64xf32>
    %c0_13 = arith.constant 0 : index
    %c1_14 = arith.constant 1 : index
    %c0_15 = arith.constant 0 : index
    %c0_16 = arith.constant 0 : index
    %13 = vector.load %arg1[%c0_13, %c1_14, %c0_15, %c0_16] : memref<1x9x9x128xbf16, #tpu.memory_space<vmem>>, vector<1x8x8x128xbf16>
    %14 = vector.shape_cast %13 : vector<1x8x8x128xbf16> to vector<8x8x128xbf16>
    %15 = vector.shape_cast %14 : vector<8x8x128xbf16> to vector<64x128xbf16>
    %c2 = arith.constant 2 : index
    %c0_17 = arith.constant 0 : index
    %c0_18 = arith.constant 0 : index
    %16 = vector.load %arg2[%c2, %c0_17, %c0_18] : memref<4x128x64xbf16, #tpu.memory_space<vmem>>, vector<1x128x64xbf16>
    %17 = vector.shape_cast %16 : vector<1x128x64xbf16> to vector<128x64xbf16>
    %cst_19 = arith.constant dense<0.000000e+00> : vector<64x64xf32>
    %18 = tpu.matmul %15, %17, %cst_19 {dimension_numbers = #tpu.dot_dimension_numbers<[1], [0], [0], [1], [0, 0, 1, 1], [], []>} : vector<64x128xbf16>, vector<128x64xbf16>, vector<64x64xf32> -> vector<64x64xf32>
    %19 = arith.addf %12, %18 : vector<64x64xf32>
    %c0_20 = arith.constant 0 : index
    %c1_21 = arith.constant 1 : index
    %c1_22 = arith.constant 1 : index
    %c0_23 = arith.constant 0 : index
    %20 = vector.load %arg1[%c0_20, %c1_21, %c1_22, %c0_23] : memref<1x9x9x128xbf16, #tpu.memory_space<vmem>>, vector<1x8x8x128xbf16>
    %21 = vector.shape_cast %20 : vector<1x8x8x128xbf16> to vector<8x8x128xbf16>
    %22 = vector.shape_cast %21 : vector<8x8x128xbf16> to vector<64x128xbf16>
    %c3 = arith.constant 3 : index
    %c0_24 = arith.constant 0 : index
    %c0_25 = arith.constant 0 : index
    %23 = vector.load %arg2[%c3, %c0_24, %c0_25] : memref<4x128x64xbf16, #tpu.memory_space<vmem>>, vector<1x128x64xbf16>
    %24 = vector.shape_cast %23 : vector<1x128x64xbf16> to vector<128x64xbf16>
    %cst_26 = arith.constant dense<0.000000e+00> : vector<64x64xf32>
    %25 = tpu.matmul %22, %24, %cst_26 {dimension_numbers = #tpu.dot_dimension_numbers<[1], [0], [0], [1], [0, 0, 1, 1], [], []>} : vector<64x128xbf16>, vector<128x64xbf16>, vector<64x64xf32> -> vector<64x64xf32>
    %26 = arith.addf %19, %25 : vector<64x64xf32>
    %c0_27 = arith.constant 0 : index
    %c0_28 = arith.constant 0 : index
    %27 = vector.load %arg3[%c0_27, %c0_28] : memref<1x64xf32, #tpu.memory_space<vmem>>, vector<1x64xf32>
    %28 = vector.broadcast %27 : vector<1x64xf32> to vector<64x64xf32>
    %29 = arith.addf %26, %28 : vector<64x64xf32>
    %30 = arith.truncf %29 : vector<64x64xf32> to vector<64x64xbf16>
    %c0_29 = arith.constant 0 : index
    %c0_30 = arith.constant 0 : index
    %c0_31 = arith.constant 0 : index
    %31 = vector.load %arg4[%c0_29, %c0_30, %c0_31] : memref<1x64x64xbf16, #tpu.memory_space<vmem>>, vector<1x64x64xbf16>
    %32 = vector.shape_cast %31 : vector<1x64x64xbf16> to vector<64x64xbf16>
    %33 = vector.shape_cast %30 : vector<64x64xbf16> to vector<1x64x64xbf16>
    tpu.vector_store %arg4[%c0_29, %c0_30, %c0_31], %33 {strides = array<i32>} : memref<1x64x64xbf16, #tpu.memory_space<vmem>>, vector<1x64x64xbf16>,
    %cst_32 = arith.constant dense<0.000000e+00> : vector<64xf32>
    %34 = vector.multi_reduction <add>, %29, %cst_32 [0] : vector<64x64xf32> to vector<64xf32>
    %35 = vector.shape_cast %34 : vector<64xf32> to vector<1x64xf32>
    %36 = arith.mulf %29, %29 : vector<64x64xf32>
    %cst_33 = arith.constant dense<0.000000e+00> : vector<64xf32>
    %37 = vector.multi_reduction <add>, %36, %cst_33 [0] : vector<64x64xf32> to vector<64xf32>
    %38 = vector.shape_cast %37 : vector<64xf32> to vector<1x64xf32>
    %39 = tpu.concatenate %35, %38 in 0 : vector<1x64xf32>, vector<1x64xf32> -> vector<2x64xf32>
    %c0_34 = arith.constant 0 : index
    %c0_35 = arith.constant 0 : index
    %c0_36 = arith.constant 0 : index
    %40 = vector.load %arg5[%c0_34, %c0_35, %c0_36] : memref<1x2x64xf32, #tpu.memory_space<vmem>>, vector<1x2x64xf32>
    %41 = vector.shape_cast %40 : vector<1x2x64xf32> to vector<2x64xf32>
    %42 = vector.shape_cast %39 : vector<2x64xf32> to vector<1x2x64xf32>
    tpu.vector_store %arg5[%c0_34, %c0_35, %c0_36], %42 {strides = array<i32>} : memref<1x2x64xf32, #tpu.memory_space<vmem>>, vector<1x2x64xf32>,
    return
  }
  func.func @transform_0(%arg0: i32) -> (i32, i32, i32, i32) {
    %c0_i32 = arith.constant 0 : i32
    %c0_i32_0 = arith.constant 0 : i32
    %c0_i32_1 = arith.constant 0 : i32
    %c0_i32_2 = arith.constant 0 : i32
    return %arg0, %c0_i32, %c0_i32_0, %c0_i32_1 : i32, i32, i32, i32
  }
  func.func @transform_1(%arg0: i32) -> (i32, i32, i32) {
    %c0_i32 = arith.constant 0 : i32
    %c0_i32_0 = arith.constant 0 : i32
    %c0_i32_1 = arith.constant 0 : i32
    %c0_i32_2 = arith.constant 0 : i32
    return %c0_i32, %c0_i32_0, %c0_i32_1 : i32, i32, i32
  }
  func.func @transform_2(%arg0: i32) -> (i32, i32) {
    %c0_i32 = arith.constant 0 : i32
    %c0_i32_0 = arith.constant 0 : i32
    %c0_i32_1 = arith.constant 0 : i32
    return %c0_i32, %c0_i32_0 : i32, i32
  }
  func.func @transform_3(%arg0: i32) -> (i32, i32, i32) {
    %c0_i32 = arith.constant 0 : i32
    %c0_i32_0 = arith.constant 0 : i32
    %c0_i32_1 = arith.constant 0 : i32
    return %arg0, %c0_i32, %c0_i32_0 : i32, i32, i32
  }
  func.func @transform_4(%arg0: i32) -> (i32, i32, i32) {
    %c0_i32 = arith.constant 0 : i32
    %c0_i32_0 = arith.constant 0 : i32
    %c0_i32_1 = arith.constant 0 : i32
    return %arg0, %c0_i32, %c0_i32_0 : i32, i32, i32
  }
}

module attributes {stable_mosaic.version = 11 : i64} {
  func.func @kernel(%arg0: i32, %arg1: memref<1x5x5x256xbf16, #tpu.memory_space<vmem>>, %arg2: memref<4x256x128xbf16, #tpu.memory_space<vmem>>, %arg3: memref<1x128xf32, #tpu.memory_space<vmem>>, %arg4: memref<1x16x128xbf16, #tpu.memory_space<vmem>>, %arg5: memref<1x2x128xf32, #tpu.memory_space<vmem>>) attributes {dimension_semantics = [#tpu.dimension_semantics<parallel>], iteration_bounds = array<i64: 2>, scalar_prefetch = 0 : i64, scratch_operands = 0 : i64, tpu.core_type = #tpu.core_type<tc>, window_params = [{transform_indices = @transform_0, window_bounds = array<i64: 1, 5, 5, 256>}, {pipeline_mode = #tpu.pipeline_mode<synchronous>, transform_indices = @transform_1, window_bounds = array<i64: 4, 256, 128>}, {pipeline_mode = #tpu.pipeline_mode<synchronous>, transform_indices = @transform_2, window_bounds = array<i64: 1, 128>}, {transform_indices = @transform_3, window_bounds = array<i64: 1, 16, 128>}, {transform_indices = @transform_4, window_bounds = array<i64: 1, 2, 128>}]} {
    %c0 = arith.constant 0 : index
    %c0_0 = arith.constant 0 : index
    %c0_1 = arith.constant 0 : index
    %c0_2 = arith.constant 0 : index
    %0 = vector.load %arg1[%c0, %c0_0, %c0_1, %c0_2] : memref<1x5x5x256xbf16, #tpu.memory_space<vmem>>, vector<1x4x4x256xbf16>
    %1 = vector.shape_cast %0 : vector<1x4x4x256xbf16> to vector<4x4x256xbf16>
    %2 = vector.shape_cast %1 : vector<4x4x256xbf16> to vector<16x256xbf16>
    %c0_3 = arith.constant 0 : index
    %c0_4 = arith.constant 0 : index
    %c0_5 = arith.constant 0 : index
    %3 = vector.load %arg2[%c0_3, %c0_4, %c0_5] : memref<4x256x128xbf16, #tpu.memory_space<vmem>>, vector<1x256x128xbf16>
    %4 = vector.shape_cast %3 : vector<1x256x128xbf16> to vector<256x128xbf16>
    %cst = arith.constant dense<0.000000e+00> : vector<16x128xf32>
    %5 = tpu.matmul %2, %4, %cst {dimension_numbers = #tpu.dot_dimension_numbers<[1], [0], [0], [1], [0, 0, 1, 1], [], []>} : vector<16x256xbf16>, vector<256x128xbf16>, vector<16x128xf32> -> vector<16x128xf32>
    %c0_6 = arith.constant 0 : index
    %c0_7 = arith.constant 0 : index
    %c1 = arith.constant 1 : index
    %c0_8 = arith.constant 0 : index
    %6 = vector.load %arg1[%c0_6, %c0_7, %c1, %c0_8] : memref<1x5x5x256xbf16, #tpu.memory_space<vmem>>, vector<1x4x4x256xbf16>
    %7 = vector.shape_cast %6 : vector<1x4x4x256xbf16> to vector<4x4x256xbf16>
    %8 = vector.shape_cast %7 : vector<4x4x256xbf16> to vector<16x256xbf16>
    %c1_9 = arith.constant 1 : index
    %c0_10 = arith.constant 0 : index
    %c0_11 = arith.constant 0 : index
    %9 = vector.load %arg2[%c1_9, %c0_10, %c0_11] : memref<4x256x128xbf16, #tpu.memory_space<vmem>>, vector<1x256x128xbf16>
    %10 = vector.shape_cast %9 : vector<1x256x128xbf16> to vector<256x128xbf16>
    %cst_12 = arith.constant dense<0.000000e+00> : vector<16x128xf32>
    %11 = tpu.matmul %8, %10, %cst_12 {dimension_numbers = #tpu.dot_dimension_numbers<[1], [0], [0], [1], [0, 0, 1, 1], [], []>} : vector<16x256xbf16>, vector<256x128xbf16>, vector<16x128xf32> -> vector<16x128xf32>
    %12 = arith.addf %5, %11 : vector<16x128xf32>
    %c0_13 = arith.constant 0 : index
    %c1_14 = arith.constant 1 : index
    %c0_15 = arith.constant 0 : index
    %c0_16 = arith.constant 0 : index
    %13 = vector.load %arg1[%c0_13, %c1_14, %c0_15, %c0_16] : memref<1x5x5x256xbf16, #tpu.memory_space<vmem>>, vector<1x4x4x256xbf16>
    %14 = vector.shape_cast %13 : vector<1x4x4x256xbf16> to vector<4x4x256xbf16>
    %15 = vector.shape_cast %14 : vector<4x4x256xbf16> to vector<16x256xbf16>
    %c2 = arith.constant 2 : index
    %c0_17 = arith.constant 0 : index
    %c0_18 = arith.constant 0 : index
    %16 = vector.load %arg2[%c2, %c0_17, %c0_18] : memref<4x256x128xbf16, #tpu.memory_space<vmem>>, vector<1x256x128xbf16>
    %17 = vector.shape_cast %16 : vector<1x256x128xbf16> to vector<256x128xbf16>
    %cst_19 = arith.constant dense<0.000000e+00> : vector<16x128xf32>
    %18 = tpu.matmul %15, %17, %cst_19 {dimension_numbers = #tpu.dot_dimension_numbers<[1], [0], [0], [1], [0, 0, 1, 1], [], []>} : vector<16x256xbf16>, vector<256x128xbf16>, vector<16x128xf32> -> vector<16x128xf32>
    %19 = arith.addf %12, %18 : vector<16x128xf32>
    %c0_20 = arith.constant 0 : index
    %c1_21 = arith.constant 1 : index
    %c1_22 = arith.constant 1 : index
    %c0_23 = arith.constant 0 : index
    %20 = vector.load %arg1[%c0_20, %c1_21, %c1_22, %c0_23] : memref<1x5x5x256xbf16, #tpu.memory_space<vmem>>, vector<1x4x4x256xbf16>
    %21 = vector.shape_cast %20 : vector<1x4x4x256xbf16> to vector<4x4x256xbf16>
    %22 = vector.shape_cast %21 : vector<4x4x256xbf16> to vector<16x256xbf16>
    %c3 = arith.constant 3 : index
    %c0_24 = arith.constant 0 : index
    %c0_25 = arith.constant 0 : index
    %23 = vector.load %arg2[%c3, %c0_24, %c0_25] : memref<4x256x128xbf16, #tpu.memory_space<vmem>>, vector<1x256x128xbf16>
    %24 = vector.shape_cast %23 : vector<1x256x128xbf16> to vector<256x128xbf16>
    %cst_26 = arith.constant dense<0.000000e+00> : vector<16x128xf32>
    %25 = tpu.matmul %22, %24, %cst_26 {dimension_numbers = #tpu.dot_dimension_numbers<[1], [0], [0], [1], [0, 0, 1, 1], [], []>} : vector<16x256xbf16>, vector<256x128xbf16>, vector<16x128xf32> -> vector<16x128xf32>
    %26 = arith.addf %19, %25 : vector<16x128xf32>
    %c0_27 = arith.constant 0 : index
    %c0_28 = arith.constant 0 : index
    %27 = vector.load %arg3[%c0_27, %c0_28] : memref<1x128xf32, #tpu.memory_space<vmem>>, vector<1x128xf32>
    %28 = vector.broadcast %27 : vector<1x128xf32> to vector<16x128xf32>
    %29 = arith.addf %26, %28 : vector<16x128xf32>
    %30 = arith.truncf %29 : vector<16x128xf32> to vector<16x128xbf16>
    %c0_29 = arith.constant 0 : index
    %c0_30 = arith.constant 0 : index
    %c0_31 = arith.constant 0 : index
    %31 = vector.load %arg4[%c0_29, %c0_30, %c0_31] : memref<1x16x128xbf16, #tpu.memory_space<vmem>>, vector<1x16x128xbf16>
    %32 = vector.shape_cast %31 : vector<1x16x128xbf16> to vector<16x128xbf16>
    %33 = vector.shape_cast %30 : vector<16x128xbf16> to vector<1x16x128xbf16>
    tpu.vector_store %arg4[%c0_29, %c0_30, %c0_31], %33 {strides = array<i32>} : memref<1x16x128xbf16, #tpu.memory_space<vmem>>, vector<1x16x128xbf16>,
    %cst_32 = arith.constant dense<0.000000e+00> : vector<128xf32>
    %34 = vector.multi_reduction <add>, %29, %cst_32 [0] : vector<16x128xf32> to vector<128xf32>
    %35 = vector.shape_cast %34 : vector<128xf32> to vector<1x128xf32>
    %36 = arith.mulf %29, %29 : vector<16x128xf32>
    %cst_33 = arith.constant dense<0.000000e+00> : vector<128xf32>
    %37 = vector.multi_reduction <add>, %36, %cst_33 [0] : vector<16x128xf32> to vector<128xf32>
    %38 = vector.shape_cast %37 : vector<128xf32> to vector<1x128xf32>
    %39 = tpu.concatenate %35, %38 in 0 : vector<1x128xf32>, vector<1x128xf32> -> vector<2x128xf32>
    %c0_34 = arith.constant 0 : index
    %c0_35 = arith.constant 0 : index
    %c0_36 = arith.constant 0 : index
    %40 = vector.load %arg5[%c0_34, %c0_35, %c0_36] : memref<1x2x128xf32, #tpu.memory_space<vmem>>, vector<1x2x128xf32>
    %41 = vector.shape_cast %40 : vector<1x2x128xf32> to vector<2x128xf32>
    %42 = vector.shape_cast %39 : vector<2x128xf32> to vector<1x2x128xf32>
    tpu.vector_store %arg5[%c0_34, %c0_35, %c0_36], %42 {strides = array<i32>} : memref<1x2x128xf32, #tpu.memory_space<vmem>>, vector<1x2x128xf32>,
    return
  }
  func.func @transform_0(%arg0: i32) -> (i32, i32, i32, i32) {
    %c0_i32 = arith.constant 0 : i32
    %c0_i32_0 = arith.constant 0 : i32
    %c0_i32_1 = arith.constant 0 : i32
    %c0_i32_2 = arith.constant 0 : i32
    return %arg0, %c0_i32, %c0_i32_0, %c0_i32_1 : i32, i32, i32, i32
  }
  func.func @transform_1(%arg0: i32) -> (i32, i32, i32) {
    %c0_i32 = arith.constant 0 : i32
    %c0_i32_0 = arith.constant 0 : i32
    %c0_i32_1 = arith.constant 0 : i32
    %c0_i32_2 = arith.constant 0 : i32
    return %c0_i32, %c0_i32_0, %c0_i32_1 : i32, i32, i32
  }
  func.func @transform_2(%arg0: i32) -> (i32, i32) {
    %c0_i32 = arith.constant 0 : i32
    %c0_i32_0 = arith.constant 0 : i32
    %c0_i32_1 = arith.constant 0 : i32
    return %c0_i32, %c0_i32_0 : i32, i32
  }
  func.func @transform_3(%arg0: i32) -> (i32, i32, i32) {
    %c0_i32 = arith.constant 0 : i32
    %c0_i32_0 = arith.constant 0 : i32
    %c0_i32_1 = arith.constant 0 : i32
    return %arg0, %c0_i32, %c0_i32_0 : i32, i32, i32
  }
  func.func @transform_4(%arg0: i32) -> (i32, i32, i32) {
    %c0_i32 = arith.constant 0 : i32
    %c0_i32_0 = arith.constant 0 : i32
    %c0_i32_1 = arith.constant 0 : i32
    return %arg0, %c0_i32, %c0_i32_0 : i32, i32, i32
  }
}

</mosaic_0001>

<bundles_post_ra>
// kernel: discriminator_forward.4
= control target key start
LH: loop header
LB: loop body
LE: loop exit
PB: predicated region body
PF: predicated region fallthrough
CT: control target
= control target key end

     0   :  { %s11461_s12 = smov 0   ;;  %s13510_s0 = inlined_call_operand.vmem [shape: bf16[2,33,33,12], index: 0, kind: input, shape index: {}]   ;;  %s13511_s1 = inlined_call_operand.vmem [shape: bf16[4,12,16], index: 1, kind: input, shape index: {}]   ;;  %s13512_s2 = inlined_call_operand.vmem [shape: f32[1,16], index: 2, kind: input, shape index: {}]   ;;  %s13513_s3 = inlined_call_operand.vmem [shape: bf16[2,1024,16], index: 3, kind: output, shape index: {}]  }
   0x1 LB: > { %s8928_s13 = sadd.s32 4294967295, %s11439_s12   ;;  %p8932_p0 = scmp.ge.s32.totalorder %s11439_s12, 1  ;;  %s11439_s12 = sphi %s11461_s12, %s13_s12  }
   0x2   : > { %p137_p1 = scmp.lt.s32.totalorder %s11439_s12, 3 }
   0x4   : > { %p138_p2 = pnand %p8932_p0, %p137_p1 }
   0x5   : > { %vm2138_vm0 = vcmask (!%p138_p2), 1045504   ;;  %p161_p3 = scmp.lt.s32.totalorder (!%p138_p2), %s8928_s13, 1  ;;  %v11183_v0 = vld [vmem:[%s13511_s1 + $0x10] sm:$0x3f] (!%p138_p2)   ;;  %v11186_v1 = vld [vmem:[%s13511_s1 + $0x8] sm:$0x3f] (!%p138_p2)  }
   0x6   : > { %141 = sbr.rel (%p138_p2) target bundleno = 802 (0x322), region = 32  ;;  %11172 = vmatprep.subr.msk.bf16.mxu0 (!%p138_p2), %vm2138_vm0, %v11183_v0  ;;  %v4402_v2 = vsel (!%p138_p2), %vm2138_vm0, %v11183_v0, 0  ;;  %vm1945_vm1 = vcmask (!%p138_p2), 97280   ;;  %11170 = vmatprep.subr.msk.bf16.mxu1 (!%p138_p2), %vm2138_vm0, %v11186_v1  ;;  %v2140_v3 = vsel (!%p138_p2), %vm2138_vm0, %v11186_v1, 0  ;;  %v11189_v4 = vld [vmem:[%s13511_s1] sm:$0x3f] (!%p138_p2)  }
   0x7   : > { %10527 = vmatpush3.bf16.msra.mxu0 (!%p138_p2), %v4402_v2  ;;  %10267 = vmatpush3.bf16.msra.mxu1 (!%p138_p2), %v2140_v3  ;;  %vm334_vm2 = vsmask.f32 (!%p138_p2), 3328  ;;  %vm335_vm3 = vsmask.f32 (!%p138_p2), 7440  ;;  %v11191_v5 = vld [vmem:[%s13511_s1 + $0x18] sm:$0x3f] (!%p138_p2)  }
   0x8   : > { %11171 = vmatprep.subr.msk.bf16.mxu1 (!%p138_p2), %vm2138_vm0, %v11189_v4  ;;  %11173 = vmatprep.subr.msk.bf16.mxu0 (!%p138_p2), %vm2138_vm0, %v11191_v5  ;;  %v7038_v8 = vsel (!%p138_p2), %vm2138_vm0, %v11191_v5, 0  ;;  %v11501_v10 = vsel (!%p138_p2), %vm2138_vm0, %v11189_v4, 0  ;;  %vm11524_vm4 = vmor (!%p138_p2), %vm334_vm2, %vm335_vm3  ;;  %vm8744_vm5 = vcmask (!%p138_p2), 125952  }
   0xd   : > { %s13517_s13 = smov (!%p161_p3, %s8928_s13), 1 }
   0xe   : > { %s11174_s18 = smul.u32 660, %s13517_s13  ;;  %s9877_s28 = sshll.u32 %s13517_s13, 9 }
   0xf   : > { %s12740_s4 = scalar_lea.vmem %s13513_s3, %s9877_s28 }
  0x10   : > { %s11488_s23 = scalar_lea.vmem %s13510_s0, %s11174_s18 }
  0x11   : > { %v11184_v6 = vld [vmem:[%s11488_s23 + $0x14] sm:$0xff]   ;;  %v11185_v7 = vld [vmem:[%s11488_s23 + $0x1c] sm:$0xff]   ;;  %v11187_v9 = vld [vmem:[%s11488_s23 + $0x28] sm:$0xff]  }
  0x12   : > { %10528 = vmatprep.mubr.msk.bf16.mxu0 %vm1945_vm1, %v11184_v6  ;;  %v172_v11 = vld [vmem:[%s11488_s23] sm:$0xf]  ;;  %v173_v12 = vld [vmem:[%s11488_s23 + $0x4] sm:$0xf]  ;;  %v11507_v13 = vld [vmem:[%s11488_s23 + $0x8] sm:$0xf] }
  0x13   : > { %10529 = vmatmul.mubr.msk.bf16.vlgmr.msra.gmra.mrb[0].mxu0 %vm1945_vm1, %v11185_v7  ;;  %v11511_v14 = vld [vmem:[%s11488_s23 + $0xc] sm:$0xf]  ;;  %v338_v15 = vshrl.u32 %v172_v11, 16  ;;  %v341_v16 = vshll.u32 %v172_v11, 16  ;;  %v347_v17 = vshll.u32 %v173_v12, 16  ;;  %v351_v18 = vshrl.u32 %v173_v12, 16 }
  0x14   : > { %10532 = vmatprep.mubr.msk.bf16.mxu0 %vm1945_vm1, %v11187_v9  ;;  %10657 = vmatpush3.bf16.msra.mxu0 %v7038_v8  ;;  %v357_v19 = vshll.u32 %v11507_v13, 16  ;;  %v361_v20 = vshrl.u32 %v11507_v13, 16  ;;  %v9068_v21 = vcombine.low %v11507_v13, %v11511_v14  ;;  %v11190_v26 = vld [vmem:[%s11488_s23 + $0x30] sm:$0xff]   ;;  %v367_v30 = vshll.u32 %v11511_v14, 16  ;;  %v11192_v35 = vld [vmem:[%s11488_s23 + $0x3c] sm:$0xff]   ;;  %v11193_v3 = vld [vmem:[%s11488_s23 + $0x44] sm:$0xff]  }
  0x15   : > { %v340_v22 = vrot.slane %v338_v15, 4  ;;  %v343_v23 = vrot.slane %v341_v16, 5  ;;  %v349_v24 = vrot.slane %v347_v17, 5  ;;  %v353_v25 = vrot.slane %v351_v18, 4  ;;  %v302_v29 = vld [vmem:[%s11488_s23 + $0x10] sm:$0x1] }
  0x16   : > { %v359_v27 = vrot.slane %v357_v19, 5  ;;  %v363_v28 = vrot.slane %v361_v20, 4  ;;  %v371_v31 = vshrl.u32 %v11511_v14, 16  ;;  %v377_v34 = vshll.u32 %v302_v29, 16  ;;  %v176_v40 = vld [vmem:[%s11488_s23 + $0x14] sm:$0xf] }
  0x17   : > { %v344_v32 = vor.u32 %v343_v23, %v340_v22  ;;  %v354_v33 = vor.u32 %v353_v25, %v349_v24  ;;  %v369_v38 = vrot.slane %v367_v30, 5  ;;  %v177_v41 = vld [vmem:[%s11488_s23 + $0x18] sm:$0xf]  ;;  %v178_v45 = vld [vmem:[%s11488_s23 + $0x1c] sm:$0xf]  ;;  %v382_v46 = vshrl.u32 %v176_v40, 16 }
  0x18   : > { %v364_v37 = vor.u32 %v363_v28, %v359_v27  ;;  %v373_v39 = vrot.slane %v371_v31, 4  ;;  %v379_v44 = vrot.slane %v377_v34, 5  ;;  %v385_v49 = vshll.u32 %v176_v40, 16  ;;  %v179_v55 = vld [vmem:[%s11488_s23 + $0x20] sm:$0xf]  ;;  %v11194_v6 = vld [vmem:[%s11488_s23 + $0x50] sm:$0xff]  }
  0x19   : > { %v345_v42 = vrot.slane %v344_v32, 4  ;;  %v355_v43 = vrot.slane %v354_v33, 4  ;;  %v391_v50 = vshll.u32 %v177_v41, 16  ;;  %v384_v53 = vrot.slane %v382_v46, 4  ;;  %v303_v60 = vld [vmem:[%s11488_s23 + $0x24] sm:$0x1] }
  0x1a   : > { %v365_v47 = vrot.slane %v364_v37, 4  ;;  %v374_v48 = vor.u32 %v373_v39, %v369_v38  ;;  %v395_v54 = vshrl.u32 %v177_v41, 16  ;;  %v387_v59 = vrot.slane %v385_v49, 5  ;;  %v180_v7 = vld [vmem:[%s11488_s23 + $0x28] sm:$0xf] }
  0x1b   : > { %10533 = vmatmul.mubr.msk.bf16.gmra.mrb[4].mxu0 %vm1945_vm1, %v11190_v26  ;;  %v350_v51 = vsel %vm11524_vm4, %v345_v42, %v349_v24  ;;  %v360_v52 = vsel %vm11524_vm4, %v355_v43, %v359_v27  ;;  %v393_v61 = vrot.slane %v391_v50, 5  ;;  %v401_v63 = vshll.u32 %v178_v45, 16  ;;  %v181_v15 = vld [vmem:[%s11488_s23 + $0x2c] sm:$0xf]  ;;  %v182_v23 = vld [vmem:[%s11488_s23 + $0x30] sm:$0xf] }
  0x1c   : > { %10536 = vmatprep.mubr.msk.bf16.mxu0 %vm1945_vm1, %v11192_v35  ;;  %v8938_v56 = vcombine.low %v350_v51, %v360_v52  ;;  %v370_v57 = vsel %vm11524_vm4, %v365_v47, %v369_v38  ;;  %v375_v58 = vrot.slane %v374_v48, 4  ;;  %v397_v62 = vrot.slane %v395_v54, 4  ;;  %v183_v30 = vld [vmem:[%s11488_s23 + $0x34] sm:$0xf]  ;;  %v304_v39 = vld [vmem:[%s11488_s23 + $0x38] sm:$0x1] }
  0x1d   : > { %v405_v0 = vshrl.u32 %v178_v45, 16  ;;  %v388_v2 = vor.u32 %v387_v59, %v384_v53  ;;  %v411_v4 = vshll.u32 %v179_v55, 16  ;;  %v415_v5 = vshrl.u32 %v179_v55, 16  ;;  %v185_v45 = vld [vmem:[%s11488_s23 + $0x40] sm:$0xf]  ;;  %v11195_v48 = vld [vmem:[%s11488_s23 + $0x58] sm:$0xff]  }
  0x1e   : > { %10268 = vmatprep.mubr.msk.bf16.mxu1 %vm1945_vm1, %v8938_v56  ;;  %v380_v1 = vsel %vm11524_vm4, %v375_v58, %v379_v44  ;;  %v398_v9 = vor.u32 %v397_v62, %v393_v61  ;;  %v403_v11 = vrot.slane %v401_v63, 5  ;;  %v421_v19 = vshll.u32 %v303_v60, 16  ;;  %v184_v44 = vld [vmem:[%s11488_s23 + $0x3c] sm:$0xf]  ;;  %v11196_v55 = vld [vmem:[%s11488_s23 + $0x64] sm:$0xff]  }
  0x1f   : > { %v8939_v8 = vcombine.low %v370_v57, %v380_v1  ;;  %v407_v12 = vrot.slane %v405_v0, 4  ;;  %v389_v16 = vrot.slane %v388_v2, 4  ;;  %v413_v17 = vrot.slane %v411_v4, 5  ;;  %v186_v62 = vld [vmem:[%s11488_s23 + $0x44] sm:$0xf] }
  0x20   : > { %v417_v18 = vrot.slane %v415_v5, 4  ;;  %v399_v20 = vrot.slane %v398_v9, 4  ;;  %v426_v24 = vshrl.u32 %v180_v7, 16  ;;  %v429_v25 = vshll.u32 %v180_v7, 16  ;;  %v187_v9 = vld [vmem:[%s11488_s23 + $0x48] sm:$0xf] }
  0x21   : > { %10269 = vmatmul.mubr.msk.bf16.vlgmr.msra.gmra.mrb[0].mxu1 %vm1945_vm1, %v8939_v8  ;;  %v408_v22 = vor.u32 %v407_v12, %v403_v11  ;;  %v394_v26 = vsel %vm11524_vm4, %v389_v16, %v393_v61  ;;  %v423_v28 = vrot.slane %v421_v19, 5  ;;  %v435_v29 = vshll.u32 %v181_v15, 16 }
  0x22   : > { %10397 = vmatpush3.bf16.msra.mxu1 %v11501_v10  ;;  %v418_v27 = vor.u32 %v417_v18, %v413_v17  ;;  %v404_v31 = vsel %vm11524_vm4, %v399_v20, %v403_v11  ;;  %v428_v33 = vrot.slane %v426_v24, 4  ;;  %v431_v10 = vrot.slane %v429_v25, 5  ;;  %v188_v24 = vld [vmem:[%s11488_s23 + $0x50] sm:$0xf] }
  0x23   : > { %10537 = vmatmul.mubr.msk.bf16.gmra.mrb[8].mxu0 %vm1945_vm1, %v11193_v3  ;;  %v409_v32 = vrot.slane %v408_v22, 4  ;;  %v8940_v34 = vcombine.low %v394_v26, %v404_v31  ;;  %v437_v37 = vrot.slane %v435_v29, 5  ;;  %v439_v38 = vshrl.u32 %v181_v15, 16  ;;  %v11198_v29 = vld [vmem:[%s11488_s23 + $0x78] sm:$0xff]  }
  0x24   : > { %10540 = vmatprep.mubr.msk.bf16.mxu0 %vm1945_vm1, %v11194_v6  ;;  %v419_v35 = vrot.slane %v418_v27, 4  ;;  %v432_v41 = vor.u32 %v431_v10, %v428_v33  ;;  %v445_v42 = vshll.u32 %v182_v23, 16  ;;  %v449_v43 = vshrl.u32 %v182_v23, 16  ;;  %v11197_v23 = vld [vmem:[%s11488_s23 + $0x6c] sm:$0xff]   ;;  %v189_v10 = vld [vmem:[%s11488_s23 + $0x54] sm:$0xf] }
  0x25   : > { %v414_v40 = vsel %vm11524_vm4, %v409_v32, %v413_v17  ;;  %10272 = vmatprep.mubr.msk.bf16.mxu1 %vm1945_vm1, %v8940_v34  ;;  %v441_v47 = vrot.slane %v439_v38, 4  ;;  %v455_v49 = vshll.u32 %v183_v30, 16  ;;  %v459_v50 = vshrl.u32 %v183_v30, 16  ;;  %v305_v17 = vld [vmem:[%s11488_s23 + $0x4c] sm:$0x1] }
  0x26   : > { %v424_v46 = vsel %vm11524_vm4, %v419_v35, %v423_v28  ;;  %v433_v52 = vrot.slane %v432_v41, 4  ;;  %v447_v53 = vrot.slane %v445_v42, 5  ;;  %v451_v54 = vrot.slane %v449_v43, 4  ;;  %v190_v34 = vld [vmem:[%s11488_s23 + $0x58] sm:$0xf] }
  0x27   : > { %v8941_v51 = vcombine.low %v414_v40, %v424_v46  ;;  %v442_v56 = vor.u32 %v441_v47, %v437_v37  ;;  %v457_v57 = vrot.slane %v455_v49, 5  ;;  %v461_v58 = vrot.slane %v459_v50, 4 }
  0x28   : > { %v465_v59 = vshll.u32 %v304_v39, 16  ;;  %v438_v60 = vsel %vm11524_vm4, %v433_v52, %v437_v37  ;;  %v452_v61 = vor.u32 %v451_v54, %v447_v53  ;;  %v470_v63 = vshrl.u32 %v184_v44, 16  ;;  %v191_v52 = vld [vmem:[%s11488_s23 + $0x5c] sm:$0xf] }
  0x29   : > { %10273 = vmatmul.mubr.msk.bf16.gmra.mrb[4].mxu1 %vm1945_vm1, %v8941_v51  ;;  %v473_v0 = vshll.u32 %v184_v44, 16  ;;  %v443_v1 = vrot.slane %v442_v56, 4  ;;  %v462_v2 = vor.u32 %v461_v58, %v457_v57  ;;  %v479_v4 = vshll.u32 %v185_v45, 16 }
  0x2a   : > { %v467_v3 = vrot.slane %v465_v59, 5  ;;  %v453_v5 = vrot.slane %v452_v61, 4  ;;  %v472_v6 = vrot.slane %v470_v63, 4  ;;  %v483_v8 = vshrl.u32 %v185_v45, 16  ;;  %v11199_v61 = vld [vmem:[%s11488_s23 + $0x80] sm:$0xff]  }
  0x2b   : > { %10541 = vmatmul.mubr.msk.bf16.gmra.mrb[12].mxu0 %vm1945_vm1, %v11195_v48  ;;  %v475_v7 = vrot.slane %v473_v0, 5  ;;  %v448_v11 = vsel %vm11524_vm4, %v443_v1, %v447_v53  ;;  %v463_v12 = vrot.slane %v462_v2, 4  ;;  %v481_v15 = vrot.slane %v479_v4, 5  ;;  %v306_v53 = vld [vmem:[%s11488_s23 + $0x60] sm:$0x1] }
  0x2c   : > { %10544 = vmatprep.mubr.msk.bf16.mxu0 %vm1945_vm1, %v11196_v55  ;;  %v489_v16 = vshll.u32 %v186_v62, 16  ;;  %v8942_v18 = vcombine.low %v438_v60, %v448_v11  ;;  %v458_v19 = vsel %vm11524_vm4, %v453_v5, %v457_v57  ;;  %v485_v22 = vrot.slane %v483_v8, 4  ;;  %v192_v4 = vld [vmem:[%s11488_s23 + $0x64] sm:$0xf] }
  0x2d   : > { %v476_v20 = vor.u32 %v475_v7, %v472_v6  ;;  %v468_v25 = vsel %vm11524_vm4, %v463_v12, %v467_v3  ;;  %v493_v27 = vshrl.u32 %v186_v62, 16  ;;  %v499_v28 = vshll.u32 %v187_v9, 16  ;;  %v11200_v3 = vld [vmem:[%s11488_s23 + $0x8c] sm:$0xff]  }
  0x2e   : > { %v491_v26 = vrot.slane %v489_v16, 5  ;;  %10276 = vmatprep.mubr.msk.bf16.mxu1 %vm1945_vm1, %v8942_v18  ;;  %v8943_v30 = vcombine.low %v458_v19, %v468_v25  ;;  %v486_v32 = vor.u32 %v485_v22, %v481_v15  ;;  %v503_v33 = vshrl.u32 %v187_v9, 16  ;;  %v193_v9 = vld [vmem:[%s11488_s23 + $0x68] sm:$0xf] }
  0x2f   : > { %v477_v31 = vrot.slane %v476_v20, 4  ;;  %v495_v35 = vrot.slane %v493_v27, 4  ;;  %v501_v37 = vrot.slane %v499_v28, 5  ;;  %v509_v38 = vshll.u32 %v305_v17, 16  ;;  %v194_v20 = vld [vmem:[%s11488_s23 + $0x6c] sm:$0xf] }
  0x30   : > { %v514_v39 = vshrl.u32 %v188_v24, 16  ;;  %v487_v41 = vrot.slane %v486_v32, 4  ;;  %v505_v42 = vrot.slane %v503_v33, 4  ;;  %v517_v43 = vshll.u32 %v188_v24, 16  ;;  %v195_v27 = vld [vmem:[%s11488_s23 + $0x70] sm:$0xf] }
  0x31   : > { %10277 = vmatmul.mubr.msk.bf16.gmra.mrb[8].mxu1 %vm1945_vm1, %v8943_v30  ;;  %v482_v40 = vsel %vm11524_vm4, %v477_v31, %v481_v15  ;;  %v496_v44 = vor.u32 %v495_v35, %v491_v26  ;;  %v511_v45 = vrot.slane %v509_v38, 5  ;;  %v523_v47 = vshll.u32 %v189_v10, 16  ;;  %v11201_v35 = vld [vmem:[%s11488_s23 + $0x94] sm:$0xff]  }
  0x32   : > { %v516_v46 = vrot.slane %v514_v39, 4  ;;  %v492_v48 = vsel %vm11524_vm4, %v487_v41, %v491_v26  ;;  %v506_v49 = vor.u32 %v505_v42, %v501_v37  ;;  %v519_v50 = vrot.slane %v517_v43, 5  ;;  %v11202_v42 = vld [vmem:[%s11488_s23 + $0xa0] sm:$0xff]  }
  0x33   : > { %10545 = vmatmul.mubr.msk.bf16.gmra.mrb[16].mxu0 %vm1945_vm1, %v11197_v23  ;;  %v527_v51 = vshrl.u32 %v189_v10, 16  ;;  %v8944_v54 = vcombine.low %v482_v40, %v492_v48  ;;  %v497_v55 = vrot.slane %v496_v44, 4  ;;  %v525_v56 = vrot.slane %v523_v47, 5  ;;  %v307_v40 = vld [vmem:[%s11488_s23 + $0x74] sm:$0x1] }
  0x34   : > { %10548 = vmatprep.mubr.msk.bf16.mxu0 %vm1945_vm1, %v11198_v29  ;;  %v533_v57 = vshll.u32 %v190_v34, 16  ;;  %v507_v58 = vrot.slane %v506_v49, 4  ;;  %v520_v59 = vor.u32 %v519_v50, %v516_v46  ;;  %v537_v62 = vshrl.u32 %v190_v34, 16  ;;  %v196_v47 = vld [vmem:[%s11488_s23 + $0x78] sm:$0xf] }
  0x35   : > { %v529_v60 = vrot.slane %v527_v51, 4  ;;  %10280 = vmatprep.mubr.msk.bf16.mxu1 %vm1945_vm1, %v8944_v54  ;;  %v502_v63 = vsel %vm11524_vm4, %v497_v55, %v501_v37  ;;  %v543_v1 = vshll.u32 %v191_v52, 16  ;;  %v547_v2 = vshrl.u32 %v191_v52, 16  ;;  %v197_v52 = vld [vmem:[%s11488_s23 + $0x7c] sm:$0xf] }
  0x36   : > { %v535_v0 = vrot.slane %v533_v57, 5  ;;  %v512_v5 = vsel %vm11524_vm4, %v507_v58, %v511_v45  ;;  %v521_v6 = vrot.slane %v520_v59, 4  ;;  %v539_v8 = vrot.slane %v537_v62, 4  ;;  %v198_v59 = vld [vmem:[%s11488_s23 + $0x80] sm:$0xf] }
  0x37   : > { %v530_v7 = vor.u32 %v529_v60, %v525_v56  ;;  %v8945_v11 = vcombine.low %v502_v63, %v512_v5  ;;  %v545_v12 = vrot.slane %v543_v1, 5  ;;  %v549_v15 = vrot.slane %v547_v2, 4 }
  0x38   : > { %v553_v16 = vshll.u32 %v306_v53, 16  ;;  %v526_v17 = vsel %vm11524_vm4, %v521_v6, %v525_v56  ;;  %v540_v19 = vor.u32 %v539_v8, %v535_v0  ;;  %v558_v22 = vshrl.u32 %v192_v4, 16  ;;  %v199_v6 = vld [vmem:[%s11488_s23 + $0x84] sm:$0xf] }
  0x39   : > { %v531_v18 = vrot.slane %v530_v7, 4  ;;  %10281 = vmatmul.mubr.msk.bf16.gmra.mrb[12].mxu1 %vm1945_vm1, %v8945_v11  ;;  %v550_v23 = vor.u32 %v549_v15, %v545_v12  ;;  %v561_v25 = vshll.u32 %v192_v4, 16  ;;  %v567_v26 = vshll.u32 %v193_v9, 16 }
  0x3a   : > { %v555_v24 = vrot.slane %v553_v16, 5  ;;  %v541_v29 = vrot.slane %v540_v19, 4  ;;  %v560_v30 = vrot.slane %v558_v22, 4  ;;  %v571_v31 = vshrl.u32 %v193_v9, 16  ;;  %v11203_v22 = vld [vmem:[%s11488_s23 + $0xa8] sm:$0xff]  }
  0x3b   : > { %10549 = vmatmul.mubr.msk.bf16.gmra.mrb[20].mxu0 %vm1945_vm1, %v11199_v61  ;;  %v536_v28 = vsel %vm11524_vm4, %v531_v18, %v535_v0  ;;  %v551_v33 = vrot.slane %v550_v23, 4  ;;  %v563_v10 = vrot.slane %v561_v25, 5  ;;  %v569_v34 = vrot.slane %v567_v26, 5  ;;  %v200_v25 = vld [vmem:[%s11488_s23 + $0x8c] sm:$0xf] }
  0x3c   : > { %10552 = vmatprep.mubr.msk.bf16.mxu0 %vm1945_vm1, %v11200_v3  ;;  %v8946_v32 = vcombine.low %v526_v17, %v536_v28  ;;  %v546_v37 = vsel %vm11524_vm4, %v541_v29, %v545_v12  ;;  %v573_v38 = vrot.slane %v571_v31, 4  ;;  %v577_v39 = vshll.u32 %v194_v20, 16  ;;  %v308_v12 = vld [vmem:[%s11488_s23 + $0x88] sm:$0x1]  ;;  %v201_v31 = vld [vmem:[%s11488_s23 + $0x90] sm:$0xf] }
  0x3d   : > { %v581_v41 = vshrl.u32 %v194_v20, 16  ;;  %v556_v43 = vsel %vm11524_vm4, %v551_v33, %v555_v24  ;;  %v564_v44 = vor.u32 %v563_v10, %v560_v30  ;;  %v587_v45 = vshll.u32 %v195_v27, 16  ;;  %v11204_v30 = vld [vmem:[%s11488_s23 + $0xb4] sm:$0xff]  }
  0x3e   : > { %10284 = vmatprep.mubr.msk.bf16.mxu1 %vm1945_vm1, %v8946_v32  ;;  %v591_v46 = vshrl.u32 %v195_v27, 16  ;;  %v8947_v48 = vcombine.low %v546_v37, %v556_v43  ;;  %v574_v49 = vor.u32 %v573_v38, %v569_v34  ;;  %v579_v50 = vrot.slane %v577_v39, 5 }
  0x3f   : > { %v583_v51 = vrot.slane %v581_v41, 4  ;;  %v565_v53 = vrot.slane %v564_v44, 4  ;;  %v589_v54 = vrot.slane %v587_v45, 5  ;;  %v597_v56 = vshll.u32 %v307_v40, 16  ;;  %v203_v45 = vld [vmem:[%s11488_s23 + $0x98] sm:$0xf] }
  0x40   : > { %v593_v55 = vrot.slane %v591_v46, 4  ;;  %v575_v57 = vrot.slane %v574_v49, 4  ;;  %v602_v60 = vshrl.u32 %v196_v47, 16  ;;  %v605_v61 = vshll.u32 %v196_v47, 16 }
  0x41   : > { %v584_v58 = vor.u32 %v583_v51, %v579_v50  ;;  %10285 = vmatmul.mubr.msk.bf16.gmra.mrb[16].mxu1 %vm1945_vm1, %v8947_v48  ;;  %v570_v62 = vsel %vm11524_vm4, %v565_v53, %v569_v34  ;;  %v599_v0 = vrot.slane %v597_v56, 5  ;;  %v611_v1 = vshll.u32 %v197_v52, 16 }
  0x42   : > { %v594_v63 = vor.u32 %v593_v55, %v589_v54  ;;  %v580_v2 = vsel %vm11524_vm4, %v575_v57, %v579_v50  ;;  %v604_v4 = vrot.slane %v602_v60, 4  ;;  %v607_v5 = vrot.slane %v605_v61, 5  ;;  %v309_v50 = vld [vmem:[%s11488_s23 + $0x9c] sm:$0x1] }
  0x43   : > { %10553 = vmatmul.mubr.msk.bf16.gmra.mrb[24].mxu0 %vm1945_vm1, %v11201_v35  ;;  %v585_v3 = vrot.slane %v584_v58, 4  ;;  %v8948_v7 = vcombine.low %v570_v62, %v580_v2  ;;  %v613_v9 = vrot.slane %v611_v1, 5  ;;  %v615_v11 = vshrl.u32 %v197_v52, 16  ;;  %v202_v35 = vld [vmem:[%s11488_s23 + $0x94] sm:$0xf]  ;;  %v11205_v62 = vld [vmem:[%s11488_s23 + $0xbc] sm:$0xff]  }
  0x44   : > { %10556 = vmatprep.mubr.msk.bf16.mxu0 %vm1945_vm1, %v11202_v42  ;;  %v595_v8 = vrot.slane %v594_v63, 4  ;;  %v608_v16 = vor.u32 %v607_v5, %v604_v4  ;;  %v621_v17 = vshll.u32 %v198_v59, 16  ;;  %v625_v18 = vshrl.u32 %v198_v59, 16  ;;  %v204_v59 = vld [vmem:[%s11488_s23 + $0xa0] sm:$0xf]  ;;  %v11206_v1 = vld [vmem:[%s11488_s23 + $0xc8] sm:$0xff]  }
  0x45   : > { %v590_v15 = vsel %vm11524_vm4, %v585_v3, %v589_v54  ;;  %10288 = vmatprep.mubr.msk.bf16.mxu1 %vm1945_vm1, %v8948_v7  ;;  %v617_v20 = vrot.slane %v615_v11, 4  ;;  %v631_v23 = vshll.u32 %v199_v6, 16  ;;  %v635_v24 = vshrl.u32 %v199_v6, 16  ;;  %v205_v6 = vld [vmem:[%s11488_s23 + $0xa4] sm:$0xf] }
  0x46   : > { %v600_v19 = vsel %vm11524_vm4, %v595_v8, %v599_v0  ;;  %v609_v27 = vrot.slane %v608_v16, 4  ;;  %v623_v28 = vrot.slane %v621_v17, 5  ;;  %v627_v29 = vrot.slane %v625_v18, 4  ;;  %v206_v17 = vld [vmem:[%s11488_s23 + $0xa8] sm:$0xf] }
  0x47   : > { %v8949_v26 = vcombine.low %v590_v15, %v600_v19  ;;  %v618_v32 = vor.u32 %v617_v20, %v613_v9  ;;  %v633_v33 = vrot.slane %v631_v23, 5  ;;  %v637_v10 = vrot.slane %v635_v24, 4  ;;  %v207_v24 = vld [vmem:[%s11488_s23 + $0xac] sm:$0xf] }
  0x48   : > { %v641_v34 = vshll.u32 %v308_v12, 16  ;;  %v614_v37 = vsel %vm11524_vm4, %v609_v27, %v613_v9  ;;  %v628_v38 = vor.u32 %v627_v29, %v623_v28  ;;  %v646_v39 = vshrl.u32 %v200_v25, 16 }
  0x49   : > { %v649_v40 = vshll.u32 %v200_v25, 16  ;;  %10289 = vmatmul.mubr.msk.bf16.gmra.mrb[20].mxu1 %vm1945_vm1, %v8949_v26  ;;  %v619_v41 = vrot.slane %v618_v32, 4  ;;  %v638_v42 = vor.u32 %v637_v10, %v633_v33  ;;  %v655_v44 = vshll.u32 %v201_v31, 16 }
  0x4a   : > { %v643_v43 = vrot.slane %v641_v34, 5  ;;  %v629_v46 = vrot.slane %v628_v38, 4  ;;  %v648_v47 = vrot.slane %v646_v39, 4  ;;  %v659_v49 = vshrl.u32 %v201_v31, 16  ;;  %v208_v39 = vld [vmem:[%s11488_s23 + $0xb4] sm:$0xf] }
  0x4b   : > { %10557 = vmatmul.mubr.msk.bf16.gmra.mrb[28].mxu0 %vm1945_vm1, %v11203_v22  ;;  %v651_v48 = vrot.slane %v649_v40, 5  ;;  %v624_v51 = vsel %vm11524_vm4, %v619_v41, %v623_v28  ;;  %v639_v52 = vrot.slane %v638_v42, 4  ;;  %v657_v53 = vrot.slane %v655_v44, 5  ;;  %v11208_v44 = vld [vmem:[%s11488_s23 + $0xdc] sm:$0xff]  }
  0x4c   : > { %10560 = vmatprep.mubr.msk.bf16.mxu0 %vm1945_vm1, %v11204_v30  ;;  %v665_v54 = vshll.u32 %v202_v35, 16  ;;  %v8950_v55 = vcombine.low %v614_v37, %v624_v51  ;;  %v634_v56 = vsel %vm11524_vm4, %v629_v46, %v633_v33  ;;  %v661_v58 = vrot.slane %v659_v49, 4  ;;  %v310_v33 = vld [vmem:[%s11488_s23 + $0xb0] sm:$0x1] }
  0x4d   : > { %v652_v57 = vor.u32 %v651_v48, %v648_v47  ;;  %v644_v60 = vsel %vm11524_vm4, %v639_v52, %v643_v43  ;;  %v669_v63 = vshrl.u32 %v202_v35, 16  ;;  %v675_v0 = vshll.u32 %v203_v45, 16  ;;  %v11207_v37 = vld [vmem:[%s11488_s23 + $0xd0] sm:$0xff]  }
  0x4e   : > { %v667_v61 = vrot.slane %v665_v54, 5  ;;  %10292 = vmatprep.mubr.msk.bf16.mxu1 %vm1945_vm1, %v8950_v55  ;;  %v8951_v2 = vcombine.low %v634_v56, %v644_v60  ;;  %v662_v4 = vor.u32 %v661_v58, %v657_v53  ;;  %v679_v5 = vshrl.u32 %v203_v45, 16  ;;  %v209_v45 = vld [vmem:[%s11488_s23 + $0xb8] sm:$0xf] }
  0x4f   : > { %v653_v3 = vrot.slane %v652_v57, 4  ;;  %v671_v7 = vrot.slane %v669_v63, 4  ;;  %v677_v8 = vrot.slane %v675_v0, 5  ;;  %v685_v9 = vshll.u32 %v309_v50, 16  ;;  %v210_v57 = vld [vmem:[%s11488_s23 + $0xbc] sm:$0xf] }
  0x50   : > { %v690_v11 = vshrl.u32 %v204_v59, 16  ;;  %v663_v15 = vrot.slane %v662_v4, 4  ;;  %v681_v16 = vrot.slane %v679_v5, 4  ;;  %v693_v18 = vshll.u32 %v204_v59, 16 }
  0x51   : > { %v658_v12 = vsel %vm11524_vm4, %v653_v3, %v657_v53  ;;  %10293 = vmatmul.mubr.msk.bf16.gmra.mrb[24].mxu1 %vm1945_vm1, %v8951_v2  ;;  %v672_v19 = vor.u32 %v671_v7, %v667_v61  ;;  %v687_v20 = vrot.slane %v685_v9, 5  ;;  %v699_v23 = vshll.u32 %v205_v6, 16  ;;  %v211_v3 = vld [vmem:[%s11488_s23 + $0xc0] sm:$0xf] }
  0x52   : > { %v692_v22 = vrot.slane %v690_v11, 4  ;;  %v668_v25 = vsel %vm11524_vm4, %v663_v15, %v667_v61  ;;  %v682_v26 = vor.u32 %v681_v16, %v677_v8  ;;  %v695_v27 = vrot.slane %v693_v18, 5  ;;  %v11209_v15 = vld [vmem:[%s11488_s23 + $0xe4] sm:$0xff]  }
  0x53   : > { %10561 = vmatmul.mubr.msk.bf16.gmra.mrb[32].mxu0 %vm1945_vm1, %v11205_v62  ;;  %v703_v28 = vshrl.u32 %v205_v6, 16  ;;  %v8952_v29 = vcombine.low %v658_v12, %v668_v25  ;;  %v673_v30 = vrot.slane %v672_v19, 4  ;;  %v701_v31 = vrot.slane %v699_v23, 5 }
  0x54   : > { %10564 = vmatprep.mubr.msk.bf16.mxu0 %vm1945_vm1, %v11206_v1  ;;  %v709_v32 = vshll.u32 %v206_v17, 16  ;;  %v683_v10 = vrot.slane %v682_v26, 4  ;;  %v696_v34 = vor.u32 %v695_v27, %v692_v22  ;;  %v713_v38 = vshrl.u32 %v206_v17, 16  ;;  %v212_v17 = vld [vmem:[%s11488_s23 + $0xc8] sm:$0xf]  ;;  %v11210_v27 = vld [vmem:[%s11488_s23 + $0xf0] sm:$0xff]  }
  0x55   : > { %v705_v35 = vrot.slane %v703_v28, 4  ;;  %10296 = vmatprep.mubr.msk.bf16.mxu1 %vm1945_vm1, %v8952_v29  ;;  %v678_v40 = vsel %vm11524_vm4, %v673_v30, %v677_v8  ;;  %v719_v42 = vshll.u32 %v207_v24, 16  ;;  %v723_v43 = vshrl.u32 %v207_v24, 16  ;;  %v311_v8 = vld [vmem:[%s11488_s23 + $0xc4] sm:$0x1] }
  0x56   : > { %v711_v41 = vrot.slane %v709_v32, 5  ;;  %v688_v46 = vsel %vm11524_vm4, %v683_v10, %v687_v20  ;;  %v697_v47 = vrot.slane %v696_v34, 4  ;;  %v715_v49 = vrot.slane %v713_v38, 4  ;;  %v213_v28 = vld [vmem:[%s11488_s23 + $0xcc] sm:$0xf] }
  0x57   : > { %v706_v48 = vor.u32 %v705_v35, %v701_v31  ;;  %v8953_v50 = vcombine.low %v678_v40, %v688_v46  ;;  %v721_v51 = vrot.slane %v719_v42, 5  ;;  %v725_v52 = vrot.slane %v723_v43, 4  ;;  %v214_v40 = vld [vmem:[%s11488_s23 + $0xd0] sm:$0xf]  ;;  %v215_v42 = vld [vmem:[%s11488_s23 + $0xd4] sm:$0xf] }
  0x58   : > { %v729_v53 = vshll.u32 %v310_v33, 16  ;;  %v702_v54 = vsel %vm11524_vm4, %v697_v47, %v701_v31  ;;  %v716_v56 = vor.u32 %v715_v49, %v711_v41  ;;  %v734_v58 = vshrl.u32 %v208_v39, 16  ;;  %v312_v47 = vld [vmem:[%s11488_s23 + $0xd8] sm:$0x1] }
  0x59   : > { %v707_v55 = vrot.slane %v706_v48, 4  ;;  %10297 = vmatmul.mubr.msk.bf16.gmra.mrb[28].mxu1 %vm1945_vm1, %v8953_v50  ;;  %v726_v59 = vor.u32 %v725_v52, %v721_v51  ;;  %v737_v61 = vshll.u32 %v208_v39, 16  ;;  %v743_v62 = vshll.u32 %v209_v45, 16 }
  0x5a   : > { %v731_v60 = vrot.slane %v729_v53, 5  ;;  %v717_v0 = vrot.slane %v716_v56, 4  ;;  %v736_v1 = vrot.slane %v734_v58, 4  ;;  %v747_v2 = vshrl.u32 %v209_v45, 16  ;;  %v216_v56 = vld [vmem:[%s11488_s23 + $0xdc] sm:$0xf] }
  0x5b   : > { %10565 = vmatmul.mubr.msk.bf16.gmra.mrb[36].mxu0 %vm1945_vm1, %v11207_v37  ;;  %v712_v63 = vsel %vm11524_vm4, %v707_v55, %v711_v41  ;;  %v727_v5 = vrot.slane %v726_v59, 4  ;;  %v739_v6 = vrot.slane %v737_v61, 5  ;;  %v745_v7 = vrot.slane %v743_v62, 5  ;;  %v11211_v59 = vld [vmem:[%s11488_s23 + $0xf8] sm:$0xff]   ;;  %v217_v62 = vld [vmem:[%s11488_s23 + $0xe0] sm:$0xf] }
  0x5c   : > { %10568 = vmatprep.mubr.msk.bf16.mxu0 %vm1945_vm1, %v11208_v44  ;;  %v8954_v4 = vcombine.low %v702_v54, %v712_v63  ;;  %v722_v9 = vsel %vm11524_vm4, %v717_v0, %v721_v51  ;;  %v749_v11 = vrot.slane %v747_v2, 4  ;;  %v753_v12 = vshll.u32 %v210_v57, 16 }
  0x5d   : > { %v757_v16 = vshrl.u32 %v210_v57, 16  ;;  %v732_v18 = vsel %vm11524_vm4, %v727_v5, %v731_v60  ;;  %v740_v19 = vor.u32 %v739_v6, %v736_v1  ;;  %v763_v20 = vshll.u32 %v211_v3, 16 }
  0x5e   : > { %10300 = vmatprep.mubr.msk.bf16.mxu1 %vm1945_vm1, %v8954_v4  ;;  %v767_v22 = vshrl.u32 %v211_v3, 16  ;;  %v8955_v23 = vcombine.low %v722_v9, %v732_v18  ;;  %v750_v24 = vor.u32 %v749_v11, %v745_v7  ;;  %v755_v25 = vrot.slane %v753_v12, 5  ;;  %v11212_v3 = vld [vmem:[%s11488_s23 + $0x104] sm:$0xff]  }
  0x5f   : > { %v759_v26 = vrot.slane %v757_v16, 4  ;;  %v741_v29 = vrot.slane %v740_v19, 4  ;;  %v765_v30 = vrot.slane %v763_v20, 5  ;;  %v773_v32 = vshll.u32 %v311_v8, 16  ;;  %v218_v11 = vld [vmem:[%s11488_s23 + $0xe4] sm:$0xf] }
  0x60   : > { %v769_v31 = vrot.slane %v767_v22, 4  ;;  %v751_v33 = vrot.slane %v750_v24, 4  ;;  %v778_v34 = vshrl.u32 %v212_v17, 16  ;;  %v781_v35 = vshll.u32 %v212_v17, 16  ;;  %v219_v20 = vld [vmem:[%s11488_s23 + $0xe8] sm:$0xf] }
  0x61   : > { %v760_v10 = vor.u32 %v759_v26, %v755_v25  ;;  %10301 = vmatmul.mubr.msk.bf16.gmra.mrb[32].mxu1 %vm1945_vm1, %v8955_v23  ;;  %v746_v37 = vsel %vm11524_vm4, %v741_v29, %v745_v7  ;;  %v775_v39 = vrot.slane %v773_v32, 5  ;;  %v787_v41 = vshll.u32 %v213_v28, 16 }
  0x62   : > { %v770_v38 = vor.u32 %v769_v31, %v765_v30  ;;  %v756_v43 = vsel %vm11524_vm4, %v751_v33, %v755_v25  ;;  %v780_v45 = vrot.slane %v778_v34, 4  ;;  %v783_v46 = vrot.slane %v781_v35, 5  ;;  %v313_v34 = vld [vmem:[%s11488_s23 + $0xec] sm:$0x1]  ;;  %v220_v35 = vld [vmem:[%s11488_s23 + $0xf0] sm:$0xf] }
  0x63   : > { %10569 = vmatmul.mubr.msk.bf16.gmra.mrb[40].mxu0 %vm1945_vm1, %v11209_v15  ;;  %v761_v44 = vrot.slane %v760_v10, 4  ;;  %v8956_v48 = vcombine.low %v746_v37, %v756_v43  ;;  %v789_v50 = vrot.slane %v787_v41, 5  ;;  %v791_v51 = vshrl.u32 %v213_v28, 16  ;;  %v11213_v10 = vld [vmem:[%s11488_s23 + $0x10c] sm:$0xff]   ;;  %v11214_v41 = vld [vmem:[%s11488_s23 + $0x118] sm:$0xff]  }
  0x64   : > { %10572 = vmatprep.mubr.msk.bf16.mxu0 %vm1945_vm1, %v11210_v27  ;;  %v771_v49 = vrot.slane %v770_v38, 4  ;;  %v784_v53 = vor.u32 %v783_v46, %v780_v45  ;;  %v797_v54 = vshll.u32 %v214_v40, 16  ;;  %v801_v55 = vshrl.u32 %v214_v40, 16  ;;  %v221_v46 = vld [vmem:[%s11488_s23 + $0xf4] sm:$0xf] }
  0x65   : > { %v766_v52 = vsel %vm11524_vm4, %v761_v44, %v765_v30  ;;  %10304 = vmatprep.mubr.msk.bf16.mxu1 %vm1945_vm1, %v8956_v48  ;;  %v793_v58 = vrot.slane %v791_v51, 4  ;;  %v807_v60 = vshll.u32 %v215_v42, 16  ;;  %v811_v61 = vshrl.u32 %v215_v42, 16 }
  0x66   : > { %v776_v57 = vsel %vm11524_vm4, %v771_v49, %v775_v39  ;;  %v785_v0 = vrot.slane %v784_v53, 4  ;;  %v799_v1 = vrot.slane %v797_v54, 5  ;;  %v803_v2 = vrot.slane %v801_v55, 4 }
  0x67   : > { %v8957_v63 = vcombine.low %v766_v52, %v776_v57  ;;  %v794_v4 = vor.u32 %v793_v58, %v789_v50  ;;  %v809_v5 = vrot.slane %v807_v60, 5  ;;  %v813_v6 = vrot.slane %v811_v61, 4 }
  0x68   : > { %v817_v7 = vshll.u32 %v312_v47, 16  ;;  %v790_v8 = vsel %vm11524_vm4, %v785_v0, %v789_v50  ;;  %v804_v9 = vor.u32 %v803_v2, %v799_v1  ;;  %v822_v12 = vshrl.u32 %v216_v56, 16  ;;  %v222_v50 = vld [vmem:[%s11488_s23 + $0xf8] sm:$0xf] }
  0x69   : > { %v825_v15 = vshll.u32 %v216_v56, 16  ;;  %10305 = vmatmul.mubr.msk.bf16.gmra.mrb[36].mxu1 %vm1945_vm1, %v8957_v63  ;;  %v795_v16 = vrot.slane %v794_v4, 4  ;;  %v814_v17 = vor.u32 %v813_v6, %v809_v5  ;;  %v831_v19 = vshll.u32 %v217_v62, 16  ;;  %v223_v56 = vld [vmem:[%s11488_s23 + $0xfc] sm:$0xf] }
  0x6a   : > { %v819_v18 = vrot.slane %v817_v7, 5  ;;  %v805_v22 = vrot.slane %v804_v9, 4  ;;  %v824_v23 = vrot.slane %v822_v12, 4  ;;  %v835_v25 = vshrl.u32 %v217_v62, 16  ;;  %v224_v6 = vld [vmem:[%s11488_s23 + $0x104] sm:$0xf] }
  0x6b   : > { %10573 = vmatmul.mubr.msk.bf16.gmra.mrb[44].mxu0 %vm1945_vm1, %v11211_v59  ;;  %v827_v24 = vrot.slane %v825_v15, 5  ;;  %v800_v26 = vsel %vm11524_vm4, %v795_v16, %v799_v1  ;;  %v815_v27 = vrot.slane %v814_v17, 4  ;;  %v833_v28 = vrot.slane %v831_v19, 5  ;;  %v314_v1 = vld [vmem:[%s11488_s23 + $0x100] sm:$0x1] }
  0x6c   : > { %10576 = vmatprep.mubr.msk.bf16.mxu0 %vm1945_vm1, %v11212_v3  ;;  %v841_v29 = vshll.u32 %v218_v11, 16  ;;  %v8958_v30 = vcombine.low %v790_v8, %v800_v26  ;;  %v810_v31 = vsel %vm11524_vm4, %v805_v22, %v809_v5  ;;  %v837_v33 = vrot.slane %v835_v25, 4  ;;  %v11215_v16 = vld [vmem:[%s11488_s23 + $0x120] sm:$0xff]   ;;  %v225_v25 = vld [vmem:[%s11488_s23 + $0x108] sm:$0xf] }
  0x6d   : > { %v828_v32 = vor.u32 %v827_v24, %v824_v23  ;;  %v820_v37 = vsel %vm11524_vm4, %v815_v27, %v819_v18  ;;  %v845_v39 = vshrl.u32 %v218_v11, 16  ;;  %v851_v40 = vshll.u32 %v219_v20, 16  ;;  %v11216_v24 = vld [vmem:[%s11488_s23 + $0x12c] sm:$0xff]  }
  0x6e   : > { %v843_v38 = vrot.slane %v841_v29, 5  ;;  %10308 = vmatprep.mubr.msk.bf16.mxu1 %vm1945_vm1, %v8958_v30  ;;  %v8959_v42 = vcombine.low %v810_v31, %v820_v37  ;;  %v838_v44 = vor.u32 %v837_v33, %v833_v28  ;;  %v855_v45 = vshrl.u32 %v219_v20, 16  ;;  %v226_v30 = vld [vmem:[%s11488_s23 + $0x10c] sm:$0xf] }
  0x6f   : > { %v829_v43 = vrot.slane %v828_v32, 4  ;;  %v847_v47 = vrot.slane %v845_v39, 4  ;;  %v853_v48 = vrot.slane %v851_v40, 5  ;;  %v861_v49 = vshll.u32 %v313_v34, 16  ;;  %v227_v39 = vld [vmem:[%s11488_s23 + $0x110] sm:$0xf] }
  0x70   : > { %v866_v51 = vshrl.u32 %v220_v35, 16  ;;  %v839_v53 = vrot.slane %v838_v44, 4  ;;  %v857_v54 = vrot.slane %v855_v45, 4  ;;  %v869_v55 = vshll.u32 %v220_v35, 16  ;;  %v315_v44 = vld [vmem:[%s11488_s23 + $0x114] sm:$0x1] }
  0x71   : > { %v834_v52 = vsel %vm11524_vm4, %v829_v43, %v833_v28  ;;  %10309 = vmatmul.mubr.msk.bf16.gmra.mrb[40].mxu1 %vm1945_vm1, %v8959_v42  ;;  %v848_v57 = vor.u32 %v847_v47, %v843_v38  ;;  %v863_v58 = vrot.slane %v861_v49, 5  ;;  %v875_v60 = vshll.u32 %v221_v46, 16 }
  0x72   : > { %v868_v59 = vrot.slane %v866_v51, 4  ;;  %v844_v61 = vsel %vm11524_vm4, %v839_v53, %v843_v38  ;;  %v858_v62 = vor.u32 %v857_v54, %v853_v48  ;;  %v871_v63 = vrot.slane %v869_v55, 5  ;;  %v11217_v55 = vld [vmem:[%s11488_s23 + $0x134] sm:$0xff]  }
  0x73   : > { %10577 = vmatmul.mubr.msk.bf16.gmra.mrb[48].mxu0 %vm1945_vm1, %v11213_v10  ;;  %v879_v0 = vshrl.u32 %v221_v46, 16  ;;  %v8960_v2 = vcombine.low %v834_v52, %v844_v61  ;;  %v849_v3 = vrot.slane %v848_v57, 4  ;;  %v877_v4 = vrot.slane %v875_v60, 5 }
  0x74   : > { %10580 = vmatprep.mubr.msk.bf16.mxu0 %vm1945_vm1, %v11214_v41  ;;  %v885_v5 = vshll.u32 %v222_v50, 16  ;;  %v859_v7 = vrot.slane %v858_v62, 4  ;;  %v872_v8 = vor.u32 %v871_v63, %v868_v59  ;;  %v889_v11 = vshrl.u32 %v222_v50, 16  ;;  %v228_v59 = vld [vmem:[%s11488_s23 + $0x118] sm:$0xf] }
  0x75   : > { %v881_v9 = vrot.slane %v879_v0, 4  ;;  %10312 = vmatprep.mubr.msk.bf16.mxu1 %vm1945_vm1, %v8960_v2  ;;  %v854_v12 = vsel %vm11524_vm4, %v849_v3, %v853_v48  ;;  %v895_v17 = vshll.u32 %v223_v56, 16  ;;  %v899_v18 = vshrl.u32 %v223_v56, 16  ;;  %v229_v0 = vld [vmem:[%s11488_s23 + $0x11c] sm:$0xf] }
  0x76   : > { %v887_v15 = vrot.slane %v885_v5, 5  ;;  %v864_v19 = vsel %vm11524_vm4, %v859_v7, %v863_v58  ;;  %v873_v20 = vrot.slane %v872_v8, 4  ;;  %v891_v23 = vrot.slane %v889_v11, 4  ;;  %v11218_v58 = vld [vmem:[%s11488_s23 + $0x140] sm:$0xff]  }
  0x77   : > { %v882_v22 = vor.u32 %v881_v9, %v877_v4  ;;  %v8961_v26 = vcombine.low %v854_v12, %v864_v19  ;;  %v897_v27 = vrot.slane %v895_v17, 5  ;;  %v901_v28 = vrot.slane %v899_v18, 4  ;;  %v230_v7 = vld [vmem:[%s11488_s23 + $0x120] sm:$0xf]  ;;  %v231_v17 = vld [vmem:[%s11488_s23 + $0x124] sm:$0xf] }
  0x78   : > { %v905_v29 = vshll.u32 %v314_v1, 16  ;;  %v878_v31 = vsel %vm11524_vm4, %v873_v20, %v877_v4  ;;  %v892_v33 = vor.u32 %v891_v23, %v887_v15  ;;  %v910_v10 = vshrl.u32 %v224_v6, 16 }
  0x79   : > { %v883_v32 = vrot.slane %v882_v22, 4  ;;  %10313 = vmatmul.mubr.msk.bf16.gmra.mrb[44].mxu1 %vm1945_vm1, %v8961_v26  ;;  %v902_v34 = vor.u32 %v901_v28, %v897_v27  ;;  %v913_v37 = vshll.u32 %v224_v6, 16  ;;  %v919_v38 = vshll.u32 %v225_v25, 16 }
  0x7a   : > { %v907_v35 = vrot.slane %v905_v29, 5  ;;  %v893_v41 = vrot.slane %v892_v33, 4  ;;  %v912_v42 = vrot.slane %v910_v10, 4  ;;  %v923_v43 = vshrl.u32 %v225_v25, 16  ;;  %v233_v33 = vld [vmem:[%s11488_s23 + $0x130] sm:$0xf] }
  0x7b   : > { %10581 = vmatmul.mubr.msk.bf16.gmra.mrb[52].mxu0 %vm1945_vm1, %v11215_v16  ;;  %v888_v40 = vsel %vm11524_vm4, %v883_v32, %v887_v15  ;;  %v903_v46 = vrot.slane %v902_v34, 4  ;;  %v915_v47 = vrot.slane %v913_v37, 5  ;;  %v921_v48 = vrot.slane %v919_v38, 5  ;;  %v232_v32 = vld [vmem:[%s11488_s23 + $0x12c] sm:$0xf] }
  0x7c   : > { %10584 = vmatprep.mubr.msk.bf16.mxu0 %vm1945_vm1, %v11216_v24  ;;  %v8962_v45 = vcombine.low %v878_v31, %v888_v40  ;;  %v898_v49 = vsel %vm11524_vm4, %v893_v41, %v897_v27  ;;  %v925_v50 = vrot.slane %v923_v43, 4  ;;  %v929_v51 = vshll.u32 %v226_v30, 16  ;;  %v316_v27 = vld [vmem:[%s11488_s23 + $0x128] sm:$0x1]  ;;  %v11220_v43 = vld [vmem:[%s11488_s23 + $0x154] sm:$0xff]  }
  0x7d   : > { %v933_v52 = vshrl.u32 %v226_v30, 16  ;;  %v908_v53 = vsel %vm11524_vm4, %v903_v46, %v907_v35  ;;  %v916_v54 = vor.u32 %v915_v47, %v912_v42  ;;  %v939_v56 = vshll.u32 %v227_v39, 16  ;;  %v11219_v35 = vld [vmem:[%s11488_s23 + $0x148] sm:$0xff]  }
  0x7e   : > { %10316 = vmatprep.mubr.msk.bf16.mxu1 %vm1945_vm1, %v8962_v45  ;;  %v943_v57 = vshrl.u32 %v227_v39, 16  ;;  %v8963_v60 = vcombine.low %v898_v49, %v908_v53  ;;  %v926_v61 = vor.u32 %v925_v50, %v921_v48  ;;  %v931_v62 = vrot.slane %v929_v51, 5  ;;  %v234_v50 = vld [vmem:[%s11488_s23 + $0x134] sm:$0xf] }
  0x7f   : > { %v935_v63 = vrot.slane %v933_v52, 4  ;;  %v917_v1 = vrot.slane %v916_v54, 4  ;;  %v941_v2 = vrot.slane %v939_v56, 5  ;;  %v949_v4 = vshll.u32 %v315_v44, 16 }
  0x80   : > { %v945_v3 = vrot.slane %v943_v57, 4  ;;  %v927_v5 = vrot.slane %v926_v61, 4  ;;  %v954_v8 = vshrl.u32 %v228_v59, 16  ;;  %v957_v9 = vshll.u32 %v228_v59, 16  ;;  %v235_v61 = vld [vmem:[%s11488_s23 + $0x138] sm:$0xf] }
  0x81   : > { %v936_v6 = vor.u32 %v935_v63, %v931_v62  ;;  %10317 = vmatmul.mubr.msk.bf16.gmra.mrb[48].mxu1 %vm1945_vm1, %v8963_v60  ;;  %v922_v11 = vsel %vm11524_vm4, %v917_v1, %v921_v48  ;;  %v951_v15 = vrot.slane %v949_v4, 5  ;;  %v963_v16 = vshll.u32 %v229_v0, 16 }
  0x82   : > { %v946_v12 = vor.u32 %v945_v3, %v941_v2  ;;  %v932_v18 = vsel %vm11524_vm4, %v927_v5, %v931_v62  ;;  %v956_v20 = vrot.slane %v954_v8, 4  ;;  %v959_v22 = vrot.slane %v957_v9, 5  ;;  %v236_v8 = vld [vmem:[%s11488_s23 + $0x140] sm:$0xf] }
  0x83   : > { %10585 = vmatmul.mubr.msk.bf16.gmra.mrb[56].mxu0 %vm1945_vm1, %v11217_v55  ;;  %v937_v19 = vrot.slane %v936_v6, 4  ;;  %v8964_v23 = vcombine.low %v922_v11, %v932_v18  ;;  %v965_v25 = vrot.slane %v963_v16, 5  ;;  %v967_v26 = vshrl.u32 %v229_v0, 16  ;;  %v11222_v16 = vld [vmem:[%s11488_s23 + $0x168] sm:$0xff]  }
  0x84   : > { %10588 = vmatprep.mubr.msk.bf16.mxu0 %vm1945_vm1, %v11218_v58  ;;  %v947_v24 = vrot.slane %v946_v12, 4  ;;  %v960_v29 = vor.u32 %v959_v22, %v956_v20  ;;  %v973_v30 = vshll.u32 %v230_v7, 16  ;;  %v977_v31 = vshrl.u32 %v230_v7, 16  ;;  %v11221_v7 = vld [vmem:[%s11488_s23 + $0x15c] sm:$0xff]   ;;  %v237_v22 = vld [vmem:[%s11488_s23 + $0x144] sm:$0xf] }
  0x85   : > { %v942_v28 = vsel %vm11524_vm4, %v937_v19, %v941_v2  ;;  %10320 = vmatprep.mubr.msk.bf16.mxu1 %vm1945_vm1, %v8964_v23  ;;  %v969_v34 = vrot.slane %v967_v26, 4  ;;  %v983_v37 = vshll.u32 %v231_v17, 16  ;;  %v987_v38 = vshrl.u32 %v231_v17, 16  ;;  %v317_v2 = vld [vmem:[%s11488_s23 + $0x13c] sm:$0x1] }
  0x86   : > { %v952_v10 = vsel %vm11524_vm4, %v947_v24, %v951_v15  ;;  %v961_v40 = vrot.slane %v960_v29, 4  ;;  %v975_v41 = vrot.slane %v973_v30, 5  ;;  %v979_v42 = vrot.slane %v977_v31, 4  ;;  %v238_v23 = vld [vmem:[%s11488_s23 + $0x148] sm:$0xf] }
  0x87   : > { %v8965_v39 = vcombine.low %v942_v28, %v952_v10  ;;  %v970_v44 = vor.u32 %v969_v34, %v965_v25  ;;  %v985_v45 = vrot.slane %v983_v37, 5  ;;  %v989_v46 = vrot.slane %v987_v38, 4 }
  0x88   : > { %v993_v47 = vshll.u32 %v316_v27, 16  ;;  %v966_v48 = vsel %vm11524_vm4, %v961_v40, %v965_v25  ;;  %v980_v49 = vor.u32 %v979_v42, %v975_v41  ;;  %v998_v51 = vshrl.u32 %v232_v32, 16  ;;  %v239_v40 = vld [vmem:[%s11488_s23 + $0x14c] sm:$0xf] }
  0x89   : > { %v1001_v52 = vshll.u32 %v232_v32, 16  ;;  %10321 = vmatmul.mubr.msk.bf16.gmra.mrb[52].mxu1 %vm1945_vm1, %v8965_v39  ;;  %v971_v53 = vrot.slane %v970_v44, 4  ;;  %v990_v54 = vor.u32 %v989_v46, %v985_v45  ;;  %v1007_v56 = vshll.u32 %v233_v33, 16 }
  0x8a   : > { %v995_v55 = vrot.slane %v993_v47, 5  ;;  %v981_v57 = vrot.slane %v980_v49, 4  ;;  %v1000_v58 = vrot.slane %v998_v51, 4  ;;  %v1011_v60 = vshrl.u32 %v233_v33, 16  ;;  %v11223_v49 = vld [vmem:[%s11488_s23 + $0x170] sm:$0xff]  }
  0x8b   : > { %10589 = vmatmul.mubr.msk.bf16.gmra.mrb[60].mxu0 %vm1945_vm1, %v11219_v35  ;;  %v1003_v59 = vrot.slane %v1001_v52, 5  ;;  %v976_v62 = vsel %vm11524_vm4, %v971_v53, %v975_v41  ;;  %v991_v63 = vrot.slane %v990_v54, 4  ;;  %v1009_v0 = vrot.slane %v1007_v56, 5  ;;  %v318_v41 = vld [vmem:[%s11488_s23 + $0x150] sm:$0x1] }
  0x8c   : > { %10592 = vmatprep.mubr.msk.bf16.mxu0 %vm1945_vm1, %v11220_v43  ;;  %v1017_v1 = vshll.u32 %v234_v50, 16  ;;  %v8966_v3 = vcombine.low %v966_v48, %v976_v62  ;;  %v986_v4 = vsel %vm11524_vm4, %v981_v57, %v985_v45  ;;  %v1013_v6 = vrot.slane %v1011_v60, 4  ;;  %v240_v56 = vld [vmem:[%s11488_s23 + $0x154] sm:$0xf] }
  0x8d   : > { %v1004_v5 = vor.u32 %v1003_v59, %v1000_v58  ;;  %v996_v9 = vsel %vm11524_vm4, %v991_v63, %v995_v55  ;;  %v1021_v12 = vshrl.u32 %v234_v50, 16  ;;  %v1027_v15 = vshll.u32 %v235_v61, 16  ;;  %v11224_v55 = vld [vmem:[%s11488_s23 + $0x17c] sm:$0xff]  }
  0x8e   : > { %v1019_v11 = vrot.slane %v1017_v1, 5  ;;  %10324 = vmatprep.mubr.msk.bf16.mxu1 %vm1945_vm1, %v8966_v3  ;;  %v8967_v17 = vcombine.low %v986_v4, %v996_v9  ;;  %v1014_v19 = vor.u32 %v1013_v6, %v1009_v0  ;;  %v1031_v20 = vshrl.u32 %v235_v61, 16  ;;  %v241_v61 = vld [vmem:[%s11488_s23 + $0x158] sm:$0xf] }
  0x8f   : > { %v1005_v18 = vrot.slane %v1004_v5, 4  ;;  %v1023_v24 = vrot.slane %v1021_v12, 4  ;;  %v1029_v25 = vrot.slane %v1027_v15, 5  ;;  %v1037_v26 = vshll.u32 %v317_v2, 16  ;;  %v242_v5 = vld [vmem:[%s11488_s23 + $0x15c] sm:$0xf] }
  0x90   : > { %v1042_v27 = vshrl.u32 %v236_v8, 16  ;;  %v1015_v29 = vrot.slane %v1014_v19, 4  ;;  %v1033_v30 = vrot.slane %v1031_v20, 4  ;;  %v1045_v31 = vshll.u32 %v236_v8, 16  ;;  %v243_v12 = vld [vmem:[%s11488_s23 + $0x160] sm:$0xf] }
  0x91   : > { %v1010_v28 = vsel %vm11524_vm4, %v1005_v18, %v1009_v0  ;;  %10325 = vmatmul.mubr.msk.bf16.gmra.mrb[56].mxu1 %vm1945_vm1, %v8967_v17  ;;  %v1024_v32 = vor.u32 %v1023_v24, %v1019_v11  ;;  %v1039_v33 = vrot.slane %v1037_v26, 5  ;;  %v1051_v34 = vshll.u32 %v237_v22, 16  ;;  %v11225_v24 = vld [vmem:[%s11488_s23 + $0x184] sm:$0xff]  }
  0x92   : > { %v1044_v10 = vrot.slane %v1042_v27, 4  ;;  %v1020_v35 = vsel %vm11524_vm4, %v1015_v29, %v1019_v11  ;;  %v1034_v37 = vor.u32 %v1033_v30, %v1029_v25  ;;  %v1047_v38 = vrot.slane %v1045_v31, 5  ;;  %v11226_v30 = vld [vmem:[%s11488_s23 + $0x190] sm:$0xff]  }
  0x93   : > { %10593 = vmatmul.mubr.msk.bf16.gmra.mrb[64].mxu0 %vm1945_vm1, %v11221_v7  ;;  %v1055_v39 = vshrl.u32 %v237_v22, 16  ;;  %v8968_v42 = vcombine.low %v1010_v28, %v1020_v35  ;;  %v1025_v43 = vrot.slane %v1024_v32, 4  ;;  %v1053_v44 = vrot.slane %v1051_v34, 5  ;;  %v319_v28 = vld [vmem:[%s11488_s23 + $0x164] sm:$0x1] }
  0x94   : > { %10596 = vmatprep.mubr.msk.bf16.mxu0 %vm1945_vm1, %v11222_v16  ;;  %v1061_v45 = vshll.u32 %v238_v23, 16  ;;  %v1035_v46 = vrot.slane %v1034_v37, 4  ;;  %v1048_v47 = vor.u32 %v1047_v38, %v1044_v10  ;;  %v1065_v50 = vshrl.u32 %v238_v23, 16  ;;  %v244_v34 = vld [vmem:[%s11488_s23 + $0x168] sm:$0xf] }
  0x95   : > { %v1057_v48 = vrot.slane %v1055_v39, 4  ;;  %10328 = vmatprep.mubr.msk.bf16.mxu1 %vm1945_vm1, %v8968_v42  ;;  %v1030_v51 = vsel %vm11524_vm4, %v1025_v43, %v1029_v25  ;;  %v1071_v53 = vshll.u32 %v239_v40, 16  ;;  %v1075_v54 = vshrl.u32 %v239_v40, 16  ;;  %v245_v40 = vld [vmem:[%s11488_s23 + $0x16c] sm:$0xf] }
  0x96   : > { %v1063_v52 = vrot.slane %v1061_v45, 5  ;;  %v1040_v57 = vsel %vm11524_vm4, %v1035_v46, %v1039_v33  ;;  %v1049_v58 = vrot.slane %v1048_v47, 4  ;;  %v1067_v60 = vrot.slane %v1065_v50, 4  ;;  %v246_v47 = vld [vmem:[%s11488_s23 + $0x170] sm:$0xf] }
  0x97   : > { %v1058_v59 = vor.u32 %v1057_v48, %v1053_v44  ;;  %v8969_v62 = vcombine.low %v1030_v51, %v1040_v57  ;;  %v1073_v63 = vrot.slane %v1071_v53, 5  ;;  %v1077_v0 = vrot.slane %v1075_v54, 4 }
  0x98   : > { %v1081_v1 = vshll.u32 %v318_v41, 16  ;;  %v1054_v2 = vsel %vm11524_vm4, %v1049_v58, %v1053_v44  ;;  %v1068_v4 = vor.u32 %v1067_v60, %v1063_v52  ;;  %v1086_v6 = vshrl.u32 %v240_v56, 16  ;;  %v247_v58 = vld [vmem:[%s11488_s23 + $0x174] sm:$0xf] }
  0x99   : > { %v1059_v3 = vrot.slane %v1058_v59, 4  ;;  %10329 = vmatmul.mubr.msk.bf16.gmra.mrb[60].mxu1 %vm1945_vm1, %v8969_v62  ;;  %v1078_v7 = vor.u32 %v1077_v0, %v1073_v63  ;;  %v1089_v9 = vshll.u32 %v240_v56, 16  ;;  %v1095_v11 = vshll.u32 %v241_v61, 16 }
  0x9a   : > { %v1083_v8 = vrot.slane %v1081_v1, 5  ;;  %v1069_v16 = vrot.slane %v1068_v4, 4  ;;  %v1088_v17 = vrot.slane %v1086_v6, 4  ;;  %v1099_v18 = vshrl.u32 %v241_v61, 16  ;;  %v11227_v6 = vld [vmem:[%s11488_s23 + $0x198] sm:$0xff]  }
  0x9b   : > { %10597 = vmatmul.mubr.msk.bf16.gmra.mrb[68].mxu0 %vm1945_vm1, %v11223_v49  ;;  %v1064_v15 = vsel %vm11524_vm4, %v1059_v3, %v1063_v52  ;;  %v1079_v20 = vrot.slane %v1078_v7, 4  ;;  %v1091_v22 = vrot.slane %v1089_v9, 5  ;;  %v1097_v23 = vrot.slane %v1095_v11, 5  ;;  %v248_v9 = vld [vmem:[%s11488_s23 + $0x17c] sm:$0xf] }
  0x9c   : > { %10600 = vmatprep.mubr.msk.bf16.mxu0 %vm1945_vm1, %v11224_v55  ;;  %v8970_v19 = vcombine.low %v1054_v2, %v1064_v15  ;;  %v1074_v25 = vsel %vm11524_vm4, %v1069_v16, %v1073_v63  ;;  %v1101_v26 = vrot.slane %v1099_v18, 4  ;;  %v1105_v27 = vshll.u32 %v242_v5, 16  ;;  %v320_v63 = vld [vmem:[%s11488_s23 + $0x178] sm:$0x1]  ;;  %v249_v18 = vld [vmem:[%s11488_s23 + $0x180] sm:$0xf] }
  0x9d   : > { %v1109_v29 = vshrl.u32 %v242_v5, 16  ;;  %v1084_v31 = vsel %vm11524_vm4, %v1079_v20, %v1083_v8  ;;  %v1092_v32 = vor.u32 %v1091_v22, %v1088_v17  ;;  %v1115_v33 = vshll.u32 %v243_v12, 16  ;;  %v11228_v17 = vld [vmem:[%s11488_s23 + $0x1a4] sm:$0xff]  }
  0x9e   : > { %10332 = vmatprep.mubr.msk.bf16.mxu1 %vm1945_vm1, %v8970_v19  ;;  %v1119_v10 = vshrl.u32 %v243_v12, 16  ;;  %v8971_v35 = vcombine.low %v1074_v25, %v1084_v31  ;;  %v1102_v37 = vor.u32 %v1101_v26, %v1097_v23  ;;  %v1107_v38 = vrot.slane %v1105_v27, 5 }
  0x9f   : > { %v1111_v39 = vrot.slane %v1109_v29, 4  ;;  %v1093_v41 = vrot.slane %v1092_v32, 4  ;;  %v1117_v42 = vrot.slane %v1115_v33, 5  ;;  %v1125_v44 = vshll.u32 %v319_v28, 16  ;;  %v251_v33 = vld [vmem:[%s11488_s23 + $0x188] sm:$0xf] }
  0xa0   : > { %v1121_v43 = vrot.slane %v1119_v10, 4  ;;  %v1103_v45 = vrot.slane %v1102_v37, 4  ;;  %v1130_v48 = vshrl.u32 %v244_v34, 16  ;;  %v1133_v49 = vshll.u32 %v244_v34, 16 }
  0xa1   : > { %v1112_v46 = vor.u32 %v1111_v39, %v1107_v38  ;;  %10333 = vmatmul.mubr.msk.bf16.gmra.mrb[64].mxu1 %vm1945_vm1, %v8971_v35  ;;  %v1098_v50 = vsel %vm11524_vm4, %v1093_v41, %v1097_v23  ;;  %v1127_v52 = vrot.slane %v1125_v44, 5  ;;  %v1139_v53 = vshll.u32 %v245_v40, 16 }
  0xa2   : > { %v1122_v51 = vor.u32 %v1121_v43, %v1117_v42  ;;  %v1108_v54 = vsel %vm11524_vm4, %v1103_v45, %v1107_v38  ;;  %v1132_v56 = vrot.slane %v1130_v48, 4  ;;  %v1135_v57 = vrot.slane %v1133_v49, 5  ;;  %v321_v38 = vld [vmem:[%s11488_s23 + $0x18c] sm:$0x1] }
  0xa3   : > { %10601 = vmatmul.mubr.msk.bf16.gmra.mrb[72].mxu0 %vm1945_vm1, %v11225_v24  ;;  %v1113_v55 = vrot.slane %v1112_v46, 4  ;;  %v8972_v59 = vcombine.low %v1098_v50, %v1108_v54  ;;  %v1141_v61 = vrot.slane %v1139_v53, 5  ;;  %v1143_v62 = vshrl.u32 %v245_v40, 16  ;;  %v250_v24 = vld [vmem:[%s11488_s23 + $0x184] sm:$0xf]  ;;  %v11229_v50 = vld [vmem:[%s11488_s23 + $0x1ac] sm:$0xff]  }
  0xa4   : > { %10604 = vmatprep.mubr.msk.bf16.mxu0 %vm1945_vm1, %v11226_v30  ;;  %v1123_v60 = vrot.slane %v1122_v51, 4  ;;  %v1136_v1 = vor.u32 %v1135_v57, %v1132_v56  ;;  %v1149_v2 = vshll.u32 %v246_v47, 16  ;;  %v1153_v3 = vshrl.u32 %v246_v47, 16  ;;  %v252_v47 = vld [vmem:[%s11488_s23 + $0x190] sm:$0xf]  ;;  %v11230_v53 = vld [vmem:[%s11488_s23 + $0x1b8] sm:$0xff]  }
  0xa5   : > { %v1118_v0 = vsel %vm11524_vm4, %v1113_v55, %v1117_v42  ;;  %10336 = vmatprep.mubr.msk.bf16.mxu1 %vm1945_vm1, %v8972_v59  ;;  %v1145_v5 = vrot.slane %v1143_v62, 4  ;;  %v1159_v7 = vshll.u32 %v247_v58, 16  ;;  %v1163_v8 = vshrl.u32 %v247_v58, 16  ;;  %v253_v58 = vld [vmem:[%s11488_s23 + $0x194] sm:$0xf] }
  0xa6   : > { %v1128_v4 = vsel %vm11524_vm4, %v1123_v60, %v1127_v52  ;;  %v1137_v12 = vrot.slane %v1136_v1, 4  ;;  %v1151_v15 = vrot.slane %v1149_v2, 5  ;;  %v1155_v16 = vrot.slane %v1153_v3, 4  ;;  %v254_v2 = vld [vmem:[%s11488_s23 + $0x198] sm:$0xf] }
  0xa7   : > { %v8973_v11 = vcombine.low %v1118_v0, %v1128_v4  ;;  %v1146_v19 = vor.u32 %v1145_v5, %v1141_v61  ;;  %v1161_v20 = vrot.slane %v1159_v7, 5  ;;  %v1165_v22 = vrot.slane %v1163_v8, 4  ;;  %v255_v8 = vld [vmem:[%s11488_s23 + $0x19c] sm:$0xf] }
  0xa8   : > { %v1169_v23 = vshll.u32 %v320_v63, 16  ;;  %v1142_v25 = vsel %vm11524_vm4, %v1137_v12, %v1141_v61  ;;  %v1156_v26 = vor.u32 %v1155_v16, %v1151_v15  ;;  %v1174_v27 = vshrl.u32 %v248_v9, 16 }
  0xa9   : > { %v1177_v28 = vshll.u32 %v248_v9, 16  ;;  %10337 = vmatmul.mubr.msk.bf16.gmra.mrb[68].mxu1 %vm1945_vm1, %v8973_v11  ;;  %v1147_v29 = vrot.slane %v1146_v19, 4  ;;  %v1166_v30 = vor.u32 %v1165_v22, %v1161_v20  ;;  %v1183_v32 = vshll.u32 %v249_v18, 16 }
  0xaa   : > { %v1171_v31 = vrot.slane %v1169_v23, 5  ;;  %v1157_v10 = vrot.slane %v1156_v26, 4  ;;  %v1176_v34 = vrot.slane %v1174_v27, 4  ;;  %v1187_v37 = vshrl.u32 %v249_v18, 16  ;;  %v256_v27 = vld [vmem:[%s11488_s23 + $0x1a4] sm:$0xf] }
  0xab   : > { %10605 = vmatmul.mubr.msk.bf16.gmra.mrb[76].mxu0 %vm1945_vm1, %v11227_v6  ;;  %v1179_v35 = vrot.slane %v1177_v28, 5  ;;  %v1152_v39 = vsel %vm11524_vm4, %v1147_v29, %v1151_v15  ;;  %v1167_v40 = vrot.slane %v1166_v30, 4  ;;  %v1185_v41 = vrot.slane %v1183_v32, 5  ;;  %v11232_v32 = vld [vmem:[%s11488_s23 + $0x1cc] sm:$0xff]  }
  0xac   : > { %10608 = vmatprep.mubr.msk.bf16.mxu0 %vm1945_vm1, %v11228_v17  ;;  %v1193_v42 = vshll.u32 %v250_v24, 16  ;;  %v8974_v43 = vcombine.low %v1142_v25, %v1152_v39  ;;  %v1162_v44 = vsel %vm11524_vm4, %v1157_v10, %v1161_v20  ;;  %v1189_v46 = vrot.slane %v1187_v37, 4  ;;  %v322_v20 = vld [vmem:[%s11488_s23 + $0x1a0] sm:$0x1] }
  0xad   : > { %v1180_v45 = vor.u32 %v1179_v35, %v1176_v34  ;;  %v1172_v48 = vsel %vm11524_vm4, %v1167_v40, %v1171_v31  ;;  %v1197_v51 = vshrl.u32 %v250_v24, 16  ;;  %v1203_v52 = vshll.u32 %v251_v33, 16  ;;  %v11231_v25 = vld [vmem:[%s11488_s23 + $0x1c0] sm:$0xff]  }
  0xae   : > { %v1195_v49 = vrot.slane %v1193_v42, 5  ;;  %10340 = vmatprep.mubr.msk.bf16.mxu1 %vm1945_vm1, %v8974_v43  ;;  %v8975_v54 = vcombine.low %v1162_v44, %v1172_v48  ;;  %v1190_v56 = vor.u32 %v1189_v46, %v1185_v41  ;;  %v1207_v57 = vshrl.u32 %v251_v33, 16  ;;  %v257_v33 = vld [vmem:[%s11488_s23 + $0x1a8] sm:$0xf] }
  0xaf   : > { %v1181_v55 = vrot.slane %v1180_v45, 4  ;;  %v1199_v59 = vrot.slane %v1197_v51, 4  ;;  %v1205_v60 = vrot.slane %v1203_v52, 5  ;;  %v1213_v61 = vshll.u32 %v321_v38, 16  ;;  %v258_v45 = vld [vmem:[%s11488_s23 + $0x1ac] sm:$0xf] }
  0xb0   : > { %v1218_v62 = vshrl.u32 %v252_v47, 16  ;;  %v1191_v0 = vrot.slane %v1190_v56, 4  ;;  %v1209_v1 = vrot.slane %v1207_v57, 4  ;;  %v1221_v3 = vshll.u32 %v252_v47, 16 }
  0xb1   : > { %v1186_v63 = vsel %vm11524_vm4, %v1181_v55, %v1185_v41  ;;  %10341 = vmatmul.mubr.msk.bf16.gmra.mrb[72].mxu1 %vm1945_vm1, %v8975_v54  ;;  %v1200_v4 = vor.u32 %v1199_v59, %v1195_v49  ;;  %v1215_v5 = vrot.slane %v1213_v61, 5  ;;  %v1227_v7 = vshll.u32 %v253_v58, 16  ;;  %v259_v55 = vld [vmem:[%s11488_s23 + $0x1b0] sm:$0xf] }
  0xb2   : > { %v1220_v6 = vrot.slane %v1218_v62, 4  ;;  %v1196_v9 = vsel %vm11524_vm4, %v1191_v0, %v1195_v49  ;;  %v1210_v11 = vor.u32 %v1209_v1, %v1205_v60  ;;  %v1223_v12 = vrot.slane %v1221_v3, 5  ;;  %v11233_v0 = vld [vmem:[%s11488_s23 + $0x1d4] sm:$0xff]  }
  0xb3   : > { %10609 = vmatmul.mubr.msk.bf16.gmra.mrb[80].mxu0 %vm1945_vm1, %v11229_v50  ;;  %v1231_v15 = vshrl.u32 %v253_v58, 16  ;;  %v8976_v16 = vcombine.low %v1186_v63, %v1196_v9  ;;  %v1201_v17 = vrot.slane %v1200_v4, 4  ;;  %v1229_v18 = vrot.slane %v1227_v7, 5 }
  0xb4   : > { %10612 = vmatprep.mubr.msk.bf16.mxu0 %vm1945_vm1, %v11230_v53  ;;  %v1237_v19 = vshll.u32 %v254_v2, 16  ;;  %v1211_v22 = vrot.slane %v1210_v11, 4  ;;  %v1224_v23 = vor.u32 %v1223_v12, %v1220_v6  ;;  %v1241_v26 = vshrl.u32 %v254_v2, 16  ;;  %v260_v2 = vld [vmem:[%s11488_s23 + $0x1b8] sm:$0xf]  ;;  %v11234_v12 = vld [vmem:[%s11488_s23 + $0x1e0] sm:$0xff]  }
  0xb5   : > { %v1233_v24 = vrot.slane %v1231_v15, 4  ;;  %10344 = vmatprep.mubr.msk.bf16.mxu1 %vm1945_vm1, %v8976_v16  ;;  %v1206_v28 = vsel %vm11524_vm4, %v1201_v17, %v1205_v60  ;;  %v1247_v30 = vshll.u32 %v255_v8, 16  ;;  %v1251_v31 = vshrl.u32 %v255_v8, 16  ;;  %v323_v60 = vld [vmem:[%s11488_s23 + $0x1b4] sm:$0x1] }
  0xb6   : > { %v1239_v29 = vrot.slane %v1237_v19, 5  ;;  %v1216_v10 = vsel %vm11524_vm4, %v1211_v22, %v1215_v5  ;;  %v1225_v34 = vrot.slane %v1224_v23, 4  ;;  %v1243_v37 = vrot.slane %v1241_v26, 4  ;;  %v261_v15 = vld [vmem:[%s11488_s23 + $0x1bc] sm:$0xf] }
  0xb7   : > { %v1234_v35 = vor.u32 %v1233_v24, %v1229_v18  ;;  %v8977_v38 = vcombine.low %v1206_v28, %v1216_v10  ;;  %v1249_v39 = vrot.slane %v1247_v30, 5  ;;  %v1253_v40 = vrot.slane %v1251_v31, 4  ;;  %v262_v28 = vld [vmem:[%s11488_s23 + $0x1c0] sm:$0xf]  ;;  %v263_v30 = vld [vmem:[%s11488_s23 + $0x1c4] sm:$0xf] }
  0xb8   : > { %v1257_v41 = vshll.u32 %v322_v20, 16  ;;  %v1230_v42 = vsel %vm11524_vm4, %v1225_v34, %v1229_v18  ;;  %v1244_v44 = vor.u32 %v1243_v37, %v1239_v29  ;;  %v1262_v46 = vshrl.u32 %v256_v27, 16  ;;  %v324_v34 = vld [vmem:[%s11488_s23 + $0x1c8] sm:$0x1] }
  0xb9   : > { %v1235_v43 = vrot.slane %v1234_v35, 4  ;;  %10345 = vmatmul.mubr.msk.bf16.gmra.mrb[76].mxu1 %vm1945_vm1, %v8977_v38  ;;  %v1254_v47 = vor.u32 %v1253_v40, %v1249_v39  ;;  %v1265_v49 = vshll.u32 %v256_v27, 16  ;;  %v1271_v50 = vshll.u32 %v257_v33, 16 }
  0xba   : > { %v1259_v48 = vrot.slane %v1257_v41, 5  ;;  %v1245_v52 = vrot.slane %v1244_v44, 4  ;;  %v1264_v53 = vrot.slane %v1262_v46, 4  ;;  %v1275_v54 = vshrl.u32 %v257_v33, 16  ;;  %v264_v44 = vld [vmem:[%s11488_s23 + $0x1cc] sm:$0xf] }
  0xbb   : > { %10613 = vmatmul.mubr.msk.bf16.gmra.mrb[84].mxu0 %vm1945_vm1, %v11231_v25  ;;  %v1240_v51 = vsel %vm11524_vm4, %v1235_v43, %v1239_v29  ;;  %v1255_v57 = vrot.slane %v1254_v47, 4  ;;  %v1267_v58 = vrot.slane %v1265_v49, 5  ;;  %v1273_v59 = vrot.slane %v1271_v50, 5  ;;  %v11235_v47 = vld [vmem:[%s11488_s23 + $0x1e8] sm:$0xff]   ;;  %v265_v50 = vld [vmem:[%s11488_s23 + $0x1d0] sm:$0xf] }
  0xbc   : > { %10616 = vmatprep.mubr.msk.bf16.mxu0 %vm1945_vm1, %v11232_v32  ;;  %v8978_v56 = vcombine.low %v1230_v42, %v1240_v51  ;;  %v1250_v61 = vsel %vm11524_vm4, %v1245_v52, %v1249_v39  ;;  %v1277_v62 = vrot.slane %v1275_v54, 4  ;;  %v1281_v63 = vshll.u32 %v258_v45, 16 }
  0xbd   : > { %v1285_v1 = vshrl.u32 %v258_v45, 16  ;;  %v1260_v3 = vsel %vm11524_vm4, %v1255_v57, %v1259_v48  ;;  %v1268_v4 = vor.u32 %v1267_v58, %v1264_v53  ;;  %v1291_v5 = vshll.u32 %v259_v55, 16 }
  0xbe   : > { %10348 = vmatprep.mubr.msk.bf16.mxu1 %vm1945_vm1, %v8978_v56  ;;  %v1295_v6 = vshrl.u32 %v259_v55, 16  ;;  %v8979_v7 = vcombine.low %v1250_v61, %v1260_v3  ;;  %v1278_v8 = vor.u32 %v1277_v62, %v1273_v59  ;;  %v1283_v9 = vrot.slane %v1281_v63, 5  ;;  %v11236_v55 = vld [vmem:[%s11488_s23 + $0x1f4] sm:$0xff]  }
  0xbf   : > { %v1287_v11 = vrot.slane %v1285_v1, 4  ;;  %v1269_v16 = vrot.slane %v1268_v4, 4  ;;  %v1293_v17 = vrot.slane %v1291_v5, 5  ;;  %v1301_v19 = vshll.u32 %v323_v60, 16  ;;  %v266_v62 = vld [vmem:[%s11488_s23 + $0x1d4] sm:$0xf] }
  0xc0   : > { %v1297_v18 = vrot.slane %v1295_v6, 4  ;;  %v1279_v20 = vrot.slane %v1278_v8, 4  ;;  %v1306_v23 = vshrl.u32 %v260_v2, 16  ;;  %v1309_v24 = vshll.u32 %v260_v2, 16  ;;  %v267_v5 = vld [vmem:[%s11488_s23 + $0x1d8] sm:$0xf] }
  0xc1   : > { %v1288_v22 = vor.u32 %v1287_v11, %v1283_v9  ;;  %10349 = vmatmul.mubr.msk.bf16.gmra.mrb[80].mxu1 %vm1945_vm1, %v8979_v7  ;;  %v1274_v25 = vsel %vm11524_vm4, %v1269_v16, %v1273_v59  ;;  %v1303_v27 = vrot.slane %v1301_v19, 5  ;;  %v1315_v29 = vshll.u32 %v261_v15, 16 }
  0xc2   : > { %v1298_v26 = vor.u32 %v1297_v18, %v1293_v17  ;;  %v1284_v31 = vsel %vm11524_vm4, %v1279_v20, %v1283_v9  ;;  %v1308_v33 = vrot.slane %v1306_v23, 4  ;;  %v1311_v10 = vrot.slane %v1309_v24, 5  ;;  %v325_v23 = vld [vmem:[%s11488_s23 + $0x1dc] sm:$0x1]  ;;  %v268_v24 = vld [vmem:[%s11488_s23 + $0x1e0] sm:$0xf] }
  0xc3   : > { %10617 = vmatmul.mubr.msk.bf16.gmra.mrb[88].mxu0 %vm1945_vm1, %v11233_v0  ;;  %v1289_v32 = vrot.slane %v1288_v22, 4  ;;  %v8980_v35 = vcombine.low %v1274_v25, %v1284_v31  ;;  %v1317_v38 = vrot.slane %v1315_v29, 5  ;;  %v1319_v39 = vshrl.u32 %v261_v15, 16  ;;  %v11237_v22 = vld [vmem:[%s11488_s23 + $0x1fc] sm:$0xff]   ;;  %v11238_v29 = vld [vmem:[%s11488_s23 + $0x208] sm:$0xff]  }
  0xc4   : > { %10620 = vmatprep.mubr.msk.bf16.mxu0 %vm1945_vm1, %v11234_v12  ;;  %v1299_v37 = vrot.slane %v1298_v26, 4  ;;  %v1312_v41 = vor.u32 %v1311_v10, %v1308_v33  ;;  %v1325_v42 = vshll.u32 %v262_v28, 16  ;;  %v1329_v43 = vshrl.u32 %v262_v28, 16  ;;  %v269_v10 = vld [vmem:[%s11488_s23 + $0x1e4] sm:$0xf] }
  0xc5   : > { %v1294_v40 = vsel %vm11524_vm4, %v1289_v32, %v1293_v17  ;;  %10352 = vmatprep.mubr.msk.bf16.mxu1 %vm1945_vm1, %v8980_v35  ;;  %v1321_v46 = vrot.slane %v1319_v39, 4  ;;  %v1335_v48 = vshll.u32 %v263_v30, 16  ;;  %v1339_v49 = vshrl.u32 %v263_v30, 16 }
  0xc6   : > { %v1304_v45 = vsel %vm11524_vm4, %v1299_v37, %v1303_v27  ;;  %v1313_v52 = vrot.slane %v1312_v41, 4  ;;  %v1327_v53 = vrot.slane %v1325_v42, 5  ;;  %v1331_v54 = vrot.slane %v1329_v43, 4 }
  0xc7   : > { %v8981_v51 = vcombine.low %v1294_v40, %v1304_v45  ;;  %v1322_v56 = vor.u32 %v1321_v46, %v1317_v38  ;;  %v1337_v57 = vrot.slane %v1335_v48, 5  ;;  %v1341_v58 = vrot.slane %v1339_v49, 4 }
  0xc8   : > { %v1345_v59 = vshll.u32 %v324_v34, 16  ;;  %v1318_v60 = vsel %vm11524_vm4, %v1313_v52, %v1317_v38  ;;  %v1332_v61 = vor.u32 %v1331_v54, %v1327_v53  ;;  %v1350_v63 = vshrl.u32 %v264_v44, 16  ;;  %v270_v38 = vld [vmem:[%s11488_s23 + $0x1e8] sm:$0xf] }
  0xc9   : > { %v1353_v0 = vshll.u32 %v264_v44, 16  ;;  %10353 = vmatmul.mubr.msk.bf16.gmra.mrb[84].mxu1 %vm1945_vm1, %v8981_v51  ;;  %v1323_v1 = vrot.slane %v1322_v56, 4  ;;  %v1342_v2 = vor.u32 %v1341_v58, %v1337_v57  ;;  %v1359_v4 = vshll.u32 %v265_v50, 16  ;;  %v271_v44 = vld [vmem:[%s11488_s23 + $0x1ec] sm:$0xf] }
  0xca   : > { %v1347_v3 = vrot.slane %v1345_v59, 5  ;;  %v1333_v6 = vrot.slane %v1332_v61, 4  ;;  %v1352_v7 = vrot.slane %v1350_v63, 4  ;;  %v1363_v9 = vshrl.u32 %v265_v50, 16  ;;  %v272_v58 = vld [vmem:[%s11488_s23 + $0x1f4] sm:$0xf] }
  0xcb   : > { %10621 = vmatmul.mubr.msk.bf16.gmra.mrb[92].mxu0 %vm1945_vm1, %v11235_v47  ;;  %v1355_v8 = vrot.slane %v1353_v0, 5  ;;  %v1328_v11 = vsel %vm11524_vm4, %v1323_v1, %v1327_v53  ;;  %v1343_v12 = vrot.slane %v1342_v2, 4  ;;  %v1361_v15 = vrot.slane %v1359_v4, 5  ;;  %v326_v53 = vld [vmem:[%s11488_s23 + $0x1f0] sm:$0x1] }
  0xcc   : > { %10624 = vmatprep.mubr.msk.bf16.mxu0 %vm1945_vm1, %v11236_v55  ;;  %v1369_v16 = vshll.u32 %v266_v62, 16  ;;  %v8982_v17 = vcombine.low %v1318_v60, %v1328_v11  ;;  %v1338_v18 = vsel %vm11524_vm4, %v1333_v6, %v1337_v57  ;;  %v1365_v20 = vrot.slane %v1363_v9, 4  ;;  %v11239_v1 = vld [vmem:[%s11488_s23 + $0x210] sm:$0xff]   ;;  %v273_v9 = vld [vmem:[%s11488_s23 + $0x1f8] sm:$0xf] }
  0xcd   : > { %v1356_v19 = vor.u32 %v1355_v8, %v1352_v7  ;;  %v1348_v25 = vsel %vm11524_vm4, %v1343_v12, %v1347_v3  ;;  %v1373_v27 = vshrl.u32 %v266_v62, 16  ;;  %v1379_v28 = vshll.u32 %v267_v5, 16  ;;  %v11240_v8 = vld [vmem:[%s11488_s23 + $0x21c] sm:$0xff]  }
  0xce   : > { %v1371_v26 = vrot.slane %v1369_v16, 5  ;;  %10356 = vmatprep.mubr.msk.bf16.mxu1 %vm1945_vm1, %v8982_v17  ;;  %v8983_v30 = vcombine.low %v1338_v18, %v1348_v25  ;;  %v1366_v32 = vor.u32 %v1365_v20, %v1361_v15  ;;  %v1383_v33 = vshrl.u32 %v267_v5, 16  ;;  %v274_v17 = vld [vmem:[%s11488_s23 + $0x1fc] sm:$0xf] }
  0xcf   : > { %v1357_v31 = vrot.slane %v1356_v19, 4  ;;  %v1375_v34 = vrot.slane %v1373_v27, 4  ;;  %v1381_v35 = vrot.slane %v1379_v28, 5  ;;  %v1389_v37 = vshll.u32 %v325_v23, 16  ;;  %v275_v27 = vld [vmem:[%s11488_s23 + $0x200] sm:$0xf] }
  0xd0   : > { %v1394_v39 = vshrl.u32 %v268_v24, 16  ;;  %v1367_v41 = vrot.slane %v1366_v32, 4  ;;  %v1385_v42 = vrot.slane %v1383_v33, 4  ;;  %v1397_v43 = vshll.u32 %v268_v24, 16  ;;  %v327_v32 = vld [vmem:[%s11488_s23 + $0x204] sm:$0x1] }
  0xd1   : > { %v1362_v40 = vsel %vm11524_vm4, %v1357_v31, %v1361_v15  ;;  %10357 = vmatmul.mubr.msk.bf16.gmra.mrb[88].mxu1 %vm1945_vm1, %v8983_v30  ;;  %v1376_v45 = vor.u32 %v1375_v34, %v1371_v26  ;;  %v1391_v46 = vrot.slane %v1389_v37, 5  ;;  %v1403_v48 = vshll.u32 %v269_v10, 16 }
  0xd2   : > { %v1396_v47 = vrot.slane %v1394_v39, 4  ;;  %v1372_v49 = vsel %vm11524_vm4, %v1367_v41, %v1371_v26  ;;  %v1386_v50 = vor.u32 %v1385_v42, %v1381_v35  ;;  %v1399_v51 = vrot.slane %v1397_v43, 5  ;;  %v11241_v43 = vld [vmem:[%s11488_s23 + $0x224] sm:$0xff]  }
  0xd3   : > { %10625 = vmatmul.mubr.msk.bf16.gmra.mrb[96].mxu0 %vm1945_vm1, %v11237_v22  ;;  %v1407_v52 = vshrl.u32 %v269_v10, 16  ;;  %v8984_v54 = vcombine.low %v1362_v40, %v1372_v49  ;;  %v1377_v55 = vrot.slane %v1376_v45, 4  ;;  %v1405_v56 = vrot.slane %v1403_v48, 5 }
  0xd4   : > { %10628 = vmatprep.mubr.msk.bf16.mxu0 %vm1945_vm1, %v11238_v29  ;;  %v1413_v57 = vshll.u32 %v270_v38, 16  ;;  %v1387_v59 = vrot.slane %v1386_v50, 4  ;;  %v1400_v60 = vor.u32 %v1399_v51, %v1396_v47  ;;  %v1417_v62 = vshrl.u32 %v270_v38, 16  ;;  %v276_v47 = vld [vmem:[%s11488_s23 + $0x208] sm:$0xf] }
  0xd5   : > { %v1409_v61 = vrot.slane %v1407_v52, 4  ;;  %10360 = vmatprep.mubr.msk.bf16.mxu1 %vm1945_vm1, %v8984_v54  ;;  %v1382_v63 = vsel %vm11524_vm4, %v1377_v55, %v1381_v35  ;;  %v1423_v2 = vshll.u32 %v271_v44, 16  ;;  %v1427_v3 = vshrl.u32 %v271_v44, 16  ;;  %v277_v52 = vld [vmem:[%s11488_s23 + $0x20c] sm:$0xf] }
  0xd6   : > { %v1415_v0 = vrot.slane %v1413_v57, 5  ;;  %v1392_v4 = vsel %vm11524_vm4, %v1387_v59, %v1391_v46  ;;  %v1401_v5 = vrot.slane %v1400_v60, 4  ;;  %v1419_v7 = vrot.slane %v1417_v62, 4  ;;  %v11242_v46 = vld [vmem:[%s11488_s23 + $0x230] sm:$0xff]  }
  0xd7   : > { %v1410_v6 = vor.u32 %v1409_v61, %v1405_v56  ;;  %v8985_v11 = vcombine.low %v1382_v63, %v1392_v4  ;;  %v1425_v12 = vrot.slane %v1423_v2, 5  ;;  %v1429_v15 = vrot.slane %v1427_v3, 4 }
  0xd8   : > { %v1433_v16 = vshll.u32 %v326_v53, 16  ;;  %v1406_v18 = vsel %vm11524_vm4, %v1401_v5, %v1405_v56  ;;  %v1420_v20 = vor.u32 %v1419_v7, %v1415_v0  ;;  %v1438_v22 = vshrl.u32 %v272_v58, 16 }
  0xd9   : > { %v1411_v19 = vrot.slane %v1410_v6, 4  ;;  %10361 = vmatmul.mubr.msk.bf16.gmra.mrb[92].mxu1 %vm1945_vm1, %v8985_v11  ;;  %v1430_v23 = vor.u32 %v1429_v15, %v1425_v12  ;;  %v1441_v25 = vshll.u32 %v272_v58, 16  ;;  %v1447_v26 = vshll.u32 %v273_v9, 16  ;;  %v279_v6 = vld [vmem:[%s11488_s23 + $0x214] sm:$0xf] }
  0xda   : > { %v1435_v24 = vrot.slane %v1433_v16, 5  ;;  %v1421_v29 = vrot.slane %v1420_v20, 4  ;;  %v1440_v30 = vrot.slane %v1438_v22, 4  ;;  %v1451_v31 = vshrl.u32 %v273_v9, 16  ;;  %v11243_v22 = vld [vmem:[%s11488_s23 + $0x238] sm:$0xff]  }
  0xdb   : > { %10629 = vmatmul.mubr.msk.bf16.gmra.mrb[100].mxu0 %vm1945_vm1, %v11239_v1  ;;  %v1416_v28 = vsel %vm11524_vm4, %v1411_v19, %v1415_v0  ;;  %v1431_v10 = vrot.slane %v1430_v23, 4  ;;  %v1443_v34 = vrot.slane %v1441_v25, 5  ;;  %v1449_v35 = vrot.slane %v1447_v26, 5  ;;  %v278_v0 = vld [vmem:[%s11488_s23 + $0x210] sm:$0xf] }
  0xdc   : > { %10632 = vmatprep.mubr.msk.bf16.mxu0 %vm1945_vm1, %v11240_v8  ;;  %v8986_v33 = vcombine.low %v1406_v18, %v1416_v28  ;;  %v1426_v37 = vsel %vm11524_vm4, %v1421_v29, %v1425_v12  ;;  %v1453_v38 = vrot.slane %v1451_v31, 4  ;;  %v1457_v39 = vshll.u32 %v274_v17, 16  ;;  %v280_v25 = vld [vmem:[%s11488_s23 + $0x21c] sm:$0xf]  ;;  %v281_v31 = vld [vmem:[%s11488_s23 + $0x220] sm:$0xf] }
  0xdd   : > { %v1461_v40 = vshrl.u32 %v274_v17, 16  ;;  %v1436_v41 = vsel %vm11524_vm4, %v1431_v10, %v1435_v24  ;;  %v1444_v42 = vor.u32 %v1443_v34, %v1440_v30  ;;  %v1467_v44 = vshll.u32 %v275_v27, 16  ;;  %v328_v17 = vld [vmem:[%s11488_s23 + $0x218] sm:$0x1]  ;;  %v11244_v30 = vld [vmem:[%s11488_s23 + $0x244] sm:$0xff]  }
  0xde   : > { %10364 = vmatprep.mubr.msk.bf16.mxu1 %vm1945_vm1, %v8986_v33  ;;  %v1471_v45 = vshrl.u32 %v275_v27, 16  ;;  %v8987_v48 = vcombine.low %v1426_v37, %v1436_v41  ;;  %v1454_v49 = vor.u32 %v1453_v38, %v1449_v35  ;;  %v1459_v50 = vrot.slane %v1457_v39, 5  ;;  %v282_v38 = vld [vmem:[%s11488_s23 + $0x224] sm:$0xf] }
  0xdf   : > { %v1463_v51 = vrot.slane %v1461_v40, 4  ;;  %v1445_v53 = vrot.slane %v1444_v42, 4  ;;  %v1469_v54 = vrot.slane %v1467_v44, 5  ;;  %v1477_v56 = vshll.u32 %v327_v32, 16 }
  0xe0   : > { %v1473_v55 = vrot.slane %v1471_v45, 4  ;;  %v1455_v57 = vrot.slane %v1454_v49, 4  ;;  %v1482_v59 = vshrl.u32 %v276_v47, 16  ;;  %v1485_v60 = vshll.u32 %v276_v47, 16  ;;  %v283_v49 = vld [vmem:[%s11488_s23 + $0x228] sm:$0xf] }
  0xe1   : > { %v1464_v58 = vor.u32 %v1463_v51, %v1459_v50  ;;  %10365 = vmatmul.mubr.msk.bf16.gmra.mrb[96].mxu1 %vm1945_vm1, %v8987_v48  ;;  %v1450_v61 = vsel %vm11524_vm4, %v1445_v53, %v1449_v35  ;;  %v1479_v63 = vrot.slane %v1477_v56, 5  ;;  %v1491_v1 = vshll.u32 %v277_v52, 16 }
  0xe2   : > { %v1474_v62 = vor.u32 %v1473_v55, %v1469_v54  ;;  %v1460_v2 = vsel %vm11524_vm4, %v1455_v57, %v1459_v50  ;;  %v1484_v4 = vrot.slane %v1482_v59, 4  ;;  %v1487_v5 = vrot.slane %v1485_v60, 5  ;;  %v284_v59 = vld [vmem:[%s11488_s23 + $0x230] sm:$0xf] }
  0xe3   : > { %10633 = vmatmul.mubr.msk.bf16.gmra.mrb[104].mxu0 %vm1945_vm1, %v11241_v43  ;;  %v1465_v3 = vrot.slane %v1464_v58, 4  ;;  %v8988_v7 = vcombine.low %v1450_v61, %v1460_v2  ;;  %v1493_v9 = vrot.slane %v1491_v1, 5  ;;  %v1495_v11 = vshrl.u32 %v277_v52, 16  ;;  %v329_v58 = vld [vmem:[%s11488_s23 + $0x22c] sm:$0x1] }
  0xe4   : > { %10636 = vmatprep.mubr.msk.bf16.mxu0 %vm1945_vm1, %v11242_v46  ;;  %v1475_v8 = vrot.slane %v1474_v62, 4  ;;  %v1488_v15 = vor.u32 %v1487_v5, %v1484_v4  ;;  %v1501_v16 = vshll.u32 %v278_v0, 16  ;;  %v1505_v18 = vshrl.u32 %v278_v0, 16  ;;  %v11245_v62 = vld [vmem:[%s11488_s23 + $0x24c] sm:$0xff]   ;;  %v11246_v5 = vld [vmem:[%s11488_s23 + $0x258] sm:$0xff]  }
  0xe5   : > { %v1470_v12 = vsel %vm11524_vm4, %v1465_v3, %v1469_v54  ;;  %10368 = vmatprep.mubr.msk.bf16.mxu1 %vm1945_vm1, %v8988_v7  ;;  %v1497_v20 = vrot.slane %v1495_v11, 4  ;;  %v1511_v23 = vshll.u32 %v279_v6, 16  ;;  %v1515_v24 = vshrl.u32 %v279_v6, 16  ;;  %v285_v6 = vld [vmem:[%s11488_s23 + $0x234] sm:$0xf] }
  0xe6   : > { %v1480_v19 = vsel %vm11524_vm4, %v1475_v8, %v1479_v63  ;;  %v1489_v27 = vrot.slane %v1488_v15, 4  ;;  %v1503_v28 = vrot.slane %v1501_v16, 5  ;;  %v1507_v29 = vrot.slane %v1505_v18, 4 }
  0xe7   : > { %v8989_v26 = vcombine.low %v1470_v12, %v1480_v19  ;;  %v1498_v32 = vor.u32 %v1497_v20, %v1493_v9  ;;  %v1513_v33 = vrot.slane %v1511_v23, 5  ;;  %v1517_v10 = vrot.slane %v1515_v24, 4 }
  0xe8   : > { %v1521_v34 = vshll.u32 %v328_v17, 16  ;;  %v1494_v35 = vsel %vm11524_vm4, %v1489_v27, %v1493_v9  ;;  %v1508_v37 = vor.u32 %v1507_v29, %v1503_v28  ;;  %v1526_v39 = vshrl.u32 %v280_v25, 16  ;;  %v286_v17 = vld [vmem:[%s11488_s23 + $0x238] sm:$0xf] }
  0xe9   : > { %v1529_v40 = vshll.u32 %v280_v25, 16  ;;  %10369 = vmatmul.mubr.msk.bf16.gmra.mrb[100].mxu1 %vm1945_vm1, %v8989_v26  ;;  %v1499_v41 = vrot.slane %v1498_v32, 4  ;;  %v1518_v42 = vor.u32 %v1517_v10, %v1513_v33  ;;  %v1535_v44 = vshll.u32 %v281_v31, 16 }
  0xea   : > { %v1523_v43 = vrot.slane %v1521_v34, 5  ;;  %v1509_v45 = vrot.slane %v1508_v37, 4  ;;  %v1528_v46 = vrot.slane %v1526_v39, 4  ;;  %v1539_v48 = vshrl.u32 %v281_v31, 16 }
  0xeb   : > { %10637 = vmatmul.mubr.msk.bf16.gmra.mrb[108].mxu0 %vm1945_vm1, %v11243_v22  ;;  %v1531_v47 = vrot.slane %v1529_v40, 5  ;;  %v1504_v50 = vsel %vm11524_vm4, %v1499_v41, %v1503_v28  ;;  %v1519_v51 = vrot.slane %v1518_v42, 4  ;;  %v1537_v52 = vrot.slane %v1535_v44, 5  ;;  %v287_v28 = vld [vmem:[%s11488_s23 + $0x23c] sm:$0xf]  ;;  %v11247_v40 = vld [vmem:[%s11488_s23 + $0x260] sm:$0xff]  }
  0xec   : > { %10640 = vmatprep.mubr.msk.bf16.mxu0 %vm1945_vm1, %v11244_v30  ;;  %v1545_v53 = vshll.u32 %v282_v38, 16  ;;  %v8990_v54 = vcombine.low %v1494_v35, %v1504_v50  ;;  %v1514_v55 = vsel %vm11524_vm4, %v1509_v45, %v1513_v33  ;;  %v1541_v57 = vrot.slane %v1539_v48, 4  ;;  %v330_v35 = vld [vmem:[%s11488_s23 + $0x240] sm:$0x1]  ;;  %v11248_v48 = vld [vmem:[%s11488_s23 + $0x26c] sm:$0xff]  }
  0xed   : > { %v1532_v56 = vor.u32 %v1531_v47, %v1528_v46  ;;  %v1524_v60 = vsel %vm11524_vm4, %v1519_v51, %v1523_v43  ;;  %v1549_v63 = vshrl.u32 %v282_v38, 16  ;;  %v1555_v0 = vshll.u32 %v283_v49, 16  ;;  %v288_v43 = vld [vmem:[%s11488_s23 + $0x244] sm:$0xf] }
  0xee   : > { %v1547_v61 = vrot.slane %v1545_v53, 5  ;;  %10372 = vmatprep.mubr.msk.bf16.mxu1 %vm1945_vm1, %v8990_v54  ;;  %v8991_v1 = vcombine.low %v1514_v55, %v1524_v60  ;;  %v1542_v3 = vor.u32 %v1541_v57, %v1537_v52  ;;  %v1559_v4 = vshrl.u32 %v283_v49, 16  ;;  %v289_v49 = vld [vmem:[%s11488_s23 + $0x248] sm:$0xf]  ;;  %v290_v60 = vld [vmem:[%s11488_s23 + $0x24c] sm:$0xf] }
  0xef   : > { %v1533_v2 = vrot.slane %v1532_v56, 4  ;;  %v1551_v7 = vrot.slane %v1549_v63, 4  ;;  %v1557_v8 = vrot.slane %v1555_v0, 5  ;;  %v1565_v9 = vshll.u32 %v329_v58, 16 }
  0xf0   : > { %v1570_v11 = vshrl.u32 %v284_v59, 16  ;;  %v1543_v15 = vrot.slane %v1542_v3, 4  ;;  %v1561_v16 = vrot.slane %v1559_v4, 4  ;;  %v1573_v18 = vshll.u32 %v284_v59, 16  ;;  %v291_v3 = vld [vmem:[%s11488_s23 + $0x250] sm:$0xf] }
  0xf1   : > { %v1538_v12 = vsel %vm11524_vm4, %v1533_v2, %v1537_v52  ;;  %10373 = vmatmul.mubr.msk.bf16.gmra.mrb[104].mxu1 %vm1945_vm1, %v8991_v1  ;;  %v1552_v19 = vor.u32 %v1551_v7, %v1547_v61  ;;  %v1567_v20 = vrot.slane %v1565_v9, 5  ;;  %v1579_v23 = vshll.u32 %v285_v6, 16 }
  0xf2   : > { %v1572_v22 = vrot.slane %v1570_v11, 4  ;;  %v1548_v24 = vsel %vm11524_vm4, %v1543_v15, %v1547_v61  ;;  %v1562_v25 = vor.u32 %v1561_v16, %v1557_v8  ;;  %v1575_v26 = vrot.slane %v1573_v18, 5  ;;  %v11249_v18 = vld [vmem:[%s11488_s23 + $0x274] sm:$0xff]  }
  0xf3   : > { %10641 = vmatmul.mubr.msk.bf16.gmra.mrb[112].mxu0 %vm1945_vm1, %v11245_v62  ;;  %v1583_v27 = vshrl.u32 %v285_v6, 16  ;;  %v8992_v29 = vcombine.low %v1538_v12, %v1548_v24  ;;  %v1553_v30 = vrot.slane %v1552_v19, 4  ;;  %v1581_v31 = vrot.slane %v1579_v23, 5  ;;  %v331_v12 = vld [vmem:[%s11488_s23 + $0x254] sm:$0x1] }
  0xf4   : > { %10644 = vmatprep.mubr.msk.bf16.mxu0 %vm1945_vm1, %v11246_v5  ;;  %v1589_v32 = vshll.u32 %v286_v17, 16  ;;  %v1563_v33 = vrot.slane %v1562_v25, 4  ;;  %v1576_v10 = vor.u32 %v1575_v26, %v1572_v22  ;;  %v1593_v37 = vshrl.u32 %v286_v17, 16  ;;  %v292_v22 = vld [vmem:[%s11488_s23 + $0x258] sm:$0xf] }
  0xf5   : > { %v1585_v34 = vrot.slane %v1583_v27, 4  ;;  %10376 = vmatprep.mubr.msk.bf16.mxu1 %vm1945_vm1, %v8992_v29  ;;  %v1558_v38 = vsel %vm11524_vm4, %v1553_v30, %v1557_v8  ;;  %v1599_v41 = vshll.u32 %v287_v28, 16  ;;  %v1603_v42 = vshrl.u32 %v287_v28, 16  ;;  %v11250_v27 = vld [vmem:[%s11488_s23 + $0x280] sm:$0xff]   ;;  %v293_v28 = vld [vmem:[%s11488_s23 + $0x25c] sm:$0xf] }
  0xf6   : > { %v1591_v39 = vrot.slane %v1589_v32, 5  ;;  %v1568_v44 = vsel %vm11524_vm4, %v1563_v33, %v1567_v20  ;;  %v1577_v45 = vrot.slane %v1576_v10, 4  ;;  %v1595_v47 = vrot.slane %v1593_v37, 4 }
  0xf7   : > { %v1586_v46 = vor.u32 %v1585_v34, %v1581_v31  ;;  %v8993_v50 = vcombine.low %v1558_v38, %v1568_v44  ;;  %v1601_v51 = vrot.slane %v1599_v41, 5  ;;  %v1605_v52 = vrot.slane %v1603_v42, 4 }
  0xf8   : > { %v1609_v53 = vshll.u32 %v330_v35, 16  ;;  %v1582_v54 = vsel %vm11524_vm4, %v1577_v45, %v1581_v31  ;;  %v1596_v56 = vor.u32 %v1595_v47, %v1591_v39  ;;  %v1614_v57 = vshrl.u32 %v288_v43, 16 }
  0xf9   : > { %v1587_v55 = vrot.slane %v1586_v46, 4  ;;  %10377 = vmatmul.mubr.msk.bf16.gmra.mrb[108].mxu1 %vm1945_vm1, %v8993_v50  ;;  %v1606_v58 = vor.u32 %v1605_v52, %v1601_v51  ;;  %v1617_v61 = vshll.u32 %v288_v43, 16  ;;  %v1623_v62 = vshll.u32 %v289_v49, 16  ;;  %v295_v46 = vld [vmem:[%s11488_s23 + $0x264] sm:$0xf] }
  0xfa   : > { %v1611_v59 = vrot.slane %v1609_v53, 5  ;;  %v1597_v0 = vrot.slane %v1596_v56, 4  ;;  %v1616_v1 = vrot.slane %v1614_v57, 4  ;;  %v1627_v2 = vshrl.u32 %v289_v49, 16 }
  0xfb   : > { %10645 = vmatmul.mubr.msk.bf16.gmra.mrb[116].mxu0 %vm1945_vm1, %v11247_v40  ;;  %v1592_v63 = vsel %vm11524_vm4, %v1587_v55, %v1591_v39  ;;  %v1607_v5 = vrot.slane %v1606_v58, 4  ;;  %v1619_v6 = vrot.slane %v1617_v61, 5  ;;  %v1625_v7 = vrot.slane %v1623_v62, 5  ;;  %v294_v40 = vld [vmem:[%s11488_s23 + $0x260] sm:$0xf]  ;;  %v11251_v58 = vld [vmem:[%s11488_s23 + $0x288] sm:$0xff]  }
  0xfc   : > { %10648 = vmatprep.mubr.msk.bf16.mxu0 %vm1945_vm1, %v11248_v48  ;;  %v8994_v4 = vcombine.low %v1582_v54, %v1592_v63  ;;  %v1602_v8 = vsel %vm11524_vm4, %v1597_v0, %v1601_v51  ;;  %v1629_v9 = vrot.slane %v1627_v2, 4  ;;  %v1633_v11 = vshll.u32 %v290_v60, 16  ;;  %v332_v54 = vld [vmem:[%s11488_s23 + $0x268] sm:$0x1]  ;;  %v9455_v61 = vld [vmem:[%s11488_s23 + $0x14] sm:$0xf] }
  0xfd   : > { %v1637_v15 = vshrl.u32 %v290_v60, 16  ;;  %v1612_v16 = vsel %vm11524_vm4, %v1607_v5, %v1611_v59  ;;  %v1620_v17 = vor.u32 %v1619_v6, %v1616_v1  ;;  %v1643_v19 = vshll.u32 %v291_v3, 16  ;;  %v9456_v2 = vld [vmem:[%s11488_s23 + $0x18] sm:$0xf] }
  0xfe   : > { %10380 = vmatprep.mubr.msk.bf16.mxu1 %vm1945_vm1, %v8994_v4  ;;  %v1647_v20 = vshrl.u32 %v291_v3, 16  ;;  %v8995_v23 = vcombine.low %v1602_v8, %v1612_v16  ;;  %v1630_v24 = vor.u32 %v1629_v9, %v1625_v7  ;;  %v1635_v25 = vrot.slane %v1633_v11, 5  ;;  %v9457_v9 = vld [vmem:[%s11488_s23 + $0x1c] sm:$0xf] }
  0xff   : > { %v1639_v26 = vrot.slane %v1637_v15, 4  ;;  %v1621_v29 = vrot.slane %v1620_v17, 4  ;;  %v1645_v30 = vrot.slane %v1643_v19, 5  ;;  %v1653_v32 = vshll.u32 %v331_v12, 16 }
 0x100   : > { %v1649_v31 = vrot.slane %v1647_v20, 4  ;;  %v1631_v33 = vrot.slane %v1630_v24, 4  ;;  %v1658_v34 = vshrl.u32 %v292_v22, 16  ;;  %v1661_v35 = vshll.u32 %v292_v22, 16  ;;  %v296_v24 = vld [vmem:[%s11488_s23 + $0x26c] sm:$0xf] }
 0x101   : > { %v1640_v10 = vor.u32 %v1639_v26, %v1635_v25  ;;  %10381 = vmatmul.mubr.msk.bf16.gmra.mrb[112].mxu1 %vm1945_vm1, %v8995_v23  ;;  %v1626_v37 = vsel %vm11524_vm4, %v1621_v29, %v1625_v7  ;;  %v1655_v39 = vrot.slane %v1653_v32, 5  ;;  %v1667_v41 = vshll.u32 %v293_v28, 16 }
 0x102   : > { %v1650_v38 = vor.u32 %v1649_v31, %v1645_v30  ;;  %v1636_v42 = vsel %vm11524_vm4, %v1631_v33, %v1635_v25  ;;  %v1660_v44 = vrot.slane %v1658_v34, 4  ;;  %v1663_v45 = vrot.slane %v1661_v35, 5  ;;  %v297_v33 = vld [vmem:[%s11488_s23 + $0x270] sm:$0xf] }
 0x103   : > { %10649 = vmatmul.mubr.msk.bf16.gmra.mrb[120].mxu0 %vm1945_vm1, %v11249_v18  ;;  %v1641_v43 = vrot.slane %v1640_v10, 4  ;;  %v8996_v47 = vcombine.low %v1626_v37, %v1636_v42  ;;  %v1669_v49 = vrot.slane %v1667_v41, 5  ;;  %v1671_v50 = vshrl.u32 %v293_v28, 16  ;;  %v298_v37 = vld [vmem:[%s11488_s23 + $0x274] sm:$0xf] }
 0x104   : > { %10652 = vmatprep.mubr.msk.bf16.mxu0 %vm1945_vm1, %v11250_v27  ;;  %v1651_v48 = vrot.slane %v1650_v38, 4  ;;  %v1664_v52 = vor.u32 %v1663_v45, %v1660_v44  ;;  %v1677_v53 = vshll.u32 %v294_v40, 16  ;;  %v1681_v55 = vshrl.u32 %v294_v40, 16 }
 0x105   : > { %v1646_v51 = vsel %vm11524_vm4, %v1641_v43, %v1645_v30  ;;  %10384 = vmatprep.mubr.msk.bf16.mxu1 %vm1945_vm1, %v8996_v47  ;;  %v1673_v57 = vrot.slane %v1671_v50, 4  ;;  %v1687_v59 = vshll.u32 %v295_v46, 16  ;;  %v1691_v60 = vshrl.u32 %v295_v46, 16  ;;  %v9458_v43 = vld [vmem:[%s11488_s23 + $0x20] sm:$0xf] }
 0x106   : > { %v1656_v56 = vsel %vm11524_vm4, %v1651_v48, %v1655_v39  ;;  %v1665_v63 = vrot.slane %v1664_v52, 4  ;;  %v1679_v0 = vrot.slane %v1677_v53, 5  ;;  %v1683_v1 = vrot.slane %v1681_v55, 4  ;;  %v9459_v55 = vld [vmem:[%s11488_s23 + $0x24] sm:$0x1] }
 0x107   : > { %v8997_v62 = vcombine.low %v1646_v51, %v1656_v56  ;;  %v1674_v3 = vor.u32 %v1673_v57, %v1669_v49  ;;  %v1689_v4 = vrot.slane %v1687_v59, 5  ;;  %v1693_v5 = vrot.slane %v1691_v60, 4 }
 0x108   : > { %v1697_v6 = vshll.u32 %v332_v54, 16  ;;  %v1670_v7 = vsel %vm11524_vm4, %v1665_v63, %v1669_v49  ;;  %v1684_v8 = vor.u32 %v1683_v1, %v1679_v0  ;;  %v5238_v11 = vshrl.u32 %v9455_v61, 16 }
 0x109   : > { %v5241_v12 = vshll.u32 %v9455_v61, 16  ;;  %10385 = vmatmul.mubr.msk.bf16.gmra.mrb[116].mxu1 %vm1945_vm1, %v8997_v62  ;;  %v1675_v15 = vrot.slane %v1674_v3, 4  ;;  %v1694_v16 = vor.u32 %v1693_v5, %v1689_v4  ;;  %v5247_v18 = vshll.u32 %v9456_v2, 16  ;;  %v299_v61 = vld [vmem:[%s11488_s23 + $0x278] sm:$0xf] }
 0x10a   : > { %v1699_v17 = vrot.slane %v1697_v6, 5  ;;  %v1685_v19 = vrot.slane %v1684_v8, 4  ;;  %v5240_v20 = vrot.slane %v5238_v11, 4  ;;  %v5251_v23 = vshrl.u32 %v9456_v2, 16  ;;  %v333_v5 = vld [vmem:[%s11488_s23 + $0x27c] sm:$0x1] }
 0x10b   : > { %10653 = vmatmul.mubr.msk.bf16.gmra.mrb[124].mxu0 %vm1945_vm1, %v11251_v58  ;;  %v5243_v22 = vrot.slane %v5241_v12, 5  ;;  %v1680_v25 = vsel %vm11524_vm4, %v1675_v15, %v1679_v0  ;;  %v1695_v26 = vrot.slane %v1694_v16, 4  ;;  %v5249_v27 = vrot.slane %v5247_v18, 5  ;;  %v9460_v12 = vld [vmem:[%s11488_s23 + $0x28] sm:$0xf] }
 0x10c   : > { %v5257_v28 = vshll.u32 %v9457_v9, 16  ;;  %v8998_v29 = vcombine.low %v1670_v7, %v1680_v25  ;;  %v1690_v30 = vsel %vm11524_vm4, %v1685_v19, %v1689_v4  ;;  %v5253_v32 = vrot.slane %v5251_v23, 4  ;;  %v9461_v19 = vld [vmem:[%s11488_s23 + $0x2c] sm:$0xf] }
 0x10d   : > { %v5244_v31 = vor.u32 %v5243_v22, %v5240_v20  ;;  %v1700_v10 = vsel %vm11524_vm4, %v1695_v26, %v1699_v17  ;;  %v5261_v35 = vshrl.u32 %v9457_v9, 16  ;;  %v1702_v38 = vshrl.u32 %v296_v24, 16 }
 0x10e   : > { %v5259_v34 = vrot.slane %v5257_v28, 5  ;;  %10388 = vmatprep.mubr.msk.bf16.mxu1 %vm1945_vm1, %v8998_v29  ;;  %v8999_v39 = vcombine.low %v1690_v30, %v1700_v10  ;;  %v5254_v41 = vor.u32 %v5253_v32, %v5249_v27  ;;  %v1705_v42 = vshll.u32 %v296_v24, 16 }
 0x10f   : > { %v5245_v40 = vrot.slane %v5244_v31, 4  ;;  %v5263_v44 = vrot.slane %v5261_v35, 4  ;;  %v1704_v45 = vrot.slane %v1702_v38, 4  ;;  %v1711_v46 = vshll.u32 %v297_v33, 16  ;;  %v9462_v31 = vld [vmem:[%s11488_s23 + $0x30] sm:$0xf] }
 0x110   : > { %v1715_v47 = vshrl.u32 %v297_v33, 16  ;;  %v5255_v49 = vrot.slane %v5254_v41, 4  ;;  %v1707_v50 = vrot.slane %v1705_v42, 5  ;;  %v1721_v51 = vshll.u32 %v298_v37, 16  ;;  %v9463_v38 = vld [vmem:[%s11488_s23 + $0x34] sm:$0xf] }
 0x111   : > { %v5250_v48 = vsel %vm11524_vm4, %v5245_v40, %v5249_v27  ;;  %10389 = vmatmul.mubr.msk.bf16.gmra.mrb[120].mxu1 %vm1945_vm1, %v8999_v39  ;;  %v5264_v52 = vor.u32 %v5263_v44, %v5259_v34  ;;  %v1713_v53 = vrot.slane %v1711_v46, 5  ;;  %v5267_v56 = vshll.u32 %v9458_v43, 16 }
 0x112   : > { %v1717_v54 = vrot.slane %v1715_v47, 4  ;;  %v5260_v57 = vsel %vm11524_vm4, %v5255_v49, %v5259_v34  ;;  %v1708_v58 = vor.u32 %v1707_v50, %v1704_v45  ;;  %v1723_v59 = vrot.slane %v1721_v51, 5  ;;  %v9464_v47 = vld [vmem:[%s11488_s23 + $0x38] sm:$0x1]  ;;  %v11305_v50 = vld [vmem:[%s11488_s23] sm:$0xf] }
 0x113   : > { %v5271_v60 = vshrl.u32 %v9458_v43, 16  ;;  %v5265_v62 = vrot.slane %v5264_v52, 4  ;;  %v9617_v63 = vcombine.low %v5250_v48, %v5260_v57  ;;  %v5269_v1 = vrot.slane %v5267_v56, 5  ;;  %v11306_v51 = vld [vmem:[%s11488_s23 + $0x4] sm:$0xf] }
 0x114   : > { %v1718_v0 = vor.u32 %v1717_v54, %v1713_v53  ;;  %v1709_v2 = vrot.slane %v1708_v58, 4  ;;  %v5277_v4 = vshll.u32 %v9459_v55, 16  ;;  %v1725_v6 = vshrl.u32 %v298_v37, 16  ;;  %v9465_v54 = vld [vmem:[%s11488_s23 + $0x3c] sm:$0xf] }
 0x115   : > { %v5273_v3 = vrot.slane %v5271_v60, 4  ;;  %10658 = vmatprep.mubr.msk.bf16.mxu0 %vm1945_vm1, %v9617_v63  ;;  %v5270_v8 = vsel %vm11524_vm4, %v5265_v62, %v5269_v1  ;;  %v1731_v9 = vshll.u32 %v299_v61, 16  ;;  %v1735_v11 = vshrl.u32 %v299_v61, 16 }
 0x116   : > { %v1719_v7 = vrot.slane %v1718_v0, 4  ;;  %v1714_v15 = vsel %vm11524_vm4, %v1709_v2, %v1713_v53  ;;  %v5279_v17 = vrot.slane %v5277_v4, 5  ;;  %v1727_v18 = vrot.slane %v1725_v6, 4 }
 0x117   : > { %v5274_v16 = vor.u32 %v5273_v3, %v5269_v1  ;;  %v1733_v22 = vrot.slane %v1731_v9, 5  ;;  %v1737_v23 = vrot.slane %v1735_v11, 4  ;;  %v1741_v24 = vshll.u32 %v333_v5, 16 }
 0x118   : > { %v1724_v20 = vsel %vm11524_vm4, %v1719_v7, %v1723_v59  ;;  %v1728_v27 = vor.u32 %v1727_v18, %v1723_v59  ;;  %v5282_v28 = vshrl.u32 %v9460_v12, 16  ;;  %v5285_v32 = vshll.u32 %v9460_v12, 16  ;;  %v9466_v59 = vld [vmem:[%s11488_s23 + $0x40] sm:$0xf]  ;;  %v9467_v7 = vld [vmem:[%s11488_s23 + $0x44] sm:$0xf] }
 0x119   : > { %v9000_v25 = vcombine.low %v1714_v15, %v1724_v20  ;;  %v5275_v26 = vrot.slane %v5274_v16, 4  ;;  %v1738_v29 = vor.u32 %v1737_v23, %v1733_v22  ;;  %v1743_v30 = vrot.slane %v1741_v24, 5  ;;  %v9468_v16 = vld [vmem:[%s11488_s23 + $0x48] sm:$0xf] }
 0x11a   : > { %v5291_v33 = vshll.u32 %v9461_v19, 16  ;;  %v1729_v34 = vrot.slane %v1728_v27, 4  ;;  %v5284_v35 = vrot.slane %v5282_v28, 4  ;;  %v5295_v37 = vshrl.u32 %v9461_v19, 16 }
 0x11b   : > { %10392 = vmatprep.mubr.msk.bf16.mxu1 %vm1945_vm1, %v9000_v25  ;;  %v5280_v10 = vsel %vm11524_vm4, %v5275_v26, %v5279_v17  ;;  %v1739_v40 = vrot.slane %v1738_v29, 4  ;;  %v5287_v41 = vrot.slane %v5285_v32, 5  ;;  %v5301_v45 = vshll.u32 %v9462_v31, 16  ;;  %v9469_v26 = vld [vmem:[%s11488_s23 + $0x4c] sm:$0x1] }
 0x11c   : > { %v9618_v39 = vcombine.low %v5270_v8, %v5280_v10  ;;  %v5293_v42 = vrot.slane %v5291_v33, 5  ;;  %v1734_v43 = vsel %vm11524_vm4, %v1729_v34, %v1733_v22  ;;  %v5297_v44 = vrot.slane %v5295_v37, 4  ;;  %v11307_v29 = vld [vmem:[%s11488_s23 + $0x14] sm:$0xf]  ;;  %v9470_v37 = vld [vmem:[%s11488_s23 + $0x50] sm:$0xf] }
 0x11d   : > { %v5305_v46 = vshrl.u32 %v9462_v31, 16  ;;  %v1744_v48 = vsel %vm11524_vm4, %v1739_v40, %v1743_v30  ;;  %v5288_v49 = vor.u32 %v5287_v41, %v5284_v35  ;;  %v9067_v52 = vcombine.low %v11305_v50, %v11306_v51  ;;  %v11308_v30 = vld [vmem:[%s11488_s23 + $0x18] sm:$0xf]  ;;  %v11309_v50 = vld [vmem:[%s11488_s23 + $0x1c] sm:$0xf] }
 0x11e   : > { %10659 = vmatmul.mubr.msk.bf16.vlgmr.msra.gmra.mrb[0].mxu0 %vm1945_vm1, %v9618_v39  ;;  %v5311_v53 = vshll.u32 %v9463_v38, 16  ;;  %v9001_v55 = vcombine.low %v1734_v43, %v1744_v48  ;;  %v5298_v56 = vor.u32 %v5297_v44, %v5293_v42  ;;  %v5303_v57 = vrot.slane %v5301_v45, 5  ;;  %v11310_v51 = vld [vmem:[%s11488_s23 + $0x20] sm:$0xf] }
 0x11f   : > { %v5307_v58 = vrot.slane %v5305_v46, 4  ;;  %v5289_v60 = vrot.slane %v5288_v49, 4  ;;  %v5315_v62 = vshrl.u32 %v9463_v38, 16  ;;  %v5321_v63 = vshll.u32 %v9464_v47, 16  ;;  %v9472_v47 = vld [vmem:[%s11488_s23 + $0x58] sm:$0xf] }
 0x120   : > { %v5313_v61 = vrot.slane %v5311_v53, 5  ;;  %10393 = vmatmul.mubr.msk.bf16.gmra.mrb[124].mxu1 %vm1945_vm1, %v9001_v55  ;;  %v5299_v0 = vrot.slane %v5298_v56, 4  ;;  %v5326_v2 = vshrl.u32 %v9465_v54, 16  ;;  %v5329_v3 = vshll.u32 %v9465_v54, 16 }
 0x121   : > { %v5308_v1 = vor.u32 %v5307_v58, %v5303_v57  ;;  %v5294_v4 = vsel %vm11524_vm4, %v5289_v60, %v5293_v42  ;;  %10398 = vmatprep.mubr.msk.bf16.mxu1 %vm1945_vm1, %v9067_v52  ;;  %v5317_v5 = vrot.slane %v5315_v62, 4  ;;  %v5323_v6 = vrot.slane %v5321_v63, 5  ;;  %v9471_v42 = vld [vmem:[%s11488_s23 + $0x54] sm:$0xf] }
 0x122   : > { %v5335_v8 = vshll.u32 %v9466_v59, 16  ;;  %v5304_v9 = vsel %vm11524_vm4, %v5299_v0, %v5303_v57  ;;  %v5328_v12 = vrot.slane %v5326_v2, 4  ;;  %v5331_v15 = vrot.slane %v5329_v3, 5 }
 0x123   : > { %v5309_v11 = vrot.slane %v5308_v1, 4  ;;  %v9619_v17 = vcombine.low %v5294_v4, %v5304_v9  ;;  %v5318_v18 = vor.u32 %v5317_v5, %v5313_v61  ;;  %v5339_v20 = vshrl.u32 %v9466_v59, 16  ;;  %v9473_v59 = vld [vmem:[%s11488_s23 + $0x5c] sm:$0xf]  ;;  %v9474_v4 = vld [vmem:[%s11488_s23 + $0x60] sm:$0x1] }
 0x124   : > { %v5337_v19 = vrot.slane %v5335_v8, 5  ;;  %v5332_v23 = vor.u32 %v5331_v15, %v5328_v12  ;;  %v5345_v24 = vshll.u32 %v9467_v7, 16  ;;  %v5349_v25 = vshrl.u32 %v9467_v7, 16  ;;  %v11311_v7 = vld [vmem:[%s11488_s23 + $0x28] sm:$0xf] }
 0x125   : > { %v5314_v22 = vsel %vm11524_vm4, %v5309_v11, %v5313_v61  ;;  %10662 = vmatprep.mubr.msk.bf16.mxu0 %vm1945_vm1, %v9619_v17  ;;  %v5319_v27 = vrot.slane %v5318_v18, 4  ;;  %v5341_v28 = vrot.slane %v5339_v20, 4  ;;  %v9069_v31 = vcombine.low %v11307_v29, %v11308_v30  ;;  %v11312_v8 = vld [vmem:[%s11488_s23 + $0x2c] sm:$0xf]  ;;  %v9475_v12 = vld [vmem:[%s11488_s23 + $0x64] sm:$0xf] }
 0x126   : > { %v5355_v32 = vshll.u32 %v9468_v16, 16  ;;  %v5333_v33 = vrot.slane %v5332_v23, 4  ;;  %v5347_v10 = vrot.slane %v5345_v24, 5  ;;  %v5351_v34 = vrot.slane %v5349_v25, 4  ;;  %v11313_v24 = vld [vmem:[%s11488_s23 + $0x30] sm:$0xf] }
 0x127   : > { %v5359_v35 = vshrl.u32 %v9468_v16, 16  ;;  %v5324_v38 = vsel %vm11524_vm4, %v5319_v27, %v5323_v6  ;;  %v5342_v39 = vor.u32 %v5341_v28, %v5337_v19  ;;  %v5365_v41 = vshll.u32 %v9469_v26, 16  ;;  %v11314_v25 = vld [vmem:[%s11488_s23 + $0x34] sm:$0xf] }
 0x128   : > { %v5357_v40 = vrot.slane %v5355_v32, 5  ;;  %v9620_v43 = vcombine.low %v5314_v22, %v5324_v38  ;;  %10399 = vmatmul.mubr.msk.bf16.vlgmr.msra.gmra.mrb[0].mxu1 %vm1945_vm1, %v9068_v21  ;;  %v5338_v44 = vsel %vm11524_vm4, %v5333_v33, %v5337_v19  ;;  %v5352_v45 = vor.u32 %v5351_v34, %v5347_v10  ;;  %v9476_v19 = vld [vmem:[%s11488_s23 + $0x68] sm:$0xf]  ;;  %v9477_v33 = vld [vmem:[%s11488_s23 + $0x6c] sm:$0xf] }
 0x129   : > { %v5361_v46 = vrot.slane %v5359_v35, 4  ;;  %v5343_v48 = vrot.slane %v5342_v39, 4  ;;  %10402 = vmatprep.mubr.msk.bf16.mxu1 %vm1945_vm1, %v9069_v31  ;;  %v5367_v49 = vrot.slane %v5365_v41, 5  ;;  %v9070_v52 = vcombine.low %v11309_v50, %v11310_v51  ;;  %v11315_v51 = vld [vmem:[%s11488_s23 + $0x3c] sm:$0xf] }
 0x12a   : > { %v5370_v53 = vshrl.u32 %v9470_v37, 16  ;;  %10663 = vmatmul.mubr.msk.bf16.gmra.mrb[4].mxu0 %vm1945_vm1, %v9620_v43  ;;  %v5353_v13 = vrot.slane %v5352_v45, 4  ;;  %v5373_v21 = vshll.u32 %v9470_v37, 16  ;;  %v5379_v54 = vshll.u32 %v9471_v42, 16 }
 0x12b   : > { %v5362_v14 = vor.u32 %v5361_v46, %v5357_v40  ;;  %v5348_v55 = vsel %vm11524_vm4, %v5343_v48, %v5347_v10  ;;  %v5383_v57 = vshrl.u32 %v9471_v42, 16  ;;  %v5389_v58 = vshll.u32 %v9472_v47, 16 }
 0x12c   : > { %v5372_v56 = vrot.slane %v5370_v53, 4  ;;  %v9621_v60 = vcombine.low %v5338_v44, %v5348_v55  ;;  %v5358_v61 = vsel %vm11524_vm4, %v5353_v13, %v5357_v40  ;;  %v5375_v63 = vrot.slane %v5373_v21, 5  ;;  %v9478_v40 = vld [vmem:[%s11488_s23 + $0x70] sm:$0xf]  ;;  %v9479_v13 = vld [vmem:[%s11488_s23 + $0x74] sm:$0x1] }
 0x12d   : > { %v5363_v62 = vrot.slane %v5362_v14, 4  ;;  %v5381_v0 = vrot.slane %v5379_v54, 5  ;;  %v5385_v1 = vrot.slane %v5383_v57, 4  ;;  %v5391_v2 = vrot.slane %v5389_v58, 5  ;;  %v9480_v57 = vld [vmem:[%s11488_s23 + $0x78] sm:$0xf] }
 0x12e   : > { %v5393_v3 = vshrl.u32 %v9472_v47, 16  ;;  %10666 = vmatprep.mubr.msk.bf16.mxu0 %vm1945_vm1, %v9621_v60  ;;  %v5376_v6 = vor.u32 %v5375_v63, %v5372_v56  ;;  %v9071_v9 = vcombine.low %v11311_v7, %v11312_v8  ;;  %v5399_v11 = vshll.u32 %v9473_v59, 16 }
 0x12f   : > { %v5368_v5 = vsel %vm11524_vm4, %v5363_v62, %v5367_v49  ;;  %v5386_v16 = vor.u32 %v5385_v1, %v5381_v0  ;;  %v5403_v18 = vshrl.u32 %v9473_v59, 16  ;;  %v5409_v23 = vshll.u32 %v9474_v4, 16  ;;  %v9481_v62 = vld [vmem:[%s11488_s23 + $0x7c] sm:$0xf] }
 0x130   : > { %v9622_v15 = vcombine.low %v5358_v61, %v5368_v5  ;;  %v5395_v17 = vrot.slane %v5393_v3, 4  ;;  %10403 = vmatmul.mubr.msk.bf16.gmra.mrb[4].mxu1 %vm1945_vm1, %v9070_v52  ;;  %v5377_v20 = vrot.slane %v5376_v6, 4  ;;  %v5401_v22 = vrot.slane %v5399_v11, 5  ;;  %v11316_v52 = vld [vmem:[%s11488_s23 + $0x40] sm:$0xf] }
 0x131   : > { %v9072_v26 = vcombine.low %v11313_v24, %v11314_v25  ;;  %v5387_v27 = vrot.slane %v5386_v16, 4  ;;  %10406 = vmatprep.mubr.msk.bf16.mxu1 %vm1945_vm1, %v9071_v9  ;;  %v5405_v29 = vrot.slane %v5403_v18, 4  ;;  %v5414_v30 = vshrl.u32 %v9475_v12, 16  ;;  %v11318_v3 = vld [vmem:[%s11488_s23 + $0x48] sm:$0xf] }
 0x132   : > { %v5396_v28 = vor.u32 %v5395_v17, %v5391_v2  ;;  %10667 = vmatmul.mubr.msk.bf16.gmra.mrb[8].mxu0 %vm1945_vm1, %v9622_v15  ;;  %v5382_v31 = vsel %vm11524_vm4, %v5377_v20, %v5381_v0  ;;  %v5411_v32 = vrot.slane %v5409_v23, 5  ;;  %v5417_v10 = vshll.u32 %v9475_v12, 16  ;;  %v9482_v15 = vld [vmem:[%s11488_s23 + $0x80] sm:$0xf] }
 0x133   : > { %v5423_v34 = vshll.u32 %v9476_v19, 16  ;;  %v5392_v35 = vsel %vm11524_vm4, %v5387_v27, %v5391_v2  ;;  %v5406_v38 = vor.u32 %v5405_v29, %v5401_v22  ;;  %v5416_v39 = vrot.slane %v5414_v30, 4  ;;  %v11317_v2 = vld [vmem:[%s11488_s23 + $0x44] sm:$0xf] }
 0x134   : > { %v5397_v37 = vrot.slane %v5396_v28, 4  ;;  %v9623_v41 = vcombine.low %v5382_v31, %v5392_v35  ;;  %v5419_v42 = vrot.slane %v5417_v10, 5  ;;  %v5427_v44 = vshrl.u32 %v9476_v19, 16  ;;  %v9484_v31 = vld [vmem:[%s11488_s23 + $0x88] sm:$0x1] }
 0x135   : > { %v5425_v43 = vrot.slane %v5423_v34, 5  ;;  %v5407_v46 = vrot.slane %v5406_v38, 4  ;;  %v5433_v47 = vshll.u32 %v9477_v33, 16  ;;  %v5437_v48 = vshrl.u32 %v9477_v33, 16  ;;  %v11319_v33 = vld [vmem:[%s11488_s23 + $0x50] sm:$0xf] }
 0x136   : > { %v5402_v45 = vsel %vm11524_vm4, %v5397_v37, %v5401_v22  ;;  %10670 = vmatprep.mubr.msk.bf16.mxu0 %vm1945_vm1, %v9623_v41  ;;  %v5420_v49 = vor.u32 %v5419_v42, %v5416_v39  ;;  %v5429_v50 = vrot.slane %v5427_v44, 4  ;;  %v9073_v53 = vcombine.low %v11315_v51, %v11316_v52  ;;  %v9483_v22 = vld [vmem:[%s11488_s23 + $0x84] sm:$0xf]  ;;  %v11320_v10 = vld [vmem:[%s11488_s23 + $0x54] sm:$0xf] }
 0x137   : > { %v5443_v14 = vshll.u32 %v9478_v40, 16  ;;  %v5412_v21 = vsel %vm11524_vm4, %v5407_v46, %v5411_v32  ;;  %v5435_v54 = vrot.slane %v5433_v47, 5  ;;  %v5439_v55 = vrot.slane %v5437_v48, 4  ;;  %v9485_v38 = vld [vmem:[%s11488_s23 + $0x8c] sm:$0xf] }
 0x138   : > { %v5447_v56 = vshrl.u32 %v9478_v40, 16  ;;  %v9624_v58 = vcombine.low %v5402_v45, %v5412_v21  ;;  %10407 = vmatmul.mubr.msk.bf16.gmra.mrb[8].mxu1 %vm1945_vm1, %v9072_v26  ;;  %v5421_v59 = vrot.slane %v5420_v49, 4  ;;  %v5430_v60 = vor.u32 %v5429_v50, %v5425_v43  ;;  %v9486_v47 = vld [vmem:[%s11488_s23 + $0x90] sm:$0xf]  ;;  %v11321_v50 = vld [vmem:[%s11488_s23 + $0x58] sm:$0xf] }
 0x139   : > { %v5445_v61 = vrot.slane %v5443_v14, 5  ;;  %10410 = vmatprep.mubr.msk.bf16.mxu1 %vm1945_vm1, %v9073_v53  ;;  %v5440_v63 = vor.u32 %v5439_v55, %v5435_v54  ;;  %v5453_v1 = vshll.u32 %v9479_v13, 16  ;;  %v9074_v4 = vcombine.low %v11317_v2, %v11318_v3  ;;  %v11322_v51 = vld [vmem:[%s11488_s23 + $0x5c] sm:$0xf] }
 0x13a   : > { %v5449_v0 = vrot.slane %v5447_v56, 4  ;;  %10671 = vmatmul.mubr.msk.bf16.gmra.mrb[12].mxu0 %vm1945_vm1, %v9624_v58  ;;  %v5426_v5 = vsel %vm11524_vm4, %v5421_v59, %v5425_v43  ;;  %v5431_v6 = vrot.slane %v5430_v60, 4  ;;  %v5458_v7 = vshrl.u32 %v9480_v57, 16 }
 0x13b   : > { %v5461_v8 = vshll.u32 %v9480_v57, 16  ;;  %v5441_v9 = vrot.slane %v5440_v63, 4  ;;  %v5455_v12 = vrot.slane %v5453_v1, 5  ;;  %v5467_v16 = vshll.u32 %v9481_v62, 16 }
 0x13c   : > { %v5450_v11 = vor.u32 %v5449_v0, %v5445_v61  ;;  %v5436_v17 = vsel %vm11524_vm4, %v5431_v6, %v5435_v54  ;;  %v5460_v18 = vrot.slane %v5458_v7, 4  ;;  %v5471_v20 = vshrl.u32 %v9481_v62, 16  ;;  %v9487_v54 = vld [vmem:[%s11488_s23 + $0x94] sm:$0xf]  ;;  %v9488_v0 = vld [vmem:[%s11488_s23 + $0x98] sm:$0xf] }
 0x13d   : > { %v5463_v19 = vrot.slane %v5461_v8, 5  ;;  %v9625_v23 = vcombine.low %v5426_v5, %v5436_v17  ;;  %v5446_v24 = vsel %vm11524_vm4, %v5441_v9, %v5445_v61  ;;  %v5469_v26 = vrot.slane %v5467_v16, 5  ;;  %v9489_v5 = vld [vmem:[%s11488_s23 + $0x9c] sm:$0x1]  ;;  %v11323_v9 = vld [vmem:[%s11488_s23 + $0x64] sm:$0xf] }
 0x13e   : > { %v5451_v25 = vrot.slane %v5450_v11, 4  ;;  %v5473_v28 = vrot.slane %v5471_v20, 4  ;;  %v5477_v29 = vshll.u32 %v9482_v15, 16  ;;  %v5481_v30 = vshrl.u32 %v9482_v15, 16  ;;  %v11324_v11 = vld [vmem:[%s11488_s23 + $0x68] sm:$0xf] }
 0x13f   : > { %v5464_v27 = vor.u32 %v5463_v19, %v5460_v18  ;;  %10674 = vmatprep.mubr.msk.bf16.mxu0 %vm1945_vm1, %v9625_v23  ;;  %v9075_v34 = vcombine.low %v11319_v33, %v11320_v10  ;;  %v5487_v35 = vshll.u32 %v9483_v22, 16  ;;  %v5491_v37 = vshrl.u32 %v9483_v22, 16  ;;  %v9490_v15 = vld [vmem:[%s11488_s23 + $0xa0] sm:$0xf] }
 0x140   : > { %v5456_v32 = vsel %vm11524_vm4, %v5451_v25, %v5455_v12  ;;  %10411 = vmatmul.mubr.msk.bf16.gmra.mrb[12].mxu1 %vm1945_vm1, %v9074_v4  ;;  %v5474_v41 = vor.u32 %v5473_v28, %v5469_v26  ;;  %v5479_v42 = vrot.slane %v5477_v29, 5  ;;  %v5483_v43 = vrot.slane %v5481_v30, 4  ;;  %v11326_v28 = vld [vmem:[%s11488_s23 + $0x70] sm:$0xf]  ;;  %v9491_v30 = vld [vmem:[%s11488_s23 + $0xa4] sm:$0xf] }
 0x141   : > { %v9626_v39 = vcombine.low %v5446_v24, %v5456_v32  ;;  %v5465_v40 = vrot.slane %v5464_v27, 4  ;;  %10414 = vmatprep.mubr.msk.bf16.mxu1 %vm1945_vm1, %v9075_v34  ;;  %v5489_v44 = vrot.slane %v5487_v35, 5  ;;  %v5493_v45 = vrot.slane %v5491_v37, 4  ;;  %v11325_v27 = vld [vmem:[%s11488_s23 + $0x6c] sm:$0xf] }
 0x142   : > { %v5497_v46 = vshll.u32 %v9484_v31, 16  ;;  %v5475_v49 = vrot.slane %v5474_v41, 4  ;;  %v9076_v52 = vcombine.low %v11321_v50, %v11322_v51  ;;  %v5502_v53 = vshrl.u32 %v9485_v38, 16  ;;  %v9492_v35 = vld [vmem:[%s11488_s23 + $0xa8] sm:$0xf] }
 0x143   : > { %10675 = vmatmul.mubr.msk.bf16.gmra.mrb[16].mxu0 %vm1945_vm1, %v9626_v39  ;;  %v5470_v48 = vsel %vm11524_vm4, %v5465_v40, %v5469_v26  ;;  %v5484_v13 = vor.u32 %v5483_v43, %v5479_v42  ;;  %v5494_v14 = vor.u32 %v5493_v45, %v5489_v44  ;;  %v5505_v55 = vshll.u32 %v9485_v38, 16  ;;  %v9493_v45 = vld [vmem:[%s11488_s23 + $0xac] sm:$0xf]  ;;  %v9494_v50 = vld [vmem:[%s11488_s23 + $0xb0] sm:$0x1] }
 0x144   : > { %v5499_v21 = vrot.slane %v5497_v46, 5  ;;  %v5480_v56 = vsel %vm11524_vm4, %v5475_v49, %v5479_v42  ;;  %v5504_v57 = vrot.slane %v5502_v53, 4  ;;  %v5511_v58 = vshll.u32 %v9486_v47, 16 }
 0x145   : > { %v5515_v59 = vshrl.u32 %v9486_v47, 16  ;;  %v9627_v60 = vcombine.low %v5470_v48, %v5480_v56  ;;  %v5485_v61 = vrot.slane %v5484_v13, 4  ;;  %v5495_v62 = vrot.slane %v5494_v14, 4  ;;  %v11327_v13 = vld [vmem:[%s11488_s23 + $0x78] sm:$0xf] }
 0x146   : > { %v5507_v63 = vrot.slane %v5505_v55, 5  ;;  %v5513_v1 = vrot.slane %v5511_v58, 5  ;;  %v5521_v3 = vshll.u32 %v9487_v54, 16  ;;  %v5525_v4 = vshrl.u32 %v9487_v54, 16  ;;  %v11328_v14 = vld [vmem:[%s11488_s23 + $0x7c] sm:$0xf] }
 0x147   : > { %v5517_v2 = vrot.slane %v5515_v59, 4  ;;  %10678 = vmatprep.mubr.msk.bf16.mxu0 %vm1945_vm1, %v9627_v60  ;;  %v5490_v6 = vsel %vm11524_vm4, %v5485_v61, %v5489_v44  ;;  %v5500_v7 = vsel %vm11524_vm4, %v5495_v62, %v5499_v21  ;;  %v9077_v12 = vcombine.low %v11323_v9, %v11324_v11  ;;  %v9495_v62 = vld [vmem:[%s11488_s23 + $0xb4] sm:$0xf] }
 0x148   : > { %v5508_v8 = vor.u32 %v5507_v63, %v5504_v57  ;;  %v9628_v16 = vcombine.low %v5490_v6, %v5500_v7  ;;  %10415 = vmatmul.mubr.msk.bf16.gmra.mrb[16].mxu1 %vm1945_vm1, %v9076_v52  ;;  %v5523_v18 = vrot.slane %v5521_v3, 5  ;;  %v5527_v19 = vrot.slane %v5525_v4, 4  ;;  %v9496_v3 = vld [vmem:[%s11488_s23 + $0xb8] sm:$0xf]  ;;  %v11329_v7 = vld [vmem:[%s11488_s23 + $0x80] sm:$0xf] }
 0x149   : > { %v5518_v17 = vor.u32 %v5517_v2, %v5513_v1  ;;  %10418 = vmatprep.mubr.msk.bf16.mxu1 %vm1945_vm1, %v9077_v12  ;;  %v5531_v22 = vshll.u32 %v9488_v0, 16  ;;  %v5535_v23 = vshrl.u32 %v9488_v0, 16  ;;  %v5541_v24 = vshll.u32 %v9489_v5, 16 }
 0x14a   : > { %v5509_v20 = vrot.slane %v5508_v8, 4  ;;  %v5528_v26 = vor.u32 %v5527_v19, %v5523_v18  ;;  %v9078_v29 = vcombine.low %v11325_v27, %v11326_v28  ;;  %v5546_v31 = vshrl.u32 %v9490_v15, 16  ;;  %v11330_v8 = vld [vmem:[%s11488_s23 + $0x84] sm:$0xf] }
 0x14b   : > { %10679 = vmatmul.mubr.msk.bf16.gmra.mrb[20].mxu0 %vm1945_vm1, %v9628_v16  ;;  %v5519_v25 = vrot.slane %v5518_v17, 4  ;;  %v5533_v33 = vrot.slane %v5531_v22, 5  ;;  %v5537_v10 = vrot.slane %v5535_v23, 4  ;;  %v5543_v34 = vrot.slane %v5541_v24, 5  ;;  %v9498_v23 = vld [vmem:[%s11488_s23 + $0xc0] sm:$0xf] }
 0x14c   : > { %v5514_v32 = vsel %vm11524_vm4, %v5509_v20, %v5513_v1  ;;  %v5529_v38 = vrot.slane %v5528_v26, 4  ;;  %v5548_v39 = vrot.slane %v5546_v31, 4  ;;  %v5549_v40 = vshll.u32 %v9490_v15, 16  ;;  %v9497_v15 = vld [vmem:[%s11488_s23 + $0xbc] sm:$0xf] }
 0x14d   : > { %v5524_v37 = vsel %vm11524_vm4, %v5519_v25, %v5523_v18  ;;  %v5538_v42 = vor.u32 %v5537_v10, %v5533_v33  ;;  %v5555_v43 = vshll.u32 %v9491_v30, 16  ;;  %v5559_v44 = vshrl.u32 %v9491_v30, 16  ;;  %v11331_v10 = vld [vmem:[%s11488_s23 + $0x8c] sm:$0xf] }
 0x14e   : > { %v9629_v41 = vcombine.low %v5514_v32, %v5524_v37  ;;  %v5534_v46 = vsel %vm11524_vm4, %v5529_v38, %v5533_v33  ;;  %v5551_v47 = vrot.slane %v5549_v40, 5  ;;  %v5565_v48 = vshll.u32 %v9492_v35, 16  ;;  %v9499_v37 = vld [vmem:[%s11488_s23 + $0xc4] sm:$0x1] }
 0x14f   : > { %v5569_v49 = vshrl.u32 %v9492_v35, 16  ;;  %v5539_v51 = vrot.slane %v5538_v42, 4  ;;  %v5557_v52 = vrot.slane %v5555_v43, 5  ;;  %v5561_v53 = vrot.slane %v5559_v44, 4  ;;  %v9500_v43 = vld [vmem:[%s11488_s23 + $0xc8] sm:$0xf] }
 0x150   : > { %10682 = vmatprep.mubr.msk.bf16.mxu0 %vm1945_vm1, %v9629_v41  ;;  %v9079_v21 = vcombine.low %v11327_v13, %v11328_v14  ;;  %10419 = vmatmul.mubr.msk.bf16.gmra.mrb[20].mxu1 %vm1945_vm1, %v9078_v29  ;;  %v5552_v54 = vor.u32 %v5551_v47, %v5548_v39  ;;  %v5567_v55 = vrot.slane %v5565_v48, 5  ;;  %v5575_v57 = vshll.u32 %v9493_v45, 16  ;;  %v9501_v48 = vld [vmem:[%s11488_s23 + $0xcc] sm:$0xf] }
 0x151   : > { %v5571_v56 = vrot.slane %v5569_v49, 4  ;;  %v5544_v58 = vsel %vm11524_vm4, %v5539_v51, %v5543_v34  ;;  %v5562_v59 = vor.u32 %v5561_v53, %v5557_v52  ;;  %v5579_v60 = vshrl.u32 %v9493_v45, 16  ;;  %v11332_v34 = vld [vmem:[%s11488_s23 + $0x90] sm:$0xf]  ;;  %v11334_v53 = vld [vmem:[%s11488_s23 + $0x98] sm:$0xf] }
 0x152   : > { %10422 = vmatprep.mubr.msk.bf16.mxu1 %vm1945_vm1, %v9079_v21  ;;  %v5585_v61 = vshll.u32 %v9494_v50, 16  ;;  %v9630_v63 = vcombine.low %v5534_v46, %v5544_v58  ;;  %v5553_v0 = vrot.slane %v5552_v54, 4  ;;  %v5577_v2 = vrot.slane %v5575_v57, 5  ;;  %v9502_v54 = vld [vmem:[%s11488_s23 + $0xd0] sm:$0xf] }
 0x153   : > { %v5572_v1 = vor.u32 %v5571_v56, %v5567_v55  ;;  %v5563_v4 = vrot.slane %v5562_v59, 4  ;;  %v5581_v5 = vrot.slane %v5579_v60, 4  ;;  %v9080_v9 = vcombine.low %v11329_v7, %v11330_v8 }
 0x154   : > { %v5587_v6 = vrot.slane %v5585_v61, 5  ;;  %10683 = vmatmul.mubr.msk.bf16.gmra.mrb[24].mxu0 %vm1945_vm1, %v9630_v63  ;;  %v5558_v11 = vsel %vm11524_vm4, %v5553_v0, %v5557_v52  ;;  %v5590_v16 = vshrl.u32 %v9495_v62, 16  ;;  %v5593_v17 = vshll.u32 %v9495_v62, 16  ;;  %v11333_v52 = vld [vmem:[%s11488_s23 + $0x94] sm:$0xf] }
 0x155   : > { %v5573_v12 = vrot.slane %v5572_v1, 4  ;;  %v5568_v18 = vsel %vm11524_vm4, %v5563_v4, %v5567_v55  ;;  %v5582_v19 = vor.u32 %v5581_v5, %v5577_v2  ;;  %v5599_v20 = vshll.u32 %v9496_v3, 16  ;;  %v9503_v1 = vld [vmem:[%s11488_s23 + $0xd4] sm:$0xf] }
 0x156   : > { %v5603_v22 = vshrl.u32 %v9496_v3, 16  ;;  %v9631_v24 = vcombine.low %v5558_v11, %v5568_v18  ;;  %v5592_v26 = vrot.slane %v5590_v16, 4  ;;  %v5595_v27 = vrot.slane %v5593_v17, 5  ;;  %v11336_v11 = vld [vmem:[%s11488_s23 + $0xa4] sm:$0xf] }
 0x157   : > { %v5578_v25 = vsel %vm11524_vm4, %v5573_v12, %v5577_v2  ;;  %v5583_v28 = vrot.slane %v5582_v19, 4  ;;  %v5601_v29 = vrot.slane %v5599_v20, 5  ;;  %v5609_v31 = vshll.u32 %v9497_v15, 16  ;;  %v9505_v20 = vld [vmem:[%s11488_s23 + $0xdc] sm:$0xf] }
 0x158   : > { %v5605_v30 = vrot.slane %v5603_v22, 4  ;;  %10686 = vmatprep.mubr.msk.bf16.mxu0 %vm1945_vm1, %v9631_v24  ;;  %10423 = vmatmul.mubr.msk.bf16.gmra.mrb[24].mxu1 %vm1945_vm1, %v9080_v9  ;;  %v5596_v32 = vor.u32 %v5595_v27, %v5592_v26  ;;  %v5613_v33 = vshrl.u32 %v9497_v15, 16  ;;  %v9081_v35 = vcombine.low %v11331_v10, %v11332_v34  ;;  %v11335_v9 = vld [vmem:[%s11488_s23 + $0xa0] sm:$0xf]  ;;  %v9504_v15 = vld [vmem:[%s11488_s23 + $0xd8] sm:$0x1] }
 0x159   : > { %v5619_v38 = vshll.u32 %v9498_v23, 16  ;;  %v5588_v39 = vsel %vm11524_vm4, %v5583_v28, %v5587_v6  ;;  %v5611_v41 = vrot.slane %v5609_v31, 5  ;;  %v5623_v42 = vshrl.u32 %v9498_v23, 16  ;;  %v9506_v26 = vld [vmem:[%s11488_s23 + $0xe0] sm:$0xf] }
 0x15a   : > { %v5606_v40 = vor.u32 %v5605_v30, %v5601_v29  ;;  %v9632_v44 = vcombine.low %v5578_v25, %v5588_v39  ;;  %v5597_v45 = vrot.slane %v5596_v32, 4  ;;  %10426 = vmatprep.mubr.msk.bf16.mxu1 %vm1945_vm1, %v9081_v35  ;;  %v5615_v46 = vrot.slane %v5613_v33, 4  ;;  %v11337_v30 = vld [vmem:[%s11488_s23 + $0xa8] sm:$0xf]  ;;  %v11338_v31 = vld [vmem:[%s11488_s23 + $0xac] sm:$0xf] }
 0x15b   : > { %v5621_v47 = vrot.slane %v5619_v38, 5  ;;  %v5625_v50 = vrot.slane %v5623_v42, 4  ;;  %v5629_v51 = vshll.u32 %v9499_v37, 16  ;;  %v9082_v13 = vcombine.low %v11333_v52, %v11334_v53  ;;  %v9507_v35 = vld [vmem:[%s11488_s23 + $0xe4] sm:$0xf] }
 0x15c   : > { %v5607_v49 = vrot.slane %v5606_v40, 4  ;;  %10687 = vmatmul.mubr.msk.bf16.gmra.mrb[28].mxu0 %vm1945_vm1, %v9632_v44  ;;  %v5602_v14 = vsel %vm11524_vm4, %v5597_v45, %v5601_v29  ;;  %v5616_v21 = vor.u32 %v5615_v46, %v5611_v41  ;;  %v5634_v55 = vshrl.u32 %v9500_v43, 16 }
 0x15d   : > { %v5637_v56 = vshll.u32 %v9500_v43, 16  ;;  %v5626_v58 = vor.u32 %v5625_v50, %v5621_v47  ;;  %v5631_v59 = vrot.slane %v5629_v51, 5  ;;  %v5643_v60 = vshll.u32 %v9501_v48, 16  ;;  %v9508_v50 = vld [vmem:[%s11488_s23 + $0xe8] sm:$0xf] }
 0x15e   : > { %v5612_v57 = vsel %vm11524_vm4, %v5607_v49, %v5611_v41  ;;  %v5617_v62 = vrot.slane %v5616_v21, 4  ;;  %v5636_v63 = vrot.slane %v5634_v55, 4  ;;  %v5647_v4 = vshrl.u32 %v9501_v48, 16 }
 0x15f   : > { %v9633_v61 = vcombine.low %v5602_v14, %v5612_v57  ;;  %v5639_v0 = vrot.slane %v5637_v56, 5  ;;  %v5627_v2 = vrot.slane %v5626_v58, 4  ;;  %v5645_v3 = vrot.slane %v5643_v60, 5  ;;  %v9509_v14 = vld [vmem:[%s11488_s23 + $0xec] sm:$0x1] }
 0x160   : > { %v5653_v5 = vshll.u32 %v9502_v54, 16  ;;  %v5622_v6 = vsel %vm11524_vm4, %v5617_v62, %v5621_v47  ;;  %10427 = vmatmul.mubr.msk.bf16.gmra.mrb[28].mxu1 %vm1945_vm1, %v9082_v13  ;;  %v5657_v8 = vshrl.u32 %v9502_v54, 16  ;;  %v9083_v12 = vcombine.low %v11335_v9, %v11336_v11  ;;  %v11339_v56 = vld [vmem:[%s11488_s23 + $0xb4] sm:$0xf]  ;;  %v11340_v57 = vld [vmem:[%s11488_s23 + $0xb8] sm:$0xf] }
 0x161   : > { %10690 = vmatprep.mubr.msk.bf16.mxu0 %vm1945_vm1, %v9633_v61  ;;  %v5640_v7 = vor.u32 %v5639_v0, %v5636_v63  ;;  %v5632_v16 = vsel %vm11524_vm4, %v5627_v2, %v5631_v59  ;;  %v5649_v17 = vrot.slane %v5647_v4, 4  ;;  %v5663_v19 = vshll.u32 %v9503_v1, 16  ;;  %v9510_v63 = vld [vmem:[%s11488_s23 + $0xf0] sm:$0xf]  ;;  %v9511_v4 = vld [vmem:[%s11488_s23 + $0xf4] sm:$0xf] }
 0x162   : > { %v5655_v18 = vrot.slane %v5653_v5, 5  ;;  %v9634_v22 = vcombine.low %v5622_v6, %v5632_v16  ;;  %10430 = vmatprep.mubr.msk.bf16.mxu1 %vm1945_vm1, %v9083_v12  ;;  %v5659_v24 = vrot.slane %v5657_v8, 4  ;;  %v5667_v25 = vshrl.u32 %v9503_v1, 16  ;;  %v11341_v8 = vld [vmem:[%s11488_s23 + $0xbc] sm:$0xf] }
 0x163   : > { %v5641_v23 = vrot.slane %v5640_v7, 4  ;;  %v5650_v27 = vor.u32 %v5649_v17, %v5645_v3  ;;  %v5665_v28 = vrot.slane %v5663_v19, 5  ;;  %v5673_v29 = vshll.u32 %v9504_v15, 16  ;;  %v11342_v9 = vld [vmem:[%s11488_s23 + $0xc0] sm:$0xf] }
 0x164   : > { %v9084_v32 = vcombine.low %v11337_v30, %v11338_v31  ;;  %10691 = vmatmul.mubr.msk.bf16.gmra.mrb[32].mxu0 %vm1945_vm1, %v9634_v22  ;;  %v5660_v10 = vor.u32 %v5659_v24, %v5655_v18  ;;  %v5669_v34 = vrot.slane %v5667_v25, 4  ;;  %v5678_v37 = vshrl.u32 %v9505_v20, 16  ;;  %v9512_v17 = vld [vmem:[%s11488_s23 + $0xf8] sm:$0xf] }
 0x165   : > { %v5646_v33 = vsel %vm11524_vm4, %v5641_v23, %v5645_v3  ;;  %v5651_v38 = vrot.slane %v5650_v27, 4  ;;  %v5675_v39 = vrot.slane %v5673_v29, 5  ;;  %v5681_v40 = vshll.u32 %v9505_v20, 16 }
 0x166   : > { %v5687_v41 = vshll.u32 %v9506_v26, 16  ;;  %v5661_v42 = vrot.slane %v5660_v10, 4  ;;  %v5670_v43 = vor.u32 %v5669_v34, %v5665_v28  ;;  %v5680_v44 = vrot.slane %v5678_v37, 4  ;;  %v11344_v37 = vld [vmem:[%s11488_s23 + $0xcc] sm:$0xf] }
 0x167   : > { %v5691_v45 = vshrl.u32 %v9506_v26, 16  ;;  %v5656_v46 = vsel %vm11524_vm4, %v5651_v38, %v5655_v18  ;;  %v5683_v47 = vrot.slane %v5681_v40, 5  ;;  %v5697_v49 = vshll.u32 %v9507_v35, 16 }
 0x168   : > { %v5689_v48 = vrot.slane %v5687_v41, 5  ;;  %v9635_v51 = vcombine.low %v5646_v33, %v5656_v46  ;;  %v5666_v52 = vsel %vm11524_vm4, %v5661_v42, %v5665_v28  ;;  %v5671_v53 = vrot.slane %v5670_v43, 4  ;;  %10431 = vmatmul.mubr.msk.bf16.gmra.mrb[32].mxu1 %vm1945_vm1, %v9084_v32  ;;  %v9513_v28 = vld [vmem:[%s11488_s23 + $0xfc] sm:$0xf] }
 0x169   : > { %v5693_v13 = vrot.slane %v5691_v45, 4  ;;  %v5684_v21 = vor.u32 %v5683_v47, %v5680_v44  ;;  %v5699_v54 = vrot.slane %v5697_v49, 5  ;;  %v5701_v55 = vshrl.u32 %v9507_v35, 16  ;;  %v11343_v35 = vld [vmem:[%s11488_s23 + $0xc8] sm:$0xf] }
 0x16a   : > { %v9085_v58 = vcombine.low %v11339_v56, %v11340_v57  ;;  %10694 = vmatprep.mubr.msk.bf16.mxu0 %vm1945_vm1, %v9635_v51  ;;  %v5676_v59 = vsel %vm11524_vm4, %v5671_v53, %v5675_v39  ;;  %v5707_v61 = vshll.u32 %v9508_v50, 16  ;;  %v5711_v62 = vshrl.u32 %v9508_v50, 16  ;;  %v9514_v39 = vld [vmem:[%s11488_s23 + $0x100] sm:$0x1]  ;;  %v9515_v44 = vld [vmem:[%s11488_s23 + $0x104] sm:$0xf] }
 0x16b   : > { %v5694_v60 = vor.u32 %v5693_v13, %v5689_v48  ;;  %v9636_v0 = vcombine.low %v5666_v52, %v5676_v59  ;;  %v5685_v1 = vrot.slane %v5684_v21, 4  ;;  %v5703_v2 = vrot.slane %v5701_v55, 4  ;;  %v9516_v49 = vld [vmem:[%s11488_s23 + $0x108] sm:$0xf]  ;;  %v11345_v53 = vld [vmem:[%s11488_s23 + $0xd0] sm:$0xf] }
 0x16c   : > { %10434 = vmatprep.mubr.msk.bf16.mxu1 %vm1945_vm1, %v9085_v58  ;;  %v5717_v3 = vshll.u32 %v9509_v14, 16  ;;  %v5709_v6 = vrot.slane %v5707_v61, 5  ;;  %v5713_v7 = vrot.slane %v5711_v62, 4  ;;  %v9086_v11 = vcombine.low %v11341_v8, %v11342_v9  ;;  %v11346_v13 = vld [vmem:[%s11488_s23 + $0xd4] sm:$0xf] }
 0x16d   : > { %v5695_v5 = vrot.slane %v5694_v60, 4  ;;  %10695 = vmatmul.mubr.msk.bf16.gmra.mrb[36].mxu0 %vm1945_vm1, %v9636_v0  ;;  %v5690_v12 = vsel %vm11524_vm4, %v5685_v1, %v5689_v48  ;;  %v5704_v15 = vor.u32 %v5703_v2, %v5699_v54  ;;  %v5722_v18 = vshrl.u32 %v9510_v63, 16  ;;  %v9517_v59 = vld [vmem:[%s11488_s23 + $0x10c] sm:$0xf]  ;;  %v9518_v2 = vld [vmem:[%s11488_s23 + $0x110] sm:$0xf] }
 0x16e   : > { %v5719_v16 = vrot.slane %v5717_v3, 5  ;;  %v5714_v20 = vor.u32 %v5713_v7, %v5709_v6  ;;  %v5725_v22 = vshll.u32 %v9510_v63, 16  ;;  %v5731_v23 = vshll.u32 %v9511_v4, 16 }
 0x16f   : > { %v5700_v19 = vsel %vm11524_vm4, %v5695_v5, %v5699_v54  ;;  %v5705_v25 = vrot.slane %v5704_v15, 4  ;;  %v5724_v26 = vrot.slane %v5722_v18, 4  ;;  %v5735_v27 = vshrl.u32 %v9511_v4, 16 }
 0x170   : > { %v9637_v24 = vcombine.low %v5690_v12, %v5700_v19  ;;  %v5715_v29 = vrot.slane %v5714_v20, 4  ;;  %10435 = vmatmul.mubr.msk.bf16.gmra.mrb[36].mxu1 %vm1945_vm1, %v9086_v11  ;;  %v5727_v30 = vrot.slane %v5725_v22, 5  ;;  %v5733_v31 = vrot.slane %v5731_v23, 5  ;;  %v9519_v19 = vld [vmem:[%s11488_s23 + $0x114] sm:$0x1] }
 0x171   : > { %v5741_v32 = vshll.u32 %v9512_v17, 16  ;;  %v5710_v33 = vsel %vm11524_vm4, %v5705_v25, %v5709_v6  ;;  %v5737_v10 = vrot.slane %v5735_v27, 4  ;;  %v5745_v34 = vshrl.u32 %v9512_v17, 16  ;;  %v11348_v17 = vld [vmem:[%s11488_s23 + $0xe0] sm:$0xf] }
 0x172   : > { %10698 = vmatprep.mubr.msk.bf16.mxu0 %vm1945_vm1, %v9637_v24  ;;  %v9087_v38 = vcombine.low %v11343_v35, %v11344_v37  ;;  %v5720_v40 = vsel %vm11524_vm4, %v5715_v29, %v5719_v16  ;;  %v5728_v41 = vor.u32 %v5727_v30, %v5724_v26  ;;  %v5751_v43 = vshll.u32 %v9513_v28, 16  ;;  %v11347_v16 = vld [vmem:[%s11488_s23 + $0xdc] sm:$0xf]  ;;  %v9520_v26 = vld [vmem:[%s11488_s23 + $0x118] sm:$0xf] }
 0x173   : > { %v5743_v42 = vrot.slane %v5741_v32, 5  ;;  %v9638_v45 = vcombine.low %v5710_v33, %v5720_v40  ;;  %v5738_v46 = vor.u32 %v5737_v10, %v5733_v31  ;;  %v5747_v47 = vrot.slane %v5745_v34, 4  ;;  %v11349_v34 = vld [vmem:[%s11488_s23 + $0xe4] sm:$0xf]  ;;  %v11350_v35 = vld [vmem:[%s11488_s23 + $0xe8] sm:$0xf] }
 0x174   : > { %10438 = vmatprep.mubr.msk.bf16.mxu1 %vm1945_vm1, %v9087_v38  ;;  %v5755_v48 = vshrl.u32 %v9513_v28, 16  ;;  %v5729_v50 = vrot.slane %v5728_v41, 4  ;;  %v5753_v51 = vrot.slane %v5751_v43, 5  ;;  %v5761_v52 = vshll.u32 %v9514_v39, 16 }
 0x175   : > { %v9088_v14 = vcombine.low %v11345_v53, %v11346_v13  ;;  %10699 = vmatmul.mubr.msk.bf16.gmra.mrb[40].mxu0 %vm1945_vm1, %v9638_v45  ;;  %v5739_v21 = vrot.slane %v5738_v46, 4  ;;  %v5748_v54 = vor.u32 %v5747_v47, %v5743_v42  ;;  %v5766_v56 = vshrl.u32 %v9515_v44, 16  ;;  %v9522_v45 = vld [vmem:[%s11488_s23 + $0x120] sm:$0xf] }
 0x176   : > { %v5757_v55 = vrot.slane %v5755_v48, 4  ;;  %v5734_v57 = vsel %vm11524_vm4, %v5729_v50, %v5733_v31  ;;  %v5763_v58 = vrot.slane %v5761_v52, 5  ;;  %v5769_v60 = vshll.u32 %v9515_v44, 16  ;;  %v9521_v31 = vld [vmem:[%s11488_s23 + $0x11c] sm:$0xf] }
 0x177   : > { %v5775_v61 = vshll.u32 %v9516_v49, 16  ;;  %v5744_v62 = vsel %vm11524_vm4, %v5739_v21, %v5743_v42  ;;  %v5749_v63 = vrot.slane %v5748_v54, 4  ;;  %v5768_v1 = vrot.slane %v5766_v56, 4 }
 0x178   : > { %v5758_v0 = vor.u32 %v5757_v55, %v5753_v51  ;;  %v9639_v3 = vcombine.low %v5734_v57, %v5744_v62  ;;  %10439 = vmatmul.mubr.msk.bf16.gmra.mrb[40].mxu1 %vm1945_vm1, %v9088_v14  ;;  %v5771_v4 = vrot.slane %v5769_v60, 5  ;;  %v5779_v6 = vshrl.u32 %v9516_v49, 16  ;;  %v9524_v57 = vld [vmem:[%s11488_s23 + $0x128] sm:$0x1]  ;;  %v11352_v60 = vld [vmem:[%s11488_s23 + $0xf4] sm:$0xf] }
 0x179   : > { %v5777_v5 = vrot.slane %v5775_v61, 5  ;;  %v5754_v7 = vsel %vm11524_vm4, %v5749_v63, %v5753_v51  ;;  %v5785_v9 = vshll.u32 %v9517_v59, 16  ;;  %v5789_v11 = vshrl.u32 %v9517_v59, 16  ;;  %v9523_v51 = vld [vmem:[%s11488_s23 + $0x124] sm:$0xf] }
 0x17a   : > { %v5759_v8 = vrot.slane %v5758_v0, 4  ;;  %10702 = vmatprep.mubr.msk.bf16.mxu0 %vm1945_vm1, %v9639_v3  ;;  %v5772_v12 = vor.u32 %v5771_v4, %v5768_v1  ;;  %v5781_v15 = vrot.slane %v5779_v6, 4  ;;  %v9089_v18 = vcombine.low %v11347_v16, %v11348_v17  ;;  %v11351_v59 = vld [vmem:[%s11488_s23 + $0xf0] sm:$0xf]  ;;  %v9525_v0 = vld [vmem:[%s11488_s23 + $0x12c] sm:$0xf] }
 0x17b   : > { %v5795_v20 = vshll.u32 %v9518_v2, 16  ;;  %v5787_v23 = vrot.slane %v5785_v9, 5  ;;  %v5791_v24 = vrot.slane %v5789_v11, 4  ;;  %v5799_v25 = vshrl.u32 %v9518_v2, 16  ;;  %v9526_v9 = vld [vmem:[%s11488_s23 + $0x130] sm:$0xf] }
 0x17c   : > { %v5764_v22 = vsel %vm11524_vm4, %v5759_v8, %v5763_v58  ;;  %v5773_v28 = vrot.slane %v5772_v12, 4  ;;  %v5782_v29 = vor.u32 %v5781_v15, %v5777_v5  ;;  %10442 = vmatprep.mubr.msk.bf16.mxu1 %vm1945_vm1, %v9089_v18  ;;  %v5805_v10 = vshll.u32 %v9519_v19, 16  ;;  %v11353_v15 = vld [vmem:[%s11488_s23 + $0xf8] sm:$0xf]  ;;  %v11354_v16 = vld [vmem:[%s11488_s23 + $0xfc] sm:$0xf] }
 0x17d   : > { %v9640_v27 = vcombine.low %v5754_v7, %v5764_v22  ;;  %v5797_v30 = vrot.slane %v5795_v20, 5  ;;  %v5792_v32 = vor.u32 %v5791_v24, %v5787_v23  ;;  %v5801_v33 = vrot.slane %v5799_v25, 4 }
 0x17e   : > { %v9090_v37 = vcombine.low %v11349_v34, %v11350_v35  ;;  %v5778_v38 = vsel %vm11524_vm4, %v5773_v28, %v5777_v5  ;;  %v5783_v39 = vrot.slane %v5782_v29, 4  ;;  %v5810_v40 = vshrl.u32 %v9520_v26, 16 }
 0x17f   : > { %10703 = vmatmul.mubr.msk.bf16.gmra.mrb[44].mxu0 %vm1945_vm1, %v9640_v27  ;;  %v5813_v41 = vshll.u32 %v9520_v26, 16  ;;  %v5793_v42 = vrot.slane %v5792_v32, 4  ;;  %v5802_v43 = vor.u32 %v5801_v33, %v5797_v30  ;;  %v5807_v44 = vrot.slane %v5805_v10, 5  ;;  %v9528_v33 = vld [vmem:[%s11488_s23 + $0x138] sm:$0xf] }
 0x180   : > { %v5819_v46 = vshll.u32 %v9521_v31, 16  ;;  %v5788_v47 = vsel %vm11524_vm4, %v5783_v39, %v5787_v23  ;;  %10443 = vmatmul.mubr.msk.bf16.gmra.mrb[44].mxu1 %vm1945_vm1, %v9090_v37  ;;  %v5812_v48 = vrot.slane %v5810_v40, 4  ;;  %v5823_v50 = vshrl.u32 %v9521_v31, 16  ;;  %v9527_v23 = vld [vmem:[%s11488_s23 + $0x134] sm:$0xf] }
 0x181   : > { %v5815_v49 = vrot.slane %v5813_v41, 5  ;;  %v9641_v52 = vcombine.low %v5778_v38, %v5788_v47  ;;  %v5798_v53 = vsel %vm11524_vm4, %v5793_v42, %v5797_v30  ;;  %v5803_v13 = vrot.slane %v5802_v43, 4  ;;  %v9529_v38 = vld [vmem:[%s11488_s23 + $0x13c] sm:$0x1]  ;;  %v11355_v42 = vld [vmem:[%s11488_s23 + $0x104] sm:$0xf] }
 0x182   : > { %v5821_v14 = vrot.slane %v5819_v46, 5  ;;  %v5825_v54 = vrot.slane %v5823_v50, 4  ;;  %v5829_v55 = vshll.u32 %v9522_v45, 16  ;;  %v5833_v56 = vshrl.u32 %v9522_v45, 16  ;;  %v11356_v43 = vld [vmem:[%s11488_s23 + $0x108] sm:$0xf] }
 0x183   : > { %v5816_v21 = vor.u32 %v5815_v49, %v5812_v48  ;;  %10706 = vmatprep.mubr.msk.bf16.mxu0 %vm1945_vm1, %v9641_v52  ;;  %v5808_v58 = vsel %vm11524_vm4, %v5803_v13, %v5807_v44  ;;  %v9091_v61 = vcombine.low %v11351_v59, %v11352_v60  ;;  %v5839_v62 = vshll.u32 %v9523_v51, 16  ;;  %v9530_v45 = vld [vmem:[%s11488_s23 + $0x140] sm:$0xf] }
 0x184   : > { %v5843_v63 = vshrl.u32 %v9523_v51, 16  ;;  %v9642_v1 = vcombine.low %v5798_v53, %v5808_v58  ;;  %v5826_v3 = vor.u32 %v5825_v54, %v5821_v14  ;;  %v5831_v4 = vrot.slane %v5829_v55, 5  ;;  %v11358_v54 = vld [vmem:[%s11488_s23 + $0x110] sm:$0xf] }
 0x185   : > { %v5817_v2 = vrot.slane %v5816_v21, 4  ;;  %10446 = vmatprep.mubr.msk.bf16.mxu1 %vm1945_vm1, %v9091_v61  ;;  %v5835_v5 = vrot.slane %v5833_v56, 4  ;;  %v5841_v6 = vrot.slane %v5839_v62, 5  ;;  %v5849_v8 = vshll.u32 %v9524_v57, 16  ;;  %v11357_v21 = vld [vmem:[%s11488_s23 + $0x10c] sm:$0xf] }
 0x186   : > { %v5845_v7 = vrot.slane %v5843_v63, 4  ;;  %v5827_v12 = vrot.slane %v5826_v3, 4  ;;  %v9092_v17 = vcombine.low %v11353_v15, %v11354_v16  ;;  %v5854_v18 = vshrl.u32 %v9525_v0, 16  ;;  %v9531_v56 = vld [vmem:[%s11488_s23 + $0x144] sm:$0xf] }
 0x187   : > { %10707 = vmatmul.mubr.msk.bf16.gmra.mrb[48].mxu0 %vm1945_vm1, %v9642_v1  ;;  %v5822_v11 = vsel %vm11524_vm4, %v5817_v2, %v5821_v14  ;;  %v5836_v19 = vor.u32 %v5835_v5, %v5831_v4  ;;  %v5851_v22 = vrot.slane %v5849_v8, 5  ;;  %v5857_v24 = vshll.u32 %v9525_v0, 16  ;;  %v9532_v62 = vld [vmem:[%s11488_s23 + $0x148] sm:$0xf]  ;;  %v9534_v15 = vld [vmem:[%s11488_s23 + $0x150] sm:$0x1] }
 0x188   : > { %v5846_v20 = vor.u32 %v5845_v7, %v5841_v6  ;;  %v5832_v25 = vsel %vm11524_vm4, %v5827_v12, %v5831_v4  ;;  %10447 = vmatmul.mubr.msk.bf16.gmra.mrb[48].mxu1 %vm1945_vm1, %v9092_v17  ;;  %v5856_v26 = vrot.slane %v5854_v18, 4  ;;  %v5863_v27 = vshll.u32 %v9526_v9, 16  ;;  %v9533_v7 = vld [vmem:[%s11488_s23 + $0x14c] sm:$0xf] }
 0x189   : > { %v5867_v28 = vshrl.u32 %v9526_v9, 16  ;;  %v9643_v29 = vcombine.low %v5822_v11, %v5832_v25  ;;  %v5837_v30 = vrot.slane %v5836_v19, 4  ;;  %v5859_v32 = vrot.slane %v5857_v24, 5  ;;  %v11359_v19 = vld [vmem:[%s11488_s23 + $0x118] sm:$0xf] }
 0x18a   : > { %v5847_v31 = vrot.slane %v5846_v20, 4  ;;  %v5865_v10 = vrot.slane %v5863_v27, 5  ;;  %v5873_v35 = vshll.u32 %v9527_v23, 16  ;;  %v5877_v37 = vshrl.u32 %v9527_v23, 16  ;;  %v11360_v20 = vld [vmem:[%s11488_s23 + $0x11c] sm:$0xf] }
 0x18b   : > { %v5869_v34 = vrot.slane %v5867_v28, 4  ;;  %10710 = vmatprep.mubr.msk.bf16.mxu0 %vm1945_vm1, %v9643_v29  ;;  %v5842_v39 = vsel %vm11524_vm4, %v5837_v30, %v5841_v6  ;;  %v5860_v41 = vor.u32 %v5859_v32, %v5856_v26  ;;  %v9093_v44 = vcombine.low %v11355_v42, %v11356_v43 }
 0x18c   : > { %v5852_v40 = vsel %vm11524_vm4, %v5847_v31, %v5851_v22  ;;  %v5875_v48 = vrot.slane %v5873_v35, 5  ;;  %v5879_v49 = vrot.slane %v5877_v37, 4  ;;  %v5883_v51 = vshll.u32 %v9528_v33, 16  ;;  %v9535_v31 = vld [vmem:[%s11488_s23 + $0x154] sm:$0xf] }
 0x18d   : > { %v9644_v46 = vcombine.low %v5842_v39, %v5852_v40  ;;  %v5870_v47 = vor.u32 %v5869_v34, %v5865_v10  ;;  %v5861_v50 = vrot.slane %v5860_v41, 4  ;;  %10450 = vmatprep.mubr.msk.bf16.mxu1 %vm1945_vm1, %v9093_v44  ;;  %v5887_v52 = vshrl.u32 %v9528_v33, 16  ;;  %v9536_v35 = vld [vmem:[%s11488_s23 + $0x158] sm:$0xf]  ;;  %v11361_v40 = vld [vmem:[%s11488_s23 + $0x120] sm:$0xf] }
 0x18e   : > { %v5893_v53 = vshll.u32 %v9529_v38, 16  ;;  %v5880_v14 = vor.u32 %v5879_v49, %v5875_v48  ;;  %v9094_v55 = vcombine.low %v11357_v21, %v11358_v54  ;;  %v5898_v57 = vshrl.u32 %v9530_v45, 16  ;;  %v11362_v41 = vld [vmem:[%s11488_s23 + $0x124] sm:$0xf] }
 0x18f   : > { %10711 = vmatmul.mubr.msk.bf16.gmra.mrb[52].mxu0 %vm1945_vm1, %v9644_v46  ;;  %v5871_v13 = vrot.slane %v5870_v47, 4  ;;  %v5866_v58 = vsel %vm11524_vm4, %v5861_v50, %v5865_v10  ;;  %v5885_v59 = vrot.slane %v5883_v51, 5  ;;  %v5889_v60 = vrot.slane %v5887_v52, 4  ;;  %v9538_v52 = vld [vmem:[%s11488_s23 + $0x160] sm:$0xf] }
 0x190   : > { %v5895_v61 = vrot.slane %v5893_v53, 5  ;;  %v5881_v0 = vrot.slane %v5880_v14, 4  ;;  %10451 = vmatmul.mubr.msk.bf16.gmra.mrb[52].mxu1 %vm1945_vm1, %v9094_v55  ;;  %v5900_v1 = vrot.slane %v5898_v57, 4  ;;  %v5901_v2 = vshll.u32 %v9530_v45, 16  ;;  %v9537_v45 = vld [vmem:[%s11488_s23 + $0x15c] sm:$0xf] }
 0x191   : > { %v5876_v63 = vsel %vm11524_vm4, %v5871_v13, %v5875_v48  ;;  %v5890_v4 = vor.u32 %v5889_v60, %v5885_v59  ;;  %v5907_v5 = vshll.u32 %v9531_v56, 16  ;;  %v5911_v6 = vshrl.u32 %v9531_v56, 16  ;;  %v11363_v60 = vld [vmem:[%s11488_s23 + $0x12c] sm:$0xf] }
 0x192   : > { %v9645_v3 = vcombine.low %v5866_v58, %v5876_v63  ;;  %v5886_v8 = vsel %vm11524_vm4, %v5881_v0, %v5885_v59  ;;  %v5903_v9 = vrot.slane %v5901_v2, 5  ;;  %v5917_v11 = vshll.u32 %v9532_v62, 16  ;;  %v9539_v63 = vld [vmem:[%s11488_s23 + $0x164] sm:$0x1] }
 0x193   : > { %v5921_v12 = vshrl.u32 %v9532_v62, 16  ;;  %v5891_v16 = vrot.slane %v5890_v4, 4  ;;  %v5909_v17 = vrot.slane %v5907_v5, 5  ;;  %v5913_v18 = vrot.slane %v5911_v6, 4  ;;  %v9540_v5 = vld [vmem:[%s11488_s23 + $0x168] sm:$0xf] }
 0x194   : > { %10714 = vmatprep.mubr.msk.bf16.mxu0 %vm1945_vm1, %v9645_v3  ;;  %v9095_v22 = vcombine.low %v11359_v19, %v11360_v20  ;;  %v5904_v23 = vor.u32 %v5903_v9, %v5900_v1  ;;  %v5919_v24 = vrot.slane %v5917_v11, 5  ;;  %v5927_v26 = vshll.u32 %v9533_v7, 16  ;;  %v9541_v11 = vld [vmem:[%s11488_s23 + $0x16c] sm:$0xf] }
 0x195   : > { %v5923_v25 = vrot.slane %v5921_v12, 4  ;;  %v5896_v27 = vsel %vm11524_vm4, %v5891_v16, %v5895_v61  ;;  %v5914_v28 = vor.u32 %v5913_v18, %v5909_v17  ;;  %v5931_v29 = vshrl.u32 %v9533_v7, 16  ;;  %v11364_v61 = vld [vmem:[%s11488_s23 + $0x130] sm:$0xf]  ;;  %v11366_v18 = vld [vmem:[%s11488_s23 + $0x138] sm:$0xf] }
 0x196   : > { %10454 = vmatprep.mubr.msk.bf16.mxu1 %vm1945_vm1, %v9095_v22  ;;  %v5937_v30 = vshll.u32 %v9534_v15, 16  ;;  %v9646_v32 = vcombine.low %v5886_v8, %v5896_v27  ;;  %v5905_v33 = vrot.slane %v5904_v23, 4  ;;  %v5929_v34 = vrot.slane %v5927_v26, 5  ;;  %v9542_v23 = vld [vmem:[%s11488_s23 + $0x170] sm:$0xf] }
 0x197   : > { %v5924_v10 = vor.u32 %v5923_v25, %v5919_v24  ;;  %v5915_v37 = vrot.slane %v5914_v28, 4  ;;  %v5933_v38 = vrot.slane %v5931_v29, 4  ;;  %v9096_v42 = vcombine.low %v11361_v40, %v11362_v41 }
 0x198   : > { %v5939_v39 = vrot.slane %v5937_v30, 5  ;;  %10715 = vmatmul.mubr.msk.bf16.gmra.mrb[56].mxu0 %vm1945_vm1, %v9646_v32  ;;  %v5910_v43 = vsel %vm11524_vm4, %v5905_v33, %v5909_v17  ;;  %v5942_v46 = vshrl.u32 %v9535_v31, 16  ;;  %v5945_v47 = vshll.u32 %v9535_v31, 16  ;;  %v11365_v17 = vld [vmem:[%s11488_s23 + $0x134] sm:$0xf] }
 0x199   : > { %v5925_v44 = vrot.slane %v5924_v10, 4  ;;  %v5920_v48 = vsel %vm11524_vm4, %v5915_v37, %v5919_v24  ;;  %v5934_v49 = vor.u32 %v5933_v38, %v5929_v34  ;;  %10455 = vmatmul.mubr.msk.bf16.gmra.mrb[56].mxu1 %vm1945_vm1, %v9096_v42  ;;  %v5951_v50 = vshll.u32 %v9536_v35, 16  ;;  %v9543_v10 = vld [vmem:[%s11488_s23 + $0x174] sm:$0xf]  ;;  %v11367_v42 = vld [vmem:[%s11488_s23 + $0x140] sm:$0xf] }
 0x19a   : > { %v5955_v51 = vshrl.u32 %v9536_v35, 16  ;;  %v9647_v53 = vcombine.low %v5910_v43, %v5920_v48  ;;  %v5944_v14 = vrot.slane %v5942_v46, 4  ;;  %v5947_v21 = vrot.slane %v5945_v47, 5  ;;  %v11368_v43 = vld [vmem:[%s11488_s23 + $0x144] sm:$0xf] }
 0x19b   : > { %v5930_v13 = vsel %vm11524_vm4, %v5925_v44, %v5929_v34  ;;  %v5935_v54 = vrot.slane %v5934_v49, 4  ;;  %v5953_v55 = vrot.slane %v5951_v50, 5  ;;  %v5961_v57 = vshll.u32 %v9537_v45, 16  ;;  %v9545_v50 = vld [vmem:[%s11488_s23 + $0x17c] sm:$0xf] }
 0x19c   : > { %v5957_v56 = vrot.slane %v5955_v51, 4  ;;  %10718 = vmatprep.mubr.msk.bf16.mxu0 %vm1945_vm1, %v9647_v53  ;;  %v5948_v58 = vor.u32 %v5947_v21, %v5944_v14  ;;  %v5965_v59 = vshrl.u32 %v9537_v45, 16  ;;  %v9097_v62 = vcombine.low %v11363_v60, %v11364_v61  ;;  %v9544_v45 = vld [vmem:[%s11488_s23 + $0x178] sm:$0x1]  ;;  %v9546_v14 = vld [vmem:[%s11488_s23 + $0x180] sm:$0xf] }
 0x19d   : > { %v5971_v0 = vshll.u32 %v9538_v52, 16  ;;  %v5940_v1 = vsel %vm11524_vm4, %v5935_v54, %v5939_v39  ;;  %v5963_v3 = vrot.slane %v5961_v57, 5  ;;  %v5975_v4 = vshrl.u32 %v9538_v52, 16  ;;  %v11370_v57 = vld [vmem:[%s11488_s23 + $0x14c] sm:$0xf] }
 0x19e   : > { %v5958_v2 = vor.u32 %v5957_v56, %v5953_v55  ;;  %v9648_v6 = vcombine.low %v5930_v13, %v5940_v1  ;;  %v5949_v7 = vrot.slane %v5948_v58, 4  ;;  %10458 = vmatprep.mubr.msk.bf16.mxu1 %vm1945_vm1, %v9097_v62  ;;  %v5967_v8 = vrot.slane %v5965_v59, 4  ;;  %v11369_v56 = vld [vmem:[%s11488_s23 + $0x148] sm:$0xf]  ;;  %v9547_v62 = vld [vmem:[%s11488_s23 + $0x184] sm:$0xf] }
 0x19f   : > { %v5973_v9 = vrot.slane %v5971_v0, 5  ;;  %v5977_v15 = vrot.slane %v5975_v4, 4  ;;  %v5981_v16 = vshll.u32 %v9539_v63, 16  ;;  %v9098_v19 = vcombine.low %v11365_v17, %v11366_v18 }
 0x1a0   : > { %v5959_v12 = vrot.slane %v5958_v2, 4  ;;  %10719 = vmatmul.mubr.msk.bf16.gmra.mrb[60].mxu0 %vm1945_vm1, %v9648_v6  ;;  %v5954_v20 = vsel %vm11524_vm4, %v5949_v7, %v5953_v55  ;;  %v5968_v22 = vor.u32 %v5967_v8, %v5963_v3  ;;  %v5986_v24 = vshrl.u32 %v9540_v5, 16 }
 0x1a1   : > { %v5989_v25 = vshll.u32 %v9540_v5, 16  ;;  %v5978_v27 = vor.u32 %v5977_v15, %v5973_v9  ;;  %v5983_v28 = vrot.slane %v5981_v16, 5  ;;  %10459 = vmatmul.mubr.msk.bf16.gmra.mrb[60].mxu1 %vm1945_vm1, %v9098_v19  ;;  %v5995_v29 = vshll.u32 %v9541_v11, 16  ;;  %v9548_v15 = vld [vmem:[%s11488_s23 + $0x188] sm:$0xf] }
 0x1a2   : > { %v5964_v26 = vsel %vm11524_vm4, %v5959_v12, %v5963_v3  ;;  %v5969_v31 = vrot.slane %v5968_v22, 4  ;;  %v5988_v32 = vrot.slane %v5986_v24, 4  ;;  %v5999_v37 = vshrl.u32 %v9541_v11, 16 }
 0x1a3   : > { %v9649_v30 = vcombine.low %v5954_v20, %v5964_v26  ;;  %v5991_v33 = vrot.slane %v5989_v25, 5  ;;  %v5979_v34 = vrot.slane %v5978_v27, 4  ;;  %v5997_v35 = vrot.slane %v5995_v29, 5  ;;  %v9549_v20 = vld [vmem:[%s11488_s23 + $0x18c] sm:$0x1] }
 0x1a4   : > { %v6005_v38 = vshll.u32 %v9542_v23, 16  ;;  %v5974_v39 = vsel %vm11524_vm4, %v5969_v31, %v5973_v9  ;;  %v6009_v41 = vshrl.u32 %v9542_v23, 16  ;;  %v9099_v44 = vcombine.low %v11367_v42, %v11368_v43  ;;  %v11371_v25 = vld [vmem:[%s11488_s23 + $0x154] sm:$0xf]  ;;  %v11372_v26 = vld [vmem:[%s11488_s23 + $0x158] sm:$0xf] }
 0x1a5   : > { %10722 = vmatprep.mubr.msk.bf16.mxu0 %vm1945_vm1, %v9649_v30  ;;  %v5992_v40 = vor.u32 %v5991_v33, %v5988_v32  ;;  %v5984_v46 = vsel %vm11524_vm4, %v5979_v34, %v5983_v28  ;;  %v6001_v47 = vrot.slane %v5999_v37, 4  ;;  %v6015_v49 = vshll.u32 %v9543_v10, 16  ;;  %v9550_v32 = vld [vmem:[%s11488_s23 + $0x190] sm:$0xf]  ;;  %v9551_v37 = vld [vmem:[%s11488_s23 + $0x194] sm:$0xf] }
 0x1a6   : > { %v6007_v48 = vrot.slane %v6005_v38, 5  ;;  %v9650_v51 = vcombine.low %v5974_v39, %v5984_v46  ;;  %10462 = vmatprep.mubr.msk.bf16.mxu1 %vm1945_vm1, %v9099_v44  ;;  %v6011_v53 = vrot.slane %v6009_v41, 4  ;;  %v6019_v13 = vshrl.u32 %v9543_v10, 16  ;;  %v11373_v41 = vld [vmem:[%s11488_s23 + $0x15c] sm:$0xf] }
 0x1a7   : > { %v5993_v52 = vrot.slane %v5992_v40, 4  ;;  %v6002_v21 = vor.u32 %v6001_v47, %v5997_v35  ;;  %v6017_v54 = vrot.slane %v6015_v49, 5  ;;  %v6025_v55 = vshll.u32 %v9544_v45, 16  ;;  %v11374_v42 = vld [vmem:[%s11488_s23 + $0x160] sm:$0xf] }
 0x1a8   : > { %v9100_v58 = vcombine.low %v11369_v56, %v11370_v57  ;;  %10723 = vmatmul.mubr.msk.bf16.gmra.mrb[64].mxu0 %vm1945_vm1, %v9650_v51  ;;  %v6012_v60 = vor.u32 %v6011_v53, %v6007_v48  ;;  %v6021_v61 = vrot.slane %v6019_v13, 4  ;;  %v6030_v63 = vshrl.u32 %v9545_v50, 16  ;;  %v9552_v47 = vld [vmem:[%s11488_s23 + $0x198] sm:$0xf] }
 0x1a9   : > { %v5998_v59 = vsel %vm11524_vm4, %v5993_v52, %v5997_v35  ;;  %v6003_v0 = vrot.slane %v6002_v21, 4  ;;  %v6027_v1 = vrot.slane %v6025_v55, 5  ;;  %v6033_v2 = vshll.u32 %v9545_v50, 16 }
 0x1aa   : > { %10463 = vmatmul.mubr.msk.bf16.gmra.mrb[64].mxu1 %vm1945_vm1, %v9100_v58  ;;  %v6039_v3 = vshll.u32 %v9546_v14, 16  ;;  %v6013_v4 = vrot.slane %v6012_v60, 4  ;;  %v6022_v5 = vor.u32 %v6021_v61, %v6017_v54  ;;  %v6032_v6 = vrot.slane %v6030_v63, 4  ;;  %v11376_v63 = vld [vmem:[%s11488_s23 + $0x16c] sm:$0xf] }
 0x1ab   : > { %v6043_v7 = vshrl.u32 %v9546_v14, 16  ;;  %v6008_v8 = vsel %vm11524_vm4, %v6003_v0, %v6007_v48  ;;  %v6035_v9 = vrot.slane %v6033_v2, 5  ;;  %v6049_v12 = vshll.u32 %v9547_v62, 16 }
 0x1ac   : > { %v6041_v11 = vrot.slane %v6039_v3, 5  ;;  %v9651_v16 = vcombine.low %v5998_v59, %v6008_v8  ;;  %v6018_v17 = vsel %vm11524_vm4, %v6013_v4, %v6017_v54  ;;  %v6023_v18 = vrot.slane %v6022_v5, 4  ;;  %v9553_v54 = vld [vmem:[%s11488_s23 + $0x19c] sm:$0xf] }
 0x1ad   : > { %v6045_v19 = vrot.slane %v6043_v7, 4  ;;  %v6036_v22 = vor.u32 %v6035_v9, %v6032_v6  ;;  %v6051_v23 = vrot.slane %v6049_v12, 5  ;;  %v6053_v24 = vshrl.u32 %v9547_v62, 16  ;;  %v11375_v62 = vld [vmem:[%s11488_s23 + $0x168] sm:$0xf] }
 0x1ae   : > { %v9101_v27 = vcombine.low %v11371_v25, %v11372_v26  ;;  %10726 = vmatprep.mubr.msk.bf16.mxu0 %vm1945_vm1, %v9651_v16  ;;  %v6028_v28 = vsel %vm11524_vm4, %v6023_v18, %v6027_v1  ;;  %v6059_v30 = vshll.u32 %v9548_v15, 16  ;;  %v6063_v31 = vshrl.u32 %v9548_v15, 16  ;;  %v9554_v1 = vld [vmem:[%s11488_s23 + $0x1a0] sm:$0x1]  ;;  %v9555_v6 = vld [vmem:[%s11488_s23 + $0x1a4] sm:$0xf] }
 0x1af   : > { %v6046_v29 = vor.u32 %v6045_v19, %v6041_v11  ;;  %v9652_v33 = vcombine.low %v6018_v17, %v6028_v28  ;;  %v6037_v10 = vrot.slane %v6036_v22, 4  ;;  %v6055_v34 = vrot.slane %v6053_v24, 4  ;;  %v9556_v12 = vld [vmem:[%s11488_s23 + $0x1a8] sm:$0xf]  ;;  %v11377_v18 = vld [vmem:[%s11488_s23 + $0x170] sm:$0xf] }
 0x1b0   : > { %10466 = vmatprep.mubr.msk.bf16.mxu1 %vm1945_vm1, %v9101_v27  ;;  %v6069_v35 = vshll.u32 %v9549_v20, 16  ;;  %v6061_v39 = vrot.slane %v6059_v30, 5  ;;  %v6065_v40 = vrot.slane %v6063_v31, 4  ;;  %v9102_v43 = vcombine.low %v11373_v41, %v11374_v42  ;;  %v11378_v19 = vld [vmem:[%s11488_s23 + $0x174] sm:$0xf] }
 0x1b1   : > { %v6047_v38 = vrot.slane %v6046_v29, 4  ;;  %10727 = vmatmul.mubr.msk.bf16.gmra.mrb[68].mxu0 %vm1945_vm1, %v9652_v33  ;;  %v6042_v44 = vsel %vm11524_vm4, %v6037_v10, %v6041_v11  ;;  %v6056_v45 = vor.u32 %v6055_v34, %v6051_v23  ;;  %v6074_v48 = vshrl.u32 %v9550_v32, 16  ;;  %v9557_v28 = vld [vmem:[%s11488_s23 + $0x1ac] sm:$0xf]  ;;  %v9558_v34 = vld [vmem:[%s11488_s23 + $0x1b0] sm:$0xf] }
 0x1b2   : > { %v6071_v46 = vrot.slane %v6069_v35, 5  ;;  %v6066_v50 = vor.u32 %v6065_v40, %v6061_v39  ;;  %10467 = vmatmul.mubr.msk.bf16.gmra.mrb[68].mxu1 %vm1945_vm1, %v9102_v43  ;;  %v6077_v51 = vshll.u32 %v9550_v32, 16  ;;  %v6083_v52 = vshll.u32 %v9551_v37, 16 }
 0x1b3   : > { %v6052_v49 = vsel %vm11524_vm4, %v6047_v38, %v6051_v23  ;;  %v6057_v13 = vrot.slane %v6056_v45, 4  ;;  %v6076_v14 = vrot.slane %v6074_v48, 4  ;;  %v6087_v21 = vshrl.u32 %v9551_v37, 16 }
 0x1b4   : > { %v9653_v53 = vcombine.low %v6042_v44, %v6052_v49  ;;  %v6067_v55 = vrot.slane %v6066_v50, 4  ;;  %v6079_v56 = vrot.slane %v6077_v51, 5  ;;  %v6085_v57 = vrot.slane %v6083_v52, 5  ;;  %v9559_v49 = vld [vmem:[%s11488_s23 + $0x1b4] sm:$0x1] }
 0x1b5   : > { %v6093_v58 = vshll.u32 %v9552_v47, 16  ;;  %v6062_v59 = vsel %vm11524_vm4, %v6057_v13, %v6061_v39  ;;  %v6089_v60 = vrot.slane %v6087_v21, 4  ;;  %v6097_v61 = vshrl.u32 %v9552_v47, 16  ;;  %v11380_v47 = vld [vmem:[%s11488_s23 + $0x180] sm:$0xf] }
 0x1b6   : > { %10730 = vmatprep.mubr.msk.bf16.mxu0 %vm1945_vm1, %v9653_v53  ;;  %v9103_v0 = vcombine.low %v11375_v62, %v11376_v63  ;;  %v6072_v2 = vsel %vm11524_vm4, %v6067_v55, %v6071_v46  ;;  %v6080_v3 = vor.u32 %v6079_v56, %v6076_v14  ;;  %v6103_v5 = vshll.u32 %v9553_v54, 16  ;;  %v11379_v46 = vld [vmem:[%s11488_s23 + $0x17c] sm:$0xf]  ;;  %v9560_v14 = vld [vmem:[%s11488_s23 + $0x1b8] sm:$0xf] }
 0x1b7   : > { %v6095_v4 = vrot.slane %v6093_v58, 5  ;;  %v9654_v7 = vcombine.low %v6062_v59, %v6072_v2  ;;  %v6090_v8 = vor.u32 %v6089_v60, %v6085_v57  ;;  %v6099_v9 = vrot.slane %v6097_v61, 4  ;;  %v11381_v61 = vld [vmem:[%s11488_s23 + $0x184] sm:$0xf]  ;;  %v11382_v62 = vld [vmem:[%s11488_s23 + $0x188] sm:$0xf] }
 0x1b8   : > { %10470 = vmatprep.mubr.msk.bf16.mxu1 %vm1945_vm1, %v9103_v0  ;;  %v6107_v11 = vshrl.u32 %v9553_v54, 16  ;;  %v6081_v15 = vrot.slane %v6080_v3, 4  ;;  %v6105_v16 = vrot.slane %v6103_v5, 5  ;;  %v6113_v17 = vshll.u32 %v9554_v1, 16 }
 0x1b9   : > { %v9104_v20 = vcombine.low %v11377_v18, %v11378_v19  ;;  %10731 = vmatmul.mubr.msk.bf16.gmra.mrb[72].mxu0 %vm1945_vm1, %v9654_v7  ;;  %v6091_v22 = vrot.slane %v6090_v8, 4  ;;  %v6100_v23 = vor.u32 %v6099_v9, %v6095_v4  ;;  %v6118_v25 = vshrl.u32 %v9555_v6, 16  ;;  %v9562_v7 = vld [vmem:[%s11488_s23 + $0x1c0] sm:$0xf] }
 0x1ba   : > { %v6109_v24 = vrot.slane %v6107_v11, 4  ;;  %v6086_v26 = vsel %vm11524_vm4, %v6081_v15, %v6085_v57  ;;  %v6115_v27 = vrot.slane %v6113_v17, 5  ;;  %v6121_v29 = vshll.u32 %v9555_v6, 16  ;;  %v9561_v57 = vld [vmem:[%s11488_s23 + $0x1bc] sm:$0xf] }
 0x1bb   : > { %10471 = vmatmul.mubr.msk.bf16.gmra.mrb[72].mxu1 %vm1945_vm1, %v9104_v20  ;;  %v6127_v30 = vshll.u32 %v9556_v12, 16  ;;  %v6096_v31 = vsel %vm11524_vm4, %v6091_v22, %v6095_v4  ;;  %v6101_v32 = vrot.slane %v6100_v23, 4  ;;  %v6120_v10 = vrot.slane %v6118_v25, 4 }
 0x1bc   : > { %v6110_v33 = vor.u32 %v6109_v24, %v6105_v16  ;;  %v9655_v35 = vcombine.low %v6086_v26, %v6096_v31  ;;  %v6123_v37 = vrot.slane %v6121_v29, 5  ;;  %v6131_v39 = vshrl.u32 %v9556_v12, 16  ;;  %v9564_v26 = vld [vmem:[%s11488_s23 + $0x1c8] sm:$0x1]  ;;  %v11384_v29 = vld [vmem:[%s11488_s23 + $0x194] sm:$0xf] }
 0x1bd   : > { %v6129_v38 = vrot.slane %v6127_v30, 5  ;;  %v6106_v40 = vsel %vm11524_vm4, %v6101_v32, %v6105_v16  ;;  %v6137_v42 = vshll.u32 %v9557_v28, 16  ;;  %v6141_v43 = vshrl.u32 %v9557_v28, 16  ;;  %v9563_v16 = vld [vmem:[%s11488_s23 + $0x1c4] sm:$0xf] }
 0x1be   : > { %v6111_v41 = vrot.slane %v6110_v33, 4  ;;  %10734 = vmatprep.mubr.msk.bf16.mxu0 %vm1945_vm1, %v9655_v35  ;;  %v6124_v44 = vor.u32 %v6123_v37, %v6120_v10  ;;  %v6133_v45 = vrot.slane %v6131_v39, 4  ;;  %v9105_v48 = vcombine.low %v11379_v46, %v11380_v47  ;;  %v11383_v28 = vld [vmem:[%s11488_s23 + $0x190] sm:$0xf]  ;;  %v9565_v33 = vld [vmem:[%s11488_s23 + $0x1cc] sm:$0xf] }
 0x1bf   : > { %v6147_v50 = vshll.u32 %v9558_v34, 16  ;;  %v6139_v52 = vrot.slane %v6137_v42, 5  ;;  %v6143_v53 = vrot.slane %v6141_v43, 4  ;;  %v6151_v13 = vshrl.u32 %v9558_v34, 16  ;;  %v9566_v42 = vld [vmem:[%s11488_s23 + $0x1d0] sm:$0xf] }
 0x1c0   : > { %v6116_v51 = vsel %vm11524_vm4, %v6111_v41, %v6115_v27  ;;  %v6125_v54 = vrot.slane %v6124_v44, 4  ;;  %v6134_v55 = vor.u32 %v6133_v45, %v6129_v38  ;;  %10474 = vmatprep.mubr.msk.bf16.mxu1 %vm1945_vm1, %v9105_v48  ;;  %v6157_v60 = vshll.u32 %v9559_v49, 16  ;;  %v11385_v45 = vld [vmem:[%s11488_s23 + $0x198] sm:$0xf]  ;;  %v11386_v46 = vld [vmem:[%s11488_s23 + $0x19c] sm:$0xf] }
 0x1c1   : > { %v9656_v21 = vcombine.low %v6106_v40, %v6116_v51  ;;  %v6149_v56 = vrot.slane %v6147_v50, 5  ;;  %v6144_v58 = vor.u32 %v6143_v53, %v6139_v52  ;;  %v6153_v59 = vrot.slane %v6151_v13, 4 }
 0x1c2   : > { %v9106_v63 = vcombine.low %v11381_v61, %v11382_v62  ;;  %v6130_v0 = vsel %vm11524_vm4, %v6125_v54, %v6129_v38  ;;  %v6135_v1 = vrot.slane %v6134_v55, 4  ;;  %v6162_v2 = vshrl.u32 %v9560_v14, 16 }
 0x1c3   : > { %10735 = vmatmul.mubr.msk.bf16.gmra.mrb[76].mxu0 %vm1945_vm1, %v9656_v21  ;;  %v6165_v3 = vshll.u32 %v9560_v14, 16  ;;  %v6145_v4 = vrot.slane %v6144_v58, 4  ;;  %v6154_v5 = vor.u32 %v6153_v59, %v6149_v56  ;;  %v6159_v6 = vrot.slane %v6157_v60, 5  ;;  %v9568_v59 = vld [vmem:[%s11488_s23 + $0x1d8] sm:$0xf] }
 0x1c4   : > { %10475 = vmatmul.mubr.msk.bf16.gmra.mrb[76].mxu1 %vm1945_vm1, %v9106_v63  ;;  %v6171_v8 = vshll.u32 %v9561_v57, 16  ;;  %v6140_v9 = vsel %vm11524_vm4, %v6135_v1, %v6139_v52  ;;  %v6164_v11 = vrot.slane %v6162_v2, 4  ;;  %v6175_v15 = vshrl.u32 %v9561_v57, 16  ;;  %v9567_v52 = vld [vmem:[%s11488_s23 + $0x1d4] sm:$0xf] }
 0x1c5   : > { %v6167_v12 = vrot.slane %v6165_v3, 5  ;;  %v9657_v17 = vcombine.low %v6130_v0, %v6140_v9  ;;  %v6150_v18 = vsel %vm11524_vm4, %v6145_v4, %v6149_v56  ;;  %v6155_v19 = vrot.slane %v6154_v5, 4  ;;  %v9569_v0 = vld [vmem:[%s11488_s23 + $0x1dc] sm:$0x1]  ;;  %v11387_v4 = vld [vmem:[%s11488_s23 + $0x1a4] sm:$0xf] }
 0x1c6   : > { %v6173_v20 = vrot.slane %v6171_v8, 5  ;;  %v6177_v23 = vrot.slane %v6175_v15, 4  ;;  %v6181_v24 = vshll.u32 %v9562_v7, 16  ;;  %v6185_v25 = vshrl.u32 %v9562_v7, 16  ;;  %v11388_v5 = vld [vmem:[%s11488_s23 + $0x1a8] sm:$0xf] }
 0x1c7   : > { %v6168_v22 = vor.u32 %v6167_v12, %v6164_v11  ;;  %10738 = vmatprep.mubr.msk.bf16.mxu0 %vm1945_vm1, %v9657_v17  ;;  %v6160_v27 = vsel %vm11524_vm4, %v6155_v19, %v6159_v6  ;;  %v9107_v30 = vcombine.low %v11383_v28, %v11384_v29  ;;  %v6191_v31 = vshll.u32 %v9563_v16, 16  ;;  %v9570_v7 = vld [vmem:[%s11488_s23 + $0x1e0] sm:$0xf] }
 0x1c8   : > { %v6195_v32 = vshrl.u32 %v9563_v16, 16  ;;  %v9658_v10 = vcombine.low %v6150_v18, %v6160_v27  ;;  %v6178_v35 = vor.u32 %v6177_v23, %v6173_v20  ;;  %v6183_v37 = vrot.slane %v6181_v24, 5  ;;  %v11390_v23 = vld [vmem:[%s11488_s23 + $0x1b0] sm:$0xf] }
 0x1c9   : > { %v6169_v34 = vrot.slane %v6168_v22, 4  ;;  %10478 = vmatprep.mubr.msk.bf16.mxu1 %vm1945_vm1, %v9107_v30  ;;  %v6187_v38 = vrot.slane %v6185_v25, 4  ;;  %v6193_v39 = vrot.slane %v6191_v31, 5  ;;  %v6201_v41 = vshll.u32 %v9564_v26, 16  ;;  %v11389_v22 = vld [vmem:[%s11488_s23 + $0x1ac] sm:$0xf] }
 0x1ca   : > { %v6197_v40 = vrot.slane %v6195_v32, 4  ;;  %v6179_v44 = vrot.slane %v6178_v35, 4  ;;  %v9108_v47 = vcombine.low %v11385_v45, %v11386_v46  ;;  %v6206_v48 = vshrl.u32 %v9565_v33, 16  ;;  %v9571_v25 = vld [vmem:[%s11488_s23 + $0x1e4] sm:$0xf] }
 0x1cb   : > { %10739 = vmatmul.mubr.msk.bf16.gmra.mrb[80].mxu0 %vm1945_vm1, %v9658_v10  ;;  %v6174_v43 = vsel %vm11524_vm4, %v6169_v34, %v6173_v20  ;;  %v6188_v49 = vor.u32 %v6187_v38, %v6183_v37  ;;  %v6203_v51 = vrot.slane %v6201_v41, 5  ;;  %v6209_v53 = vshll.u32 %v9565_v33, 16  ;;  %v9572_v31 = vld [vmem:[%s11488_s23 + $0x1e8] sm:$0xf]  ;;  %v9574_v45 = vld [vmem:[%s11488_s23 + $0x1f0] sm:$0x1] }
 0x1cc   : > { %v6198_v50 = vor.u32 %v6197_v40, %v6193_v39  ;;  %v6184_v13 = vsel %vm11524_vm4, %v6179_v44, %v6183_v37  ;;  %10479 = vmatmul.mubr.msk.bf16.gmra.mrb[80].mxu1 %vm1945_vm1, %v9108_v47  ;;  %v6208_v14 = vrot.slane %v6206_v48, 4  ;;  %v6215_v21 = vshll.u32 %v9566_v42, 16  ;;  %v9573_v40 = vld [vmem:[%s11488_s23 + $0x1ec] sm:$0xf] }
 0x1cd   : > { %v6219_v54 = vshrl.u32 %v9566_v42, 16  ;;  %v9659_v55 = vcombine.low %v6174_v43, %v6184_v13  ;;  %v6189_v56 = vrot.slane %v6188_v49, 4  ;;  %v6211_v58 = vrot.slane %v6209_v53, 5  ;;  %v11391_v49 = vld [vmem:[%s11488_s23 + $0x1b8] sm:$0xf] }
 0x1ce   : > { %v6199_v57 = vrot.slane %v6198_v50, 4  ;;  %v6217_v60 = vrot.slane %v6215_v21, 5  ;;  %v6225_v62 = vshll.u32 %v9567_v52, 16  ;;  %v6229_v63 = vshrl.u32 %v9567_v52, 16  ;;  %v11392_v50 = vld [vmem:[%s11488_s23 + $0x1bc] sm:$0xf] }
 0x1cf   : > { %v6221_v61 = vrot.slane %v6219_v54, 4  ;;  %10742 = vmatprep.mubr.msk.bf16.mxu0 %vm1945_vm1, %v9659_v55  ;;  %v6194_v1 = vsel %vm11524_vm4, %v6189_v56, %v6193_v39  ;;  %v6212_v3 = vor.u32 %v6211_v58, %v6208_v14  ;;  %v9109_v6 = vcombine.low %v11387_v4, %v11388_v5 }
 0x1d0   : > { %v6204_v2 = vsel %vm11524_vm4, %v6199_v57, %v6203_v51  ;;  %v6227_v11 = vrot.slane %v6225_v62, 5  ;;  %v6231_v12 = vrot.slane %v6229_v63, 4  ;;  %v6235_v16 = vshll.u32 %v9568_v59, 16  ;;  %v9575_v57 = vld [vmem:[%s11488_s23 + $0x1f4] sm:$0xf] }
 0x1d1   : > { %v9660_v8 = vcombine.low %v6194_v1, %v6204_v2  ;;  %v6222_v9 = vor.u32 %v6221_v61, %v6217_v60  ;;  %v6213_v15 = vrot.slane %v6212_v3, 4  ;;  %10482 = vmatprep.mubr.msk.bf16.mxu1 %vm1945_vm1, %v9109_v6  ;;  %v6239_v17 = vshrl.u32 %v9568_v59, 16  ;;  %v9576_v62 = vld [vmem:[%s11488_s23 + $0x1f8] sm:$0xf]  ;;  %v11393_v2 = vld [vmem:[%s11488_s23 + $0x1c0] sm:$0xf] }
 0x1d2   : > { %v6245_v18 = vshll.u32 %v9569_v0, 16  ;;  %v6232_v20 = vor.u32 %v6231_v12, %v6227_v11  ;;  %v9110_v24 = vcombine.low %v11389_v22, %v11390_v23  ;;  %v6250_v26 = vshrl.u32 %v9570_v7, 16  ;;  %v11394_v3 = vld [vmem:[%s11488_s23 + $0x1c4] sm:$0xf] }
 0x1d3   : > { %10743 = vmatmul.mubr.msk.bf16.gmra.mrb[84].mxu0 %vm1945_vm1, %v9660_v8  ;;  %v6223_v19 = vrot.slane %v6222_v9, 4  ;;  %v6218_v27 = vsel %vm11524_vm4, %v6213_v15, %v6217_v60  ;;  %v6237_v28 = vrot.slane %v6235_v16, 5  ;;  %v6241_v29 = vrot.slane %v6239_v17, 4  ;;  %v9578_v17 = vld [vmem:[%s11488_s23 + $0x200] sm:$0xf] }
 0x1d4   : > { %v6247_v30 = vrot.slane %v6245_v18, 5  ;;  %v6233_v33 = vrot.slane %v6232_v20, 4  ;;  %10483 = vmatmul.mubr.msk.bf16.gmra.mrb[84].mxu1 %vm1945_vm1, %v9110_v24  ;;  %v6252_v10 = vrot.slane %v6250_v26, 4  ;;  %v6253_v34 = vshll.u32 %v9570_v7, 16  ;;  %v9577_v7 = vld [vmem:[%s11488_s23 + $0x1fc] sm:$0xf] }
 0x1d5   : > { %v6228_v32 = vsel %vm11524_vm4, %v6223_v19, %v6227_v11  ;;  %v6242_v37 = vor.u32 %v6241_v29, %v6237_v28  ;;  %v6259_v38 = vshll.u32 %v9571_v25, 16  ;;  %v6263_v39 = vshrl.u32 %v9571_v25, 16  ;;  %v11395_v29 = vld [vmem:[%s11488_s23 + $0x1cc] sm:$0xf] }
 0x1d6   : > { %v9661_v35 = vcombine.low %v6218_v27, %v6228_v32  ;;  %v6238_v41 = vsel %vm11524_vm4, %v6233_v33, %v6237_v28  ;;  %v6255_v42 = vrot.slane %v6253_v34, 5  ;;  %v6269_v43 = vshll.u32 %v9572_v31, 16  ;;  %v9579_v32 = vld [vmem:[%s11488_s23 + $0x204] sm:$0x1] }
 0x1d7   : > { %v6273_v44 = vshrl.u32 %v9572_v31, 16  ;;  %v6243_v46 = vrot.slane %v6242_v37, 4  ;;  %v6261_v47 = vrot.slane %v6259_v38, 5  ;;  %v6265_v48 = vrot.slane %v6263_v39, 4  ;;  %v9580_v38 = vld [vmem:[%s11488_s23 + $0x208] sm:$0xf] }
 0x1d8   : > { %10746 = vmatprep.mubr.msk.bf16.mxu0 %vm1945_vm1, %v9661_v35  ;;  %v9111_v51 = vcombine.low %v11391_v49, %v11392_v50  ;;  %v6256_v52 = vor.u32 %v6255_v42, %v6252_v10  ;;  %v6271_v53 = vrot.slane %v6269_v43, 5  ;;  %v6279_v14 = vshll.u32 %v9573_v40, 16  ;;  %v9581_v43 = vld [vmem:[%s11488_s23 + $0x20c] sm:$0xf] }
 0x1d9   : > { %v6275_v13 = vrot.slane %v6273_v44, 4  ;;  %v6248_v21 = vsel %vm11524_vm4, %v6243_v46, %v6247_v30  ;;  %v6266_v54 = vor.u32 %v6265_v48, %v6261_v47  ;;  %v6283_v55 = vshrl.u32 %v9573_v40, 16  ;;  %v11396_v30 = vld [vmem:[%s11488_s23 + $0x1d0] sm:$0xf]  ;;  %v11398_v48 = vld [vmem:[%s11488_s23 + $0x1d8] sm:$0xf] }
 0x1da   : > { %10486 = vmatprep.mubr.msk.bf16.mxu1 %vm1945_vm1, %v9111_v51  ;;  %v6289_v56 = vshll.u32 %v9574_v45, 16  ;;  %v9662_v58 = vcombine.low %v6238_v41, %v6248_v21  ;;  %v6257_v59 = vrot.slane %v6256_v52, 4  ;;  %v6281_v61 = vrot.slane %v6279_v14, 5  ;;  %v9582_v52 = vld [vmem:[%s11488_s23 + $0x210] sm:$0xf] }
 0x1db   : > { %v6276_v60 = vor.u32 %v6275_v13, %v6271_v53  ;;  %v6267_v63 = vrot.slane %v6266_v54, 4  ;;  %v6285_v0 = vrot.slane %v6283_v55, 4  ;;  %v9112_v4 = vcombine.low %v11393_v2, %v11394_v3 }
 0x1dc   : > { %v6291_v1 = vrot.slane %v6289_v56, 5  ;;  %10747 = vmatmul.mubr.msk.bf16.gmra.mrb[88].mxu0 %vm1945_vm1, %v9662_v58  ;;  %v6262_v5 = vsel %vm11524_vm4, %v6257_v59, %v6261_v47  ;;  %v6294_v8 = vshrl.u32 %v9575_v57, 16  ;;  %v6297_v9 = vshll.u32 %v9575_v57, 16  ;;  %v11397_v47 = vld [vmem:[%s11488_s23 + $0x1d4] sm:$0xf] }
 0x1dd   : > { %v6277_v6 = vrot.slane %v6276_v60, 4  ;;  %v6272_v11 = vsel %vm11524_vm4, %v6267_v63, %v6271_v53  ;;  %v6286_v12 = vor.u32 %v6285_v0, %v6281_v61  ;;  %10487 = vmatmul.mubr.msk.bf16.gmra.mrb[88].mxu1 %vm1945_vm1, %v9112_v4  ;;  %v6303_v15 = vshll.u32 %v9576_v62, 16  ;;  %v9583_v60 = vld [vmem:[%s11488_s23 + $0x214] sm:$0xf]  ;;  %v11399_v4 = vld [vmem:[%s11488_s23 + $0x1e0] sm:$0xf] }
 0x1de   : > { %v6307_v16 = vshrl.u32 %v9576_v62, 16  ;;  %v9663_v18 = vcombine.low %v6262_v5, %v6272_v11  ;;  %v6296_v20 = vrot.slane %v6294_v8, 4  ;;  %v6299_v22 = vrot.slane %v6297_v9, 5  ;;  %v11400_v5 = vld [vmem:[%s11488_s23 + $0x1e4] sm:$0xf] }
 0x1df   : > { %v6282_v19 = vsel %vm11524_vm4, %v6277_v6, %v6281_v61  ;;  %v6287_v23 = vrot.slane %v6286_v12, 4  ;;  %v6305_v24 = vrot.slane %v6303_v15, 5  ;;  %v6313_v26 = vshll.u32 %v9577_v7, 16  ;;  %v9585_v15 = vld [vmem:[%s11488_s23 + $0x21c] sm:$0xf] }
 0x1e0   : > { %v6309_v25 = vrot.slane %v6307_v16, 4  ;;  %10750 = vmatprep.mubr.msk.bf16.mxu0 %vm1945_vm1, %v9663_v18  ;;  %v6300_v27 = vor.u32 %v6299_v22, %v6296_v20  ;;  %v6317_v28 = vshrl.u32 %v9577_v7, 16  ;;  %v9113_v31 = vcombine.low %v11395_v29, %v11396_v30  ;;  %v9584_v7 = vld [vmem:[%s11488_s23 + $0x218] sm:$0x1]  ;;  %v9586_v20 = vld [vmem:[%s11488_s23 + $0x220] sm:$0xf] }
 0x1e1   : > { %v6323_v33 = vshll.u32 %v9578_v17, 16  ;;  %v6292_v10 = vsel %vm11524_vm4, %v6287_v23, %v6291_v1  ;;  %v6315_v35 = vrot.slane %v6313_v26, 5  ;;  %v6327_v37 = vshrl.u32 %v9578_v17, 16  ;;  %v11402_v26 = vld [vmem:[%s11488_s23 + $0x1ec] sm:$0xf] }
 0x1e2   : > { %v6310_v34 = vor.u32 %v6309_v25, %v6305_v24  ;;  %v9664_v39 = vcombine.low %v6282_v19, %v6292_v10  ;;  %v6301_v40 = vrot.slane %v6300_v27, 4  ;;  %10490 = vmatprep.mubr.msk.bf16.mxu1 %vm1945_vm1, %v9113_v31  ;;  %v6319_v41 = vrot.slane %v6317_v28, 4  ;;  %v11401_v25 = vld [vmem:[%s11488_s23 + $0x1e8] sm:$0xf]  ;;  %v9587_v31 = vld [vmem:[%s11488_s23 + $0x224] sm:$0xf] }
 0x1e3   : > { %v6325_v42 = vrot.slane %v6323_v33, 5  ;;  %v6329_v45 = vrot.slane %v6327_v37, 4  ;;  %v6333_v46 = vshll.u32 %v9579_v32, 16  ;;  %v9114_v49 = vcombine.low %v11397_v47, %v11398_v48 }
 0x1e4   : > { %v6311_v44 = vrot.slane %v6310_v34, 4  ;;  %10751 = vmatmul.mubr.msk.bf16.gmra.mrb[92].mxu0 %vm1945_vm1, %v9664_v39  ;;  %v6306_v50 = vsel %vm11524_vm4, %v6301_v40, %v6305_v24  ;;  %v6320_v51 = vor.u32 %v6319_v41, %v6315_v35  ;;  %v6338_v53 = vshrl.u32 %v9580_v38, 16 }
 0x1e5   : > { %v6341_v13 = vshll.u32 %v9580_v38, 16  ;;  %v6330_v21 = vor.u32 %v6329_v45, %v6325_v42  ;;  %v6335_v54 = vrot.slane %v6333_v46, 5  ;;  %10491 = vmatmul.mubr.msk.bf16.gmra.mrb[92].mxu1 %vm1945_vm1, %v9114_v49  ;;  %v6347_v55 = vshll.u32 %v9581_v43, 16  ;;  %v9588_v45 = vld [vmem:[%s11488_s23 + $0x228] sm:$0xf] }
 0x1e6   : > { %v6316_v14 = vsel %vm11524_vm4, %v6311_v44, %v6315_v35  ;;  %v6321_v57 = vrot.slane %v6320_v51, 4  ;;  %v6340_v58 = vrot.slane %v6338_v53, 4  ;;  %v6351_v63 = vshrl.u32 %v9581_v43, 16 }
 0x1e7   : > { %v9665_v56 = vcombine.low %v6306_v50, %v6316_v14  ;;  %v6343_v59 = vrot.slane %v6341_v13, 5  ;;  %v6331_v61 = vrot.slane %v6330_v21, 4  ;;  %v6349_v62 = vrot.slane %v6347_v55, 5  ;;  %v9589_v50 = vld [vmem:[%s11488_s23 + $0x22c] sm:$0x1] }
 0x1e8   : > { %v6357_v0 = vshll.u32 %v9582_v52, 16  ;;  %v6326_v1 = vsel %vm11524_vm4, %v6321_v57, %v6325_v42  ;;  %v6361_v3 = vshrl.u32 %v9582_v52, 16  ;;  %v9115_v6 = vcombine.low %v11399_v4, %v11400_v5  ;;  %v11403_v14 = vld [vmem:[%s11488_s23 + $0x1f4] sm:$0xf]  ;;  %v11404_v21 = vld [vmem:[%s11488_s23 + $0x1f8] sm:$0xf] }
 0x1e9   : > { %10754 = vmatprep.mubr.msk.bf16.mxu0 %vm1945_vm1, %v9665_v56  ;;  %v6344_v2 = vor.u32 %v6343_v59, %v6340_v58  ;;  %v6336_v8 = vsel %vm11524_vm4, %v6331_v61, %v6335_v54  ;;  %v6353_v9 = vrot.slane %v6351_v63, 4  ;;  %v6367_v12 = vshll.u32 %v9583_v60, 16  ;;  %v9590_v61 = vld [vmem:[%s11488_s23 + $0x230] sm:$0xf] }
 0x1ea   : > { %v6359_v11 = vrot.slane %v6357_v0, 5  ;;  %v9666_v16 = vcombine.low %v6326_v1, %v6336_v8  ;;  %10494 = vmatprep.mubr.msk.bf16.mxu1 %vm1945_vm1, %v9115_v6  ;;  %v6363_v18 = vrot.slane %v6361_v3, 4  ;;  %v6371_v19 = vshrl.u32 %v9583_v60, 16  ;;  %v9591_v3 = vld [vmem:[%s11488_s23 + $0x234] sm:$0xf] }
 0x1eb   : > { %v6345_v17 = vrot.slane %v6344_v2, 4  ;;  %v6354_v22 = vor.u32 %v6353_v9, %v6349_v62  ;;  %v6369_v23 = vrot.slane %v6367_v12, 5  ;;  %v6377_v24 = vshll.u32 %v9584_v7, 16  ;;  %v11405_v7 = vld [vmem:[%s11488_s23 + $0x1fc] sm:$0xf] }
 0x1ec   : > { %v9116_v27 = vcombine.low %v11401_v25, %v11402_v26  ;;  %10755 = vmatmul.mubr.msk.bf16.gmra.mrb[96].mxu0 %vm1945_vm1, %v9666_v16  ;;  %v6364_v29 = vor.u32 %v6363_v18, %v6359_v11  ;;  %v6373_v30 = vrot.slane %v6371_v19, 4  ;;  %v6382_v32 = vshrl.u32 %v9585_v15, 16  ;;  %v11406_v8 = vld [vmem:[%s11488_s23 + $0x200] sm:$0xf]  ;;  %v9592_v16 = vld [vmem:[%s11488_s23 + $0x238] sm:$0xf] }
 0x1ed   : > { %v6350_v28 = vsel %vm11524_vm4, %v6345_v17, %v6349_v62  ;;  %v6355_v33 = vrot.slane %v6354_v22, 4  ;;  %v6379_v10 = vrot.slane %v6377_v24, 5  ;;  %v6385_v34 = vshll.u32 %v9585_v15, 16 }
 0x1ee   : > { %10495 = vmatmul.mubr.msk.bf16.gmra.mrb[96].mxu1 %vm1945_vm1, %v9116_v27  ;;  %v6391_v35 = vshll.u32 %v9586_v20, 16  ;;  %v6365_v37 = vrot.slane %v6364_v29, 4  ;;  %v6374_v38 = vor.u32 %v6373_v30, %v6369_v23  ;;  %v6384_v39 = vrot.slane %v6382_v32, 4  ;;  %v9593_v27 = vld [vmem:[%s11488_s23 + $0x23c] sm:$0xf] }
 0x1ef   : > { %v6395_v40 = vshrl.u32 %v9586_v20, 16  ;;  %v6360_v41 = vsel %vm11524_vm4, %v6355_v33, %v6359_v11  ;;  %v6387_v42 = vrot.slane %v6385_v34, 5  ;;  %v6401_v44 = vshll.u32 %v9587_v31, 16  ;;  %v11407_v34 = vld [vmem:[%s11488_s23 + $0x208] sm:$0xf] }
 0x1f0   : > { %v6393_v43 = vrot.slane %v6391_v35, 5  ;;  %v9667_v46 = vcombine.low %v6350_v28, %v6360_v41  ;;  %v6370_v47 = vsel %vm11524_vm4, %v6365_v37, %v6369_v23  ;;  %v6375_v48 = vrot.slane %v6374_v38, 4  ;;  %v11408_v35 = vld [vmem:[%s11488_s23 + $0x20c] sm:$0xf]  ;;  %v9594_v38 = vld [vmem:[%s11488_s23 + $0x240] sm:$0x1] }
 0x1f1   : > { %v6397_v49 = vrot.slane %v6395_v40, 4  ;;  %v12666_v51 = vpop.f32.mrb[0].mxu0  ;;  %v6388_v52 = vor.u32 %v6387_v42, %v6384_v39  ;;  %v6403_v53 = vrot.slane %v6401_v44, 5  ;;  %v6405_v13 = vshrl.u32 %v9587_v31, 16 }
 0x1f2   : > { %v9117_v54 = vcombine.low %v11403_v14, %v11404_v21  ;;  %v12670_v55 = vpop.f32.mrb[1].mxu0  ;;  %10758 = vmatprep.mubr.msk.bf16.mxu0 %vm1945_vm1, %v9667_v46  ;;  %v6380_v56 = vsel %vm11524_vm4, %v6375_v48, %v6379_v10  ;;  %v6411_v58 = vshll.u32 %v9588_v45, 16  ;;  %v6415_v59 = vshrl.u32 %v9588_v45, 16  ;;  %v12706_v14 = vld [vmem:[%s13512_s2] ss:$0 sm:$0xff] }
 0x1f3   : > { %v6398_v57 = vor.u32 %v6397_v49, %v6393_v43  ;;  %v12675_v60 = vpop.f32.mrb[2].mxu0  ;;  %v9668_v62 = vcombine.low %v6370_v47, %v6380_v56  ;;  %v6389_v63 = vrot.slane %v6388_v52, 4  ;;  %v6407_v0 = vrot.slane %v6405_v13, 4  ;;  %v11409_v52 = vld [vmem:[%s11488_s23 + $0x210] sm:$0xf] }
 0x1f4   : > { %10498 = vmatprep.mubr.msk.bf16.mxu1 %vm1945_vm1, %v9117_v54  ;;  %v6421_v1 = vshll.u32 %v9589_v50, 16  ;;  %v12679_v2 = vpop.f32.mrb[3].mxu0  ;;  %v6413_v5 = vrot.slane %v6411_v58, 5  ;;  %v6417_v6 = vrot.slane %v6415_v59, 4  ;;  %v9118_v9 = vcombine.low %v11405_v7, %v11406_v8 }
 0x1f5   : > { %v6399_v4 = vrot.slane %v6398_v57, 4  ;;  %10759 = vmatmul.mubr.msk.bf16.gmra.mrb[100].mxu0 %vm1945_vm1, %v9668_v62  ;;  %v6394_v11 = vsel %vm11524_vm4, %v6389_v63, %v6393_v43  ;;  %v6408_v12 = vor.u32 %v6407_v0, %v6403_v53  ;;  %v6426_v17 = vshrl.u32 %v9590_v61, 16 }
 0x1f6   : > { %v6423_v15 = vrot.slane %v6421_v1, 5  ;;  %v6418_v19 = vor.u32 %v6417_v6, %v6413_v5  ;;  %10499 = vmatmul.mubr.msk.bf16.gmra.mrb[100].mxu1 %vm1945_vm1, %v9118_v9  ;;  %v6429_v20 = vshll.u32 %v9590_v61, 16  ;;  %v6435_v22 = vshll.u32 %v9591_v3, 16 }
 0x1f7   : > { %v6404_v18 = vsel %vm11524_vm4, %v6399_v4, %v6403_v53  ;;  %v6409_v24 = vrot.slane %v6408_v12, 4  ;;  %v6428_v25 = vrot.slane %v6426_v17, 4  ;;  %v6439_v26 = vshrl.u32 %v9591_v3, 16  ;;  %v11410_v53 = vld [vmem:[%s11488_s23 + $0x214] sm:$0xf] }
 0x1f8   : > { %v9669_v23 = vcombine.low %v6394_v11, %v6404_v18  ;;  %v6419_v28 = vrot.slane %v6418_v19, 4  ;;  %v6431_v29 = vrot.slane %v6429_v20, 5  ;;  %v6437_v30 = vrot.slane %v6435_v22, 5 }
 0x1f9   : > { %v6445_v31 = vshll.u32 %v9592_v16, 16  ;;  %v6414_v32 = vsel %vm11524_vm4, %v6409_v24, %v6413_v5  ;;  %v6441_v33 = vrot.slane %v6439_v26, 4  ;;  %v6449_v10 = vshrl.u32 %v9592_v16, 16 }
 0x1fa   : > { %10762 = vmatprep.mubr.msk.bf16.mxu0 %vm1945_vm1, %v9669_v23  ;;  %v9119_v37 = vcombine.low %v11407_v34, %v11408_v35  ;;  %v6424_v39 = vsel %vm11524_vm4, %v6419_v28, %v6423_v15  ;;  %v6432_v40 = vor.u32 %v6431_v29, %v6428_v25  ;;  %v6455_v42 = vshll.u32 %v9593_v27, 16  ;;  %v9595_v15 = vld [vmem:[%s11488_s23 + $0x244] sm:$0xf]  ;;  %v9596_v23 = vld [vmem:[%s11488_s23 + $0x248] sm:$0xf] }
 0x1fb   : > { %v6447_v41 = vrot.slane %v6445_v31, 5  ;;  %v9670_v43 = vcombine.low %v6414_v32, %v6424_v39  ;;  %v6442_v44 = vor.u32 %v6441_v33, %v6437_v30  ;;  %v6451_v45 = vrot.slane %v6449_v10, 4  ;;  %v10400_v47 = vpop.f32.mrb[0].mxu1  ;;  %v9598_v34 = vld [vmem:[%s11488_s23 + $0x250] sm:$0xf] }
 0x1fc   : > { %10502 = vmatprep.mubr.msk.bf16.mxu1 %vm1945_vm1, %v9119_v37  ;;  %v6459_v46 = vshrl.u32 %v9593_v27, 16  ;;  %v6433_v48 = vrot.slane %v6432_v40, 4  ;;  %v6457_v49 = vrot.slane %v6455_v42, 5  ;;  %v6465_v50 = vshll.u32 %v9594_v38, 16  ;;  %v3241_v21 = vpop.f32.mrb[1].mxu1 }
 0x1fd   : > { %v9120_v13 = vcombine.low %v11409_v52, %v11410_v53  ;;  %10763 = vmatmul.mubr.msk.bf16.gmra.mrb[104].mxu0 %vm1945_vm1, %v9670_v43  ;;  %v6443_v54 = vrot.slane %v6442_v44, 4  ;;  %v6452_v56 = vor.u32 %v6451_v45, %v6447_v41  ;;  %v12709_v58 = vpop.f32.mrb[4].mxu0  ;;  %v10786_v59 = vadd.f32 %v12666_v51, %v10400_v47  ;;  %v10401_v61 = vpop.f32.mrb[2].mxu1  ;;  %v9599_v47 = vld [vmem:[%s11488_s23 + $0x254] sm:$0x1] }
 0x1fe   : > { %v6461_v57 = vrot.slane %v6459_v46, 4  ;;  %v6438_v62 = vsel %vm11524_vm4, %v6433_v48, %v6437_v30  ;;  %v6467_v63 = vrot.slane %v6465_v50, 5  ;;  %v12715_v0 = vpop.f32.mrb[5].mxu0  ;;  %v10787_v1 = vadd.f32 %v12670_v55, %v3241_v21  ;;  %v3244_v3 = vpop.f32.mrb[3].mxu1  ;;  %v9597_v30 = vld [vmem:[%s11488_s23 + $0x24c] sm:$0xf] }
 0x1ff   : > { %10503 = vmatmul.mubr.msk.bf16.gmra.mrb[104].mxu1 %vm1945_vm1, %v9120_v13  ;;  %v6448_v4 = vsel %vm11524_vm4, %v6443_v54, %v6447_v41  ;;  %v6453_v5 = vrot.slane %v6452_v56, 4  ;;  %v7722_v51 = vadd.f32 %v10786_v59, %v12706_v14  ;;  %v12721_v7 = vpop.f32.mrb[6].mxu0  ;;  %v10788_v11 = vadd.f32 %v12675_v60, %v10401_v61  ;;  %v11412_v59 = vld [vmem:[%s11488_s23 + $0x220] sm:$0xf] }
 0x200   : > { %v6462_v6 = vor.u32 %v6461_v57, %v6457_v49  ;;  %v9671_v8 = vcombine.low %v6438_v62, %v6448_v4  ;;  %v7720_v9 = vadd.f32 %v10787_v1, %v12706_v14  ;;  %v12726_v12 = vpop.f32.mrb[7].mxu0  ;;  %v10789_v55 = vadd.f32 %v12679_v2, %v3244_v3  ;;  %v11411_v57 = vld [vmem:[%s11488_s23 + $0x21c] sm:$0xf] }
 0x201   : > { %v6458_v16 = vsel %vm11524_vm4, %v6453_v5, %v6457_v49  ;;  %vm7850_vm6 = vcmp.ge.f32.partialorder %v7722_v51, 0.0  ;;  %v7978_v18 = vmul.f32 0.2, %v7722_v51  ;;  %v7723_v20 = vadd.f32 %v10788_v11, %v12706_v14 }
 0x202   : > { %v6463_v17 = vrot.slane %v6462_v6, 4  ;;  %10766 = vmatprep.mubr.msk.bf16.mxu0 %vm1945_vm1, %v9671_v8  ;;  %vm7848_vm7 = vcmp.ge.f32.partialorder %v7720_v9, 0.0  ;;  %v7976_v19 = vmul.f32 0.2, %v7720_v9  ;;  %v7721_v60 = vadd.f32 %v10789_v55, %v12706_v14  ;;  %v11414_v8 = vld [vmem:[%s11488_s23 + $0x228] sm:$0xf] }
 0x203   : > { %v8106_v2 = vsel %vm7850_vm6, %v7722_v51, %v7978_v18  ;;  %v6470_v24 = vshrl.u32 %v9595_v15, 16  ;;  %v6473_v25 = vshll.u32 %v9595_v15, 16  ;;  %v10404_v26 = vpop.f32.mrb[4].mxu1  ;;  %vm7851_vm8 = vcmp.ge.f32.partialorder %v7723_v20, 0.0  ;;  %v11413_v51 = vld [vmem:[%s11488_s23 + $0x224] sm:$0xf] }
 0x204   : > { %v6468_v22 = vsel %vm11524_vm4, %v6463_v17, %v6467_v63  ;;  %v9880_v28 = vpack.c.bf16 %v8106_v2, %v8106_v2  ;;  %v8104_v29 = vsel %vm7848_vm7, %v7720_v9, %v7976_v19  ;;  %v3257_v31 = vpop.f32.mrb[5].mxu1  ;;  %v7979_v33 = vmul.f32 0.2, %v7723_v20  ;;  %v9600_v55 = vld [vmem:[%s11488_s23 + $0x258] sm:$0xf] }
 0x205   : > { %v9672_v27 = vcombine.low %v6458_v16, %v6468_v22  ;;  %v9878_v32 = vpack.c.bf16 %v8104_v29, %v8104_v29  ;;  %vm7849_vm9 = vcmp.ge.f32.partialorder %v7721_v60, 0.0  ;;  %v7977_v10 = vmul.f32 0.2, %v7721_v60  ;;  %v12745_v35 = vpop.f32.mrb[8].mxu0  ;;  %v10405_v42 = vpop.f32.mrb[6].mxu1 }
 0x206   : > { %8747 = vst.msk [vmem:[%s12740_s4 + $0x8] sm:$0xf] %vm8744_vm5, %v9880_v28  ;;  %v6472_v37 = vrot.slane %v6470_v24, 4  ;;  %v6475_v38 = vrot.slane %v6473_v25, 5  ;;  %v6479_v39 = vshll.u32 %v9596_v23, 16  ;;  %v6483_v40 = vshrl.u32 %v9596_v23, 16 }
 0x207   : > { %10767 = vmatmul.mubr.msk.bf16.gmra.mrb[108].mxu0 %vm1945_vm1, %v9672_v27  ;;  %v12750_v41 = vpop.f32.mrb[9].mxu0  ;;  %8745 = vst.msk [vmem:[%s12740_s4] sm:$0xf] %vm8744_vm5, %v9878_v32  ;;  %v8107_v43 = vsel %vm7851_vm8, %v7723_v20, %v7979_v33  ;;  %v8105_v44 = vsel %vm7849_vm9, %v7721_v60, %v7977_v10  ;;  %v6489_v45 = vshll.u32 %v9597_v30, 16  ;;  %v6493_v46 = vshrl.u32 %v9597_v30, 16  ;;  %v3260_v49 = vpop.f32.mrb[7].mxu1 }
 0x208   : > { %v12756_v48 = vpop.f32.mrb[10].mxu0  ;;  %v9881_v50 = vpack.c.bf16 %v8107_v43, %v8107_v43  ;;  %v9879_v52 = vpack.c.bf16 %v8105_v44, %v8105_v44  ;;  %v6476_v53 = vor.u32 %v6475_v38, %v6472_v37  ;;  %v6481_v13 = vrot.slane %v6479_v39, 5 }
 0x209   : > { %v12758_v21 = vpop.f32.mrb[11].mxu0  ;;  %v6485_v54 = vrot.slane %v6483_v40, 4  ;;  %v6491_v56 = vrot.slane %v6489_v45, 5  ;;  %v9121_v61 = vcombine.low %v11411_v57, %v11412_v59  ;;  %v6495_v62 = vrot.slane %v6493_v46, 4  ;;  %v9601_v40 = vld [vmem:[%s11488_s23 + $0x25c] sm:$0xf] }
 0x20a   : > { %8748 = vst.msk [vmem:[%s12740_s4 + $0xc] sm:$0xf] %vm8744_vm5, %v9881_v50  ;;  %8746 = vst.msk [vmem:[%s12740_s4 + $0x4] sm:$0xf] %vm8744_vm5, %v9879_v52  ;;  %v6477_v63 = vrot.slane %v6476_v53, 4  ;;  %v6499_v1 = vshll.u32 %v9598_v34, 16  ;;  %v9122_v9 = vcombine.low %v11413_v51, %v11414_v8  ;;  %v10790_v11 = vadd.f32 %v12709_v58, %v10404_v26 }
 0x20b   : > { %v6503_v3 = vshrl.u32 %v9598_v34, 16  ;;  %v6509_v4 = vshll.u32 %v9599_v47, 16  ;;  %v6486_v5 = vor.u32 %v6485_v54, %v6481_v13  ;;  %10506 = vmatprep.mubr.msk.bf16.mxu1 %vm1945_vm1, %v9121_v61  ;;  %v6496_v6 = vor.u32 %v6495_v62, %v6491_v56  ;;  %v12771_v15 = vpop.f32.mrb[8].mxu1  ;;  %v9602_v47 = vld [vmem:[%s11488_s23 + $0x260] sm:$0xf] }
 0x20c   : > { %v6482_v16 = vsel %vm11524_vm4, %v6477_v63, %v6481_v13  ;;  %v6501_v17 = vrot.slane %v6499_v1, 5  ;;  %v12775_v20 = vpop.f32.mrb[9].mxu1  ;;  %10507 = vmatmul.mubr.msk.bf16.gmra.mrb[108].mxu1 %vm1945_vm1, %v9122_v9  ;;  %v7726_v2 = vadd.f32 %v10790_v11, %v12706_v14  ;;  %v10791_v23 = vadd.f32 %v12715_v0, %v3257_v31  ;;  %v9603_v1 = vld [vmem:[%s11488_s23 + $0x264] sm:$0xf]  ;;  %v9604_v9 = vld [vmem:[%s11488_s23 + $0x268] sm:$0x1] }
 0x20d   : > { %v6505_v18 = vrot.slane %v6503_v3, 4  ;;  %v6511_v19 = vrot.slane %v6509_v4, 5  ;;  %v6487_v60 = vrot.slane %v6486_v5, 4  ;;  %v6497_v22 = vrot.slane %v6496_v6, 4  ;;  %v12780_v58 = vpop.f32.mrb[12].mxu0  ;;  %v12782_v24 = vpop.f32.mrb[10].mxu1 }
 0x20e   : > { %v10792_v26 = vadd.f32 %v12721_v7, %v10405_v42  ;;  %v10793_v27 = vadd.f32 %v12726_v12, %v3260_v49  ;;  %v6514_v28 = vshrl.u32 %v9600_v55, 16  ;;  %v12786_v29 = vpop.f32.mrb[13].mxu0  ;;  %v12788_v30 = vpop.f32.mrb[11].mxu1  ;;  %vm7854_vm10 = vcmp.ge.f32.partialorder %v7726_v2, 0.0 }
 0x20f   : > { %v6506_v25 = vor.u32 %v6505_v18, %v6501_v17  ;;  %v6492_v32 = vsel %vm11524_vm4, %v6487_v60, %v6491_v56  ;;  %v6502_v0 = vsel %vm11524_vm4, %v6497_v22, %v6501_v17  ;;  %v7982_v31 = vmul.f32 0.2, %v7726_v2  ;;  %v12794_v33 = vpop.f32.mrb[14].mxu0 }
 0x210   : > { %v9673_v7 = vcombine.low %v6482_v16, %v6492_v32  ;;  %v7724_v12 = vadd.f32 %v10791_v23, %v12706_v14  ;;  %v7727_v34 = vadd.f32 %v10792_v26, %v12706_v14  ;;  %v12798_v37 = vpop.f32.mrb[15].mxu0  ;;  %v7725_v39 = vadd.f32 %v10793_v27, %v12706_v14  ;;  %v11416_v23 = vld [vmem:[%s11488_s23 + $0x234] sm:$0xf] }
 0x211   : > { %v6507_v10 = vrot.slane %v6506_v25, 4  ;;  %v8110_v38 = vsel %vm7854_vm10, %v7726_v2, %v7982_v31  ;;  %v6516_v42 = vrot.slane %v6514_v28, 4  ;;  %v6517_v43 = vshll.u32 %v9600_v55, 16  ;;  %v11415_v2 = vld [vmem:[%s11488_s23 + $0x230] sm:$0xf] }
 0x212   : > { %10770 = vmatprep.mubr.msk.bf16.mxu0 %vm1945_vm1, %v9673_v7  ;;  %v9884_v45 = vpack.c.bf16 %v8110_v38, %v8110_v38  ;;  %vm7852_vm11 = vcmp.ge.f32.partialorder %v7724_v12, 0.0  ;;  %v7980_v46 = vmul.f32 0.2, %v7724_v12  ;;  %vm7855_vm12 = vcmp.ge.f32.partialorder %v7727_v34, 0.0  ;;  %v11417_v7 = vld [vmem:[%s11488_s23 + $0x238] sm:$0xf] }
 0x213   : > { %v6512_v44 = vsel %vm11524_vm4, %v6507_v10, %v6511_v19  ;;  %v7983_v50 = vmul.f32 0.2, %v7727_v34  ;;  %vm7853_vm13 = vcmp.ge.f32.partialorder %v7725_v39, 0.0  ;;  %v12806_v52 = vpop.f32.mrb[12].mxu1  ;;  %v7981_v13 = vmul.f32 0.2, %v7725_v39 }
 0x214   : > { %v9674_v49 = vcombine.low %v6502_v0, %v6512_v44  ;;  %8751 = vst.msk [vmem:[%s12740_s4 + $0x18] sm:$0xf] %vm8744_vm5, %v9884_v45  ;;  %v8108_v53 = vsel %vm7852_vm11, %v7724_v12, %v7980_v46  ;;  %v6519_v54 = vrot.slane %v6517_v43, 5  ;;  %v6523_v56 = vshll.u32 %v9601_v40, 16  ;;  %v12810_v57 = vpop.f32.mrb[13].mxu1 }
 0x215   : > { %v9882_v59 = vpack.c.bf16 %v8108_v53, %v8108_v53  ;;  %v8111_v61 = vsel %vm7855_vm12, %v7727_v34, %v7983_v50  ;;  %v6527_v62 = vshrl.u32 %v9601_v40, 16  ;;  %v6533_v63 = vshll.u32 %v9602_v47, 16  ;;  %v12816_v4 = vpop.f32.mrb[14].mxu1  ;;  %v11418_v10 = vld [vmem:[%s11488_s23 + $0x23c] sm:$0xf] }
 0x216   : > { %10771 = vmatmul.mubr.msk.bf16.gmra.mrb[112].mxu0 %vm1945_vm1, %v9674_v49  ;;  %v12814_v3 = vpop.f32.mrb[16].mxu0  ;;  %v9885_v5 = vpack.c.bf16 %v8111_v61, %v8111_v61  ;;  %v8109_v6 = vsel %vm7853_vm13, %v7725_v39, %v7981_v13  ;;  %v6520_v51 = vor.u32 %v6519_v54, %v6516_v42  ;;  %v6525_v8 = vrot.slane %v6523_v56, 5  ;;  %v12822_v55 = vpop.f32.mrb[15].mxu1  ;;  %v12844_v42 = vld [vmem:[%s11488_s23 + $0x26c] sm:$0xf] }
 0x217   : > { %v12820_v11 = vpop.f32.mrb[17].mxu0  ;;  %8749 = vst.msk [vmem:[%s12740_s4 + $0x10] sm:$0xf] %vm8744_vm5, %v9882_v59  ;;  %v9883_v16 = vpack.c.bf16 %v8109_v6, %v8109_v6  ;;  %v6529_v17 = vrot.slane %v6527_v62, 4  ;;  %v6535_v18 = vrot.slane %v6533_v63, 5  ;;  %v6537_v19 = vshrl.u32 %v9602_v47, 16 }
 0x218   : > { %v12826_v60 = vpop.f32.mrb[18].mxu0  ;;  %8752 = vst.msk [vmem:[%s12740_s4 + $0x1c] sm:$0xf] %vm8744_vm5, %v9885_v5  ;;  %v6521_v22 = vrot.slane %v6520_v51, 4  ;;  %v9123_v25 = vcombine.low %v11415_v2, %v11416_v23  ;;  %v6543_v26 = vshll.u32 %v9603_v1, 16  ;;  %v6547_v27 = vshrl.u32 %v9603_v1, 16 }
 0x219   : > { %v12832_v28 = vpop.f32.mrb[19].mxu0  ;;  %8750 = vst.msk [vmem:[%s12740_s4 + $0x14] sm:$0xf] %vm8744_vm5, %v9883_v16  ;;  %v6530_v32 = vor.u32 %v6529_v17, %v6525_v8  ;;  %v6539_v0 = vrot.slane %v6537_v19, 4  ;;  %v6553_v31 = vshll.u32 %v9604_v9, 16  ;;  %v9124_v12 = vcombine.low %v11417_v7, %v11418_v10 }
 0x21a   : > { %v6526_v34 = vsel %vm11524_vm4, %v6521_v22, %v6525_v8  ;;  %10510 = vmatprep.mubr.msk.bf16.mxu1 %vm1945_vm1, %v9123_v25  ;;  %v6545_v38 = vrot.slane %v6543_v26, 5  ;;  %v6549_v39 = vrot.slane %v6547_v27, 4  ;;  %v10794_v40 = vadd.f32 %v12745_v35, %v12771_v15  ;;  %v9606_v9 = vld [vmem:[%s11488_s23 + $0x270] sm:$0xf]  ;;  %v9607_v16 = vld [vmem:[%s11488_s23 + $0x274] sm:$0xf] }
 0x21b   : > { %v6531_v43 = vrot.slane %v6530_v32, 4  ;;  %v6540_v44 = vor.u32 %v6539_v0, %v6535_v18  ;;  %v6555_v45 = vrot.slane %v6553_v31, 5  ;;  %10511 = vmatmul.mubr.msk.bf16.gmra.mrb[112].mxu1 %vm1945_vm1, %v9124_v12  ;;  %v10795_v46 = vadd.f32 %v12750_v41, %v12775_v20  ;;  %v12849_v47 = vpop.f32.mrb[16].mxu1  ;;  %v9608_v23 = vld [vmem:[%s11488_s23 + $0x278] sm:$0xf] }
 0x21c   : > { %v6550_v49 = vor.u32 %v6549_v39, %v6545_v38  ;;  %v7730_v50 = vadd.f32 %v10794_v40, %v12706_v14  ;;  %v10796_v53 = vadd.f32 %v12756_v48, %v12782_v24  ;;  %v10797_v35 = vadd.f32 %v12758_v21, %v12788_v30  ;;  %v12856_v15 = vpop.f32.mrb[17].mxu1  ;;  %v11419_v39 = vld [vmem:[%s11488_s23 + $0x244] sm:$0xf]  ;;  %v11420_v40 = vld [vmem:[%s11488_s23 + $0x248] sm:$0xf] }
 0x21d   : > { %v6536_v13 = vsel %vm11524_vm4, %v6531_v43, %v6535_v18  ;;  %v6541_v54 = vrot.slane %v6540_v44, 4  ;;  %v7728_v56 = vadd.f32 %v10795_v46, %v12706_v14  ;;  %v6558_v41 = vshrl.u32 %v12844_v42, 16  ;;  %v12864_v59 = vpop.f32.mrb[18].mxu1  ;;  %v9609_v44 = vld [vmem:[%s11488_s23 + $0x27c] sm:$0x1] }
 0x21e   : > { %v12862_v20 = vpop.f32.mrb[20].mxu0  ;;  %v9675_v61 = vcombine.low %v6526_v34, %v6536_v13  ;;  %v6551_v48 = vrot.slane %v6550_v49, 4  ;;  %vm7858_vm14 = vcmp.ge.f32.partialorder %v7730_v50, 0.0  ;;  %v7986_v21 = vmul.f32 0.2, %v7730_v50  ;;  %v12868_v30 = vpop.f32.mrb[19].mxu1 }
 0x21f   : > { %v12866_v24 = vpop.f32.mrb[21].mxu0  ;;  %v6546_v62 = vsel %vm11524_vm4, %v6541_v54, %v6545_v38  ;;  %vm7856_vm15 = vcmp.ge.f32.partialorder %v7728_v56, 0.0  ;;  %v7984_v63 = vmul.f32 0.2, %v7728_v56  ;;  %v7731_v1 = vadd.f32 %v10796_v53, %v12706_v14 }
 0x220   : > { %v12873_v5 = vpop.f32.mrb[22].mxu0  ;;  %10774 = vmatprep.mubr.msk.bf16.mxu0 %vm1945_vm1, %v9675_v61  ;;  %v6556_v6 = vsel %vm11524_vm4, %v6551_v48, %v6555_v45  ;;  %v8114_v51 = vsel %vm7858_vm14, %v7730_v50, %v7986_v21  ;;  %v7729_v8 = vadd.f32 %v10797_v35, %v12706_v14  ;;  %v6560_v17 = vrot.slane %v6558_v41, 4 }
 0x221   : > { %v12881_v18 = vpop.f32.mrb[23].mxu0  ;;  %v9676_v19 = vcombine.low %v6546_v62, %v6556_v6  ;;  %v9888_v22 = vpack.c.bf16 %v8114_v51, %v8114_v51  ;;  %v8112_v2 = vsel %vm7856_vm15, %v7728_v56, %v7984_v63  ;;  %vm7859_vm0 = vcmp.ge.f32.partialorder %v7731_v1, 0.0  ;;  %v11421_v62 = vld [vmem:[%s11488_s23 + $0x24c] sm:$0xf]  ;;  %v11422_v63 = vld [vmem:[%s11488_s23 + $0x250] sm:$0xf] }
 0x222   : > { %v9886_v25 = vpack.c.bf16 %v8112_v2, %v8112_v2  ;;  %v7987_v26 = vmul.f32 0.2, %v7731_v1  ;;  %vm7857_vm2 = vcmp.ge.f32.partialorder %v7729_v8, 0.0  ;;  %v7985_v27 = vmul.f32 0.2, %v7729_v8 }
 0x223   : > { %10775 = vmatmul.mubr.msk.bf16.gmra.mrb[116].mxu0 %vm1945_vm1, %v9676_v19  ;;  %8755 = vst.msk [vmem:[%s12740_s4 + $0x28] sm:$0xf] %vm8744_vm5, %v9888_v22  ;;  %v6561_v32 = vshll.u32 %v12844_v42, 16  ;;  %v6567_v0 = vshll.u32 %v9606_v9, 16  ;;  %v6571_v31 = vshrl.u32 %v9606_v9, 16  ;;  %v6577_v7 = vshll.u32 %v9607_v16, 16 }
 0x224   : > { %v12888_v10 = vpop.f32.mrb[20].mxu1  ;;  %8753 = vst.msk [vmem:[%s12740_s4 + $0x20] sm:$0xf] %vm8744_vm5, %v9886_v25  ;;  %v8115_v12 = vsel %vm7859_vm0, %v7731_v1, %v7987_v26  ;;  %v8113_v34 = vsel %vm7857_vm2, %v7729_v8, %v7985_v27  ;;  %v6581_v38 = vshrl.u32 %v9607_v16, 16  ;;  %v9125_v43 = vcombine.low %v11419_v39, %v11420_v40 }
 0x225   : > { %v12895_v45 = vpop.f32.mrb[21].mxu1  ;;  %v9889_v46 = vpack.c.bf16 %v8115_v12, %v8115_v12  ;;  %v9887_v42 = vpack.c.bf16 %v8113_v34, %v8113_v34  ;;  %v6563_v49 = vrot.slane %v6561_v32, 5  ;;  %v6569_v50 = vrot.slane %v6567_v0, 5 }
 0x226   : > { %v12897_v53 = vpop.f32.mrb[22].mxu1  ;;  %v6573_v35 = vrot.slane %v6571_v31, 4  ;;  %v6579_v13 = vrot.slane %v6577_v7, 5  ;;  %10514 = vmatprep.mubr.msk.bf16.mxu1 %vm1945_vm1, %v9125_v43  ;;  %v6583_v54 = vrot.slane %v6581_v38, 4  ;;  %v6587_v56 = vshll.u32 %v9608_v23, 16 }
 0x227   : > { %v12900_v41 = vpop.f32.mrb[23].mxu1  ;;  %8756 = vst.msk [vmem:[%s12740_s4 + $0x2c] sm:$0xf] %vm8744_vm5, %v9889_v46  ;;  %8754 = vst.msk [vmem:[%s12740_s4 + $0x24] sm:$0xf] %vm8744_vm5, %v9887_v42  ;;  %v6564_v61 = vor.u32 %v6563_v49, %v6560_v17  ;;  %v6591_v48 = vshrl.u32 %v9608_v23, 16  ;;  %v9126_v1 = vcombine.low %v11421_v62, %v11422_v63  ;;  %v10798_v16 = vadd.f32 %v12780_v58, %v12806_v52 }
 0x228   : > { %v6597_v21 = vshll.u32 %v9609_v44, 16  ;;  %v12908_v6 = vpop.f32.mrb[24].mxu0  ;;  %v6574_v51 = vor.u32 %v6573_v35, %v6569_v50  ;;  %v6584_v8 = vor.u32 %v6583_v54, %v6579_v13  ;;  %v6589_v9 = vrot.slane %v6587_v56, 5  ;;  %v9611_v54 = vld [vmem:[%s11488_s23 + $0x284] sm:$0xf] }
 0x229   : > { %v12912_v19 = vpop.f32.mrb[25].mxu0  ;;  %v6565_v22 = vrot.slane %v6564_v61, 4  ;;  %v6593_v2 = vrot.slane %v6591_v48, 4  ;;  %10515 = vmatmul.mubr.msk.bf16.gmra.mrb[116].mxu1 %vm1945_vm1, %v9126_v1  ;;  %v10799_v17 = vadd.f32 %v12786_v29, %v12810_v57  ;;  %v7734_v32 = vadd.f32 %v10798_v16, %v12706_v14  ;;  %v9610_v57 = vld [vmem:[%s11488_s23 + $0x280] sm:$0xf] }
 0x22a   : > { %v6599_v25 = vrot.slane %v6597_v21, 5  ;;  %v12917_v23 = vpop.f32.mrb[26].mxu0  ;;  %v6575_v26 = vrot.slane %v6574_v51, 4  ;;  %v6585_v27 = vrot.slane %v6584_v8, 4  ;;  %v10800_v58 = vadd.f32 %v12794_v33, %v12816_v4  ;;  %v9612_v56 = vld [vmem:[%s11488_s23 + $0x288] sm:$0xf] }
 0x22b   : > { %v12922_v52 = vpop.f32.mrb[27].mxu0  ;;  %v6570_v0 = vsel %vm11524_vm4, %v6565_v22, %v6569_v50  ;;  %v6594_v31 = vor.u32 %v6593_v2, %v6589_v9  ;;  %v7732_v7 = vadd.f32 %v10799_v17, %v12706_v14  ;;  %v10801_v29 = vadd.f32 %v12798_v37, %v12822_v55  ;;  %v12930_v12 = vpop.f32.mrb[24].mxu1 }
 0x22c   : > { %v6580_v34 = vsel %vm11524_vm4, %v6575_v26, %v6579_v13  ;;  %v6590_v33 = vsel %vm11524_vm4, %v6585_v27, %v6589_v9  ;;  %vm7862_vm3 = vcmp.ge.f32.partialorder %v7734_v32, 0.0  ;;  %v7990_v4 = vmul.f32 0.2, %v7734_v32  ;;  %v12936_v38 = vpop.f32.mrb[25].mxu1  ;;  %v9613_v26 = vld [vmem:[%s11488_s23 + $0x28c] sm:$0xf] }
 0x22d   : > { %v9677_v39 = vcombine.low %v6570_v0, %v6580_v34  ;;  %v6595_v40 = vrot.slane %v6594_v31, 4  ;;  %vm7860_vm6 = vcmp.ge.f32.partialorder %v7732_v7, 0.0  ;;  %v7988_v43 = vmul.f32 0.2, %v7732_v7  ;;  %v12938_v37 = vpop.f32.mrb[26].mxu1 }
 0x22e   : > { %v8118_v55 = vsel %vm7862_vm3, %v7734_v32, %v7990_v4  ;;  %v7735_v44 = vadd.f32 %v10800_v58, %v12706_v14  ;;  %v7733_v46 = vadd.f32 %v10801_v29, %v12706_v14  ;;  %v6602_v42 = vshrl.u32 %v9610_v57, 16  ;;  %v12942_v49 = vpop.f32.mrb[27].mxu1 }
 0x22f   : > { %10778 = vmatprep.mubr.msk.bf16.mxu0 %vm1945_vm1, %v9677_v39  ;;  %v6600_v50 = vsel %vm11524_vm4, %v6595_v40, %v6599_v25  ;;  %v9892_v35 = vpack.c.bf16 %v8118_v55, %v8118_v55  ;;  %v8116_v13 = vsel %vm7860_vm6, %v7732_v7, %v7988_v43  ;;  %v6605_v61 = vshll.u32 %v9610_v57, 16  ;;  %v12949_v48 = vpop.f32.mrb[28].mxu0  ;;  %v9614_v7 = vld [vmem:[%s11488_s23 + $0x290] sm:$0x1]  ;;  %v11423_v43 = vld [vmem:[%s11488_s23 + $0x258] sm:$0xf] }
 0x230   : > { %v9678_v21 = vcombine.low %v6590_v33, %v6600_v50  ;;  %v9890_v62 = vpack.c.bf16 %v8116_v13, %v8116_v13  ;;  %vm7863_vm7 = vcmp.ge.f32.partialorder %v7735_v44, 0.0  ;;  %v7991_v63 = vmul.f32 0.2, %v7735_v44  ;;  %v12951_v1 = vpop.f32.mrb[29].mxu0  ;;  %v11424_v55 = vld [vmem:[%s11488_s23 + $0x25c] sm:$0xf] }
 0x231   : > { %8759 = vst.msk [vmem:[%s12740_s4 + $0x38] sm:$0xf] %vm8744_vm5, %v9892_v35  ;;  %vm7861_vm8 = vcmp.ge.f32.partialorder %v7733_v46, 0.0  ;;  %v7989_v51 = vmul.f32 0.2, %v7733_v46  ;;  %v6604_v8 = vrot.slane %v6602_v42, 4  ;;  %v10807_v36 = vadd.f32 %v12866_v24, %v12895_v45 }
 0x232   : > { %v6607_v9 = vrot.slane %v6605_v61, 5  ;;  %v12955_v16 = vpop.f32.mrb[30].mxu0  ;;  %10779 = vmatmul.mubr.msk.bf16.gmra.mrb[120].mxu0 %vm1945_vm1, %v9678_v21  ;;  %8757 = vst.msk [vmem:[%s12740_s4 + $0x30] sm:$0xf] %vm8744_vm5, %v9890_v62  ;;  %v8119_v22 = vsel %vm7863_vm7, %v7735_v44, %v7991_v63  ;;  %v6611_v2 = vshll.u32 %v9611_v54, 16  ;;  %v6615_v25 = vshrl.u32 %v9611_v54, 16 }
 0x233   : > { %v6621_v17 = vshll.u32 %v9612_v56, 16  ;;  %v12961_v27 = vpop.f32.mrb[31].mxu0  ;;  %v9893_v32 = vpack.c.bf16 %v8119_v22, %v8119_v22  ;;  %v8117_v58 = vsel %vm7861_vm8, %v7733_v46, %v7989_v51  ;;  %v6625_v31 = vshrl.u32 %v9612_v56, 16  ;;  %v12964_v29 = vpop.f32.mrb[28].mxu1  ;;  %v11425_v56 = vld [vmem:[%s11488_s23 + $0x260] sm:$0xf] }
 0x234   : > { %v6608_v0 = vor.u32 %v6607_v9, %v6604_v8  ;;  %v9891_v57 = vpack.c.bf16 %v8117_v58, %v8117_v58  ;;  %v6613_v34 = vrot.slane %v6611_v2, 5  ;;  %v6617_v33 = vrot.slane %v6615_v25, 4  ;;  %v12966_v39 = vpop.f32.mrb[29].mxu1  ;;  %v11426_v61 = vld [vmem:[%s11488_s23 + $0x264] sm:$0xf] }
 0x235   : > { %v6623_v4 = vrot.slane %v6621_v17, 5  ;;  %8760 = vst.msk [vmem:[%s12740_s4 + $0x3c] sm:$0xf] %vm8744_vm5, %v9893_v32  ;;  %v9127_v44 = vcombine.low %v11423_v43, %v11424_v55  ;;  %v6627_v46 = vrot.slane %v6625_v31, 4  ;;  %v6631_v42 = vshll.u32 %v9613_v26, 16  ;;  %v12972_v50 = vpop.f32.mrb[30].mxu1 }
 0x236   : > { %v6609_v40 = vrot.slane %v6608_v0, 4  ;;  %8758 = vst.msk [vmem:[%s12740_s4 + $0x34] sm:$0xf] %vm8744_vm5, %v9891_v57  ;;  %v6618_v35 = vor.u32 %v6617_v33, %v6613_v34  ;;  %v6635_v13 = vshrl.u32 %v9613_v26, 16  ;;  %v6641_v54 = vshll.u32 %v9614_v7, 16  ;;  %v12978_v62 = vpop.f32.mrb[31].mxu1 }
 0x237   : > { %v9128_v21 = vcombine.low %v11425_v56, %v11426_v61  ;;  %10518 = vmatprep.mubr.msk.bf16.mxu1 %vm1945_vm1, %v9127_v44  ;;  %v6628_v51 = vor.u32 %v6627_v46, %v6623_v4  ;;  %v6633_v8 = vrot.slane %v6631_v42, 5  ;;  %v10802_v9 = vadd.f32 %v12814_v3, %v12849_v47  ;;  %v12985_v22 = vpop.f32.mrb[32].mxu0 }
 0x238   : > { %v6614_v63 = vsel %vm11524_vm4, %v6609_v40, %v6613_v34  ;;  %v6619_v2 = vrot.slane %v6618_v35, 4  ;;  %v6637_v25 = vrot.slane %v6635_v13, 4  ;;  %v6643_v17 = vrot.slane %v6641_v54, 5  ;;  %v12990_v32 = vpop.f32.mrb[33].mxu0  ;;  %v11429_v35 = vld [vmem:[%s11488_s23 + $0x274] sm:$0xf] }
 0x239   : > { %10519 = vmatmul.mubr.msk.bf16.gmra.mrb[120].mxu1 %vm1945_vm1, %v9128_v21  ;;  %v10803_v26 = vadd.f32 %v12820_v11, %v12856_v15  ;;  %v6629_v58 = vrot.slane %v6628_v51, 4  ;;  %v7738_v0 = vadd.f32 %v10802_v9, %v12706_v14  ;;  %v10804_v3 = vadd.f32 %v12826_v60, %v12864_v59  ;;  %v12997_v31 = vpop.f32.mrb[34].mxu0  ;;  %v11427_v11 = vld [vmem:[%s11488_s23 + $0x26c] sm:$0xf]  ;;  %v11428_v15 = vld [vmem:[%s11488_s23 + $0x270] sm:$0xf] }
 0x23a   : > { %v10805_v47 = vadd.f32 %v12832_v28, %v12868_v30  ;;  %v6624_v7 = vsel %vm11524_vm4, %v6619_v2, %v6623_v4  ;;  %v6638_v57 = vor.u32 %v6637_v25, %v6633_v8  ;;  %v9129_v33 = vcombine.low %v11427_v11, %v11428_v15  ;;  %v13004_v40 = vpop.f32.mrb[35].mxu0  ;;  %v11430_v13 = vld [vmem:[%s11488_s23 + $0x278] sm:$0xf] }
 0x23b   : > { %v7736_v34 = vadd.f32 %v10803_v26, %v12706_v14  ;;  %v9679_v43 = vcombine.low %v6614_v63, %v6624_v7  ;;  %v6634_v60 = vsel %vm11524_vm4, %v6629_v58, %v6633_v8  ;;  %vm7866_vm9 = vcmp.ge.f32.partialorder %v7738_v0, 0.0  ;;  %v13008_v59 = vpop.f32.mrb[32].mxu1 }
 0x23c   : > { %v7994_v28 = vmul.f32 0.2, %v7738_v0  ;;  %v6639_v30 = vrot.slane %v6638_v57, 4  ;;  %v7739_v55 = vadd.f32 %v10804_v3, %v12706_v14  ;;  %10522 = vmatprep.mubr.msk.bf16.mxu1 %vm1945_vm1, %v9129_v33  ;;  %v13012_v44 = vpop.f32.mrb[33].mxu1  ;;  %v7737_v42 = vadd.f32 %v10805_v47, %v12706_v14 }
 0x23d   : > { %vm7864_vm10 = vcmp.ge.f32.partialorder %v7736_v34, 0.0  ;;  %v7992_v4 = vmul.f32 0.2, %v7736_v34  ;;  %10782 = vmatprep.mubr.msk.bf16.mxu0 %vm1945_vm1, %v9679_v43  ;;  %v9130_v54 = vcombine.low %v11429_v35, %v11430_v13  ;;  %v10806_v56 = vadd.f32 %v12862_v20, %v12888_v10  ;;  %v13020_v61 = vpop.f32.mrb[34].mxu1 }
 0x23e   : > { %v8122_v46 = vsel %vm7866_vm9, %v7738_v0, %v7994_v28  ;;  %v6644_v21 = vsel %vm11524_vm4, %v6639_v30, %v6643_v17  ;;  %vm7867_vm11 = vcmp.ge.f32.partialorder %v7739_v55, 0.0  ;;  %v13024_v8 = vpop.f32.mrb[35].mxu1  ;;  %v7995_v25 = vmul.f32 0.2, %v7739_v55 }
 0x23f   : > { %v9896_v63 = vpack.c.bf16 %v8122_v46, %v8122_v46  ;;  %v8120_v51 = vsel %vm7864_vm10, %v7736_v34, %v7992_v4  ;;  %v9680_v9 = vcombine.low %v6634_v60, %v6644_v21  ;;  %vm7865_vm12 = vcmp.ge.f32.partialorder %v7737_v42, 0.0 }
 0x240   : > { %v9894_v2 = vpack.c.bf16 %v8120_v51, %v8120_v51  ;;  %v7993_v26 = vmul.f32 0.2, %v7737_v42  ;;  %v7742_v20 = vadd.f32 %v10806_v56, %v12706_v14  ;;  %v10808_v10 = vadd.f32 %v12873_v5, %v12897_v53  ;;  %v13034_v17 = vpop.f32.mrb[36].mxu0 }
 0x241   : > { %8763 = vst.msk [vmem:[%s12740_s4 + $0x48] sm:$0xf] %vm8744_vm5, %v9896_v63  ;;  %10523 = vmatmul.mubr.msk.bf16.gmra.mrb[124].mxu1 %vm1945_vm1, %v9130_v54  ;;  %10783 = vmatmul.mubr.msk.bf16.gmra.mrb[124].mxu0 %vm1945_vm1, %v9680_v9  ;;  %v8123_v58 = vsel %vm7867_vm11, %v7739_v55, %v7995_v25  ;;  %v10809_v0 = vadd.f32 %v12881_v18, %v12900_v41  ;;  %v13045_v45 = vpop.f32.mrb[37].mxu0 }
 0x242   : > { %8761 = vst.msk [vmem:[%s12740_s4 + $0x40] sm:$0xf] %vm8744_vm5, %v9894_v2  ;;  %v10810_v3 = vadd.f32 %v12908_v6, %v12930_v12  ;;  %v10811_v24 = vadd.f32 %v12912_v19, %v12936_v38  ;;  %v9897_v5 = vpack.c.bf16 %v8123_v58, %v8123_v58  ;;  %v8121_v53 = vsel %vm7865_vm12, %v7737_v42, %v7993_v26  ;;  %v13048_v7 = vpop.f32.mrb[38].mxu0 }
 0x243   : > { %vm7870_vm1 = vcmp.ge.f32.partialorder %v7742_v20, 0.0  ;;  %v7998_v47 = vmul.f32 0.2, %v7742_v20  ;;  %v9895_v57 = vpack.c.bf16 %v8121_v53, %v8121_v53  ;;  %v7740_v34 = vadd.f32 %v10807_v36, %v12706_v14  ;;  %v13053_v6 = vpop.f32.mrb[39].mxu0  ;;  %v13055_v19 = vpop.f32.mrb[36].mxu1 }
 0x244   : > { %v7743_v18 = vadd.f32 %v10808_v10, %v12706_v14  ;;  %v7741_v41 = vadd.f32 %v10809_v0, %v12706_v14  ;;  %8764 = vst.msk [vmem:[%s12740_s4 + $0x4c] sm:$0xf] %vm8744_vm5, %v9897_v5  ;;  %v7746_v38 = vadd.f32 %v10810_v3, %v12706_v14  ;;  %v7744_v11 = vadd.f32 %v10811_v24, %v12706_v14  ;;  %v13063_v33 = vpop.f32.mrb[37].mxu1 }
 0x245   : > { %v8126_v12 = vsel %vm7870_vm1, %v7742_v20, %v7998_v47  ;;  %v10812_v15 = vadd.f32 %v12917_v23, %v12938_v37  ;;  %8762 = vst.msk [vmem:[%s12740_s4 + $0x44] sm:$0xf] %vm8744_vm5, %v9895_v57  ;;  %vm7868_vm4 = vcmp.ge.f32.partialorder %v7740_v34, 0.0  ;;  %v7996_v60 = vmul.f32 0.2, %v7740_v34  ;;  %v13067_v28 = vpop.f32.mrb[38].mxu1 }
 0x246   : > { %v9900_v43 = vpack.c.bf16 %v8126_v12, %v8126_v12  ;;  %vm7871_vm13 = vcmp.ge.f32.partialorder %v7743_v18, 0.0  ;;  %v7999_v30 = vmul.f32 0.2, %v7743_v18  ;;  %vm7869_vm14 = vcmp.ge.f32.partialorder %v7741_v41, 0.0  ;;  %v13071_v37 = vpop.f32.mrb[39].mxu1 }
 0x247   : > { %v7997_v4 = vmul.f32 0.2, %v7741_v41  ;;  %vm7874_vm15 = vcmp.ge.f32.partialorder %v7746_v38, 0.0  ;;  %v8124_v55 = vsel %vm7868_vm4, %v7740_v34, %v7996_v60  ;;  %v8002_v46 = vmul.f32 0.2, %v7746_v38 }
 0x248   : > { %8767 = vst.msk [vmem:[%s12740_s4 + $0x58] sm:$0xf] %vm8744_vm5, %v9900_v43  ;;  %vm7872_vm0 = vcmp.ge.f32.partialorder %v7744_v11, 0.0  ;;  %v8000_v23 = vmul.f32 0.2, %v7744_v11  ;;  %v9898_v42 = vpack.c.bf16 %v8124_v55, %v8124_v55  ;;  %v8127_v35 = vsel %vm7871_vm13, %v7743_v18, %v7999_v30  ;;  %v13074_v56 = vpop.f32.mrb[40].mxu0 }
 0x249   : > { %v8125_v13 = vsel %vm7869_vm14, %v7741_v41, %v7997_v4  ;;  %v7747_v54 = vadd.f32 %v10812_v15, %v12706_v14  ;;  %v9901_v21 = vpack.c.bf16 %v8127_v35, %v8127_v35  ;;  %v8130_v51 = vsel %vm7874_vm15, %v7746_v38, %v8002_v46  ;;  %v13076_v2 = vpop.f32.mrb[41].mxu0 }
 0x24a   : > { %v9899_v63 = vpack.c.bf16 %v8125_v13, %v8125_v13  ;;  %v8128_v9 = vsel %vm7872_vm0, %v7744_v11, %v8000_v23  ;;  %8765 = vst.msk [vmem:[%s12740_s4 + $0x50] sm:$0xf] %vm8744_vm5, %v9898_v42  ;;  %v9904_v25 = vpack.c.bf16 %v8130_v51, %v8130_v51  ;;  %v13080_v36 = vpop.f32.mrb[42].mxu0  ;;  %v10813_v10 = vadd.f32 %v12922_v52, %v12942_v49 }
 0x24b   : > { %v9902_v26 = vpack.c.bf16 %v8128_v9, %v8128_v9  ;;  %vm7875_vm2 = vcmp.ge.f32.partialorder %v7747_v54, 0.0  ;;  %v8003_v20 = vmul.f32 0.2, %v7747_v54  ;;  %8768 = vst.msk [vmem:[%s12740_s4 + $0x5c] sm:$0xf] %vm8744_vm5, %v9901_v21  ;;  %v10814_v58 = vadd.f32 %v12949_v48, %v12964_v29  ;;  %v13094_v24 = vpop.f32.mrb[43].mxu0 }
 0x24c   : > { %8766 = vst.msk [vmem:[%s12740_s4 + $0x54] sm:$0xf] %vm8744_vm5, %v9899_v63  ;;  %v10815_v0 = vadd.f32 %v12951_v1, %v12966_v39  ;;  %v10816_v3 = vadd.f32 %v12955_v16, %v12972_v50  ;;  %v13096_v5 = vpop.f32.mrb[40].mxu1  ;;  %8771 = vst.msk [vmem:[%s12740_s4 + $0x68] sm:$0xf] %vm8744_vm5, %v9904_v25  ;;  %v10817_v52 = vadd.f32 %v12961_v27, %v12978_v62 }
 0x24d   : > { %8769 = vst.msk [vmem:[%s12740_s4 + $0x60] sm:$0xf] %vm8744_vm5, %v9902_v26  ;;  %v8131_v53 = vsel %vm7875_vm2, %v7747_v54, %v8003_v20  ;;  %v10818_v49 = vadd.f32 %v12985_v22, %v13008_v59  ;;  %v10819_v48 = vadd.f32 %v12990_v32, %v13012_v44  ;;  %v13108_v1 = vpop.f32.mrb[41].mxu1  ;;  %v7745_v29 = vadd.f32 %v10813_v10, %v12706_v14 }
 0x24e   : > { %v9905_v16 = vpack.c.bf16 %v8131_v53, %v8131_v53  ;;  %v7750_v39 = vadd.f32 %v10814_v58, %v12706_v14  ;;  %v7748_v50 = vadd.f32 %v10815_v0, %v12706_v14  ;;  %v13113_v47 = vpop.f32.mrb[42].mxu1  ;;  %v7751_v57 = vadd.f32 %v10816_v3, %v12706_v14 }
 0x24f   : > { %v7749_v27 = vadd.f32 %v10817_v52, %v12706_v14  ;;  %v7754_v62 = vadd.f32 %v10818_v49, %v12706_v14  ;;  %v7752_v22 = vadd.f32 %v10819_v48, %v12706_v14  ;;  %v13119_v32 = vpop.f32.mrb[43].mxu1  ;;  %vm7873_vm3 = vcmp.ge.f32.partialorder %v7745_v29, 0.0 }
 0x250   : > { %8772 = vst.msk [vmem:[%s12740_s4 + $0x6c] sm:$0xf] %vm8744_vm5, %v9905_v16  ;;  %v8001_v59 = vmul.f32 0.2, %v7745_v29  ;;  %vm7878_vm6 = vcmp.ge.f32.partialorder %v7750_v39, 0.0  ;;  %vm7876_vm7 = vcmp.ge.f32.partialorder %v7748_v50, 0.0  ;;  %v10820_v63 = vadd.f32 %v12997_v31, %v13020_v61 }
 0x251   : > { %v8006_v44 = vmul.f32 0.2, %v7750_v39  ;;  %v8004_v34 = vmul.f32 0.2, %v7748_v50  ;;  %vm7879_vm8 = vcmp.ge.f32.partialorder %v7751_v57, 0.0  ;;  %vm7877_vm9 = vcmp.ge.f32.partialorder %v7749_v27, 0.0 }
 0x252   : > { %v8007_v18 = vmul.f32 0.2, %v7751_v57  ;;  %v8129_v41 = vsel %vm7873_vm3, %v7745_v29, %v8001_v59  ;;  %v8005_v38 = vmul.f32 0.2, %v7749_v27  ;;  %v13123_v11 = vpop.f32.mrb[44].mxu0  ;;  %vm7882_vm10 = vcmp.ge.f32.partialorder %v7754_v62, 0.0 }
 0x253   : > { %v8134_v12 = vsel %vm7878_vm6, %v7750_v39, %v8006_v44  ;;  %v9903_v14 = vpack.c.bf16 %v8129_v41, %v8129_v41  ;;  %v8132_v43 = vsel %vm7876_vm7, %v7748_v50, %v8004_v34  ;;  %v13125_v30 = vpop.f32.mrb[45].mxu0  ;;  %v13129_v42 = vpop.f32.mrb[44].mxu1  ;;  %v8010_v13 = vmul.f32 0.2, %v7754_v62 }
 0x254   : > { %v9908_v15 = vpack.c.bf16 %v8134_v12, %v8134_v12  ;;  %v8135_v60 = vsel %vm7879_vm8, %v7751_v57, %v8007_v18  ;;  %v9906_v4 = vpack.c.bf16 %v8132_v43, %v8132_v43  ;;  %v8133_v46 = vsel %vm7877_vm9, %v7749_v27, %v8005_v38  ;;  %v13127_v23 = vpop.f32.mrb[46].mxu0  ;;  %v3417_v26 = vpop.f32.mrb[45].mxu1 }
 0x255   : > { %v9909_v55 = vpack.c.bf16 %v8135_v60, %v8135_v60  ;;  %8770 = vst.msk [vmem:[%s12740_s4 + $0x64] sm:$0xf] %vm8744_vm5, %v9903_v14  ;;  %v9907_v35 = vpack.c.bf16 %v8133_v46, %v8133_v46  ;;  %vm7880_vm11 = vcmp.ge.f32.partialorder %v7752_v22, 0.0  ;;  %v8008_v54 = vmul.f32 0.2, %v7752_v22  ;;  %v13135_v21 = vpop.f32.mrb[47].mxu0 }
 0x256   : > { %8775 = vst.msk [vmem:[%s12740_s4 + $0x78] sm:$0xf] %vm8744_vm5, %v9908_v15  ;;  %8773 = vst.msk [vmem:[%s12740_s4 + $0x70] sm:$0xf] %vm8744_vm5, %v9906_v4  ;;  %v10821_v51 = vadd.f32 %v13004_v40, %v13024_v8  ;;  %v10822_v9 = vadd.f32 %v13034_v17, %v13055_v19  ;;  %v10823_v25 = vadd.f32 %v13045_v45, %v13063_v33  ;;  %v10445_v61 = vpop.f32.mrb[46].mxu1 }
 0x257   : > { %8776 = vst.msk [vmem:[%s12740_s4 + $0x7c] sm:$0xf] %vm8744_vm5, %v9909_v55  ;;  %8774 = vst.msk [vmem:[%s12740_s4 + $0x74] sm:$0xf] %vm8744_vm5, %v9907_v35  ;;  %v8138_v20 = vsel %vm7882_vm10, %v7754_v62, %v8010_v13  ;;  %v8136_v10 = vsel %vm7880_vm11, %v7752_v22, %v8008_v54  ;;  %v10824_v31 = vadd.f32 %v13048_v7, %v13067_v28  ;;  %v13159_v45 = vld [vmem:[%s13512_s2] ss:$0 sm:$0xff] }
 0x258   : > { %v10825_v40 = vadd.f32 %v13053_v6, %v13071_v37  ;;  %v9912_v8 = vpack.c.bf16 %v8138_v20, %v8138_v20  ;;  %v9910_v17 = vpack.c.bf16 %v8136_v10, %v8136_v10  ;;  %v7755_v19 = vadd.f32 %v13159_v45, %v10820_v63  ;;  %v13163_v58 = vpop.f32.mrb[47].mxu1 }
 0x259   : > { %v7753_v33 = vadd.f32 %v13159_v45, %v10821_v51  ;;  %v7758_v0 = vadd.f32 %v13159_v45, %v10822_v9  ;;  %v7756_v7 = vadd.f32 %v13159_v45, %v10823_v25  ;;  %v7759_v6 = vadd.f32 %v13159_v45, %v10824_v31 }
 0x25a   : > { %v7757_v28 = vadd.f32 %v13159_v45, %v10825_v40  ;;  %8779 = vst.msk [vmem:[%s12740_s4 + $0x88] sm:$0xf] %vm8744_vm5, %v9912_v8  ;;  %8777 = vst.msk [vmem:[%s12740_s4 + $0x80] sm:$0xf] %vm8744_vm5, %v9910_v17  ;;  %vm7883_vm12 = vcmp.ge.f32.partialorder %v7755_v19, 0.0  ;;  %v13173_v29 = vpop.f32.mrb[48].mxu0  ;;  %v10826_v15 = vadd.f32 %v13074_v56, %v13096_v5  ;;  %v10827_v43 = vadd.f32 %v13076_v2, %v13108_v1 }
 0x25b   : > { %v8011_v37 = vmul.f32 0.2, %v7755_v19  ;;  %vm7881_vm1 = vcmp.ge.f32.partialorder %v7753_v33, 0.0  ;;  %v8009_v3 = vmul.f32 0.2, %v7753_v33  ;;  %vm7886_vm4 = vcmp.ge.f32.partialorder %v7758_v0, 0.0 }
 0x25c   : > { %v8014_v53 = vmul.f32 0.2, %v7758_v0  ;;  %vm7884_vm13 = vcmp.ge.f32.partialorder %v7756_v7, 0.0  ;;  %v8012_v52 = vmul.f32 0.2, %v7756_v7  ;;  %vm7887_vm14 = vcmp.ge.f32.partialorder %v7759_v6, 0.0 }
 0x25d   : > { %v8139_v49 = vsel %vm7883_vm12, %v7755_v19, %v8011_v37  ;;  %v8137_v48 = vsel %vm7881_vm1, %v7753_v33, %v8009_v3  ;;  %v8015_v16 = vmul.f32 0.2, %v7759_v6  ;;  %v13175_v39 = vpop.f32.mrb[48].mxu1  ;;  %v13177_v22 = vpop.f32.mrb[49].mxu0  ;;  %vm7885_vm15 = vcmp.ge.f32.partialorder %v7757_v28, 0.0 }
 0x25e   : > { %v9913_v50 = vpack.c.bf16 %v8139_v49, %v8139_v49  ;;  %v9911_v57 = vpack.c.bf16 %v8137_v48, %v8137_v48  ;;  %v8142_v27 = vsel %vm7886_vm4, %v7758_v0, %v8014_v53  ;;  %v8140_v62 = vsel %vm7884_vm13, %v7756_v7, %v8012_v52  ;;  %v13179_v59 = vpop.f32.mrb[49].mxu1  ;;  %v13181_v41 = vpop.f32.mrb[50].mxu0 }
 0x25f   : > { %v9916_v44 = vpack.c.bf16 %v8142_v27, %v8142_v27  ;;  %v9914_v34 = vpack.c.bf16 %v8140_v62, %v8140_v62  ;;  %v8143_v18 = vsel %vm7887_vm14, %v7759_v6, %v8015_v16  ;;  %v13183_v12 = vpop.f32.mrb[50].mxu1  ;;  %v8013_v14 = vmul.f32 0.2, %v7757_v28  ;;  %v13193_v60 = vpop.f32.mrb[51].mxu0 }
 0x260   : > { %8780 = vst.msk [vmem:[%s12740_s4 + $0x8c] sm:$0xf] %vm8744_vm5, %v9913_v50  ;;  %8778 = vst.msk [vmem:[%s12740_s4 + $0x84] sm:$0xf] %vm8744_vm5, %v9911_v57  ;;  %v9917_v38 = vpack.c.bf16 %v8143_v18, %v8143_v18  ;;  %v13195_v4 = vpop.f32.mrb[51].mxu1  ;;  %v10828_v55 = vadd.f32 %v13080_v36, %v13113_v47  ;;  %v10829_v46 = vadd.f32 %v13094_v24, %v13119_v32 }
 0x261   : > { %8783 = vst.msk [vmem:[%s12740_s4 + $0x98] sm:$0xf] %vm8744_vm5, %v9916_v44  ;;  %8781 = vst.msk [vmem:[%s12740_s4 + $0x90] sm:$0xf] %vm8744_vm5, %v9914_v34  ;;  %v10830_v56 = vadd.f32 %v13123_v11, %v13129_v42  ;;  %v10831_v2 = vadd.f32 %v13125_v30, %v3417_v26  ;;  %v8141_v5 = vsel %vm7885_vm15, %v7757_v28, %v8013_v14 }
 0x262   : > { %8784 = vst.msk [vmem:[%s12740_s4 + $0x9c] sm:$0xf] %vm8744_vm5, %v9917_v38  ;;  %v7762_v1 = vadd.f32 %v13159_v45, %v10826_v15  ;;  %v7760_v35 = vadd.f32 %v13159_v45, %v10827_v43  ;;  %v10832_v13 = vadd.f32 %v13127_v23, %v10445_v61  ;;  %v9915_v36 = vpack.c.bf16 %v8141_v5, %v8141_v5  ;;  %v13217_v11 = vpop.f32.mrb[52].mxu0 }
 0x263   : > { %v7763_v47 = vadd.f32 %v13159_v45, %v10828_v55  ;;  %v7761_v24 = vadd.f32 %v13159_v45, %v10829_v46  ;;  %v7766_v32 = vadd.f32 %v13159_v45, %v10830_v56  ;;  %v13221_v25 = vpop.f32.mrb[53].mxu0  ;;  %v10452_v26 = vpop.f32.mrb[52].mxu1  ;;  %v7764_v0 = vadd.f32 %v13159_v45, %v10831_v2 }
 0x264   : > { %vm7890_vm0 = vcmp.ge.f32.partialorder %v7762_v1, 0.0  ;;  %v8018_v30 = vmul.f32 0.2, %v7762_v1  ;;  %vm7888_vm2 = vcmp.ge.f32.partialorder %v7760_v35, 0.0  ;;  %v8016_v42 = vmul.f32 0.2, %v7760_v35 }
 0x265   : > { %8782 = vst.msk [vmem:[%s12740_s4 + $0x94] sm:$0xf] %vm8744_vm5, %v9915_v36  ;;  %vm7891_vm3 = vcmp.ge.f32.partialorder %v7763_v47, 0.0  ;;  %v8019_v54 = vmul.f32 0.2, %v7763_v47  ;;  %vm7889_vm6 = vcmp.ge.f32.partialorder %v7761_v24, 0.0  ;;  %v7767_v37 = vadd.f32 %v13159_v45, %v10832_v13 }
 0x266   : > { %v8017_v63 = vmul.f32 0.2, %v7761_v24  ;;  %v8146_v23 = vsel %vm7890_vm0, %v7762_v1, %v8018_v30  ;;  %v8144_v51 = vsel %vm7888_vm2, %v7760_v35, %v8016_v42  ;;  %vm7894_vm7 = vcmp.ge.f32.partialorder %v7766_v32, 0.0  ;;  %v13223_v61 = vpop.f32.mrb[54].mxu0  ;;  %v3449_v8 = vpop.f32.mrb[53].mxu1 }
 0x267   : > { %v8022_v9 = vmul.f32 0.2, %v7766_v32  ;;  %v9920_v20 = vpack.c.bf16 %v8146_v23, %v8146_v23  ;;  %v9918_v10 = vpack.c.bf16 %v8144_v51, %v8144_v51  ;;  %v8147_v31 = vsel %vm7891_vm3, %v7763_v47, %v8019_v54  ;;  %v13226_v7 = vpop.f32.mrb[55].mxu0  ;;  %v10453_v6 = vpop.f32.mrb[54].mxu1 }
 0x268   : > { %v8145_v40 = vsel %vm7889_vm6, %v7761_v24, %v8017_v63  ;;  %v9921_v17 = vpack.c.bf16 %v8147_v31, %v8147_v31  ;;  %v10833_v3 = vadd.f32 %v13135_v21, %v13163_v58  ;;  %v10834_v53 = vadd.f32 %v13173_v29, %v13175_v39  ;;  %v3452_v52 = vpop.f32.mrb[55].mxu1 }
 0x269   : > { %v9919_v19 = vpack.c.bf16 %v8145_v40, %v8145_v40  ;;  %v8150_v33 = vsel %vm7894_vm7, %v7766_v32, %v8022_v9  ;;  %8787 = vst.msk [vmem:[%s12740_s4 + $0xa8] sm:$0xf] %vm8744_vm5, %v9920_v20  ;;  %8785 = vst.msk [vmem:[%s12740_s4 + $0xa0] sm:$0xf] %vm8744_vm5, %v9918_v10  ;;  %vm7892_vm8 = vcmp.ge.f32.partialorder %v7764_v0, 0.0  ;;  %v10835_v48 = vadd.f32 %v13177_v22, %v13179_v59 }
 0x26a   : > { %v9924_v28 = vpack.c.bf16 %v8150_v33, %v8150_v33  ;;  %8788 = vst.msk [vmem:[%s12740_s4 + $0xac] sm:$0xf] %vm8744_vm5, %v9921_v17  ;;  %v8020_v49 = vmul.f32 0.2, %v7764_v0  ;;  %v10836_v16 = vadd.f32 %v13181_v41, %v13183_v12  ;;  %vm7895_vm9 = vcmp.ge.f32.partialorder %v7767_v37, 0.0 }
 0x26b   : > { %8786 = vst.msk [vmem:[%s12740_s4 + $0xa4] sm:$0xf] %vm8744_vm5, %v9919_v19  ;;  %v8023_v21 = vmul.f32 0.2, %v7767_v37  ;;  %v7765_v58 = vadd.f32 %v13159_v45, %v10833_v3  ;;  %v7770_v29 = vadd.f32 %v13159_v45, %v10834_v53  ;;  %v7768_v50 = vadd.f32 %v13159_v45, %v10835_v48  ;;  %v10716_v44 = vpop.f32.mrb[56].mxu0 }
 0x26c   : > { %8791 = vst.msk [vmem:[%s12740_s4 + $0xb8] sm:$0xf] %vm8744_vm5, %v9924_v28  ;;  %v8148_v39 = vsel %vm7892_vm8, %v7764_v0, %v8020_v49  ;;  %v7771_v57 = vadd.f32 %v13159_v45, %v10836_v16  ;;  %v10837_v27 = vadd.f32 %v13193_v60, %v13195_v4  ;;  %v7298_v41 = vpop.f32.mrb[57].mxu0  ;;  %v10456_v12 = vpop.f32.mrb[56].mxu1  ;;  %v10838_v46 = vadd.f32 %v13217_v11, %v10452_v26 }
 0x26d   : > { %v9922_v62 = vpack.c.bf16 %v8148_v39, %v8148_v39  ;;  %v8151_v22 = vsel %vm7895_vm9, %v7767_v37, %v8023_v21  ;;  %vm7893_vm10 = vcmp.ge.f32.partialorder %v7765_v58, 0.0  ;;  %v8021_v59 = vmul.f32 0.2, %v7765_v58  ;;  %v10717_v43 = vpop.f32.mrb[58].mxu0  ;;  %v3465_v2 = vpop.f32.mrb[57].mxu1 }
 0x26e   : > { %v9925_v34 = vpack.c.bf16 %v8151_v22, %v8151_v22  ;;  %vm7898_vm11 = vcmp.ge.f32.partialorder %v7770_v29, 0.0  ;;  %v8026_v18 = vmul.f32 0.2, %v7770_v29  ;;  %vm7896_vm12 = vcmp.ge.f32.partialorder %v7768_v50, 0.0  ;;  %v7301_v56 = vpop.f32.mrb[59].mxu0  ;;  %v10457_v36 = vpop.f32.mrb[58].mxu1 }
 0x26f   : > { %8789 = vst.msk [vmem:[%s12740_s4 + $0xb0] sm:$0xf] %vm8744_vm5, %v9922_v62  ;;  %v8149_v38 = vsel %vm7893_vm10, %v7765_v58, %v8021_v59  ;;  %v8024_v14 = vmul.f32 0.2, %v7768_v50  ;;  %vm7899_vm1 = vcmp.ge.f32.partialorder %v7771_v57, 0.0  ;;  %v7769_v55 = vadd.f32 %v13159_v45, %v10837_v27  ;;  %v3468_v30 = vpop.f32.mrb[59].mxu1 }
 0x270   : > { %v8027_v15 = vmul.f32 0.2, %v7771_v57  ;;  %8792 = vst.msk [vmem:[%s12740_s4 + $0xbc] sm:$0xf] %vm8744_vm5, %v9925_v34  ;;  %v9923_v60 = vpack.c.bf16 %v8149_v38, %v8149_v38  ;;  %v8154_v4 = vsel %vm7898_vm11, %v7770_v29, %v8026_v18  ;;  %v10839_v13 = vadd.f32 %v13221_v25, %v3449_v8 }
 0x271   : > { %v9928_v5 = vpack.c.bf16 %v8154_v4, %v8154_v4  ;;  %v8152_v1 = vsel %vm7896_vm12, %v7768_v50, %v8024_v14  ;;  %vm7897_vm4 = vcmp.ge.f32.partialorder %v7769_v55, 0.0  ;;  %v8025_v32 = vmul.f32 0.2, %v7769_v55 }
 0x272   : > { %v8155_v35 = vsel %vm7899_vm1, %v7771_v57, %v8027_v15  ;;  %8790 = vst.msk [vmem:[%s12740_s4 + $0xb4] sm:$0xf] %vm8744_vm5, %v9923_v60  ;;  %v9926_v47 = vpack.c.bf16 %v8152_v1, %v8152_v1  ;;  %v7774_v11 = vadd.f32 %v13159_v45, %v10838_v46  ;;  %v7772_v42 = vadd.f32 %v13159_v45, %v10839_v13 }
 0x273   : > { %v9929_v24 = vpack.c.bf16 %v8155_v35, %v8155_v35  ;;  %8795 = vst.msk [vmem:[%s12740_s4 + $0xc8] sm:$0xf] %vm8744_vm5, %v9928_v5  ;;  %v10840_v54 = vadd.f32 %v13223_v61, %v10453_v6  ;;  %v10841_v63 = vadd.f32 %v13226_v7, %v3452_v52  ;;  %v8153_v23 = vsel %vm7897_vm4, %v7769_v55, %v8025_v32  ;;  %v10720_v10 = vpop.f32.mrb[60].mxu0 }
 0x274   : > { %8793 = vst.msk [vmem:[%s12740_s4 + $0xc0] sm:$0xf] %vm8744_vm5, %v9926_v47  ;;  %v10842_v51 = vadd.f32 %v10716_v44, %v10456_v12  ;;  %v10843_v9 = vadd.f32 %v7298_v41, %v3465_v2  ;;  %v10844_v25 = vadd.f32 %v10717_v43, %v10457_v36  ;;  %v9927_v26 = vpack.c.bf16 %v8153_v23, %v8153_v23  ;;  %v7314_v17 = vpop.f32.mrb[61].mxu0  ;;  %v10460_v19 = vpop.f32.mrb[60].mxu1 }
 0x275   : > { %8796 = vst.msk [vmem:[%s12740_s4 + $0xcc] sm:$0xf] %vm8744_vm5, %v9929_v24  ;;  %vm7902_vm13 = vcmp.ge.f32.partialorder %v7774_v11, 0.0  ;;  %v8030_v20 = vmul.f32 0.2, %v7774_v11  ;;  %vm7900_vm14 = vcmp.ge.f32.partialorder %v7772_v42, 0.0  ;;  %v7775_v40 = vadd.f32 %v13159_v45, %v10840_v54 }
 0x276   : > { %v8028_v31 = vmul.f32 0.2, %v7772_v42  ;;  %v7773_v61 = vadd.f32 %v13159_v45, %v10841_v63  ;;  %v7778_v8 = vadd.f32 %v13159_v45, %v10842_v51  ;;  %8794 = vst.msk [vmem:[%s12740_s4 + $0xc4] sm:$0xf] %vm8744_vm5, %v9927_v26  ;;  %v7776_v0 = vadd.f32 %v13159_v45, %v10843_v9  ;;  %v10721_v7 = vpop.f32.mrb[62].mxu0  ;;  %v3481_v37 = vpop.f32.mrb[61].mxu1 }
 0x277   : > { %v8158_v33 = vsel %vm7902_vm13, %v7774_v11, %v8030_v20  ;;  %v7779_v6 = vadd.f32 %v13159_v45, %v10844_v25  ;;  %v10845_v28 = vadd.f32 %v7301_v56, %v3468_v30  ;;  %vm7903_vm15 = vcmp.ge.f32.partialorder %v7775_v40, 0.0  ;;  %v7317_v49 = vpop.f32.mrb[63].mxu0  ;;  %v10461_v48 = vpop.f32.mrb[62].mxu1 }
 0x278   : > { %v9932_v3 = vpack.c.bf16 %v8158_v33, %v8158_v33  ;;  %v8156_v53 = vsel %vm7900_vm14, %v7772_v42, %v8028_v31  ;;  %v8031_v52 = vmul.f32 0.2, %v7775_v40  ;;  %vm7901_vm0 = vcmp.ge.f32.partialorder %v7773_v61, 0.0  ;;  %v3484_v58 = vpop.f32.mrb[63].mxu1 }
 0x279   : > { %v9930_v16 = vpack.c.bf16 %v8156_v53, %v8156_v53  ;;  %v8029_v21 = vmul.f32 0.2, %v7773_v61  ;;  %vm7906_vm2 = vcmp.ge.f32.partialorder %v7778_v8, 0.0  ;;  %v8034_v39 = vmul.f32 0.2, %v7778_v8 }
 0x27a   : > { %8799 = vst.msk [vmem:[%s12740_s4 + $0xd8] sm:$0xf] %vm8744_vm5, %v9932_v3  ;;  %v8159_v29 = vsel %vm7903_vm15, %v7775_v40, %v8031_v52  ;;  %vm7904_vm3 = vcmp.ge.f32.partialorder %v7776_v0, 0.0  ;;  %v8032_v50 = vmul.f32 0.2, %v7776_v0  ;;  %vm7907_vm6 = vcmp.ge.f32.partialorder %v7779_v6, 0.0 }
 0x27b   : > { %8797 = vst.msk [vmem:[%s12740_s4 + $0xd0] sm:$0xf] %vm8744_vm5, %v9930_v16  ;;  %v9933_v57 = vpack.c.bf16 %v8159_v29, %v8159_v29  ;;  %v8157_v27 = vsel %vm7901_vm0, %v7773_v61, %v8029_v21  ;;  %v8035_v62 = vmul.f32 0.2, %v7779_v6  ;;  %v8162_v59 = vsel %vm7906_vm2, %v7778_v8, %v8034_v39  ;;  %v10724_v38 = vpop.f32.mrb[64].mxu0 }
 0x27c   : > { %v9931_v22 = vpack.c.bf16 %v8157_v27, %v8157_v27  ;;  %v8160_v44 = vsel %vm7904_vm3, %v7776_v0, %v8032_v50  ;;  %v7777_v34 = vadd.f32 %v13159_v45, %v10845_v28  ;;  %v9936_v18 = vpack.c.bf16 %v8162_v59, %v8162_v59  ;;  %v7330_v60 = vpop.f32.mrb[65].mxu0 }
 0x27d   : > { %8800 = vst.msk [vmem:[%s12740_s4 + $0xdc] sm:$0xf] %vm8744_vm5, %v9933_v57  ;;  %v9934_v41 = vpack.c.bf16 %v8160_v44, %v8160_v44  ;;  %v8163_v12 = vsel %vm7907_vm6, %v7779_v6, %v8035_v62  ;;  %v10846_v14 = vadd.f32 %v10720_v10, %v10460_v19  ;;  %v10847_v4 = vadd.f32 %v7314_v17, %v3481_v37  ;;  %v10464_v55 = vpop.f32.mrb[64].mxu1  ;;  %v10725_v56 = vpop.f32.mrb[66].mxu0 }
 0x27e   : > { %8798 = vst.msk [vmem:[%s12740_s4 + $0xd4] sm:$0xf] %vm8744_vm5, %v9931_v22  ;;  %v9937_v15 = vpack.c.bf16 %v8163_v12, %v8163_v12  ;;  %vm7905_vm7 = vcmp.ge.f32.partialorder %v7777_v34, 0.0  ;;  %v8033_v43 = vmul.f32 0.2, %v7777_v34  ;;  %v10848_v2 = vadd.f32 %v10721_v7, %v10461_v48  ;;  %v3497_v35 = vpop.f32.mrb[65].mxu1 }
 0x27f   : > { %8803 = vst.msk [vmem:[%s12740_s4 + $0xe8] sm:$0xf] %vm8744_vm5, %v9936_v18  ;;  %8801 = vst.msk [vmem:[%s12740_s4 + $0xe0] sm:$0xf] %vm8744_vm5, %v9934_v41  ;;  %v7782_v46 = vadd.f32 %v13159_v45, %v10846_v14  ;;  %v10849_v5 = vadd.f32 %v7317_v49, %v3484_v58  ;;  %v10850_v1 = vadd.f32 %v10724_v38, %v10464_v55  ;;  %v7333_v47 = vpop.f32.mrb[67].mxu0  ;;  %v10465_v32 = vpop.f32.mrb[66].mxu1 }
 0x280   : > { %8804 = vst.msk [vmem:[%s12740_s4 + $0xec] sm:$0xf] %vm8744_vm5, %v9937_v15  ;;  %v8161_v13 = vsel %vm7905_vm7, %v7777_v34, %v8033_v43  ;;  %v7780_v36 = vadd.f32 %v13159_v45, %v10847_v4  ;;  %v10851_v24 = vadd.f32 %v7330_v60, %v3497_v35  ;;  %v7783_v42 = vadd.f32 %v13159_v45, %v10848_v2  ;;  %v3500_v54 = vpop.f32.mrb[67].mxu1 }
 0x281   : > { %v9935_v30 = vpack.c.bf16 %v8161_v13, %v8161_v13  ;;  %vm7910_vm8 = vcmp.ge.f32.partialorder %v7782_v46, 0.0  ;;  %v8038_v11 = vmul.f32 0.2, %v7782_v46  ;;  %v7781_v23 = vadd.f32 %v13159_v45, %v10849_v5 }
 0x282   : > { %vm7908_vm9 = vcmp.ge.f32.partialorder %v7780_v36, 0.0  ;;  %v8036_v63 = vmul.f32 0.2, %v7780_v36  ;;  %v7786_v51 = vadd.f32 %v13159_v45, %v10850_v1  ;;  %vm7911_vm10 = vcmp.ge.f32.partialorder %v7783_v42, 0.0 }
 0x283   : > { %8802 = vst.msk [vmem:[%s12740_s4 + $0xe4] sm:$0xf] %vm8744_vm5, %v9935_v30  ;;  %v8166_v9 = vsel %vm7910_vm8, %v7782_v46, %v8038_v11  ;;  %v8039_v25 = vmul.f32 0.2, %v7783_v42  ;;  %v7784_v26 = vadd.f32 %v13159_v45, %v10851_v24  ;;  %vm7909_vm11 = vcmp.ge.f32.partialorder %v7781_v23, 0.0 }
 0x284   : > { %v9940_v20 = vpack.c.bf16 %v8166_v9, %v8166_v9  ;;  %v8164_v10 = vsel %vm7908_vm9, %v7780_v36, %v8036_v63  ;;  %v8037_v31 = vmul.f32 0.2, %v7781_v23  ;;  %vm7914_vm12 = vcmp.ge.f32.partialorder %v7786_v51, 0.0  ;;  %v10728_v33 = vpop.f32.mrb[68].mxu0 }
 0x285   : > { %v9938_v40 = vpack.c.bf16 %v8164_v10, %v8164_v10  ;;  %v8167_v61 = vsel %vm7911_vm10, %v7783_v42, %v8039_v25  ;;  %v8042_v8 = vmul.f32 0.2, %v7786_v51  ;;  %vm7912_vm1 = vcmp.ge.f32.partialorder %v7784_v26, 0.0  ;;  %v7346_v28 = vpop.f32.mrb[69].mxu0  ;;  %v10468_v53 = vpop.f32.mrb[68].mxu1 }
 0x286   : > { %8807 = vst.msk [vmem:[%s12740_s4 + $0xf8] sm:$0xf] %vm8744_vm5, %v9940_v20  ;;  %v9941_v17 = vpack.c.bf16 %v8167_v61, %v8167_v61  ;;  %v8165_v19 = vsel %vm7909_vm11, %v7781_v23, %v8037_v31  ;;  %v8040_v0 = vmul.f32 0.2, %v7784_v26  ;;  %v10852_v37 = vadd.f32 %v10725_v56, %v10465_v32  ;;  %v10729_v48 = vpop.f32.mrb[70].mxu0  ;;  %v3513_v21 = vpop.f32.mrb[69].mxu1 }
 0x287   : > { %8805 = vst.msk [vmem:[%s12740_s4 + $0xf0] sm:$0xf] %vm8744_vm5, %v9938_v40  ;;  %v9939_v7 = vpack.c.bf16 %v8165_v19, %v8165_v19  ;;  %v8170_v6 = vsel %vm7914_vm12, %v7786_v51, %v8042_v8  ;;  %v10853_v3 = vadd.f32 %v7333_v47, %v3500_v54  ;;  %v10854_v16 = vadd.f32 %v10728_v33, %v10468_v53  ;;  %v7349_v39 = vpop.f32.mrb[71].mxu0  ;;  %v10469_v27 = vpop.f32.mrb[70].mxu1 }
 0x288   : > { %8808 = vst.msk [vmem:[%s12740_s4 + $0xfc] sm:$0xf] %vm8744_vm5, %v9941_v17  ;;  %v9944_v52 = vpack.c.bf16 %v8170_v6, %v8170_v6  ;;  %v8168_v49 = vsel %vm7912_vm1, %v7784_v26, %v8040_v0  ;;  %v7787_v29 = vadd.f32 %v13159_v45, %v10852_v37  ;;  %v10855_v57 = vadd.f32 %v7346_v28, %v3513_v21  ;;  %v3516_v59 = vpop.f32.mrb[71].mxu1 }
 0x289   : > { %8806 = vst.msk [vmem:[%s12740_s4 + $0xf4] sm:$0xf] %vm8744_vm5, %v9939_v7  ;;  %v9942_v58 = vpack.c.bf16 %v8168_v49, %v8168_v49  ;;  %v7785_v50 = vadd.f32 %v13159_v45, %v10853_v3  ;;  %v7790_v62 = vadd.f32 %v13159_v45, %v10854_v16  ;;  %v10856_v22 = vadd.f32 %v10729_v48, %v10469_v27 }
 0x28a   : > { %8811 = vst.msk [vmem:[%s12740_s4 + $0x108] sm:$0xf] %vm8744_vm5, %v9944_v52  ;;  %vm7915_vm4 = vcmp.ge.f32.partialorder %v7787_v29, 0.0  ;;  %v8043_v44 = vmul.f32 0.2, %v7787_v29  ;;  %v7788_v41 = vadd.f32 %v13159_v45, %v10855_v57  ;;  %v10857_v15 = vadd.f32 %v7349_v39, %v3516_v59 }
 0x28b   : > { %8809 = vst.msk [vmem:[%s12740_s4 + $0x100] sm:$0xf] %vm8744_vm5, %v9942_v58  ;;  %vm7913_vm13 = vcmp.ge.f32.partialorder %v7785_v50, 0.0  ;;  %v8041_v34 = vmul.f32 0.2, %v7785_v50  ;;  %vm7918_vm14 = vcmp.ge.f32.partialorder %v7790_v62, 0.0  ;;  %v7791_v12 = vadd.f32 %v13159_v45, %v10856_v22 }
 0x28c   : > { %v8046_v18 = vmul.f32 0.2, %v7790_v62  ;;  %v8171_v38 = vsel %vm7915_vm4, %v7787_v29, %v8043_v44  ;;  %v10732_v4 = vpop.f32.mrb[72].mxu0  ;;  %vm7916_vm15 = vcmp.ge.f32.partialorder %v7788_v41, 0.0  ;;  %v8044_v2 = vmul.f32 0.2, %v7788_v41 }
 0x28d   : > { %v8169_v14 = vsel %vm7913_vm13, %v7785_v50, %v8041_v34  ;;  %v9945_v43 = vpack.c.bf16 %v8171_v38, %v8171_v38  ;;  %v7362_v56 = vpop.f32.mrb[73].mxu0  ;;  %vm7919_vm0 = vcmp.ge.f32.partialorder %v7791_v12, 0.0  ;;  %v8047_v5 = vmul.f32 0.2, %v7791_v12 }
 0x28e   : > { %v9943_v60 = vpack.c.bf16 %v8169_v14, %v8169_v14  ;;  %v8174_v55 = vsel %vm7918_vm14, %v7790_v62, %v8046_v18  ;;  %v10733_v1 = vpop.f32.mrb[74].mxu0  ;;  %v7789_v35 = vadd.f32 %v13159_v45, %v10857_v15  ;;  %v10472_v13 = vpop.f32.mrb[72].mxu1  ;;  %v8172_v36 = vsel %vm7916_vm15, %v7788_v41, %v8044_v2 }
 0x28f   : > { %v9948_v46 = vpack.c.bf16 %v8174_v55, %v8174_v55  ;;  %8812 = vst.msk [vmem:[%s12740_s4 + $0x10c] sm:$0xf] %vm8744_vm5, %v9945_v43  ;;  %v8175_v47 = vsel %vm7919_vm0, %v7791_v12, %v8047_v5  ;;  %v7365_v24 = vpop.f32.mrb[75].mxu0  ;;  %v10858_v32 = vadd.f32 %v10732_v4, %v10472_v13  ;;  %v3529_v30 = vpop.f32.mrb[73].mxu1  ;;  %v9946_v11 = vpack.c.bf16 %v8172_v36, %v8172_v36 }
 0x290   : > { %8810 = vst.msk [vmem:[%s12740_s4 + $0x104] sm:$0xf] %vm8744_vm5, %v9943_v60  ;;  %v9949_v42 = vpack.c.bf16 %v8175_v47, %v8175_v47  ;;  %vm7917_vm2 = vcmp.ge.f32.partialorder %v7789_v35, 0.0  ;;  %v8045_v54 = vmul.f32 0.2, %v7789_v35  ;;  %v10473_v63 = vpop.f32.mrb[74].mxu1  ;;  %v10859_v51 = vadd.f32 %v7362_v56, %v3529_v30 }
 0x291   : > { %8815 = vst.msk [vmem:[%s12740_s4 + $0x118] sm:$0xf] %vm8744_vm5, %v9948_v46  ;;  %v7794_v23 = vadd.f32 %v13159_v45, %v10858_v32  ;;  %v10860_v9 = vadd.f32 %v10733_v1, %v10473_v63  ;;  %v3532_v25 = vpop.f32.mrb[75].mxu1  ;;  %8813 = vst.msk [vmem:[%s12740_s4 + $0x110] sm:$0xf] %vm8744_vm5, %v9946_v11 }
 0x292   : > { %8816 = vst.msk [vmem:[%s12740_s4 + $0x11c] sm:$0xf] %vm8744_vm5, %v9949_v42  ;;  %v8173_v26 = vsel %vm7917_vm2, %v7789_v35, %v8045_v54  ;;  %v10861_v20 = vadd.f32 %v7365_v24, %v3532_v25  ;;  %v7792_v40 = vadd.f32 %v13159_v45, %v10859_v51 }
 0x293   : > { %v9947_v10 = vpack.c.bf16 %v8173_v26, %v8173_v26  ;;  %vm7922_vm3 = vcmp.ge.f32.partialorder %v7794_v23, 0.0  ;;  %v8050_v31 = vmul.f32 0.2, %v7794_v23  ;;  %v7795_v61 = vadd.f32 %v13159_v45, %v10860_v9 }
 0x294   : > { %v7793_v8 = vadd.f32 %v13159_v45, %v10861_v20  ;;  %vm7920_vm6 = vcmp.ge.f32.partialorder %v7792_v40, 0.0  ;;  %v8048_v33 = vmul.f32 0.2, %v7792_v40 }
 0x295   : > { %8814 = vst.msk [vmem:[%s12740_s4 + $0x114] sm:$0xf] %vm8744_vm5, %v9947_v10  ;;  %v8178_v19 = vsel %vm7922_vm3, %v7794_v23, %v8050_v31  ;;  %vm7923_vm7 = vcmp.ge.f32.partialorder %v7795_v61, 0.0  ;;  %v8051_v6 = vmul.f32 0.2, %v7795_v61 }
 0x296   : > { %v10736_v17 = vpop.f32.mrb[76].mxu0  ;;  %v9952_v0 = vpack.c.bf16 %v8178_v19, %v8178_v19  ;;  %vm7921_vm8 = vcmp.ge.f32.partialorder %v7793_v8, 0.0  ;;  %v8176_v37 = vsel %vm7920_vm6, %v7792_v40, %v8048_v33  ;;  %v8049_v53 = vmul.f32 0.2, %v7793_v8 }
 0x297   : > { %v7378_v7 = vpop.f32.mrb[77].mxu0  ;;  %v10476_v28 = vpop.f32.mrb[76].mxu1  ;;  %v9950_v48 = vpack.c.bf16 %v8176_v37, %v8176_v37  ;;  %v8179_v16 = vsel %vm7923_vm7, %v7795_v61, %v8051_v6 }
 0x298   : > { %v10737_v3 = vpop.f32.mrb[78].mxu0  ;;  %v10862_v52 = vadd.f32 %v10736_v17, %v10476_v28  ;;  %v3545_v49 = vpop.f32.mrb[77].mxu1  ;;  %8819 = vst.msk [vmem:[%s12740_s4 + $0x128] sm:$0xf] %vm8744_vm5, %v9952_v0  ;;  %v9953_v39 = vpack.c.bf16 %v8179_v16, %v8179_v16  ;;  %v8177_v50 = vsel %vm7921_vm8, %v7793_v8, %v8049_v53 }
 0x299   : > { %v7381_v21 = vpop.f32.mrb[79].mxu0  ;;  %v10863_v58 = vadd.f32 %v7378_v7, %v3545_v49  ;;  %v10477_v29 = vpop.f32.mrb[78].mxu1  ;;  %8817 = vst.msk [vmem:[%s12740_s4 + $0x120] sm:$0xf] %vm8744_vm5, %v9950_v48  ;;  %v9951_v22 = vpack.c.bf16 %v8177_v50, %v8177_v50 }
 0x29a   : > { %v7798_v57 = vadd.f32 %v13159_v45, %v10862_v52  ;;  %v10864_v27 = vadd.f32 %v10737_v3, %v10477_v29  ;;  %v3548_v62 = vpop.f32.mrb[79].mxu1  ;;  %8820 = vst.msk [vmem:[%s12740_s4 + $0x12c] sm:$0xf] %vm8744_vm5, %v9953_v39 }
 0x29b   : > { %v7796_v59 = vadd.f32 %v13159_v45, %v10863_v58  ;;  %v10865_v44 = vadd.f32 %v7381_v21, %v3548_v62  ;;  %8818 = vst.msk [vmem:[%s12740_s4 + $0x124] sm:$0xf] %vm8744_vm5, %v9951_v22 }
 0x29c   : > { %vm7926_vm9 = vcmp.ge.f32.partialorder %v7798_v57, 0.0  ;;  %v8054_v34 = vmul.f32 0.2, %v7798_v57  ;;  %v7799_v18 = vadd.f32 %v13159_v45, %v10864_v27 }
 0x29d   : > { %vm7924_vm10 = vcmp.ge.f32.partialorder %v7796_v59, 0.0  ;;  %v8052_v41 = vmul.f32 0.2, %v7796_v59  ;;  %v7797_v12 = vadd.f32 %v13159_v45, %v10865_v44 }
 0x29e   : > { %v10740_v38 = vpop.f32.mrb[80].mxu0  ;;  %v8182_v14 = vsel %vm7926_vm9, %v7798_v57, %v8054_v34  ;;  %vm7927_vm11 = vcmp.ge.f32.partialorder %v7799_v18, 0.0  ;;  %v8055_v15 = vmul.f32 0.2, %v7799_v18 }
 0x29f   : > { %v9956_v43 = vpack.c.bf16 %v8182_v14, %v8182_v14  ;;  %v7394_v60 = vpop.f32.mrb[81].mxu0  ;;  %v8180_v4 = vsel %vm7924_vm10, %v7796_v59, %v8052_v41  ;;  %vm7925_vm12 = vcmp.ge.f32.partialorder %v7797_v12, 0.0  ;;  %v8053_v55 = vmul.f32 0.2, %v7797_v12  ;;  %v10480_v5 = vpop.f32.mrb[80].mxu1 }
 0x2a0   : > { %v9954_v46 = vpack.c.bf16 %v8180_v4, %v8180_v4  ;;  %v10741_v56 = vpop.f32.mrb[82].mxu0  ;;  %v8183_v2 = vsel %vm7927_vm11, %v7799_v18, %v8055_v15  ;;  %v10866_v36 = vadd.f32 %v10740_v38, %v10480_v5  ;;  %v3561_v47 = vpop.f32.mrb[81].mxu1 }
 0x2a1   : > { %8823 = vst.msk [vmem:[%s12740_s4 + $0x138] sm:$0xf] %vm8744_vm5, %v9956_v43  ;;  %v9957_v1 = vpack.c.bf16 %v8183_v2, %v8183_v2  ;;  %v7397_v35 = vpop.f32.mrb[83].mxu0  ;;  %v8181_v13 = vsel %vm7925_vm12, %v7797_v12, %v8053_v55  ;;  %v10867_v32 = vadd.f32 %v7394_v60, %v3561_v47  ;;  %v10481_v30 = vpop.f32.mrb[82].mxu1 }
 0x2a2   : > { %8821 = vst.msk [vmem:[%s12740_s4 + $0x130] sm:$0xf] %vm8744_vm5, %v9954_v46  ;;  %v9955_v24 = vpack.c.bf16 %v8181_v13, %v8181_v13  ;;  %v7802_v11 = vadd.f32 %v13159_v45, %v10866_v36  ;;  %v10868_v42 = vadd.f32 %v10741_v56, %v10481_v30  ;;  %v3564_v54 = vpop.f32.mrb[83].mxu1 }
 0x2a3   : > { %8824 = vst.msk [vmem:[%s12740_s4 + $0x13c] sm:$0xf] %vm8744_vm5, %v9957_v1  ;;  %v7800_v63 = vadd.f32 %v13159_v45, %v10867_v32  ;;  %v10869_v23 = vadd.f32 %v7397_v35, %v3564_v54 }
 0x2a4   : > { %8822 = vst.msk [vmem:[%s12740_s4 + $0x134] sm:$0xf] %vm8744_vm5, %v9955_v24  ;;  %vm7930_vm1 = vcmp.ge.f32.partialorder %v7802_v11, 0.0  ;;  %v8058_v51 = vmul.f32 0.2, %v7802_v11  ;;  %v7803_v9 = vadd.f32 %v13159_v45, %v10868_v42 }
 0x2a5   : > { %vm7928_vm4 = vcmp.ge.f32.partialorder %v7800_v63, 0.0  ;;  %v8056_v26 = vmul.f32 0.2, %v7800_v63  ;;  %v7801_v20 = vadd.f32 %v13159_v45, %v10869_v23 }
 0x2a6   : > { %v10744_v25 = vpop.f32.mrb[84].mxu0  ;;  %v8186_v10 = vsel %vm7930_vm1, %v7802_v11, %v8058_v51  ;;  %vm7931_vm13 = vcmp.ge.f32.partialorder %v7803_v9, 0.0  ;;  %v8059_v40 = vmul.f32 0.2, %v7803_v9 }
 0x2a7   : > { %v7410_v31 = vpop.f32.mrb[85].mxu0  ;;  %v9960_v61 = vpack.c.bf16 %v8186_v10, %v8186_v10  ;;  %v8184_v8 = vsel %vm7928_vm4, %v7800_v63, %v8056_v26  ;;  %vm7929_vm14 = vcmp.ge.f32.partialorder %v7801_v20, 0.0  ;;  %v8057_v19 = vmul.f32 0.2, %v7801_v20  ;;  %v10484_v33 = vpop.f32.mrb[84].mxu1 }
 0x2a8   : > { %v10745_v17 = vpop.f32.mrb[86].mxu0  ;;  %v9958_v0 = vpack.c.bf16 %v8184_v8, %v8184_v8  ;;  %v8187_v7 = vsel %vm7931_vm13, %v7803_v9, %v8059_v40  ;;  %v10870_v28 = vadd.f32 %v10744_v25, %v10484_v33  ;;  %v3577_v37 = vpop.f32.mrb[85].mxu1 }
 0x2a9   : > { %v7413_v6 = vpop.f32.mrb[87].mxu0  ;;  %8827 = vst.msk [vmem:[%s12740_s4 + $0x148] sm:$0xf] %vm8744_vm5, %v9960_v61  ;;  %v9961_v3 = vpack.c.bf16 %v8187_v7, %v8187_v7  ;;  %v8185_v53 = vsel %vm7929_vm14, %v7801_v20, %v8057_v19  ;;  %v10871_v52 = vadd.f32 %v7410_v31, %v3577_v37  ;;  %v10485_v49 = vpop.f32.mrb[86].mxu1 }
 0x2aa   : > { %8825 = vst.msk [vmem:[%s12740_s4 + $0x140] sm:$0xf] %vm8744_vm5, %v9958_v0  ;;  %v9959_v48 = vpack.c.bf16 %v8185_v53, %v8185_v53  ;;  %v7806_v16 = vadd.f32 %v13159_v45, %v10870_v28  ;;  %v10872_v21 = vadd.f32 %v10745_v17, %v10485_v49  ;;  %v3580_v58 = vpop.f32.mrb[87].mxu1 }
 0x2ab   : > { %8828 = vst.msk [vmem:[%s12740_s4 + $0x14c] sm:$0xf] %vm8744_vm5, %v9961_v3  ;;  %v7804_v29 = vadd.f32 %v13159_v45, %v10871_v52  ;;  %v10873_v39 = vadd.f32 %v7413_v6, %v3580_v58 }
 0x2ac   : > { %8826 = vst.msk [vmem:[%s12740_s4 + $0x144] sm:$0xf] %vm8744_vm5, %v9959_v48  ;;  %vm7934_vm15 = vcmp.ge.f32.partialorder %v7806_v16, 0.0  ;;  %v8062_v50 = vmul.f32 0.2, %v7806_v16  ;;  %v7807_v57 = vadd.f32 %v13159_v45, %v10872_v21 }
 0x2ad   : > { %vm7932_vm0 = vcmp.ge.f32.partialorder %v7804_v29, 0.0  ;;  %v8060_v27 = vmul.f32 0.2, %v7804_v29  ;;  %v7805_v62 = vadd.f32 %v13159_v45, %v10873_v39 }
 0x2ae   : > { %v8190_v22 = vsel %vm7934_vm15, %v7806_v16, %v8062_v50  ;;  %vm7935_vm2 = vcmp.ge.f32.partialorder %v7807_v57, 0.0  ;;  %v8063_v59 = vmul.f32 0.2, %v7807_v57 }
 0x2af   : > { %v10748_v44 = vpop.f32.mrb[88].mxu0  ;;  %v9964_v34 = vpack.c.bf16 %v8190_v22, %v8190_v22  ;;  %v8188_v18 = vsel %vm7932_vm0, %v7804_v29, %v8060_v27  ;;  %vm7933_vm3 = vcmp.ge.f32.partialorder %v7805_v62, 0.0  ;;  %v8061_v41 = vmul.f32 0.2, %v7805_v62 }
 0x2b0   : > { %v7426_v12 = vpop.f32.mrb[89].mxu0  ;;  %v9962_v38 = vpack.c.bf16 %v8188_v18, %v8188_v18  ;;  %v8191_v14 = vsel %vm7935_vm2, %v7807_v57, %v8063_v59  ;;  %v10488_v15 = vpop.f32.mrb[88].mxu1 }
 0x2b1   : > { %8831 = vst.msk [vmem:[%s12740_s4 + $0x158] sm:$0xf] %vm8744_vm5, %v9964_v34  ;;  %v10749_v43 = vpop.f32.mrb[90].mxu0  ;;  %v9965_v60 = vpack.c.bf16 %v8191_v14, %v8191_v14  ;;  %v8189_v4 = vsel %vm7933_vm3, %v7805_v62, %v8061_v41  ;;  %v10874_v55 = vadd.f32 %v10748_v44, %v10488_v15  ;;  %v3593_v46 = vpop.f32.mrb[89].mxu1 }
 0x2b2   : > { %8829 = vst.msk [vmem:[%s12740_s4 + $0x150] sm:$0xf] %vm8744_vm5, %v9962_v38  ;;  %v7429_v56 = vpop.f32.mrb[91].mxu0  ;;  %v9963_v2 = vpack.c.bf16 %v8189_v4, %v8189_v4  ;;  %v10875_v5 = vadd.f32 %v7426_v12, %v3593_v46  ;;  %v10489_v1 = vpop.f32.mrb[90].mxu1 }
 0x2b3   : > { %8832 = vst.msk [vmem:[%s12740_s4 + $0x15c] sm:$0xf] %vm8744_vm5, %v9965_v60  ;;  %v7810_v35 = vadd.f32 %v13159_v45, %v10874_v55  ;;  %v10876_v13 = vadd.f32 %v10749_v43, %v10489_v1  ;;  %v3596_v36 = vpop.f32.mrb[91].mxu1  ;;  %v13405_v60 = vld [vmem:[%s13512_s2] ss:$0 sm:$0xff] }
 0x2b4   : > { %8830 = vst.msk [vmem:[%s12740_s4 + $0x154] sm:$0xf] %vm8744_vm5, %v9963_v2  ;;  %v7808_v47 = vadd.f32 %v13159_v45, %v10875_v5  ;;  %v10877_v24 = vadd.f32 %v7429_v56, %v3596_v36 }
 0x2b5   : > { %vm7938_vm6 = vcmp.ge.f32.partialorder %v7810_v35, 0.0  ;;  %v8066_v32 = vmul.f32 0.2, %v7810_v35  ;;  %v7811_v30 = vadd.f32 %v13159_v45, %v10876_v13 }
 0x2b6   : > { %vm7936_vm7 = vcmp.ge.f32.partialorder %v7808_v47, 0.0  ;;  %v8064_v11 = vmul.f32 0.2, %v7808_v47  ;;  %v7809_v42 = vadd.f32 %v13159_v45, %v10877_v24 }
 0x2b7   : > { %v10752_v54 = vpop.f32.mrb[92].mxu0  ;;  %v8194_v63 = vsel %vm7938_vm6, %v7810_v35, %v8066_v32  ;;  %vm7939_vm8 = vcmp.ge.f32.partialorder %v7811_v30, 0.0  ;;  %v8067_v23 = vmul.f32 0.2, %v7811_v30 }
 0x2b8   : > { %v9968_v51 = vpack.c.bf16 %v8194_v63, %v8194_v63  ;;  %v7442_v9 = vpop.f32.mrb[93].mxu0  ;;  %v8192_v25 = vsel %vm7936_vm7, %v7808_v47, %v8064_v11  ;;  %vm7937_vm9 = vcmp.ge.f32.partialorder %v7809_v42, 0.0  ;;  %v8065_v26 = vmul.f32 0.2, %v7809_v42  ;;  %v10492_v20 = vpop.f32.mrb[92].mxu1 }
 0x2b9   : > { %v9966_v10 = vpack.c.bf16 %v8192_v25, %v8192_v25  ;;  %v10753_v31 = vpop.f32.mrb[94].mxu0  ;;  %v8195_v40 = vsel %vm7939_vm8, %v7811_v30, %v8067_v23  ;;  %v10878_v61 = vadd.f32 %v10752_v54, %v10492_v20  ;;  %v3609_v8 = vpop.f32.mrb[93].mxu1 }
 0x2ba   : > { %8835 = vst.msk [vmem:[%s12740_s4 + $0x168] sm:$0xf] %vm8744_vm5, %v9968_v51  ;;  %v9969_v17 = vpack.c.bf16 %v8195_v40, %v8195_v40  ;;  %v7445_v19 = vpop.f32.mrb[95].mxu0  ;;  %v8193_v33 = vsel %vm7937_vm9, %v7809_v42, %v8065_v26  ;;  %v10879_v0 = vadd.f32 %v7442_v9, %v3609_v8  ;;  %v10493_v7 = vpop.f32.mrb[94].mxu1 }
 0x2bb   : > { %8833 = vst.msk [vmem:[%s12740_s4 + $0x160] sm:$0xf] %vm8744_vm5, %v9966_v10  ;;  %v9967_v6 = vpack.c.bf16 %v8193_v33, %v8193_v33  ;;  %v7814_v28 = vadd.f32 %v13159_v45, %v10878_v61  ;;  %v10880_v37 = vadd.f32 %v10753_v31, %v10493_v7  ;;  %v3612_v3 = vpop.f32.mrb[95].mxu1 }
 0x2bc   : > { %8836 = vst.msk [vmem:[%s12740_s4 + $0x16c] sm:$0xf] %vm8744_vm5, %v9969_v17  ;;  %v7812_v53 = vadd.f32 %v13159_v45, %v10879_v0  ;;  %v10881_v52 = vadd.f32 %v7445_v19, %v3612_v3 }
 0x2bd   : > { %8834 = vst.msk [vmem:[%s12740_s4 + $0x164] sm:$0xf] %vm8744_vm5, %v9967_v6  ;;  %vm7942_vm10 = vcmp.ge.f32.partialorder %v7814_v28, 0.0  ;;  %v8070_v49 = vmul.f32 0.2, %v7814_v28  ;;  %v7815_v48 = vadd.f32 %v13159_v45, %v10880_v37 }
 0x2be   : > { %vm7940_vm11 = vcmp.ge.f32.partialorder %v7812_v53, 0.0  ;;  %v8068_v16 = vmul.f32 0.2, %v7812_v53  ;;  %v7813_v21 = vadd.f32 %v13159_v45, %v10881_v52 }
 0x2bf   : > { %v10756_v58 = vpop.f32.mrb[96].mxu0  ;;  %v8198_v29 = vsel %vm7942_vm10, %v7814_v28, %v8070_v49  ;;  %vm7943_vm12 = vcmp.ge.f32.partialorder %v7815_v48, 0.0  ;;  %v8071_v39 = vmul.f32 0.2, %v7815_v48 }
 0x2c0   : > { %v9972_v50 = vpack.c.bf16 %v8198_v29, %v8198_v29  ;;  %v7458_v57 = vpop.f32.mrb[97].mxu0  ;;  %v8196_v27 = vsel %vm7940_vm11, %v7812_v53, %v8068_v16  ;;  %vm7941_vm1 = vcmp.ge.f32.partialorder %v7813_v21, 0.0  ;;  %v8069_v62 = vmul.f32 0.2, %v7813_v21 }
 0x2c1   : > { %v10496_v22 = vpop.f32.mrb[96].mxu1  ;;  %v9970_v59 = vpack.c.bf16 %v8196_v27, %v8196_v27  ;;  %v10757_v44 = vpop.f32.mrb[98].mxu0  ;;  %v8199_v34 = vsel %vm7943_vm12, %v7815_v48, %v8071_v39 }
 0x2c2   : > { %v10882_v18 = vadd.f32 %v10756_v58, %v10496_v22  ;;  %v3625_v41 = vpop.f32.mrb[97].mxu1  ;;  %8839 = vst.msk [vmem:[%s12740_s4 + $0x178] sm:$0xf] %vm8744_vm5, %v9972_v50  ;;  %v9973_v45 = vpack.c.bf16 %v8199_v34, %v8199_v34  ;;  %v7461_v12 = vpop.f32.mrb[99].mxu0  ;;  %v8197_v38 = vsel %vm7941_vm1, %v7813_v21, %v8069_v62 }
 0x2c3   : > { %v10883_v14 = vadd.f32 %v7458_v57, %v3625_v41  ;;  %v10497_v15 = vpop.f32.mrb[98].mxu1  ;;  %8837 = vst.msk [vmem:[%s12740_s4 + $0x170] sm:$0xf] %vm8744_vm5, %v9970_v59  ;;  %v9971_v43 = vpack.c.bf16 %v8197_v38, %v8197_v38 }
 0x2c4   : > { %v7818_v4 = vadd.f32 %v13405_v60, %v10882_v18  ;;  %v10884_v55 = vadd.f32 %v10757_v44, %v10497_v15  ;;  %v3628_v46 = vpop.f32.mrb[99].mxu1  ;;  %8840 = vst.msk [vmem:[%s12740_s4 + $0x17c] sm:$0xf] %vm8744_vm5, %v9973_v45 }
 0x2c5   : > { %v7816_v56 = vadd.f32 %v13405_v60, %v10883_v14  ;;  %v10885_v2 = vadd.f32 %v7461_v12, %v3628_v46  ;;  %8838 = vst.msk [vmem:[%s12740_s4 + $0x174] sm:$0xf] %vm8744_vm5, %v9971_v43 }
 0x2c6   : > { %vm7946_vm4 = vcmp.ge.f32.partialorder %v7818_v4, 0.0  ;;  %v8074_v5 = vmul.f32 0.2, %v7818_v4  ;;  %v7819_v1 = vadd.f32 %v13405_v60, %v10884_v55 }
 0x2c7   : > { %vm7944_vm13 = vcmp.ge.f32.partialorder %v7816_v56, 0.0  ;;  %v8072_v35 = vmul.f32 0.2, %v7816_v56  ;;  %v7817_v13 = vadd.f32 %v13405_v60, %v10885_v2 }
 0x2c8   : > { %v8202_v36 = vsel %vm7946_vm4, %v7818_v4, %v8074_v5  ;;  %vm7947_vm14 = vcmp.ge.f32.partialorder %v7819_v1, 0.0  ;;  %v8075_v47 = vmul.f32 0.2, %v7819_v1  ;;  %v10760_v24 = vpop.f32.mrb[100].mxu0 }
 0x2c9   : > { %v9976_v32 = vpack.c.bf16 %v8202_v36, %v8202_v36  ;;  %v8200_v30 = vsel %vm7944_vm13, %v7816_v56, %v8072_v35  ;;  %vm7945_vm15 = vcmp.ge.f32.partialorder %v7817_v13, 0.0  ;;  %v8073_v11 = vmul.f32 0.2, %v7817_v13  ;;  %v7474_v42 = vpop.f32.mrb[101].mxu0  ;;  %v10500_v23 = vpop.f32.mrb[100].mxu1 }
 0x2ca   : > { %v9974_v54 = vpack.c.bf16 %v8200_v30, %v8200_v30  ;;  %v8203_v63 = vsel %vm7947_vm14, %v7819_v1, %v8075_v47  ;;  %v10761_v51 = vpop.f32.mrb[102].mxu0  ;;  %v10886_v26 = vadd.f32 %v10760_v24, %v10500_v23  ;;  %v3641_v20 = vpop.f32.mrb[101].mxu1 }
 0x2cb   : > { %8843 = vst.msk [vmem:[%s12740_s4 + $0x188] sm:$0xf] %vm8744_vm5, %v9976_v32  ;;  %v9977_v9 = vpack.c.bf16 %v8203_v63, %v8203_v63  ;;  %v8201_v25 = vsel %vm7945_vm15, %v7817_v13, %v8073_v11  ;;  %v7477_v10 = vpop.f32.mrb[103].mxu0  ;;  %v10887_v40 = vadd.f32 %v7474_v42, %v3641_v20  ;;  %v10501_v61 = vpop.f32.mrb[102].mxu1 }
 0x2cc   : > { %8841 = vst.msk [vmem:[%s12740_s4 + $0x180] sm:$0xf] %vm8744_vm5, %v9974_v54  ;;  %v9975_v31 = vpack.c.bf16 %v8201_v25, %v8201_v25  ;;  %v7822_v8 = vadd.f32 %v13405_v60, %v10886_v26  ;;  %v10888_v17 = vadd.f32 %v10761_v51, %v10501_v61  ;;  %v3644_v19 = vpop.f32.mrb[103].mxu1 }
 0x2cd   : > { %8844 = vst.msk [vmem:[%s12740_s4 + $0x18c] sm:$0xf] %vm8744_vm5, %v9977_v9  ;;  %v7820_v33 = vadd.f32 %v13405_v60, %v10887_v40  ;;  %v10889_v0 = vadd.f32 %v7477_v10, %v3644_v19 }
 0x2ce   : > { %8842 = vst.msk [vmem:[%s12740_s4 + $0x184] sm:$0xf] %vm8744_vm5, %v9975_v31  ;;  %vm7950_vm0 = vcmp.ge.f32.partialorder %v7822_v8, 0.0  ;;  %v8078_v7 = vmul.f32 0.2, %v7822_v8  ;;  %v7823_v6 = vadd.f32 %v13405_v60, %v10888_v17 }
 0x2cf   : > { %vm7948_vm2 = vcmp.ge.f32.partialorder %v7820_v33, 0.0  ;;  %v8076_v28 = vmul.f32 0.2, %v7820_v33  ;;  %v7821_v37 = vadd.f32 %v13405_v60, %v10889_v0 }
 0x2d0   : > { %v10764_v3 = vpop.f32.mrb[104].mxu0  ;;  %v8206_v53 = vsel %vm7950_vm0, %v7822_v8, %v8078_v7  ;;  %vm7951_vm3 = vcmp.ge.f32.partialorder %v7823_v6, 0.0  ;;  %v8079_v52 = vmul.f32 0.2, %v7823_v6 }
 0x2d1   : > { %v9980_v49 = vpack.c.bf16 %v8206_v53, %v8206_v53  ;;  %v7490_v48 = vpop.f32.mrb[105].mxu0  ;;  %v8204_v16 = vsel %vm7948_vm2, %v7820_v33, %v8076_v28  ;;  %vm7949_vm6 = vcmp.ge.f32.partialorder %v7821_v37, 0.0  ;;  %v8077_v21 = vmul.f32 0.2, %v7821_v37 }
 0x2d2   : > { %v10504_v58 = vpop.f32.mrb[104].mxu1  ;;  %v9978_v29 = vpack.c.bf16 %v8204_v16, %v8204_v16  ;;  %v10765_v39 = vpop.f32.mrb[106].mxu0  ;;  %v8207_v50 = vsel %vm7951_vm3, %v7823_v6, %v8079_v52 }
 0x2d3   : > { %v10890_v57 = vadd.f32 %v10764_v3, %v10504_v58  ;;  %v3657_v27 = vpop.f32.mrb[105].mxu1  ;;  %8847 = vst.msk [vmem:[%s12740_s4 + $0x198] sm:$0xf] %vm8744_vm5, %v9980_v49  ;;  %v9981_v62 = vpack.c.bf16 %v8207_v50, %v8207_v50  ;;  %v7493_v22 = vpop.f32.mrb[107].mxu0  ;;  %v8205_v59 = vsel %vm7949_vm6, %v7821_v37, %v8077_v21 }
 0x2d4   : > { %v10891_v44 = vadd.f32 %v7490_v48, %v3657_v27  ;;  %v10505_v34 = vpop.f32.mrb[106].mxu1  ;;  %8845 = vst.msk [vmem:[%s12740_s4 + $0x190] sm:$0xf] %vm8744_vm5, %v9978_v29  ;;  %v9979_v18 = vpack.c.bf16 %v8205_v59, %v8205_v59 }
 0x2d5   : > { %v7826_v41 = vadd.f32 %v13405_v60, %v10890_v57  ;;  %v10892_v45 = vadd.f32 %v10765_v39, %v10505_v34  ;;  %v3660_v12 = vpop.f32.mrb[107].mxu1  ;;  %8848 = vst.msk [vmem:[%s12740_s4 + $0x19c] sm:$0xf] %vm8744_vm5, %v9981_v62 }
 0x2d6   : > { %v7824_v38 = vadd.f32 %v13405_v60, %v10891_v44  ;;  %v10893_v14 = vadd.f32 %v7493_v22, %v3660_v12  ;;  %8846 = vst.msk [vmem:[%s12740_s4 + $0x194] sm:$0xf] %vm8744_vm5, %v9979_v18 }
 0x2d7   : > { %vm7954_vm7 = vcmp.ge.f32.partialorder %v7826_v41, 0.0  ;;  %v8082_v15 = vmul.f32 0.2, %v7826_v41  ;;  %v7827_v43 = vadd.f32 %v13405_v60, %v10892_v45 }
 0x2d8   : > { %vm7952_vm8 = vcmp.ge.f32.partialorder %v7824_v38, 0.0  ;;  %v8080_v4 = vmul.f32 0.2, %v7824_v38  ;;  %v7825_v55 = vadd.f32 %v13405_v60, %v10893_v14 }
 0x2d9   : > { %v8210_v46 = vsel %vm7954_vm7, %v7826_v41, %v8082_v15  ;;  %vm7955_vm9 = vcmp.ge.f32.partialorder %v7827_v43, 0.0  ;;  %v8083_v56 = vmul.f32 0.2, %v7827_v43 }
 0x2da   : > { %v10768_v2 = vpop.f32.mrb[108].mxu0  ;;  %v9984_v5 = vpack.c.bf16 %v8210_v46, %v8210_v46  ;;  %v8208_v1 = vsel %vm7952_vm8, %v7824_v38, %v8080_v4  ;;  %vm7953_vm10 = vcmp.ge.f32.partialorder %v7825_v55, 0.0  ;;  %v8081_v35 = vmul.f32 0.2, %v7825_v55 }
 0x2db   : > { %v7506_v13 = vpop.f32.mrb[109].mxu0  ;;  %v9982_v36 = vpack.c.bf16 %v8208_v1, %v8208_v1  ;;  %v8211_v47 = vsel %vm7955_vm9, %v7827_v43, %v8083_v56 }
 0x2dc   : > { %8851 = vst.msk [vmem:[%s12740_s4 + $0x1a8] sm:$0xf] %vm8744_vm5, %v9984_v5  ;;  %v10769_v24 = vpop.f32.mrb[110].mxu0  ;;  %v9985_v32 = vpack.c.bf16 %v8211_v47, %v8211_v47  ;;  %v8209_v30 = vsel %vm7953_vm10, %v7825_v55, %v8081_v35 }
 0x2dd   : > { %8849 = vst.msk [vmem:[%s12740_s4 + $0x1a0] sm:$0xf] %vm8744_vm5, %v9982_v36  ;;  %v7509_v11 = vpop.f32.mrb[111].mxu0  ;;  %v9983_v42 = vpack.c.bf16 %v8209_v30, %v8209_v30 }
 0x2de   : > { %8852 = vst.msk [vmem:[%s12740_s4 + $0x1ac] sm:$0xf] %vm8744_vm5, %v9985_v32 }
 0x2df   : > { %8850 = vst.msk [vmem:[%s12740_s4 + $0x1a4] sm:$0xf] %vm8744_vm5, %v9983_v42  ;;  %v10508_v54 = vpop.f32.mrb[108].mxu1 }
 0x2e0   : > { %v10894_v63 = vadd.f32 %v10768_v2, %v10508_v54  ;;  %v3673_v23 = vpop.f32.mrb[109].mxu1 }
 0x2e1   : > { %v10895_v51 = vadd.f32 %v7506_v13, %v3673_v23  ;;  %v10509_v9 = vpop.f32.mrb[110].mxu1 }
 0x2e2   : > { %v7830_v25 = vadd.f32 %v13405_v60, %v10894_v63  ;;  %v10896_v26 = vadd.f32 %v10769_v24, %v10509_v9  ;;  %v3676_v20 = vpop.f32.mrb[111].mxu1 }
 0x2e3   : > { %v7828_v10 = vadd.f32 %v13405_v60, %v10895_v51  ;;  %v10897_v31 = vadd.f32 %v7509_v11, %v3676_v20 }
 0x2e4   : > { %vm7958_vm11 = vcmp.ge.f32.partialorder %v7830_v25, 0.0  ;;  %v8086_v40 = vmul.f32 0.2, %v7830_v25  ;;  %v7831_v61 = vadd.f32 %v13405_v60, %v10896_v26 }
 0x2e5   : > { %vm7956_vm12 = vcmp.ge.f32.partialorder %v7828_v10, 0.0  ;;  %v8084_v8 = vmul.f32 0.2, %v7828_v10  ;;  %v7829_v17 = vadd.f32 %v13405_v60, %v10897_v31 }
 0x2e6   : > { %v8214_v19 = vsel %vm7958_vm11, %v7830_v25, %v8086_v40  ;;  %vm7959_vm1 = vcmp.ge.f32.partialorder %v7831_v61, 0.0  ;;  %v8087_v33 = vmul.f32 0.2, %v7831_v61 }
 0x2e7   : > { %v9988_v7 = vpack.c.bf16 %v8214_v19, %v8214_v19  ;;  %v8212_v6 = vsel %vm7956_vm12, %v7828_v10, %v8084_v8  ;;  %vm7957_vm4 = vcmp.ge.f32.partialorder %v7829_v17, 0.0  ;;  %v8085_v28 = vmul.f32 0.2, %v7829_v17 }
 0x2e8   : > { %v9986_v3 = vpack.c.bf16 %v8212_v6, %v8212_v6  ;;  %v8215_v53 = vsel %vm7959_vm1, %v7831_v61, %v8087_v33 }
 0x2e9   : > { %v10772_v0 = vpop.f32.mrb[112].mxu0  ;;  %8855 = vst.msk [vmem:[%s12740_s4 + $0x1b8] sm:$0xf] %vm8744_vm5, %v9988_v7  ;;  %v9989_v49 = vpack.c.bf16 %v8215_v53, %v8215_v53  ;;  %v8213_v48 = vsel %vm7957_vm4, %v7829_v17, %v8085_v28 }
 0x2ea   : > { %v7522_v37 = vpop.f32.mrb[113].mxu0  ;;  %8853 = vst.msk [vmem:[%s12740_s4 + $0x1b0] sm:$0xf] %vm8744_vm5, %v9986_v3  ;;  %v9987_v21 = vpack.c.bf16 %v8213_v48, %v8213_v48 }
 0x2eb   : > { %v10773_v52 = vpop.f32.mrb[114].mxu0  ;;  %8856 = vst.msk [vmem:[%s12740_s4 + $0x1bc] sm:$0xf] %vm8744_vm5, %v9989_v49 }
 0x2ec   : > { %v7525_v16 = vpop.f32.mrb[115].mxu0  ;;  %8854 = vst.msk [vmem:[%s12740_s4 + $0x1b4] sm:$0xf] %vm8744_vm5, %v9987_v21 }
 0x2ee   : > { %v10512_v58 = vpop.f32.mrb[112].mxu1 }
 0x2ef   : > { %v10898_v29 = vadd.f32 %v10772_v0, %v10512_v58  ;;  %v3689_v39 = vpop.f32.mrb[113].mxu1 }
 0x2f0   : > { %v10899_v50 = vadd.f32 %v7522_v37, %v3689_v39  ;;  %v10513_v57 = vpop.f32.mrb[114].mxu1 }
 0x2f1   : > { %v7834_v27 = vadd.f32 %v13405_v60, %v10898_v29  ;;  %v10900_v62 = vadd.f32 %v10773_v52, %v10513_v57  ;;  %v3692_v22 = vpop.f32.mrb[115].mxu1 }
 0x2f2   : > { %v7832_v59 = vadd.f32 %v13405_v60, %v10899_v50  ;;  %v10901_v44 = vadd.f32 %v7525_v16, %v3692_v22 }
 0x2f3   : > { %vm7962_vm13 = vcmp.ge.f32.partialorder %v7834_v27, 0.0  ;;  %v8090_v34 = vmul.f32 0.2, %v7834_v27  ;;  %v7835_v18 = vadd.f32 %v13405_v60, %v10900_v62 }
 0x2f4   : > { %vm7960_vm14 = vcmp.ge.f32.partialorder %v7832_v59, 0.0  ;;  %v8088_v41 = vmul.f32 0.2, %v7832_v59  ;;  %v7833_v45 = vadd.f32 %v13405_v60, %v10901_v44 }
 0x2f5   : > { %v8218_v12 = vsel %vm7962_vm13, %v7834_v27, %v8090_v34  ;;  %vm7963_vm15 = vcmp.ge.f32.partialorder %v7835_v18, 0.0  ;;  %v8091_v38 = vmul.f32 0.2, %v7835_v18 }
 0x2f6   : > { %v10776_v14 = vpop.f32.mrb[116].mxu0  ;;  %v9992_v15 = vpack.c.bf16 %v8218_v12, %v8218_v12  ;;  %v8216_v43 = vsel %vm7960_vm14, %v7832_v59, %v8088_v41  ;;  %vm7961_vm0 = vcmp.ge.f32.partialorder %v7833_v45, 0.0  ;;  %v8089_v4 = vmul.f32 0.2, %v7833_v45 }
 0x2f7   : > { %v7538_v55 = vpop.f32.mrb[117].mxu0  ;;  %v9990_v46 = vpack.c.bf16 %v8216_v43, %v8216_v43  ;;  %v8219_v56 = vsel %vm7963_vm15, %v7835_v18, %v8091_v38 }
 0x2f8   : > { %8859 = vst.msk [vmem:[%s12740_s4 + $0x1c8] sm:$0xf] %vm8744_vm5, %v9992_v15  ;;  %v10777_v2 = vpop.f32.mrb[118].mxu0  ;;  %v9993_v5 = vpack.c.bf16 %v8219_v56, %v8219_v56  ;;  %v8217_v1 = vsel %vm7961_vm0, %v7833_v45, %v8089_v4 }
 0x2f9   : > { %8857 = vst.msk [vmem:[%s12740_s4 + $0x1c0] sm:$0xf] %vm8744_vm5, %v9990_v46  ;;  %v7541_v35 = vpop.f32.mrb[119].mxu0  ;;  %v9991_v13 = vpack.c.bf16 %v8217_v1, %v8217_v1 }
 0x2fa   : > { %8860 = vst.msk [vmem:[%s12740_s4 + $0x1cc] sm:$0xf] %vm8744_vm5, %v9993_v5 }
 0x2fb   : > { %8858 = vst.msk [vmem:[%s12740_s4 + $0x1c4] sm:$0xf] %vm8744_vm5, %v9991_v13 }
 0x2fc   : > { %v10516_v36 = vpop.f32.mrb[116].mxu1 }
 0x2fd   : > { %v10902_v47 = vadd.f32 %v10776_v14, %v10516_v36  ;;  %v3705_v24 = vpop.f32.mrb[117].mxu1 }
 0x2fe   : > { %v10903_v32 = vadd.f32 %v7538_v55, %v3705_v24  ;;  %v10517_v30 = vpop.f32.mrb[118].mxu1 }
 0x2ff   : > { %v7838_v11 = vadd.f32 %v13405_v60, %v10902_v47  ;;  %v10904_v42 = vadd.f32 %v10777_v2, %v10517_v30  ;;  %v3708_v54 = vpop.f32.mrb[119].mxu1 }
 0x300   : > { %v7836_v63 = vadd.f32 %v13405_v60, %v10903_v32  ;;  %v10905_v23 = vadd.f32 %v7541_v35, %v3708_v54 }
 0x301   : > { %vm7966_vm2 = vcmp.ge.f32.partialorder %v7838_v11, 0.0  ;;  %v8094_v51 = vmul.f32 0.2, %v7838_v11  ;;  %v7839_v9 = vadd.f32 %v13405_v60, %v10904_v42 }
 0x302   : > { %vm7964_vm3 = vcmp.ge.f32.partialorder %v7836_v63, 0.0  ;;  %v8092_v25 = vmul.f32 0.2, %v7836_v63  ;;  %v7837_v26 = vadd.f32 %v13405_v60, %v10905_v23 }
 0x303   : > { %v8222_v20 = vsel %vm7966_vm2, %v7838_v11, %v8094_v51  ;;  %vm7967_vm6 = vcmp.ge.f32.partialorder %v7839_v9, 0.0  ;;  %v8095_v10 = vmul.f32 0.2, %v7839_v9 }
 0x304   : > { %v9996_v31 = vpack.c.bf16 %v8222_v20, %v8222_v20  ;;  %v8220_v40 = vsel %vm7964_vm3, %v7836_v63, %v8092_v25  ;;  %vm7965_vm7 = vcmp.ge.f32.partialorder %v7837_v26, 0.0  ;;  %v8093_v61 = vmul.f32 0.2, %v7837_v26 }
 0x305   : > { %v10780_v8 = vpop.f32.mrb[120].mxu0  ;;  %v9994_v17 = vpack.c.bf16 %v8220_v40, %v8220_v40  ;;  %v8223_v19 = vsel %vm7967_vm6, %v7839_v9, %v8095_v10 }
 0x306   : > { %8863 = vst.msk [vmem:[%s12740_s4 + $0x1d8] sm:$0xf] %vm8744_vm5, %v9996_v31  ;;  %v7554_v33 = vpop.f32.mrb[121].mxu0  ;;  %v9997_v0 = vpack.c.bf16 %v8223_v19, %v8223_v19  ;;  %v8221_v7 = vsel %vm7965_vm7, %v7837_v26, %v8093_v61 }
 0x307   : > { %8861 = vst.msk [vmem:[%s12740_s4 + $0x1d0] sm:$0xf] %vm8744_vm5, %v9994_v17  ;;  %v10781_v6 = vpop.f32.mrb[122].mxu0  ;;  %v9995_v28 = vpack.c.bf16 %v8221_v7, %v8221_v7 }
 0x308   : > { %8864 = vst.msk [vmem:[%s12740_s4 + $0x1dc] sm:$0xf] %vm8744_vm5, %v9997_v0  ;;  %v7557_v37 = vpop.f32.mrb[123].mxu0 }
 0x309   : > { %8862 = vst.msk [vmem:[%s12740_s4 + $0x1d4] sm:$0xf] %vm8744_vm5, %v9995_v28 }
 0x30c   : > { %v10520_v3 = vpop.f32.mrb[120].mxu1 }
 0x30d   : > { %v10906_v53 = vadd.f32 %v10780_v8, %v10520_v3  ;;  %v3721_v52 = vpop.f32.mrb[121].mxu1 }
 0x30e   : > { %v10907_v49 = vadd.f32 %v7554_v33, %v3721_v52  ;;  %v10521_v48 = vpop.f32.mrb[122].mxu1 }
 0x30f   : > { %v7842_v16 = vadd.f32 %v13405_v60, %v10906_v53  ;;  %v10908_v21 = vadd.f32 %v10781_v6, %v10521_v48  ;;  %v3724_v58 = vpop.f32.mrb[123].mxu1 }
 0x310   : > { %v7840_v29 = vadd.f32 %v13405_v60, %v10907_v49  ;;  %v10909_v39 = vadd.f32 %v7557_v37, %v3724_v58 }
 0x311   : > { %vm7970_vm8 = vcmp.ge.f32.partialorder %v7842_v16, 0.0  ;;  %v8098_v50 = vmul.f32 0.2, %v7842_v16  ;;  %v7843_v57 = vadd.f32 %v13405_v60, %v10908_v21 }
 0x312   : > { %vm7968_vm9 = vcmp.ge.f32.partialorder %v7840_v29, 0.0  ;;  %v8096_v27 = vmul.f32 0.2, %v7840_v29  ;;  %v7841_v62 = vadd.f32 %v13405_v60, %v10909_v39 }
 0x313   : > { %v8226_v22 = vsel %vm7970_vm8, %v7842_v16, %v8098_v50  ;;  %vm7971_vm10 = vcmp.ge.f32.partialorder %v7843_v57, 0.0  ;;  %v8099_v59 = vmul.f32 0.2, %v7843_v57 }
 0x314   : > { %v10000_v44 = vpack.c.bf16 %v8226_v22, %v8226_v22  ;;  %v8224_v34 = vsel %vm7968_vm9, %v7840_v29, %v8096_v27  ;;  %vm7969_vm11 = vcmp.ge.f32.partialorder %v7841_v62, 0.0  ;;  %v8097_v18 = vmul.f32 0.2, %v7841_v62  ;;  %v10524_v41 = vpop.f32.mrb[124].mxu1  ;;  %v10784_v45 = vpop.f32.mrb[124].mxu0 }
 0x315   : > { %v9998_v12 = vpack.c.bf16 %v8224_v34, %v8224_v34  ;;  %v8227_v38 = vsel %vm7971_vm10, %v7843_v57, %v8099_v59  ;;  %v3737_v14 = vpop.f32.mrb[125].mxu1  ;;  %v7570_v15 = vpop.f32.mrb[125].mxu0  ;;  %v10910_v55 = vadd.f32 %v10784_v45, %v10524_v41 }
 0x316   : > { %8867 = vst.msk [vmem:[%s12740_s4 + $0x1e8] sm:$0xf] %vm8744_vm5, %v10000_v44  ;;  %v10001_v43 = vpack.c.bf16 %v8227_v38, %v8227_v38  ;;  %v8225_v4 = vsel %vm7969_vm11, %v7841_v62, %v8097_v18  ;;  %v10525_v46 = vpop.f32.mrb[126].mxu1  ;;  %v10785_v56 = vpop.f32.mrb[126].mxu0  ;;  %v10911_v5 = vadd.f32 %v7570_v15, %v3737_v14 }
 0x317   : > { %8865 = vst.msk [vmem:[%s12740_s4 + $0x1e0] sm:$0xf] %vm8744_vm5, %v9998_v12  ;;  %v9999_v2 = vpack.c.bf16 %v8225_v4, %v8225_v4  ;;  %v3740_v1 = vpop.f32.mrb[127].mxu1  ;;  %v7573_v35 = vpop.f32.mrb[127].mxu0  ;;  %v7846_v13 = vadd.f32 %v13405_v60, %v10910_v55  ;;  %v10912_v36 = vadd.f32 %v10785_v56, %v10525_v46 }
 0x318   : > { %8868 = vst.msk [vmem:[%s12740_s4 + $0x1ec] sm:$0xf] %vm8744_vm5, %v10001_v43  ;;  %v7844_v47 = vadd.f32 %v13405_v60, %v10911_v5  ;;  %v10913_v24 = vadd.f32 %v7573_v35, %v3740_v1 }
 0x319   : > { %8866 = vst.msk [vmem:[%s12740_s4 + $0x1e4] sm:$0xf] %vm8744_vm5, %v9999_v2  ;;  %vm7974_vm12 = vcmp.ge.f32.partialorder %v7846_v13, 0.0  ;;  %v8102_v32 = vmul.f32 0.2, %v7846_v13  ;;  %v7847_v30 = vadd.f32 %v13405_v60, %v10912_v36 }
 0x31a   : > { %vm7972_vm1 = vcmp.ge.f32.partialorder %v7844_v47, 0.0  ;;  %v8100_v11 = vmul.f32 0.2, %v7844_v47  ;;  %v7845_v42 = vadd.f32 %v13405_v60, %v10913_v24 }
 0x31b   : > { %v8230_v54 = vsel %vm7974_vm12, %v7846_v13, %v8102_v32  ;;  %vm7975_vm4 = vcmp.ge.f32.partialorder %v7847_v30, 0.0  ;;  %v8103_v63 = vmul.f32 0.2, %v7847_v30 }
 0x31c   : > { %v10004_v23 = vpack.c.bf16 %v8230_v54, %v8230_v54  ;;  %v8228_v51 = vsel %vm7972_vm1, %v7844_v47, %v8100_v11  ;;  %vm7973_vm13 = vcmp.ge.f32.partialorder %v7845_v42, 0.0  ;;  %v8101_v9 = vmul.f32 0.2, %v7845_v42 }
 0x31d   : > { %v10002_v25 = vpack.c.bf16 %v8228_v51, %v8228_v51  ;;  %v8231_v26 = vsel %vm7975_vm4, %v7847_v30, %v8103_v63 }
 0x31e   : > { %8871 = vst.msk [vmem:[%s12740_s4 + $0x1f8] sm:$0xf] %vm8744_vm5, %v10004_v23  ;;  %v10005_v20 = vpack.c.bf16 %v8231_v26, %v8231_v26  ;;  %v8229_v10 = vsel %vm7973_vm13, %v7845_v42, %v8101_v9 }
 0x31f   : > { %8869 = vst.msk [vmem:[%s12740_s4 + $0x1f0] sm:$0xf] %vm8744_vm5, %v10002_v25  ;;  %v10003_v31 = vpack.c.bf16 %v8229_v10, %v8229_v10 }
 0x320   : > { %8872 = vst.msk [vmem:[%s12740_s4 + $0x1fc] sm:$0xf] %vm8744_vm5, %v10005_v20 }
 0x321   : > { %8870 = vst.msk [vmem:[%s12740_s4 + $0x1f4] sm:$0xf] %vm8744_vm5, %v10003_v31 }
 0x322 PF: > { %s13_s12 = sadd.s32 1, %s11439_s12  }
 0x323   : > { %p10_p4 = scmp.ge.s32.totalorder %s13_s12, 4  }
 0x325   :  { %12 = sbr.rel (!%p10_p4) target bundleno = 1 (0x1), region = 66 }

// kernel: discriminator_forward.5
= control target key start
LH: loop header
LB: loop body
LE: loop exit
PB: predicated region body
PF: predicated region fallthrough
CT: control target
= control target key end

     0   :  { %s3610_s15 = smov 0   ;;  %s4349_s0 = inlined_call_operand.vmem [shape: bf16[2,17,17,64], index: 0, kind: input, shape index: {}]   ;;  %s4350_s1 = inlined_call_operand.vmem [shape: bf16[4,64,32], index: 1, kind: input, shape index: {}]   ;;  %s4351_s2 = inlined_call_operand.vmem [shape: f32[1,32], index: 2, kind: input, shape index: {}]   ;;  %s4352_s3 = inlined_call_operand.vmem [shape: bf16[2,256,32], index: 3, kind: output, shape index: {0}]   ;;  %s4353_s4 = inlined_call_operand.vmem [shape: f32[2,2,32], index: 4, kind: output, shape index: {1}]  }
   0x1 LB: > { %s2859_s16 = sadd.s32 4294967295, %s3583_s15   ;;  %p2863_p0 = scmp.ge.s32.totalorder %s3583_s15, 1  ;;  %s3583_s15 = sphi %s3610_s15, %s15_s15  }
   0x2   : > { %p165_p1 = scmp.lt.s32.totalorder %s3583_s15, 3 }
   0x4   : > { %p166_p2 = pnand %p2863_p0, %p165_p1 }
   0x5   : > { %v3529_v0 = vld [vmem:[%s4350_s1 + $0x20] sm:$0xff] (!%p166_p2)   ;;  %p195_p3 = scmp.lt.s32.totalorder (!%p166_p2), %s2859_s16, 1  ;;  %v3531_v2 = vld [vmem:[%s4350_s1 + $0x28] sm:$0xff] (!%p166_p2)   ;;  %v3533_v4 = vld [vmem:[%s4350_s1 + $0x30] sm:$0xff] (!%p166_p2)   ;;  %vm734_vm0 = vcmask (!%p166_p2), 523264   ;;  %vm2565_vm4 = vcmask (!%p166_p2), 257024  }
   0x6   : > { %169 = sbr.rel (%p166_p2) target bundleno = 406 (0x196), region = 32  ;;  %v3530_v1 = vld [vmem:[%s4350_s1 + $0x40] sm:$0xff] (!%p166_p2)   ;;  %3264 = vmatprep.subr.bf16.mxu1 (!%p166_p2), %v3529_v0  ;;  %v3532_v3 = vld [vmem:[%s4350_s1 + $0x48] sm:$0xff] (!%p166_p2)   ;;  %v3534_v5 = vld [vmem:[%s4350_s1 + $0x50] sm:$0xff] (!%p166_p2)   ;;  %vm266_vm1 = vsmask.f32 (!%p166_p2), 3328 }
   0x7   : > { %3344 = vmatprep.subr.bf16.mxu0 (!%p166_p2), %v3530_v1  ;;  %3265 = vmatpush3.bf16.msra.mxu1 (!%p166_p2), %v3529_v0  ;;  %v3535_v6 = vld [vmem:[%s4350_s1 + $0x38] sm:$0xff] (!%p166_p2)   ;;  %vm267_vm2 = vsmask.f32 (!%p166_p2), 7440  ;;  %v3666_v17 = vld [vmem:[%s4350_s1] sm:$0xff] (!%p166_p2)   ;;  %vm2598_vm5 = vcmask (!%p166_p2), 261120   ;;  %vm2769_vm6 = vcmask (!%p166_p2), 1040384  }
   0x8   : > { %3345 = vmatpush3.bf16.msra.mxu0 (!%p166_p2), %v3530_v1  ;;  %3266 = vmatprep.subr.bf16.mxu1 (!%p166_p2), %v3531_v2  ;;  %v3536_v7 = vld [vmem:[%s4350_s1 + $0x58] sm:$0xff] (!%p166_p2)   ;;  %vm3671_vm3 = vmor (!%p166_p2), %vm266_vm1, %vm267_vm2  ;;  %v3540_v27 = vld [vmem:[%s4350_s1 + $0x60] sm:$0xff] (!%p166_p2)   ;;  %vm2771_vm7 = vcmask (!%p166_p2), 254976  }
   0x9   : > { %3346 = vmatprep.subr.bf16.mxu0 (!%p166_p2), %v3532_v3 }
   0xb   : > { %3267 = vmatpush3.bf16.msra.mxu1 (!%p166_p2), %v3531_v2 }
   0xc   : > { %3347 = vmatpush3.bf16.msra.mxu0 (!%p166_p2), %v3532_v3  ;;  %3268 = vmatprep.subr.bf16.mxu1 (!%p166_p2), %v3533_v4 }
   0xd   : > { %s4363_s16 = smov (!%p195_p3, %s2859_s16), 1  ;;  %3348 = vmatprep.subr.bf16.mxu0 %v3534_v5 }
   0xe   : > { %s3520_s27 = smul.u32 204, %s4363_s16  ;;  %s3151_s5 = sshll.u32 %s4363_s16, 7 }
   0xf   : > { %3269 = vmatpush3.bf16.msra.mxu1 %v3533_v4  ;;  %s2867_s9 = sshll.u32 %s4363_s16, 1 }
  0x10   : > { %s3645_s8 = scalar_lea.vmem %s4349_s0, %s3520_s27  ;;  %3349 = vmatpush3.bf16.msra.mxu0 %v3534_v5  ;;  %3270 = vmatprep.subr.bf16.mxu1 %v3535_v6  ;;  %s208_s12 = scalar_lea.vmem %s4353_s4, %s2867_s9 }
  0x11   : > { %v3537_v8 = vld [vmem:[%s3645_s8 + $0xc] sm:$0xff]   ;;  %v3652_v9 = vld [vmem:[%s3645_s8] sm:$0xf]  ;;  %v3655_v10 = vld [vmem:[%s3645_s8 + $0x4] sm:$0xf]  ;;  %3350 = vmatprep.subr.bf16.mxu0 %v3536_v7 }
  0x12   : > { %v250_v11 = vld [vmem:[%s3645_s8 + $0x8] sm:$0x1]  ;;  %3352 = vmatprep.mubr.msk.bf16.mxu0 %vm734_vm0, %v3537_v8  ;;  %v270_v12 = vshrl.u32 %v3652_v9, 16  ;;  %v273_v13 = vshll.u32 %v3652_v9, 16  ;;  %v279_v14 = vshll.u32 %v3655_v10, 16  ;;  %v283_v15 = vshrl.u32 %v3655_v10, 16 }
  0x13   : > { %v289_v16 = vshll.u32 %v250_v11, 16  ;;  %v2912_v18 = vcombine.low %v3652_v9, %v3655_v10  ;;  %v3539_v24 = vld [vmem:[%s3645_s8 + $0x18] sm:$0xff]   ;;  %3271 = vmatpush3.bf16.msra.mxu1 %v3535_v6  ;;  %v3680_v29 = vld [vmem:[%s3645_s8 + $0xc] sm:$0xf]  ;;  %v3683_v30 = vld [vmem:[%s3645_s8 + $0x10] sm:$0xf] }
  0x14   : > { %v272_v19 = vrot.slane %v270_v12, 4  ;;  %v275_v20 = vrot.slane %v273_v13, 5  ;;  %v281_v22 = vrot.slane %v279_v14, 5  ;;  %v285_v23 = vrot.slane %v283_v15, 4  ;;  %v251_v31 = vld [vmem:[%s3645_s8 + $0x14] sm:$0x1]  ;;  %3351 = vmatpush3.bf16.msra.mxu0 %v3536_v7  ;;  %3304 = vmatprep.subr.bf16.mxu1 %v3666_v17 }
  0x15   : > { %v291_v26 = vrot.slane %v289_v16, 5  ;;  %v294_v33 = vshrl.u32 %v3680_v29, 16  ;;  %v297_v34 = vshll.u32 %v3680_v29, 16  ;;  %v303_v35 = vshll.u32 %v3683_v30, 16  ;;  %3384 = vmatprep.subr.bf16.mxu0 %v3540_v27  ;;  %v3541_v39 = vld [vmem:[%s3645_s8 + $0x24] sm:$0xff]   ;;  %v3542_v59 = vld [vmem:[%s3645_s8 + $0x30] sm:$0xff]  }
  0x16   : > { %v276_v25 = vor.u32 %v275_v20, %v272_v19  ;;  %v286_v28 = vor.u32 %v285_v23, %v281_v22  ;;  %v307_v37 = vshrl.u32 %v3683_v30, 16  ;;  %v313_v38 = vshll.u32 %v251_v31, 16  ;;  %v3697_v45 = vld [vmem:[%s3645_s8 + $0x18] sm:$0xf]  ;;  %v3703_v49 = vld [vmem:[%s3645_s8 + $0x1c] sm:$0xf] }
  0x17   : > { %v2913_v40 = vcombine.low %v3680_v29, %v3683_v30  ;;  %v296_v42 = vrot.slane %v294_v33, 4  ;;  %v299_v43 = vrot.slane %v297_v34, 5  ;;  %v305_v44 = vrot.slane %v303_v35, 5  ;;  %3353 = vmatmul.mubr.msk.bf16.vlgmr.msra.gmra.mrb[0].mxu0 %vm734_vm0, %v3539_v24  ;;  %v252_v50 = vld [vmem:[%s3645_s8 + $0x20] sm:$0x1] }
  0x18   : > { %v277_v32 = vrot.slane %v276_v25, 4  ;;  %v287_v36 = vrot.slane %v286_v28, 4  ;;  %v309_v47 = vrot.slane %v307_v37, 4  ;;  %v315_v48 = vrot.slane %v313_v38, 5  ;;  %3385 = vmatpush3.bf16.msra.mxu0 %v3540_v27  ;;  %3356 = vmatprep.mubr.msk.bf16.mxu0 %vm734_vm0, %v3541_v39  ;;  %v3713_v60 = vld [vmem:[%s3645_s8 + $0x24] sm:$0xf] }
  0x19   : > { %v300_v52 = vor.u32 %v299_v43, %v296_v42  ;;  %v318_v53 = vshrl.u32 %v3697_v45, 16  ;;  %v321_v54 = vshll.u32 %v3697_v45, 16  ;;  %v327_v56 = vshll.u32 %v3703_v49, 16  ;;  %v3717_v0 = vld [vmem:[%s3645_s8 + $0x28] sm:$0xf]  ;;  %v3543_v2 = vld [vmem:[%s3645_s8 + $0x3c] sm:$0xff]  }
  0x1a   : > { %v282_v41 = vsel %vm3671_vm3, %v277_v32, %v281_v22  ;;  %v292_v46 = vsel %vm3671_vm3, %v287_v36, %v291_v26  ;;  %v310_v55 = vor.u32 %v309_v47, %v305_v44  ;;  %v331_v57 = vshrl.u32 %v3703_v49, 16  ;;  %v253_v7 = vld [vmem:[%s3645_s8 + $0x2c] sm:$0x1]  ;;  %v3730_v20 = vld [vmem:[%s3645_s8 + $0x30] sm:$0xf] }
  0x1b   : > { %v2876_v51 = vcombine.low %v282_v41, %v292_v46  ;;  %v337_v58 = vshll.u32 %v252_v50, 16  ;;  %v301_v61 = vrot.slane %v300_v52, 4  ;;  %v320_v62 = vrot.slane %v318_v53, 4  ;;  %v3733_v22 = vld [vmem:[%s3645_s8 + $0x34] sm:$0xf]  ;;  %v3544_v28 = vld [vmem:[%s4350_s1 + $0x8] sm:$0xff]  }
  0x1c   : > { %v323_v63 = vrot.slane %v321_v54, 5  ;;  %v342_v1 = vshrl.u32 %v3713_v60, 16  ;;  %v311_v3 = vrot.slane %v310_v55, 4  ;;  %v329_v4 = vrot.slane %v327_v56, 5  ;;  %v254_v27 = vld [vmem:[%s3645_s8 + $0x38] sm:$0x1] }
  0x1d   : > { %3272 = vmatprep.mubr.msk.bf16.mxu1 %vm734_vm0, %v2876_v51  ;;  %v333_v5 = vrot.slane %v331_v57, 4  ;;  %v339_v6 = vrot.slane %v337_v58, 5  ;;  %v306_v8 = vsel %vm3671_vm3, %v301_v61, %v305_v44  ;;  %v345_v13 = vshll.u32 %v3713_v60, 16  ;;  %v3546_v44 = vld [vmem:[%s4350_s1 + $0x68] sm:$0xff]   ;;  %v3761_v58 = vld [vmem:[%s3645_s8 + $0x3c] sm:$0xf] }
  0x1e   : > { %v324_v11 = vor.u32 %v323_v63, %v320_v62  ;;  %v344_v12 = vrot.slane %v342_v1, 4  ;;  %v316_v14 = vsel %vm3671_vm3, %v311_v3, %v315_v48  ;;  %v351_v16 = vshll.u32 %v3717_v0, 16  ;;  %v3545_v53 = vld [vmem:[%s3645_s8 + $0x48] sm:$0xff]   ;;  %3386 = vmatprep.subr.bf16.mxu0 %v3546_v44  ;;  %v3547_v61 = vld [vmem:[%s3645_s8 + $0x54] sm:$0xff]  }
  0x1f   : > { %v334_v15 = vor.u32 %v333_v5, %v329_v4  ;;  %v355_v19 = vshrl.u32 %v3717_v0, 16  ;;  %v2877_v23 = vcombine.low %v306_v8, %v316_v14  ;;  %v347_v25 = vrot.slane %v345_v13, 5  ;;  %3357 = vmatmul.mubr.msk.bf16.gmra.mrb[4].mxu0 %vm734_vm0, %v3542_v59  ;;  %v3764_v59 = vld [vmem:[%s3645_s8 + $0x40] sm:$0xf]  ;;  %v3550_v5 = vld [vmem:[%s4350_s1 + $0x10] sm:$0xff]  }
  0x20   : > { %v325_v24 = vrot.slane %v324_v11, 4  ;;  %v361_v26 = vshll.u32 %v253_v7, 16  ;;  %v353_v32 = vrot.slane %v351_v16, 5  ;;  %v366_v34 = vshrl.u32 %v3730_v20, 16  ;;  %3360 = vmatprep.mubr.msk.bf16.mxu0 %vm734_vm0, %v3543_v2  ;;  %3387 = vmatpush3.bf16.msra.mxu0 %v3546_v44  ;;  %v255_v2 = vld [vmem:[%s3645_s8 + $0x44] sm:$0x1] }
  0x21   : > { %v335_v31 = vrot.slane %v334_v15, 4  ;;  %v357_v33 = vrot.slane %v355_v19, 4  ;;  %3273 = vmatmul.mubr.msk.bf16.vlgmr.msra.gmra.mrb[0].mxu1 %vm734_vm0, %v2877_v23  ;;  %v348_v36 = vor.u32 %v347_v25, %v344_v12  ;;  %v369_v38 = vshll.u32 %v3730_v20, 16  ;;  %v3781_v16 = vld [vmem:[%s3645_s8 + $0x48] sm:$0xf] }
  0x22   : > { %v330_v35 = vsel %vm3671_vm3, %v325_v24, %v329_v4  ;;  %v363_v37 = vrot.slane %v361_v26, 5  ;;  %3305 = vmatpush3.bf16.msra.mxu1 %v3666_v17  ;;  %v368_v42 = vrot.slane %v366_v34, 4  ;;  %v375_v43 = vshll.u32 %v3733_v22, 16  ;;  %v3788_v25 = vld [vmem:[%s3645_s8 + $0x4c] sm:$0xf]  ;;  %v3548_v34 = vld [vmem:[%s3645_s8 + $0x60] sm:$0xff]  }
  0x23   : > { %v340_v39 = vsel %vm3671_vm3, %v335_v31, %v339_v6  ;;  %v358_v41 = vor.u32 %v357_v33, %v353_v32  ;;  %v349_v47 = vrot.slane %v348_v36, 4  ;;  %v371_v48 = vrot.slane %v369_v38, 5  ;;  %3306 = vmatprep.subr.bf16.mxu1 %v3544_v28  ;;  %v256_v26 = vld [vmem:[%s3645_s8 + $0x50] sm:$0x1]  ;;  %v3040_v29 = vld [vmem:[%s3645_s8 + $0x4c] sm:$0xf] }
  0x24   : > { %v2878_v46 = vcombine.low %v330_v35, %v340_v39  ;;  %v379_v50 = vshrl.u32 %v3733_v22, 16  ;;  %v377_v51 = vrot.slane %v375_v43, 5  ;;  %v385_v52 = vshll.u32 %v254_v27, 16  ;;  %v3549_v39 = vld [vmem:[%s3645_s8 + $0x6c] sm:$0xff]  }
  0x25   : > { %v359_v17 = vrot.slane %v358_v41, 4  ;;  %v354_v55 = vsel %vm3671_vm3, %v349_v47, %v353_v32  ;;  %v372_v56 = vor.u32 %v371_v48, %v368_v42  ;;  %v390_v3 = vshrl.u32 %v3761_v58, 16  ;;  %v3552_v41 = vld [vmem:[%s4350_s1 + $0x70] sm:$0xff]   ;;  %v3808_v48 = vld [vmem:[%s3645_s8 + $0x58] sm:$0xf] }
  0x26   : > { %3276 = vmatprep.mubr.msk.bf16.mxu1 %vm734_vm0, %v2878_v46  ;;  %v381_v57 = vrot.slane %v379_v50, 4  ;;  %v387_v1 = vrot.slane %v385_v52, 5  ;;  %v393_v4 = vshll.u32 %v3761_v58, 16  ;;  %3307 = vmatpush3.bf16.msra.mxu1 %v3544_v28  ;;  %v399_v11 = vshll.u32 %v3764_v59, 16  ;;  %v3805_v47 = vld [vmem:[%s3645_s8 + $0x54] sm:$0xf] }
  0x27   : > { %v364_v63 = vsel %vm3671_vm3, %v359_v17, %v363_v37  ;;  %v373_v7 = vrot.slane %v372_v56, 4  ;;  %3361 = vmatmul.mubr.msk.bf16.gmra.mrb[8].mxu0 %vm734_vm0, %v3545_v53  ;;  %v392_v12 = vrot.slane %v390_v3, 4  ;;  %v403_v14 = vshrl.u32 %v3764_v59, 16  ;;  %3308 = vmatprep.subr.bf16.mxu1 %v3550_v5  ;;  %v257_v53 = vld [vmem:[%s3645_s8 + $0x5c] sm:$0x1] }
  0x28   : > { %v2879_v6 = vcombine.low %v354_v55, %v364_v63  ;;  %v382_v8 = vor.u32 %v381_v57, %v377_v51  ;;  %v395_v13 = vrot.slane %v393_v4, 5  ;;  %v409_v15 = vshll.u32 %v255_v2, 16  ;;  %3364 = vmatprep.mubr.msk.bf16.mxu0 %vm734_vm0, %v3547_v61  ;;  %3388 = vmatprep.subr.bf16.mxu0 %v3552_v41  ;;  %v3818_v4 = vld [vmem:[%s3645_s8 + $0x60] sm:$0xf] }
  0x29   : > { %v378_v19 = vsel %vm3671_vm3, %v373_v7, %v377_v51  ;;  %v401_v24 = vrot.slane %v399_v11, 5  ;;  %v405_v31 = vrot.slane %v403_v14, 4  ;;  %v414_v33 = vshrl.u32 %v3781_v16, 16  ;;  %3389 = vmatpush3.bf16.msra.mxu0 %v3552_v41  ;;  %v3825_v11 = vld [vmem:[%s3645_s8 + $0x64] sm:$0xf] }
  0x2a   : > { %3277 = vmatmul.mubr.msk.bf16.gmra.mrb[4].mxu1 %vm734_vm0, %v2879_v6  ;;  %v383_v23 = vrot.slane %v382_v8, 4  ;;  %v396_v28 = vor.u32 %v395_v13, %v392_v12  ;;  %v411_v32 = vrot.slane %v409_v15, 5  ;;  %v417_v36 = vshll.u32 %v3781_v16, 16 }
  0x2b   : > { %3309 = vmatpush3.bf16.msra.mxu1 %v3550_v5  ;;  %v423_v37 = vshll.u32 %v3788_v25, 16  ;;  %v427_v38 = vshrl.u32 %v3788_v25, 16  ;;  %v406_v44 = vor.u32 %v405_v31, %v401_v24  ;;  %v416_v46 = vrot.slane %v414_v33, 4  ;;  %v3551_v31 = vld [vmem:[%s3645_s8 + $0x78] sm:$0xff]  }
  0x2c   : > { %v388_v35 = vsel %vm3671_vm3, %v383_v23, %v387_v1  ;;  %v397_v43 = vrot.slane %v396_v28, 4  ;;  %v419_v50 = vrot.slane %v417_v36, 5  ;;  %v433_v52 = vshll.u32 %v256_v26, 16 }
  0x2d   : > { %v2880_v42 = vcombine.low %v378_v19, %v388_v35  ;;  %v425_v17 = vrot.slane %v423_v37, 5  ;;  %v429_v51 = vrot.slane %v427_v38, 4  ;;  %v407_v56 = vrot.slane %v406_v44, 4  ;;  %v258_v19 = vld [vmem:[%s3645_s8 + $0x68] sm:$0x1] }
  0x2e   : > { %v402_v55 = vsel %vm3671_vm3, %v397_v43, %v401_v24  ;;  %v438_v57 = vshrl.u32 %v3805_v47, 16  ;;  %v441_v61 = vshll.u32 %v3805_v47, 16  ;;  %v420_v63 = vor.u32 %v419_v50, %v416_v46  ;;  %v3553_v37 = vld [vmem:[%s3645_s8 + $0x84] sm:$0xff]  }
  0x2f   : > { %3280 = vmatprep.mubr.msk.bf16.mxu1 %vm734_vm0, %v2880_v42  ;;  %v430_v1 = vor.u32 %v429_v51, %v425_v17  ;;  %v435_v2 = vrot.slane %v433_v52, 5  ;;  %v447_v3 = vshll.u32 %v3808_v48, 16  ;;  %v412_v5 = vsel %vm3671_vm3, %v407_v56, %v411_v32  ;;  %3365 = vmatmul.mubr.msk.bf16.gmra.mrb[12].mxu0 %vm734_vm0, %v3548_v34  ;;  %v3556_v32 = vld [vmem:[%s4350_s1 + $0x18] sm:$0xff]  }
  0x30   : > { %v440_v6 = vrot.slane %v438_v57, 4  ;;  %v443_v7 = vrot.slane %v441_v61, 5  ;;  %v451_v8 = vshrl.u32 %v3808_v48, 16  ;;  %v2881_v12 = vcombine.low %v402_v55, %v412_v5  ;;  %3368 = vmatprep.mubr.msk.bf16.mxu0 %vm734_vm0, %v3549_v39  ;;  %3310 = vmatprep.subr.bf16.mxu1 %v3556_v32  ;;  %v3850_v55 = vld [vmem:[%s3645_s8 + $0x70] sm:$0xf] }
  0x31   : > { %v421_v13 = vrot.slane %v420_v63, 4  ;;  %v431_v14 = vrot.slane %v430_v1, 4  ;;  %v449_v15 = vrot.slane %v447_v3, 5  ;;  %v457_v26 = vshll.u32 %v257_v53, 16  ;;  %3311 = vmatpush3.bf16.msra.mxu1 %v3556_v32  ;;  %v3847_v53 = vld [vmem:[%s3645_s8 + $0x6c] sm:$0xf] }
  0x32   : > { %v444_v23 = vor.u32 %v443_v7, %v440_v6  ;;  %v453_v24 = vrot.slane %v451_v8, 4  ;;  %v462_v28 = vshrl.u32 %v3818_v4, 16  ;;  %3281 = vmatmul.mubr.msk.bf16.gmra.mrb[8].mxu1 %vm734_vm0, %v2881_v12  ;;  %v465_v35 = vshll.u32 %v3818_v4, 16  ;;  %v259_v63 = vld [vmem:[%s3645_s8 + $0x74] sm:$0x1]  ;;  %v3558_v8 = vld [vmem:[%s4350_s1 + $0x78] sm:$0xff]  }
  0x33   : > { %v426_v33 = vsel %vm3671_vm3, %v421_v13, %v425_v17  ;;  %v436_v34 = vsel %vm3671_vm3, %v431_v14, %v435_v2  ;;  %v471_v36 = vshll.u32 %v3825_v11, 16  ;;  %v459_v42 = vrot.slane %v457_v26, 5  ;;  %3390 = vmatprep.subr.bf16.mxu0 %v3558_v8 }
  0x34   : > { %v2882_v38 = vcombine.low %v426_v33, %v436_v34  ;;  %v445_v39 = vrot.slane %v444_v23, 4  ;;  %v454_v41 = vor.u32 %v453_v24, %v449_v15  ;;  %v464_v43 = vrot.slane %v462_v28, 4  ;;  %v260_v34 = vld [vmem:[%s3645_s8 + $0x80] sm:$0x1]  ;;  %3391 = vmatpush3.bf16.msra.mxu0 %v3558_v8 }
  0x35   : > { %v467_v44 = vrot.slane %v465_v35, 5  ;;  %v473_v46 = vrot.slane %v471_v36, 5  ;;  %v475_v50 = vshrl.u32 %v3825_v11, 16  ;;  %v481_v52 = vshll.u32 %v258_v19, 16  ;;  %v3867_v19 = vld [vmem:[%s3645_s8 + $0x78] sm:$0xf] }
  0x36   : > { %3284 = vmatprep.mubr.msk.bf16.mxu1 %vm734_vm0, %v2882_v38  ;;  %v450_v17 = vsel %vm3671_vm3, %v445_v39, %v449_v15  ;;  %v455_v51 = vrot.slane %v454_v41, 4  ;;  %v486_v1 = vshrl.u32 %v3847_v53, 16  ;;  %v489_v2 = vshll.u32 %v3847_v53, 16 }
  0x37   : > { %v468_v57 = vor.u32 %v467_v44, %v464_v43  ;;  %v477_v61 = vrot.slane %v475_v50, 4  ;;  %v483_v5 = vrot.slane %v481_v52, 5  ;;  %3369 = vmatmul.mubr.msk.bf16.gmra.mrb[16].mxu0 %vm734_vm0, %v3551_v31  ;;  %v495_v6 = vshll.u32 %v3850_v55, 16  ;;  %v3870_v31 = vld [vmem:[%s3645_s8 + $0x7c] sm:$0xf] }
  0x38   : > { %v460_v3 = vsel %vm3671_vm3, %v455_v51, %v459_v42  ;;  %v499_v7 = vshrl.u32 %v3850_v55, 16  ;;  %v488_v15 = vrot.slane %v486_v1, 4  ;;  %3372 = vmatprep.mubr.msk.bf16.mxu0 %vm734_vm0, %v3553_v37  ;;  %v491_v23 = vrot.slane %v489_v2, 5  ;;  %v3554_v37 = vld [vmem:[%s3645_s8 + $0x90] sm:$0xff]   ;;  %v3555_v51 = vld [vmem:[%s3645_s8 + $0x9c] sm:$0xff]  }
  0x39   : > { %v2883_v12 = vcombine.low %v450_v17, %v460_v3  ;;  %v469_v13 = vrot.slane %v468_v57, 4  ;;  %v478_v14 = vor.u32 %v477_v61, %v473_v46  ;;  %v497_v24 = vrot.slane %v495_v6, 5  ;;  %v3884_v17 = vld [vmem:[%s3645_s8 + $0x84] sm:$0xf]  ;;  %v3888_v1 = vld [vmem:[%s3645_s8 + $0x88] sm:$0xf] }
  0x3a   : > { %v501_v26 = vrot.slane %v499_v7, 4  ;;  %v505_v28 = vshll.u32 %v259_v63, 16  ;;  %v510_v35 = vshrl.u32 %v3867_v19, 16  ;;  %v513_v36 = vshll.u32 %v3867_v19, 16  ;;  %v261_v7 = vld [vmem:[%s3645_s8 + $0x8c] sm:$0x1] }
  0x3b   : > { %3285 = vmatmul.mubr.msk.bf16.gmra.mrb[12].mxu1 %vm734_vm0, %v2883_v12  ;;  %v474_v32 = vsel %vm3671_vm3, %v469_v13, %v473_v46  ;;  %v479_v33 = vrot.slane %v478_v14, 4  ;;  %v492_v38 = vor.u32 %v491_v23, %v488_v15  ;;  %v519_v42 = vshll.u32 %v3870_v31, 16 }
  0x3c   : > { %v502_v39 = vor.u32 %v501_v26, %v497_v24  ;;  %v507_v41 = vrot.slane %v505_v28, 5  ;;  %v512_v44 = vrot.slane %v510_v35, 4  ;;  %v515_v46 = vrot.slane %v513_v36, 5 }
  0x3d   : > { %v484_v43 = vsel %vm3671_vm3, %v479_v33, %v483_v5  ;;  %v523_v50 = vshrl.u32 %v3870_v31, 16  ;;  %v493_v57 = vrot.slane %v492_v38, 4  ;;  %v521_v63 = vrot.slane %v519_v42, 5 }
  0x3e   : > { %v2884_v52 = vcombine.low %v474_v32, %v484_v43  ;;  %v503_v61 = vrot.slane %v502_v39, 4  ;;  %v516_v2 = vor.u32 %v515_v46, %v512_v44  ;;  %v529_v6 = vshll.u32 %v260_v34, 16  ;;  %v3902_v32 = vld [vmem:[%s3645_s8 + $0x90] sm:$0xf] }
  0x3f   : > { %v525_v3 = vrot.slane %v523_v50, 4  ;;  %v534_v5 = vshrl.u32 %v3884_v17, 16  ;;  %v498_v8 = vsel %vm3671_vm3, %v493_v57, %v497_v24  ;;  %3373 = vmatmul.mubr.msk.bf16.gmra.mrb[20].mxu0 %vm734_vm0, %v3554_v37  ;;  %v537_v13 = vshll.u32 %v3884_v17, 16  ;;  %v3905_v24 = vld [vmem:[%s3645_s8 + $0x94] sm:$0xf] }
  0x40   : > { %3288 = vmatprep.mubr.msk.bf16.mxu1 %vm734_vm0, %v2884_v52  ;;  %v508_v12 = vsel %vm3671_vm3, %v503_v61, %v507_v41  ;;  %v543_v14 = vshll.u32 %v3888_v1, 16  ;;  %v517_v23 = vrot.slane %v516_v2, 4  ;;  %v531_v28 = vrot.slane %v529_v6, 5  ;;  %3376 = vmatprep.mubr.msk.bf16.mxu0 %vm734_vm0, %v3555_v51  ;;  %v262_v37 = vld [vmem:[%s3645_s8 + $0x98] sm:$0x1]  ;;  %v3557_v51 = vld [vmem:[%s3645_s8 + $0xa8] sm:$0xff]  }
  0x41   : > { %v2885_v15 = vcombine.low %v498_v8, %v508_v12  ;;  %v526_v26 = vor.u32 %v525_v3, %v521_v63  ;;  %v536_v33 = vrot.slane %v534_v5, 4  ;;  %v539_v34 = vrot.slane %v537_v13, 5 }
  0x42   : > { %v545_v35 = vrot.slane %v543_v14, 5  ;;  %v547_v36 = vshrl.u32 %v3888_v1, 16  ;;  %v522_v38 = vsel %vm3671_vm3, %v517_v23, %v521_v63  ;;  %v553_v41 = vshll.u32 %v261_v7, 16  ;;  %v3559_v63 = vld [vmem:[%s3645_s8 + $0xb4] sm:$0xff]  }
  0x43   : > { %3289 = vmatmul.mubr.msk.bf16.gmra.mrb[16].mxu1 %vm734_vm0, %v2885_v15  ;;  %v527_v39 = vrot.slane %v526_v26, 4  ;;  %v558_v42 = vshrl.u32 %v3902_v32, 16  ;;  %v540_v43 = vor.u32 %v539_v34, %v536_v33  ;;  %v561_v46 = vshll.u32 %v3902_v32, 16  ;;  %v3930_v33 = vld [vmem:[%s3645_s8 + $0xa0] sm:$0xf] }
  0x44   : > { %v549_v44 = vrot.slane %v547_v36, 4  ;;  %v567_v50 = vshll.u32 %v3905_v24, 16  ;;  %v555_v57 = vrot.slane %v553_v41, 5  ;;  %v571_v2 = vshrl.u32 %v3905_v24, 16 }
  0x45   : > { %v532_v52 = vsel %vm3671_vm3, %v527_v39, %v531_v28  ;;  %v560_v61 = vrot.slane %v558_v42, 4  ;;  %v541_v6 = vrot.slane %v540_v43, 4  ;;  %v563_v5 = vrot.slane %v561_v46, 5  ;;  %v3927_v28 = vld [vmem:[%s3645_s8 + $0x9c] sm:$0xf] }
  0x46   : > { %v2886_v3 = vcombine.low %v522_v38, %v532_v52  ;;  %v550_v7 = vor.u32 %v549_v44, %v545_v35  ;;  %v569_v8 = vrot.slane %v567_v50, 5  ;;  %v573_v12 = vrot.slane %v571_v2, 4  ;;  %v263_v38 = vld [vmem:[%s3645_s8 + $0xa4] sm:$0x1] }
  0x47   : > { %v577_v13 = vshll.u32 %v262_v37, 16  ;;  %v546_v15 = vsel %vm3671_vm3, %v541_v6, %v545_v35  ;;  %v564_v26 = vor.u32 %v563_v5, %v560_v61  ;;  %3377 = vmatmul.mubr.msk.bf16.gmra.mrb[24].mxu0 %vm734_vm0, %v3557_v51  ;;  %v582_v39 = vshrl.u32 %v3927_v28, 16  ;;  %v3945_v6 = vld [vmem:[%s3645_s8 + $0xa8] sm:$0xf] }
  0x48   : > { %3292 = vmatprep.mubr.msk.bf16.mxu1 %vm734_vm0, %v2886_v3  ;;  %v551_v23 = vrot.slane %v550_v7, 4  ;;  %v574_v36 = vor.u32 %v573_v12, %v569_v8  ;;  %v585_v35 = vshll.u32 %v3927_v28, 16  ;;  %3380 = vmatprep.mubr.msk.bf16.mxu0 %vm734_vm0, %v3559_v63  ;;  %v591_v43 = vshll.u32 %v3930_v33, 16  ;;  %v3952_v12 = vld [vmem:[%s3645_s8 + $0xac] sm:$0xf] }
  0x49   : > { %v579_v37 = vrot.slane %v577_v13, 5  ;;  %v565_v42 = vrot.slane %v564_v26, 4  ;;  %v595_v44 = vshrl.u32 %v3930_v33, 16  ;;  %v584_v51 = vrot.slane %v582_v39, 4  ;;  %v264_v13 = vld [vmem:[%s3645_s8 + $0xb0] sm:$0x1] }
  0x4a   : > { %v556_v41 = vsel %vm3671_vm3, %v551_v23, %v555_v57  ;;  %v575_v50 = vrot.slane %v574_v36, 4  ;;  %v587_v52 = vrot.slane %v585_v35, 5  ;;  %v593_v2 = vrot.slane %v591_v43, 5  ;;  %v3560_v57 = vld [vmem:[%s3645_s8 + $0xc0] sm:$0xff]  }
  0x4b   : > { %v2887_v46 = vcombine.low %v546_v15, %v556_v41  ;;  %v570_v61 = vsel %vm3671_vm3, %v565_v42, %v569_v8  ;;  %v597_v3 = vrot.slane %v595_v44, 4  ;;  %v601_v63 = vshll.u32 %v263_v38, 16  ;;  %v3960_v42 = vld [vmem:[%s3645_s8 + $0xb4] sm:$0xf] }
  0x4c   : > { %v580_v7 = vsel %vm3671_vm3, %v575_v50, %v579_v37  ;;  %v588_v5 = vor.u32 %v587_v52, %v584_v51  ;;  %v606_v15 = vshrl.u32 %v3945_v6, 16  ;;  %v609_v8 = vshll.u32 %v3945_v6, 16  ;;  %v3965_v50 = vld [vmem:[%s3645_s8 + $0xb8] sm:$0xf] }
  0x4d   : > { %3293 = vmatmul.mubr.msk.bf16.gmra.mrb[20].mxu1 %vm734_vm0, %v2887_v46  ;;  %v2888_v23 = vcombine.low %v570_v61, %v580_v7  ;;  %v598_v26 = vor.u32 %v597_v3, %v593_v2  ;;  %v603_v36 = vrot.slane %v601_v63, 5  ;;  %v615_v38 = vshll.u32 %v3952_v12, 16  ;;  %v265_v63 = vld [vmem:[%s3645_s8 + $0xbc] sm:$0x1] }
  0x4e   : > { %v589_v39 = vrot.slane %v588_v5, 4  ;;  %v608_v35 = vrot.slane %v606_v15, 4  ;;  %v611_v41 = vrot.slane %v609_v8, 5  ;;  %v619_v37 = vshrl.u32 %v3952_v12, 16  ;;  %v3024_v5 = vld [vmem:[%s3645_s8 + $0xc] sm:$0xf] }
  0x4f   : > { %3296 = vmatprep.mubr.msk.bf16.mxu1 %vm734_vm0, %v2888_v23  ;;  %v599_v43 = vrot.slane %v598_v26, 4  ;;  %v617_v44 = vrot.slane %v615_v38, 5  ;;  %v625_v46 = vshll.u32 %v264_v13, 16  ;;  %3381 = vmatmul.mubr.msk.bf16.gmra.mrb[28].mxu0 %vm734_vm0, %v3560_v57  ;;  %v630_v51 = vshrl.u32 %v3960_v42, 16 }
  0x50   : > { %v594_v52 = vsel %vm3671_vm3, %v589_v39, %v593_v2  ;;  %v612_v61 = vor.u32 %v611_v41, %v608_v35  ;;  %v621_v3 = vrot.slane %v619_v37, 4  ;;  %v633_v7 = vshll.u32 %v3960_v42, 16  ;;  %v3025_v2 = vld [vmem:[%s3645_s8 + $0x10] sm:$0xf] }
  0x51   : > { %v604_v15 = vsel %vm3671_vm3, %v599_v43, %v603_v36  ;;  %v627_v13 = vrot.slane %v625_v46, 5  ;;  %v632_v57 = vrot.slane %v630_v51, 4  ;;  %v639_v8 = vshll.u32 %v3965_v50, 16  ;;  %v3026_v51 = vld [vmem:[%s3645_s8 + $0x14] sm:$0x1] }
  0x52   : > { %v2889_v23 = vcombine.low %v594_v52, %v604_v15  ;;  %v613_v26 = vrot.slane %v612_v61, 4  ;;  %v622_v38 = vor.u32 %v621_v3, %v617_v44  ;;  %v635_v34 = vrot.slane %v633_v7, 5 }
  0x53   : > { %v641_v39 = vrot.slane %v639_v8, 5  ;;  %v643_v35 = vshrl.u32 %v3965_v50, 16  ;;  %v649_v41 = vshll.u32 %v265_v63, 16  ;;  %v1693_v37 = vshrl.u32 %v3024_v5, 16  ;;  %v3027_v8 = vld [vmem:[%s3645_s8 + $0x18] sm:$0xf] }
  0x54   : > { %v618_v36 = vsel %vm3671_vm3, %v613_v26, %v617_v44  ;;  %v623_v43 = vrot.slane %v622_v38, 4  ;;  %v636_v46 = vor.u32 %v635_v34, %v632_v57  ;;  %v1696_v52 = vshll.u32 %v3024_v5, 16  ;;  %v3029_v38 = vld [vmem:[%s3645_s8 + $0x20] sm:$0x1] }
  0x55   : > { %3297 = vmatmul.mubr.msk.bf16.gmra.mrb[24].mxu1 %vm734_vm0, %v2889_v23  ;;  %v645_v61 = vrot.slane %v643_v35, 4  ;;  %v651_v3 = vrot.slane %v649_v41, 5  ;;  %v1695_v7 = vrot.slane %v1693_v37, 4  ;;  %v1702_v15 = vshll.u32 %v3025_v2, 16  ;;  %v3028_v23 = vld [vmem:[%s3645_s8 + $0x1c] sm:$0xf] }
  0x56   : > { %v628_v63 = vsel %vm3671_vm3, %v623_v43, %v627_v13  ;;  %v637_v14 = vrot.slane %v636_v46, 4  ;;  %v1698_v56 = vrot.slane %v1696_v52, 5  ;;  %v1706_v27 = vshrl.u32 %v3025_v2, 16 }
  0x57   : > { %v2890_v62 = vcombine.low %v618_v36, %v628_v63  ;;  %v646_v54 = vor.u32 %v645_v61, %v641_v39  ;;  %v1704_v44 = vrot.slane %v1702_v15, 5  ;;  %v1712_v34 = vshll.u32 %v3026_v51, 16  ;;  %v3030_v51 = vld [vmem:[%s3645_s8 + $0x24] sm:$0xf]  ;;  %v3031_v61 = vld [vmem:[%s3645_s8 + $0x28] sm:$0xf] }
  0x58   : > { %v642_v5 = vsel %vm3671_vm3, %v637_v14, %v641_v39  ;;  %v1699_v57 = vor.u32 %v1698_v56, %v1695_v7  ;;  %v1708_v26 = vrot.slane %v1706_v27, 4  ;;  %v1717_v35 = vshrl.u32 %v3027_v8, 16 }
  0x59   : > { %3300 = vmatprep.mubr.msk.bf16.mxu1 %vm734_vm0, %v2890_v62  ;;  %v647_v13 = vrot.slane %v646_v54, 4  ;;  %v1714_v41 = vrot.slane %v1712_v34, 5  ;;  %v1720_v37 = vshll.u32 %v3027_v8, 16  ;;  %v1726_v2 = vshll.u32 %v3028_v23, 16  ;;  %v3032_v34 = vld [vmem:[%s3645_s8 + $0x2c] sm:$0x1] }
  0x5a   : > { %v1700_v43 = vrot.slane %v1699_v57, 4  ;;  %v1709_v36 = vor.u32 %v1708_v26, %v1704_v44  ;;  %v1719_v46 = vrot.slane %v1717_v35, 4  ;;  %v1730_v52 = vshrl.u32 %v3028_v23, 16  ;;  %v3033_v35 = vld [vmem:[%s3645_s8 + $0x30] sm:$0xf] }
  0x5b   : > { %v652_v14 = vsel %vm3671_vm3, %v647_v13, %v651_v3  ;;  %v1722_v56 = vrot.slane %v1720_v37, 5  ;;  %v1728_v27 = vrot.slane %v1726_v2, 5  ;;  %v1736_v39 = vshll.u32 %v3029_v38, 16 }
  0x5c   : > { %v2891_v7 = vcombine.low %v642_v5, %v652_v14  ;;  %v1705_v54 = vsel %vm3671_vm3, %v1700_v43, %v1704_v44  ;;  %v1710_v62 = vrot.slane %v1709_v36, 4  ;;  %v1732_v15 = vrot.slane %v1730_v52, 4  ;;  %v3034_v43 = vld [vmem:[%s3645_s8 + $0x34] sm:$0xf] }
  0x5d   : > { %v1723_v8 = vor.u32 %v1722_v56, %v1719_v46  ;;  %v1738_v63 = vrot.slane %v1736_v39, 5  ;;  %v1741_v23 = vshrl.u32 %v3030_v51, 16  ;;  %v1744_v57 = vshll.u32 %v3030_v51, 16  ;;  %v3035_v56 = vld [vmem:[%s3645_s8 + $0x38] sm:$0x1] }
  0x5e   : > { %3301 = vmatmul.mubr.msk.bf16.gmra.mrb[28].mxu1 %vm734_vm0, %v2891_v7  ;;  %v1715_v3 = vsel %vm3671_vm3, %v1710_v62, %v1714_v41  ;;  %v1733_v26 = vor.u32 %v1732_v15, %v1728_v27  ;;  %v1750_v38 = vshll.u32 %v3031_v61, 16  ;;  %v1754_v5 = vshrl.u32 %v3031_v61, 16 }
  0x5f   : > { %v3080_v13 = vcombine.low %v1705_v54, %v1715_v3  ;;  %3312 = vmatprep.mubr.msk.bf16.mxu1 %vm734_vm0, %v2912_v18  ;;  %v1724_v44 = vrot.slane %v1723_v8, 4  ;;  %v1743_v37 = vrot.slane %v1741_v23, 4  ;;  %v1746_v2 = vrot.slane %v1744_v57, 5  ;;  %v3036_v54 = vld [vmem:[%s3645_s8 + $0x3c] sm:$0xf] }
  0x60   : > { %v1734_v36 = vrot.slane %v1733_v26, 4  ;;  %v1752_v46 = vrot.slane %v1750_v38, 5  ;;  %v1756_v52 = vrot.slane %v1754_v5, 4  ;;  %v1760_v41 = vshll.u32 %v3032_v34, 16  ;;  %v3037_v23 = vld [vmem:[%s3645_s8 + $0x40] sm:$0xf] }
  0x61   : > { %3392 = vmatprep.mubr.msk.bf16.mxu0 %vm734_vm0, %v3080_v13  ;;  %v1729_v51 = vsel %vm3671_vm3, %v1724_v44, %v1728_v27  ;;  %v1747_v14 = vor.u32 %v1746_v2, %v1743_v37  ;;  %v1765_v9 = vshrl.u32 %v3033_v35, 16  ;;  %v1768_v10 = vshll.u32 %v3033_v35, 16  ;;  %v3038_v5 = vld [vmem:[%s3645_s8 + $0x44] sm:$0x1] }
  0x62   : > { %v1739_v18 = vsel %vm3671_vm3, %v1734_v36, %v1738_v63  ;;  %v1757_v39 = vor.u32 %v1756_v52, %v1752_v46  ;;  %v1762_v61 = vrot.slane %v1760_v41, 5  ;;  %v1774_v7 = vshll.u32 %v3034_v43, 16  ;;  %v3039_v36 = vld [vmem:[%s3645_s8 + $0x48] sm:$0xf] }
  0x63   : > { %v3081_v62 = vcombine.low %v1729_v51, %v1739_v18  ;;  %v1748_v15 = vrot.slane %v1747_v14, 4  ;;  %v1767_v8 = vrot.slane %v1765_v9, 4  ;;  %v1770_v34 = vrot.slane %v1768_v10, 5 }
  0x64   : > { %v1758_v57 = vrot.slane %v1757_v39, 4  ;;  %v1776_v27 = vrot.slane %v1774_v7, 5  ;;  %v1778_v3 = vshrl.u32 %v3034_v43, 16  ;;  %v1784_v26 = vshll.u32 %v3035_v56, 16  ;;  %v3041_v39 = vld [vmem:[%s3645_s8 + $0x50] sm:$0x1] }
  0x65   : > { %3393 = vmatmul.mubr.msk.bf16.vlgmr.msra.gmra.mrb[0].mxu0 %vm734_vm0, %v3081_v62  ;;  %v1753_v63 = vsel %vm3671_vm3, %v1748_v15, %v1752_v46  ;;  %v1771_v38 = vor.u32 %v1770_v34, %v1767_v8  ;;  %v1789_v35 = vshrl.u32 %v3036_v54, 16  ;;  %v1792_v13 = vshll.u32 %v3036_v54, 16 }
  0x66   : > { %3313 = vmatmul.mubr.msk.bf16.vlgmr.msra.gmra.mrb[0].mxu1 %vm734_vm0, %v2913_v40  ;;  %v1763_v44 = vsel %vm3671_vm3, %v1758_v57, %v1762_v61  ;;  %v1780_v37 = vrot.slane %v1778_v3, 4  ;;  %v1786_v2 = vrot.slane %v1784_v26, 5  ;;  %v1798_v43 = vshll.u32 %v3037_v23, 16  ;;  %v3042_v57 = vld [vmem:[%s3645_s8 + $0x54] sm:$0xf] }
  0x67   : > { %v3082_v52 = vcombine.low %v1753_v63, %v1763_v44  ;;  %v4356_v46 = vcombine.low %v3697_v45, %v3703_v49  ;;  %v1772_v41 = vrot.slane %v1771_v38, 4  ;;  %v1791_v51 = vrot.slane %v1789_v35, 4  ;;  %v3043_v38 = vld [vmem:[%s3645_s8 + $0x58] sm:$0xf] }
  0x68   : > { %v1794_v14 = vrot.slane %v1792_v13, 5  ;;  %v1781_v30 = vor.u32 %v1780_v37, %v1776_v27  ;;  %v1800_v40 = vrot.slane %v1798_v43, 5  ;;  %v1802_v56 = vshrl.u32 %v3037_v23, 16  ;;  %v3044_v37 = vld [vmem:[%s3645_s8 + $0x5c] sm:$0x1] }
  0x69   : > { %3316 = vmatprep.mubr.msk.bf16.mxu1 %vm734_vm0, %v4356_v46  ;;  %v1808_v9 = vshll.u32 %v3038_v5, 16  ;;  %3396 = vmatprep.mubr.msk.bf16.mxu0 %vm734_vm0, %v3082_v52  ;;  %v1777_v10 = vsel %vm3671_vm3, %v1772_v41, %v1776_v27  ;;  %v1813_v45 = vshrl.u32 %v3039_v36, 16  ;;  %v1816_v49 = vshll.u32 %v3039_v36, 16 }
  0x6a   : > { %v1795_v18 = vor.u32 %v1794_v14, %v1791_v51  ;;  %v1782_v61 = vrot.slane %v1781_v30, 4  ;;  %v1804_v7 = vrot.slane %v1802_v56, 4  ;;  %v1822_v62 = vshll.u32 %v3040_v29, 16 }
  0x6b   : > { %v1810_v54 = vrot.slane %v1808_v9, 5  ;;  %v1815_v8 = vrot.slane %v1813_v45, 4  ;;  %v1818_v34 = vrot.slane %v1816_v49, 5  ;;  %v1826_v23 = vshrl.u32 %v3040_v29, 16 }
  0x6c   : > { %v1796_v15 = vrot.slane %v1795_v18, 4  ;;  %v1787_v3 = vsel %vm3671_vm3, %v1782_v61, %v1786_v2  ;;  %v1805_v26 = vor.u32 %v1804_v7, %v1800_v40  ;;  %v1824_v27 = vrot.slane %v1822_v62, 5  ;;  %v3047_v7 = vld [vmem:[%s3645_s8 + $0x68] sm:$0x1] }
  0x6d   : > { %v1832_v63 = vshll.u32 %v3041_v39, 16  ;;  %v3083_v5 = vcombine.low %v1777_v10, %v1787_v3  ;;  %v1819_v13 = vor.u32 %v1818_v34, %v1815_v8  ;;  %v1828_v44 = vrot.slane %v1826_v23, 4  ;;  %v3046_v10 = vld [vmem:[%s3645_s8 + $0x64] sm:$0xf]  ;;  %v3048_v23 = vld [vmem:[%s3645_s8 + $0x6c] sm:$0xf] }
  0x6e   : > { %v1801_v35 = vsel %vm3671_vm3, %v1796_v15, %v1800_v40  ;;  %v4357_v43 = vcombine.low %v3713_v60, %v3717_v0  ;;  %v1806_v36 = vrot.slane %v1805_v26, 4  ;;  %v1837_v52 = vshrl.u32 %v3042_v57, 16  ;;  %v3045_v60 = vld [vmem:[%s3645_s8 + $0x60] sm:$0xf] }
  0x6f   : > { %v1834_v2 = vrot.slane %v1832_v63, 5  ;;  %v1840_v46 = vshll.u32 %v3042_v57, 16  ;;  %3397 = vmatmul.mubr.msk.bf16.gmra.mrb[4].mxu0 %vm734_vm0, %v3083_v5  ;;  %v4358_v41 = vcombine.low %v3730_v20, %v3733_v22  ;;  %v1820_v51 = vrot.slane %v1819_v13, 4  ;;  %v3049_v63 = vld [vmem:[%s3645_s8 + $0x70] sm:$0xf] }
  0x70   : > { %3317 = vmatmul.mubr.msk.bf16.gmra.mrb[4].mxu1 %vm734_vm0, %v4357_v43  ;;  %v1829_v14 = vor.u32 %v1828_v44, %v1824_v27  ;;  %v1846_v29 = vshll.u32 %v3043_v38, 16  ;;  %v1850_v30 = vshrl.u32 %v3043_v38, 16  ;;  %v1811_v0 = vsel %vm3671_vm3, %v1806_v36, %v1810_v54 }
  0x71   : > { %3320 = vmatprep.mubr.msk.bf16.mxu1 %vm734_vm0, %v4358_v41  ;;  %v1839_v40 = vrot.slane %v1837_v52, 4  ;;  %v1842_v56 = vrot.slane %v1840_v46, 5  ;;  %v1856_v9 = vshll.u32 %v3044_v37, 16  ;;  %v3084_v18 = vcombine.low %v1801_v35, %v1811_v0  ;;  %v3051_v0 = vld [vmem:[%s3645_s8 + $0x78] sm:$0xf] }
  0x72   : > { %v1825_v20 = vsel %vm3671_vm3, %v1820_v51, %v1824_v27  ;;  %v1830_v22 = vrot.slane %v1829_v14, 4  ;;  %v1848_v39 = vrot.slane %v1846_v29, 5  ;;  %v1852_v49 = vrot.slane %v1850_v30, 4 }
  0x73   : > { %v1843_v45 = vor.u32 %v1842_v56, %v1839_v40  ;;  %v1858_v61 = vrot.slane %v1856_v9, 5  ;;  %v1861_v62 = vshrl.u32 %v3045_v60, 16  ;;  %3400 = vmatprep.mubr.msk.bf16.mxu0 %vm734_vm0, %v3084_v18  ;;  %v1864_v15 = vshll.u32 %v3045_v60, 16 }
  0x74   : > { %v1835_v54 = vsel %vm3671_vm3, %v1830_v22, %v1834_v2  ;;  %v1870_v8 = vshll.u32 %v3046_v10, 16  ;;  %v1874_v34 = vshrl.u32 %v3046_v10, 16  ;;  %v1853_v26 = vor.u32 %v1852_v49, %v1848_v39  ;;  %v3052_v22 = vld [vmem:[%s3645_s8 + $0x7c] sm:$0xf]  ;;  %v3053_v49 = vld [vmem:[%s3645_s8 + $0x80] sm:$0x1] }
  0x75   : > { %v3085_v57 = vcombine.low %v1825_v20, %v1835_v54  ;;  %v1844_v3 = vrot.slane %v1843_v45, 4  ;;  %v1863_v27 = vrot.slane %v1861_v62, 4  ;;  %v1866_v38 = vrot.slane %v1864_v15, 5 }
  0x76   : > { %v1872_v5 = vrot.slane %v1870_v8, 5  ;;  %v1876_v35 = vrot.slane %v1874_v34, 4  ;;  %v1880_v13 = vshll.u32 %v3047_v7, 16  ;;  %v4359_v44 = vcombine.low %v3761_v58, %v3764_v59  ;;  %v3050_v58 = vld [vmem:[%s3645_s8 + $0x74] sm:$0x1] }
  0x77   : > { %v1849_v37 = vsel %vm3671_vm3, %v1844_v3, %v1848_v39  ;;  %v1854_v43 = vrot.slane %v1853_v26, 4  ;;  %v1885_v36 = vshrl.u32 %v3048_v23, 16  ;;  %v1888_v2 = vshll.u32 %v3048_v23, 16  ;;  %3401 = vmatmul.mubr.msk.bf16.gmra.mrb[8].mxu0 %vm734_vm0, %v3085_v57  ;;  %v3054_v34 = vld [vmem:[%s3645_s8 + $0x84] sm:$0xf] }
  0x78   : > { %3321 = vmatmul.mubr.msk.bf16.gmra.mrb[8].mxu1 %vm734_vm0, %v4359_v44  ;;  %v4360_v52 = vcombine.low %v3781_v16, %v3788_v25  ;;  %v1867_v46 = vor.u32 %v1866_v38, %v1863_v27  ;;  %v1877_v41 = vor.u32 %v1876_v35, %v1872_v5  ;;  %v1882_v51 = vrot.slane %v1880_v13, 5  ;;  %v3055_v3 = vld [vmem:[%s3645_s8 + $0x88] sm:$0xf] }
  0x79   : > { %v1894_v59 = vshll.u32 %v3049_v63, 16  ;;  %v1859_v14 = vsel %vm3671_vm3, %v1854_v43, %v1858_v61  ;;  %v1887_v29 = vrot.slane %v1885_v36, 4  ;;  %v1890_v30 = vrot.slane %v1888_v2, 5 }
  0x7a   : > { %3324 = vmatprep.mubr.msk.bf16.mxu1 %vm734_vm0, %v4360_v52  ;;  %v1898_v60 = vshrl.u32 %v3049_v63, 16  ;;  %v3086_v40 = vcombine.low %v1849_v37, %v1859_v14  ;;  %v1868_v56 = vrot.slane %v1867_v46, 4  ;;  %v1878_v9 = vrot.slane %v1877_v41, 4  ;;  %v3057_v52 = vld [vmem:[%s3645_s8 + $0x90] sm:$0xf] }
  0x7b   : > { %v1896_v16 = vrot.slane %v1894_v59, 5  ;;  %v1891_v25 = vor.u32 %v1890_v30, %v1887_v29  ;;  %v1904_v18 = vshll.u32 %v3050_v58, 16  ;;  %v2920_v20 = vcombine.low %v3818_v4, %v3825_v11  ;;  %v3058_v29 = vld [vmem:[%s3645_s8 + $0x94] sm:$0xf] }
  0x7c   : > { %v1900_v10 = vrot.slane %v1898_v60, 4  ;;  %3404 = vmatprep.mubr.msk.bf16.mxu0 %vm734_vm0, %v3086_v40  ;;  %v1873_v39 = vsel %vm3671_vm3, %v1868_v56, %v1872_v5  ;;  %v1883_v45 = vsel %vm3671_vm3, %v1878_v9, %v1882_v51  ;;  %v1909_v61 = vshrl.u32 %v3051_v0, 16 }
  0x7d   : > { %v1912_v7 = vshll.u32 %v3051_v0, 16  ;;  %v3087_v62 = vcombine.low %v1873_v39, %v1883_v45  ;;  %v1892_v54 = vrot.slane %v1891_v25, 4  ;;  %v1906_v8 = vrot.slane %v1904_v18, 5  ;;  %v3059_v25 = vld [vmem:[%s3645_s8 + $0x98] sm:$0x1] }
  0x7e   : > { %v1901_v15 = vor.u32 %v1900_v10, %v1896_v16  ;;  %v1911_v4 = vrot.slane %v1909_v61, 4  ;;  %v1918_v23 = vshll.u32 %v3052_v22, 16  ;;  %v1922_v57 = vshrl.u32 %v3052_v22, 16  ;;  %v3060_v45 = vld [vmem:[%s3645_s8 + $0x9c] sm:$0xf] }
  0x7f   : > { %v1914_v11 = vrot.slane %v1912_v7, 5  ;;  %v4361_v26 = vcombine.low %v3805_v47, %v3808_v48  ;;  %v1897_v27 = vsel %vm3671_vm3, %v1892_v54, %v1896_v16  ;;  %v1928_v38 = vshll.u32 %v3053_v49, 16  ;;  %3405 = vmatmul.mubr.msk.bf16.gmra.mrb[12].mxu0 %vm734_vm0, %v3087_v62  ;;  %v3056_v47 = vld [vmem:[%s3645_s8 + $0x8c] sm:$0x1]  ;;  %v3061_v7 = vld [vmem:[%s3645_s8 + $0xa0] sm:$0xf] }
  0x80   : > { %v1902_v63 = vrot.slane %v1901_v15, 4  ;;  %v2921_v5 = vcombine.low %v3847_v53, %v3850_v55  ;;  %v1920_v13 = vrot.slane %v1918_v23, 5  ;;  %v1924_v44 = vrot.slane %v1922_v57, 4 }
  0x81   : > { %3325 = vmatmul.mubr.msk.bf16.gmra.mrb[12].mxu1 %vm734_vm0, %v4361_v26  ;;  %v1915_v35 = vor.u32 %v1914_v11, %v1911_v4  ;;  %v1933_v48 = vshrl.u32 %v3054_v34, 16  ;;  %v1930_v43 = vrot.slane %v1928_v38, 5  ;;  %v1936_v36 = vshll.u32 %v3054_v34, 16  ;;  %v3062_v26 = vld [vmem:[%s3645_s8 + $0xa4] sm:$0x1] }
  0x82   : > { %3328 = vmatprep.mubr.msk.bf16.mxu1 %vm734_vm0, %v2920_v20  ;;  %v1907_v37 = vsel %vm3671_vm3, %v1902_v63, %v1906_v8  ;;  %v1942_v2 = vshll.u32 %v3055_v3, 16  ;;  %v1925_v53 = vor.u32 %v1924_v44, %v1920_v13  ;;  %v1946_v59 = vshrl.u32 %v3055_v3, 16 }
  0x83   : > { %v3088_v46 = vcombine.low %v1897_v27, %v1907_v37  ;;  %v1916_v41 = vrot.slane %v1915_v35, 4  ;;  %v1935_v55 = vrot.slane %v1933_v48, 4  ;;  %v1938_v51 = vrot.slane %v1936_v36, 5  ;;  %v3063_v35 = vld [vmem:[%s3645_s8 + $0xa8] sm:$0xf] }
  0x84   : > { %v1944_v58 = vrot.slane %v1942_v2, 5  ;;  %v1952_v14 = vshll.u32 %v3056_v47, 16  ;;  %v1926_v60 = vrot.slane %v1925_v53, 4  ;;  %v2922_v0 = vcombine.low %v3867_v19, %v3870_v31  ;;  %v3064_v37 = vld [vmem:[%s3645_s8 + $0xac] sm:$0xf] }
  0x85   : > { %3408 = vmatprep.mubr.msk.bf16.mxu0 %vm734_vm0, %v3088_v46  ;;  %v1921_v30 = vsel %vm3671_vm3, %v1916_v41, %v1920_v13  ;;  %v1957_v40 = vshrl.u32 %v3057_v52, 16  ;;  %v1939_v56 = vor.u32 %v1938_v51, %v1935_v55  ;;  %v1948_v9 = vrot.slane %v1946_v59, 4  ;;  %v3065_v53 = vld [vmem:[%s3645_s8 + $0xb0] sm:$0x1] }
  0x86   : > { %v1954_v16 = vrot.slane %v1952_v14, 5  ;;  %v1960_v10 = vshll.u32 %v3057_v52, 16  ;;  %v1931_v18 = vsel %vm3671_vm3, %v1926_v60, %v1930_v43  ;;  %v1966_v22 = vshll.u32 %v3058_v29, 16 }
  0x87   : > { %v1959_v20 = vrot.slane %v1957_v40, 4  ;;  %v1970_v39 = vshrl.u32 %v3058_v29, 16  ;;  %v3089_v49 = vcombine.low %v1921_v30, %v1931_v18  ;;  %v1940_v61 = vrot.slane %v1939_v56, 4  ;;  %v3066_v30 = vld [vmem:[%s3645_s8 + $0xb4] sm:$0xf] }
  0x88   : > { %v1949_v19 = vor.u32 %v1948_v9, %v1944_v58  ;;  %v1962_v31 = vrot.slane %v1960_v10, 5  ;;  %v1968_v62 = vrot.slane %v1966_v22, 5  ;;  %v1976_v15 = vshll.u32 %v3059_v25, 16  ;;  %v3067_v40 = vld [vmem:[%s3645_s8 + $0xb8] sm:$0xf] }
  0x89   : > { %3329 = vmatmul.mubr.msk.bf16.gmra.mrb[16].mxu1 %vm734_vm0, %v2921_v5  ;;  %v1972_v54 = vrot.slane %v1970_v39, 4  ;;  %v2923_v8 = vcombine.low %v3884_v17, %v3888_v1  ;;  %3409 = vmatmul.mubr.msk.bf16.gmra.mrb[16].mxu0 %vm734_vm0, %v3089_v49  ;;  %v1945_v34 = vsel %vm3671_vm3, %v1940_v61, %v1944_v58  ;;  %v1981_v23 = vshrl.u32 %v3060_v45, 16  ;;  %v3068_v22 = vld [vmem:[%s3645_s8 + $0xbc] sm:$0x1] }
  0x8a   : > { %3332 = vmatprep.mubr.msk.bf16.mxu1 %vm734_vm0, %v2922_v0  ;;  %v1950_v4 = vrot.slane %v1949_v19, 4  ;;  %v1963_v11 = vor.u32 %v1962_v31, %v1959_v20  ;;  %v1978_v3 = vrot.slane %v1976_v15, 5  ;;  %v1984_v27 = vshll.u32 %v3060_v45, 16  ;;  %v3069_v31 = vld [vmem:[%s3645_s8 + $0xc0] sm:$0xf] }
  0x8b   : > { %v1973_v57 = vor.u32 %v1972_v54, %v1968_v62  ;;  %v1990_v63 = vshll.u32 %v3061_v7, 16  ;;  %v1983_v17 = vrot.slane %v1981_v23, 4  ;;  %v1994_v1 = vshrl.u32 %v3061_v7, 16 }
  0x8c   : > { %v1955_v38 = vsel %vm3671_vm3, %v1950_v4, %v1954_v16  ;;  %v1964_v5 = vrot.slane %v1963_v11, 4  ;;  %v1986_v47 = vrot.slane %v1984_v27, 5  ;;  %v2000_v2 = vshll.u32 %v3062_v26, 16  ;;  %v3070_v4 = vld [vmem:[%s3645_s8 + $0xc4] sm:$0xf] }
  0x8d   : > { %v3090_v13 = vcombine.low %v1945_v34, %v1955_v38  ;;  %v1974_v44 = vrot.slane %v1973_v57, 4  ;;  %v1992_v48 = vrot.slane %v1990_v63, 5  ;;  %v1996_v36 = vrot.slane %v1994_v1, 4  ;;  %v3071_v38 = vld [vmem:[%s3645_s8 + $0xc8] sm:$0x1]  ;;  %s4181_s8 = scalar_lea.vmem %s4352_s3, %s3151_s5 }
  0x8e   : > { %v1969_v43 = vsel %vm3671_vm3, %v1964_v5, %v1968_v62  ;;  %v2924_v52 = vcombine.low %v3902_v32, %v3905_v24  ;;  %v1987_v41 = vor.u32 %v1986_v47, %v1983_v17  ;;  %v2005_v55 = vshrl.u32 %v3063_v35, 16 }
  0x8f   : > { %3412 = vmatprep.mubr.msk.bf16.mxu0 %vm734_vm0, %v3090_v13  ;;  %v1979_v46 = vsel %vm3671_vm3, %v1974_v44, %v1978_v3  ;;  %v2008_v51 = vshll.u32 %v3063_v35, 16  ;;  %v1997_v59 = vor.u32 %v1996_v36, %v1992_v48  ;;  %v2002_v14 = vrot.slane %v2000_v2, 5 }
  0x90   : > { %v3091_v58 = vcombine.low %v1969_v43, %v1979_v46  ;;  %v2014_v29 = vshll.u32 %v3064_v37, 16  ;;  %v1988_v60 = vrot.slane %v1987_v41, 4  ;;  %v2007_v32 = vrot.slane %v2005_v55, 4 }
  0x91   : > { %3333 = vmatmul.mubr.msk.bf16.gmra.mrb[20].mxu1 %vm734_vm0, %v2923_v8  ;;  %v2010_v24 = vrot.slane %v2008_v51, 5  ;;  %v2018_v0 = vshrl.u32 %v3064_v37, 16  ;;  %v1998_v56 = vrot.slane %v1997_v59, 4  ;;  %v2024_v16 = vshll.u32 %v3065_v53, 16 }
  0x92   : > { %3336 = vmatprep.mubr.msk.bf16.mxu1 %vm734_vm0, %v2924_v52  ;;  %3413 = vmatmul.mubr.msk.bf16.gmra.mrb[20].mxu0 %vm734_vm0, %v3091_v58  ;;  %v2016_v9 = vrot.slane %v2014_v29, 5  ;;  %v2925_v25 = vcombine.low %v3927_v28, %v3930_v33  ;;  %v1993_v10 = vsel %vm3671_vm3, %v1988_v60, %v1992_v48  ;;  %v2029_v39 = vshrl.u32 %v3066_v30, 16  ;;  %v4174_v60 = vld [vmem:[%s4351_s2] ss:$0 sm:$0xff] }
  0x93   : > { %v2011_v18 = vor.u32 %v2010_v24, %v2007_v32  ;;  %v2020_v20 = vrot.slane %v2018_v0, 4  ;;  %v2003_v45 = vsel %vm3671_vm3, %v1998_v56, %v2002_v14  ;;  %v2026_v49 = vrot.slane %v2024_v16, 5 }
  0x94   : > { %v2032_v61 = vshll.u32 %v3066_v30, 16  ;;  %v2038_v19 = vshll.u32 %v3067_v40, 16  ;;  %v3092_v7 = vcombine.low %v1993_v10, %v2003_v45  ;;  %v2031_v28 = vrot.slane %v2029_v39, 4 }
  0x95   : > { %v2012_v62 = vrot.slane %v2011_v18, 4  ;;  %v2021_v54 = vor.u32 %v2020_v20, %v2016_v9  ;;  %v2042_v8 = vshrl.u32 %v3067_v40, 16  ;;  %v2048_v34 = vshll.u32 %v3068_v22, 16 }
  0x96   : > { %v2034_v33 = vrot.slane %v2032_v61, 5  ;;  %v2040_v15 = vrot.slane %v2038_v19, 5  ;;  %3416 = vmatprep.mubr.msk.bf16.mxu0 %vm734_vm0, %v3092_v7  ;;  %v2926_v57 = vcombine.low %v3945_v6, %v3952_v12  ;;  %v2053_v3 = vshrl.u32 %v3069_v31, 16 }
  0x97   : > { %v2017_v11 = vsel %vm3671_vm3, %v2012_v62, %v2016_v9  ;;  %v2022_v23 = vrot.slane %v2021_v54, 4  ;;  %v2044_v27 = vrot.slane %v2042_v8, 4  ;;  %v2050_v63 = vrot.slane %v2048_v34, 5 }
  0x98   : > { %v2035_v26 = vor.u32 %v2034_v33, %v2031_v28  ;;  %v2056_v5 = vshll.u32 %v3069_v31, 16  ;;  %v2055_v1 = vrot.slane %v2053_v3, 4  ;;  %v2062_v35 = vshll.u32 %v3070_v4, 16 }
  0x99   : > { %3337 = vmatmul.mubr.msk.bf16.gmra.mrb[24].mxu1 %vm734_vm0, %v2925_v25  ;;  %v2027_v17 = vsel %vm3671_vm3, %v2022_v23, %v2026_v49  ;;  %v2066_v13 = vshrl.u32 %v3070_v4, 16  ;;  %v2045_v48 = vor.u32 %v2044_v27, %v2040_v15  ;;  %v2072_v43 = vshll.u32 %v3071_v38, 16 }
  0x9a   : > { %3340 = vmatprep.mubr.msk.bf16.mxu1 %vm734_vm0, %v2926_v57  ;;  %v3093_v44 = vcombine.low %v2017_v11, %v2027_v17  ;;  %v2036_v47 = vrot.slane %v2035_v26, 4  ;;  %v2058_v6 = vrot.slane %v2056_v5, 5  ;;  %v2064_v12 = vrot.slane %v2062_v35, 5 }
  0x9b   : > { %v2068_v37 = vrot.slane %v2066_v13, 4  ;;  %v2046_v2 = vrot.slane %v2045_v48, 4  ;;  %v2927_v46 = vcombine.low %v3960_v42, %v3965_v50  ;;  %v2074_v53 = vrot.slane %v2072_v43, 5 }
  0x9c   : > { %3417 = vmatmul.mubr.msk.bf16.gmra.mrb[24].mxu0 %vm734_vm0, %v3093_v44  ;;  %v2041_v36 = vsel %vm3671_vm3, %v2036_v47, %v2040_v15  ;;  %v2059_v52 = vor.u32 %v2058_v6, %v2055_v1 }
  0x9d   : > { %v2069_v41 = vor.u32 %v2068_v37, %v2064_v12  ;;  %v2051_v55 = vsel %vm3671_vm3, %v2046_v2, %v2050_v63 }
  0x9e   : > { %v2060_v51 = vrot.slane %v2059_v52, 4  ;;  %v3094_v58 = vcombine.low %v2041_v36, %v2051_v55 }
  0x9f   : > { %v2070_v59 = vrot.slane %v2069_v41, 4 }
  0xa0   : > { %v2065_v14 = vsel %vm3671_vm3, %v2060_v51, %v2064_v12  ;;  %3420 = vmatprep.mubr.msk.bf16.mxu0 %vm734_vm0, %v3094_v58 }
  0xa1   : > { %3341 = vmatmul.mubr.msk.bf16.gmra.mrb[28].mxu1 %vm734_vm0, %v2927_v46  ;;  %v2075_v29 = vsel %vm3671_vm3, %v2070_v59, %v2074_v53 }
  0xa2   : > { %v3095_v42 = vcombine.low %v2065_v14, %v2075_v29 }
  0xa4   : > { %3421 = vmatmul.mubr.msk.bf16.gmra.mrb[28].mxu0 %vm734_vm0, %v3095_v42 }
 0x138   : > { %v3394_v50 = vpop.f32.mrb[0].mxu0 }
 0x139   : > { %v3314_v30 = vpop.f32.mrb[0].mxu1  ;;  %v2239_v32 = vpop.f32.mrb[1].mxu0 }
 0x13a   : > { %v3424_v24 = vadd.f32 %v3394_v50, %v3314_v30  ;;  %v1130_v0 = vpop.f32.mrb[1].mxu1  ;;  %v3395_v40 = vpop.f32.mrb[2].mxu0 }
 0x13b   : > { %v3425_v56 = vadd.f32 %v2239_v32, %v1130_v0  ;;  %v3315_v9 = vpop.f32.mrb[2].mxu1  ;;  %v2242_v16 = vpop.f32.mrb[3].mxu0 }
 0x13c   : > { %v2407_v21 = vadd.f32 %v3424_v24, %v4174_v60  ;;  %v3426_v25 = vadd.f32 %v3395_v40, %v3315_v9  ;;  %v1133_v10 = vpop.f32.mrb[3].mxu1 }
 0x13d   : > { %v2405_v18 = vadd.f32 %v3425_v56, %v4174_v60  ;;  %v3427_v20 = vadd.f32 %v2242_v16, %v1133_v10 }
 0x13e   : > { %v3154_v22 = vpack.c.bf16 %v2407_v21, %v2407_v21  ;;  %v2408_v39 = vadd.f32 %v3426_v25, %v4174_v60  ;;  %v2670_v19 = vmul.f32 %v2407_v21, %v2407_v21  ;;  %v2602_v15 = vsel %vm2598_vm5, %v2407_v21, 0.0 }
 0x13f   : > { %v3152_v45 = vpack.c.bf16 %v2405_v18, %v2405_v18  ;;  %v2668_v49 = vmul.f32 %v2405_v18, %v2405_v18  ;;  %v2406_v61 = vadd.f32 %v3427_v20, %v4174_v60  ;;  %v2599_v7 = vsel %vm2598_vm5, %v2405_v18, 0.0 }
 0x140   : > { %2568 = vst.msk [vmem:[%s4181_s8 + $0x8] sm:$0xf] %vm2565_vm4, %v3154_v22  ;;  %v3155_v31 = vpack.c.bf16 %v2408_v39, %v2408_v39  ;;  %v2671_v23 = vmul.f32 %v2408_v39, %v2408_v39  ;;  %v2703_v35 = vsel %vm2598_vm5, %v2670_v19, 0.0  ;;  %v2604_v13 = vsel %vm2598_vm5, %v2408_v39, 0.0 }
 0x141   : > { %2566 = vst.msk [vmem:[%s4181_s8] sm:$0xf] %vm2565_vm4, %v3152_v45  ;;  %v3153_v62 = vpack.c.bf16 %v2406_v61, %v2406_v61  ;;  %v2600_v54 = vsel %vm2598_vm5, %v2406_v61, 0.0  ;;  %v2669_v28 = vmul.f32 %v2406_v61, %v2406_v61  ;;  %v2700_v11 = vsel %vm2598_vm5, %v2668_v49, 0.0 }
 0x142   : > { %2569 = vst.msk [vmem:[%s4181_s8 + $0xc] sm:$0xf] %vm2565_vm4, %v3155_v31  ;;  %v2601_v8 = vadd.f32 %v2600_v54, %v2599_v7  ;;  %v3398_v34 = vpop.f32.mrb[4].mxu0  ;;  %v2705_v36 = vsel %vm2598_vm5, %v2671_v23, 0.0 }
 0x143   : > { %v3318_v33 = vpop.f32.mrb[4].mxu1  ;;  %2567 = vst.msk [vmem:[%s4181_s8 + $0x4] sm:$0xf] %vm2565_vm4, %v3153_v62  ;;  %v2701_v57 = vsel %vm2598_vm5, %v2669_v28, 0.0  ;;  %v2255_v26 = vpop.f32.mrb[5].mxu0 }
 0x144   : > { %v1146_v4 = vpop.f32.mrb[5].mxu1  ;;  %v3428_v3 = vadd.f32 %v3398_v34, %v3318_v33  ;;  %v2603_v63 = vadd.f32 %v2602_v15, %v2601_v8  ;;  %v2702_v38 = vadd.f32 %v2701_v57, %v2700_v11  ;;  %v3399_v17 = vpop.f32.mrb[6].mxu0 }
 0x145   : > { %v3319_v27 = vpop.f32.mrb[6].mxu1  ;;  %v3429_v5 = vadd.f32 %v2255_v26, %v1146_v4  ;;  %v2258_v48 = vpop.f32.mrb[7].mxu0 }
 0x146   : > { %v1149_v1 = vpop.f32.mrb[7].mxu1  ;;  %v2411_v44 = vadd.f32 %v3428_v3, %v4174_v60  ;;  %v3430_v47 = vadd.f32 %v3399_v17, %v3319_v27  ;;  %v2704_v6 = vadd.f32 %v2703_v35, %v2702_v38  ;;  %v2605_v37 = vadd.f32 %v2604_v13, %v2603_v63 }
 0x147   : > { %v2409_v12 = vadd.f32 %v3429_v5, %v4174_v60  ;;  %v3431_v43 = vadd.f32 %v2258_v48, %v1149_v1 }
 0x148   : > { %v3158_v2 = vpack.c.bf16 %v2411_v44, %v2411_v44  ;;  %v2412_v52 = vadd.f32 %v3430_v47, %v4174_v60  ;;  %v2706_v55 = vadd.f32 %v2705_v36, %v2704_v6  ;;  %v2674_v30 = vmul.f32 %v2411_v44, %v2411_v44 }
 0x149   : > { %v3156_v46 = vpack.c.bf16 %v2409_v12, %v2409_v12  ;;  %v2606_v41 = vsel %vm2598_vm5, %v2409_v12, 0.0  ;;  %v2672_v53 = vmul.f32 %v2409_v12, %v2409_v12  ;;  %v2410_v29 = vadd.f32 %v3431_v43, %v4174_v60 }
 0x14a   : > { %2572 = vst.msk [vmem:[%s4181_s8 + $0x18] sm:$0xf] %vm2565_vm4, %v3158_v2  ;;  %v2607_v51 = vadd.f32 %v2606_v41, %v2605_v37  ;;  %v3159_v58 = vpack.c.bf16 %v2412_v52, %v2412_v52  ;;  %v3402_v42 = vpop.f32.mrb[8].mxu0  ;;  %v2610_v45 = vsel %vm2598_vm5, %v2411_v44, 0.0  ;;  %v2675_v49 = vmul.f32 %v2412_v52, %v2412_v52 }
 0x14b   : > { %v3322_v59 = vpop.f32.mrb[8].mxu1  ;;  %2570 = vst.msk [vmem:[%s4181_s8 + $0x10] sm:$0xf] %vm2565_vm4, %v3156_v46  ;;  %v2707_v14 = vsel %vm2598_vm5, %v2672_v53, 0.0  ;;  %v2271_v0 = vpop.f32.mrb[9].mxu0  ;;  %v3157_v56 = vpack.c.bf16 %v2410_v29, %v2410_v29  ;;  %v2608_v9 = vsel %vm2598_vm5, %v2410_v29, 0.0  ;;  %v2673_v16 = vmul.f32 %v2410_v29, %v2410_v29 }
 0x14c   : > { %v1162_v50 = vpop.f32.mrb[9].mxu1  ;;  %v2708_v32 = vadd.f32 %v2707_v14, %v2706_v55  ;;  %2573 = vst.msk [vmem:[%s4181_s8 + $0x1c] sm:$0xf] %vm2565_vm4, %v3159_v58  ;;  %v3432_v24 = vadd.f32 %v3402_v42, %v3322_v59  ;;  %v3403_v21 = vpop.f32.mrb[10].mxu0  ;;  %v2609_v10 = vadd.f32 %v2608_v9, %v2607_v51  ;;  %v2711_v31 = vsel %vm2598_vm5, %v2674_v30, 0.0 }
 0x14d   : > { %v3323_v40 = vpop.f32.mrb[10].mxu1  ;;  %v3433_v20 = vadd.f32 %v2271_v0, %v1162_v50  ;;  %v2274_v39 = vpop.f32.mrb[11].mxu0  ;;  %2571 = vst.msk [vmem:[%s4181_s8 + $0x14] sm:$0xf] %vm2565_vm4, %v3157_v56  ;;  %v2709_v61 = vsel %vm2598_vm5, %v2673_v16, 0.0  ;;  %v2612_v28 = vsel %vm2598_vm5, %v2412_v52, 0.0 }
 0x14e   : > { %v1165_v25 = vpop.f32.mrb[11].mxu1  ;;  %v2415_v18 = vadd.f32 %v3432_v24, %v4174_v60  ;;  %v3434_v22 = vadd.f32 %v3403_v21, %v3323_v40  ;;  %v2611_v7 = vadd.f32 %v2610_v45, %v2609_v10  ;;  %v2710_v62 = vadd.f32 %v2709_v61, %v2708_v32 }
 0x14f   : > { %v3435_v19 = vadd.f32 %v2274_v39, %v1165_v25  ;;  %v2413_v33 = vadd.f32 %v3433_v20, %v4174_v60  ;;  %v2713_v23 = vsel %vm2598_vm5, %v2675_v49, 0.0 }
 0x150   : > { %v3162_v54 = vpack.c.bf16 %v2415_v18, %v2415_v18  ;;  %v2416_v15 = vadd.f32 %v3434_v22, %v4174_v60  ;;  %v2712_v34 = vadd.f32 %v2711_v31, %v2710_v62  ;;  %v2613_v4 = vadd.f32 %v2612_v28, %v2611_v7 }
 0x151   : > { %v2414_v8 = vadd.f32 %v3435_v19, %v4174_v60  ;;  %v3160_v57 = vpack.c.bf16 %v2413_v33, %v2413_v33  ;;  %v2614_v3 = vsel %vm2598_vm5, %v2413_v33, 0.0  ;;  %v2676_v26 = vmul.f32 %v2413_v33, %v2413_v33 }
 0x152   : > { %2576 = vst.msk [vmem:[%s4181_s8 + $0x28] sm:$0xf] %vm2565_vm4, %v3162_v54  ;;  %v3406_v27 = vpop.f32.mrb[12].mxu0  ;;  %v2618_v38 = vsel %vm2598_vm5, %v2415_v18, 0.0  ;;  %v2615_v5 = vadd.f32 %v2614_v3, %v2613_v4  ;;  %v2714_v17 = vadd.f32 %v2713_v23, %v2712_v34  ;;  %v3163_v1 = vpack.c.bf16 %v2416_v15, %v2416_v15 }
 0x153   : > { %v2287_v35 = vpop.f32.mrb[13].mxu0  ;;  %v2678_v44 = vmul.f32 %v2415_v18, %v2415_v18  ;;  %2574 = vst.msk [vmem:[%s4181_s8 + $0x20] sm:$0xf] %vm2565_vm4, %v3160_v57  ;;  %v2715_v47 = vsel %vm2598_vm5, %v2676_v26, 0.0  ;;  %v3161_v48 = vpack.c.bf16 %v2414_v8, %v2414_v8  ;;  %v2616_v6 = vsel %vm2598_vm5, %v2414_v8, 0.0 }
 0x154   : > { %v3326_v11 = vpop.f32.mrb[12].mxu1  ;;  %v3407_v12 = vpop.f32.mrb[14].mxu0  ;;  %v2716_v43 = vadd.f32 %v2715_v47, %v2714_v17  ;;  %2577 = vst.msk [vmem:[%s4181_s8 + $0x2c] sm:$0xf] %vm2565_vm4, %v3163_v1  ;;  %v2617_v36 = vadd.f32 %v2616_v6, %v2615_v5  ;;  %v2677_v2 = vmul.f32 %v2414_v8, %v2414_v8  ;;  %v2620_v41 = vsel %vm2598_vm5, %v2416_v15, 0.0 }
 0x155   : > { %v1178_v63 = vpop.f32.mrb[13].mxu1  ;;  %v3436_v52 = vadd.f32 %v3406_v27, %v3326_v11  ;;  %v2290_v46 = vpop.f32.mrb[15].mxu0  ;;  %2575 = vst.msk [vmem:[%s4181_s8 + $0x24] sm:$0xf] %vm2565_vm4, %v3161_v48  ;;  %v2679_v58 = vmul.f32 %v2416_v15, %v2416_v15  ;;  %v2719_v24 = vsel %vm2598_vm5, %v2678_v44, 0.0 }
 0x156   : > { %v3327_v13 = vpop.f32.mrb[14].mxu1  ;;  %v3437_v53 = vadd.f32 %v2287_v35, %v1178_v63  ;;  %v2619_v59 = vadd.f32 %v2618_v38, %v2617_v36  ;;  %v2717_v14 = vsel %vm2598_vm5, %v2677_v2, 0.0 }
 0x157   : > { %v1181_v37 = vpop.f32.mrb[15].mxu1  ;;  %v3438_v55 = vadd.f32 %v3407_v12, %v3327_v13  ;;  %v2419_v29 = vadd.f32 %v3436_v52, %v4174_v60  ;;  %v2718_v42 = vadd.f32 %v2717_v14, %v2716_v43  ;;  %v2721_v18 = vsel %vm2598_vm5, %v2679_v58, 0.0 }
 0x158   : > { %v3439_v51 = vadd.f32 %v2290_v46, %v1181_v37  ;;  %v2417_v50 = vadd.f32 %v3437_v53, %v4174_v60  ;;  %v2621_v40 = vadd.f32 %v2620_v41, %v2619_v59 }
 0x159   : > { %v2420_v30 = vadd.f32 %v3438_v55, %v4174_v60  ;;  %v3166_v0 = vpack.c.bf16 %v2419_v29, %v2419_v29  ;;  %v2720_v9 = vadd.f32 %v2719_v24, %v2718_v42  ;;  %v2626_v20 = vsel %vm2598_vm5, %v2419_v29, 0.0 }
 0x15a   : > { %v2418_v32 = vadd.f32 %v3439_v51, %v4174_v60  ;;  %v3164_v16 = vpack.c.bf16 %v2417_v50, %v2417_v50  ;;  %v2622_v21 = vsel %vm2598_vm5, %v2417_v50, 0.0  ;;  %v2680_v25 = vmul.f32 %v2417_v50, %v2417_v50 }
 0x15b   : > { %2580 = vst.msk [vmem:[%s4181_s8 + $0x38] sm:$0xf] %vm2565_vm4, %v3166_v0  ;;  %v2623_v22 = vadd.f32 %v2622_v21, %v2621_v40  ;;  %v3167_v39 = vpack.c.bf16 %v2420_v30, %v2420_v30  ;;  %v2682_v61 = vmul.f32 %v2419_v29, %v2419_v29  ;;  %v2722_v19 = vadd.f32 %v2721_v18, %v2720_v9 }
 0x15c   : > { %v3330_v56 = vpop.f32.mrb[16].mxu1  ;;  %v3410_v45 = vpop.f32.mrb[16].mxu0  ;;  %2578 = vst.msk [vmem:[%s4181_s8 + $0x30] sm:$0xf] %vm2565_vm4, %v3164_v16  ;;  %v2723_v31 = vsel %vm2598_vm5, %v2680_v25, 0.0  ;;  %v3165_v7 = vpack.c.bf16 %v2418_v32, %v2418_v32  ;;  %v2624_v28 = vsel %vm2598_vm5, %v2418_v32, 0.0  ;;  %v2681_v33 = vmul.f32 %v2418_v32, %v2418_v32 }
 0x15d   : > { %v1194_v10 = vpop.f32.mrb[17].mxu1  ;;  %v2303_v62 = vpop.f32.mrb[17].mxu0  ;;  %2581 = vst.msk [vmem:[%s4181_s8 + $0x3c] sm:$0xf] %vm2565_vm4, %v3167_v39  ;;  %v3440_v15 = vadd.f32 %v3410_v45, %v3330_v56  ;;  %v2724_v4 = vadd.f32 %v2723_v31, %v2722_v19  ;;  %v2683_v11 = vmul.f32 %v2420_v30, %v2420_v30  ;;  %v2625_v23 = vadd.f32 %v2624_v28, %v2623_v22 }
 0x15e   : > { %v3331_v49 = vpop.f32.mrb[18].mxu1  ;;  %v3441_v8 = vadd.f32 %v2303_v62, %v1194_v10  ;;  %v3411_v34 = vpop.f32.mrb[18].mxu0  ;;  %2579 = vst.msk [vmem:[%s4181_s8 + $0x34] sm:$0xf] %vm2565_vm4, %v3165_v7  ;;  %v2725_v26 = vsel %vm2598_vm5, %v2681_v33, 0.0  ;;  %v2727_v35 = vsel %vm2598_vm5, %v2682_v61, 0.0 }
 0x15f   : > { %v1197_v54 = vpop.f32.mrb[19].mxu1  ;;  %v3442_v57 = vadd.f32 %v3411_v34, %v3331_v49  ;;  %v2306_v3 = vpop.f32.mrb[19].mxu0  ;;  %v2423_v27 = vadd.f32 %v3440_v15, %v4174_v60  ;;  %v2627_v5 = vadd.f32 %v2626_v20, %v2625_v23  ;;  %v2726_v17 = vadd.f32 %v2725_v26, %v2724_v4 }
 0x160   : > { %v2421_v63 = vadd.f32 %v3441_v8, %v4174_v60  ;;  %v3443_v38 = vadd.f32 %v2306_v3, %v1197_v54  ;;  %v2628_v13 = vsel %vm2598_vm5, %v2420_v30, 0.0  ;;  %v2729_v2 = vsel %vm2598_vm5, %v2683_v11, 0.0 }
 0x161   : > { %v2424_v1 = vadd.f32 %v3442_v57, %v4174_v60  ;;  %v3170_v44 = vpack.c.bf16 %v2423_v27, %v2423_v27  ;;  %v2728_v6 = vadd.f32 %v2727_v35, %v2726_v17  ;;  %v2629_v12 = vadd.f32 %v2628_v13, %v2627_v5 }
 0x162   : > { %v3168_v47 = vpack.c.bf16 %v2421_v63, %v2421_v63  ;;  %v2630_v37 = vsel %vm2598_vm5, %v2421_v63, 0.0  ;;  %v2684_v43 = vmul.f32 %v2421_v63, %v2421_v63  ;;  %v2422_v58 = vadd.f32 %v3443_v38, %v4174_v60 }
 0x163   : > { %2584 = vst.msk [vmem:[%s4181_s8 + $0x48] sm:$0xf] %vm2565_vm4, %v3170_v44  ;;  %v3171_v52 = vpack.c.bf16 %v2424_v1, %v2424_v1  ;;  %v2631_v53 = vadd.f32 %v2630_v37, %v2629_v12  ;;  %v2730_v55 = vadd.f32 %v2729_v2, %v2728_v6  ;;  %v2686_v29 = vmul.f32 %v2423_v27, %v2423_v27 }
 0x164   : > { %v3334_v48 = vpop.f32.mrb[20].mxu1  ;;  %2582 = vst.msk [vmem:[%s4181_s8 + $0x40] sm:$0xf] %vm2565_vm4, %v3168_v47  ;;  %v2731_v51 = vsel %vm2598_vm5, %v2684_v43, 0.0  ;;  %v3169_v24 = vpack.c.bf16 %v2422_v58, %v2422_v58  ;;  %v2632_v0 = vsel %vm2598_vm5, %v2422_v58, 0.0  ;;  %v2685_v40 = vmul.f32 %v2422_v58, %v2422_v58 }
 0x165   : > { %v1210_v36 = vpop.f32.mrb[21].mxu1  ;;  %v3414_v46 = vpop.f32.mrb[20].mxu0  ;;  %2585 = vst.msk [vmem:[%s4181_s8 + $0x4c] sm:$0xf] %vm2565_vm4, %v3171_v52  ;;  %v2732_v32 = vadd.f32 %v2731_v51, %v2730_v55  ;;  %v2633_v9 = vadd.f32 %v2632_v0, %v2631_v53  ;;  %v2634_v10 = vsel %vm2598_vm5, %v2423_v27, 0.0  ;;  %v2687_v18 = vmul.f32 %v2424_v1, %v2424_v1 }
 0x166   : > { %v3335_v41 = vpop.f32.mrb[22].mxu1  ;;  %v2319_v59 = vpop.f32.mrb[21].mxu0  ;;  %v3444_v42 = vadd.f32 %v3414_v46, %v3334_v48  ;;  %2583 = vst.msk [vmem:[%s4181_s8 + $0x44] sm:$0xf] %vm2565_vm4, %v3169_v24  ;;  %v2733_v20 = vsel %vm2598_vm5, %v2685_v40, 0.0  ;;  %v2735_v39 = vsel %vm2598_vm5, %v2686_v29, 0.0 }
 0x167   : > { %v1213_v14 = vpop.f32.mrb[23].mxu1  ;;  %v3445_v50 = vadd.f32 %v2319_v59, %v1210_v36  ;;  %v3415_v30 = vpop.f32.mrb[22].mxu0  ;;  %v2635_v45 = vadd.f32 %v2634_v10, %v2633_v9  ;;  %v2734_v49 = vadd.f32 %v2733_v20, %v2732_v32  ;;  %v2636_v31 = vsel %vm2598_vm5, %v2424_v1, 0.0 }
 0x168   : > { %v2322_v56 = vpop.f32.mrb[23].mxu0  ;;  %v2427_v16 = vadd.f32 %v3444_v42, %v4174_v60  ;;  %v3446_v25 = vadd.f32 %v3415_v30, %v3335_v41  ;;  %v2737_v11 = vsel %vm2598_vm5, %v2687_v18, 0.0 }
 0x169   : > { %v2425_v21 = vadd.f32 %v3445_v50, %v4174_v60  ;;  %v3447_v22 = vadd.f32 %v2322_v56, %v1213_v14  ;;  %v2736_v33 = vadd.f32 %v2735_v39, %v2734_v49  ;;  %v2637_v15 = vadd.f32 %v2636_v31, %v2635_v45 }
 0x16a   : > { %v3174_v61 = vpack.c.bf16 %v2427_v16, %v2427_v16  ;;  %v2428_v8 = vadd.f32 %v3446_v25, %v4174_v60  ;;  %v2690_v3 = vmul.f32 %v2427_v16, %v2427_v16  ;;  %v2642_v37 = vsel %vm2598_vm5, %v2427_v16, 0.0 }
 0x16b   : > { %v3172_v7 = vpack.c.bf16 %v2425_v21, %v2425_v21  ;;  %v2638_v62 = vsel %vm2598_vm5, %v2425_v21, 0.0  ;;  %v2688_v54 = vmul.f32 %v2425_v21, %v2425_v21  ;;  %v2426_v34 = vadd.f32 %v3447_v22, %v4174_v60 }
 0x16c   : > { %v3338_v19 = vpop.f32.mrb[24].mxu1  ;;  %2588 = vst.msk [vmem:[%s4181_s8 + $0x58] sm:$0xf] %vm2565_vm4, %v3174_v61  ;;  %v2639_v26 = vadd.f32 %v2638_v62, %v2637_v15  ;;  %v2738_v27 = vadd.f32 %v2737_v11, %v2736_v33  ;;  %v3175_v63 = vpack.c.bf16 %v2428_v8, %v2428_v8  ;;  %v2691_v5 = vmul.f32 %v2428_v8, %v2428_v8 }
 0x16d   : > { %v1226_v28 = vpop.f32.mrb[25].mxu1  ;;  %2586 = vst.msk [vmem:[%s4181_s8 + $0x50] sm:$0xf] %vm2565_vm4, %v3172_v7  ;;  %v2739_v23 = vsel %vm2598_vm5, %v2688_v54, 0.0  ;;  %v3173_v17 = vpack.c.bf16 %v2426_v34, %v2426_v34  ;;  %v2640_v1 = vsel %vm2598_vm5, %v2426_v34, 0.0  ;;  %v2689_v35 = vmul.f32 %v2426_v34, %v2426_v34 }
 0x16e   : > { %v3339_v4 = vpop.f32.mrb[26].mxu1  ;;  %v2740_v44 = vadd.f32 %v2739_v23, %v2738_v27  ;;  %2589 = vst.msk [vmem:[%s4181_s8 + $0x5c] sm:$0xf] %vm2565_vm4, %v3175_v63  ;;  %v2641_v47 = vadd.f32 %v2640_v1, %v2639_v26  ;;  %v2743_v51 = vsel %vm2598_vm5, %v2690_v3, 0.0  ;;  %v2644_v29 = vsel %vm2598_vm5, %v2428_v8, 0.0 }
 0x16f   : > { %v1229_v57 = vpop.f32.mrb[27].mxu1  ;;  %v3418_v38 = vpop.f32.mrb[24].mxu0  ;;  %2587 = vst.msk [vmem:[%s4181_s8 + $0x54] sm:$0xf] %vm2565_vm4, %v3173_v17  ;;  %v2741_v43 = vsel %vm2598_vm5, %v2689_v35, 0.0  ;;  %v2745_v42 = vsel %vm2598_vm5, %v2691_v5, 0.0 }
 0x170   : > { %v2335_v13 = vpop.f32.mrb[25].mxu0  ;;  %v3448_v48 = vadd.f32 %v3418_v38, %v3338_v19  ;;  %v2643_v52 = vadd.f32 %v2642_v37, %v2641_v47  ;;  %v2742_v46 = vadd.f32 %v2741_v43, %v2740_v44 }
 0x171   : > { %v3449_v6 = vadd.f32 %v2335_v13, %v1226_v28  ;;  %v3419_v12 = vpop.f32.mrb[26].mxu0 }
 0x172   : > { %v3450_v36 = vadd.f32 %v3419_v12, %v3339_v4  ;;  %v2338_v2 = vpop.f32.mrb[27].mxu0  ;;  %v2431_v41 = vadd.f32 %v3448_v48, %v4174_v60  ;;  %v2744_v50 = vadd.f32 %v2743_v51, %v2742_v46  ;;  %v2645_v0 = vadd.f32 %v2644_v29, %v2643_v52 }
 0x173   : > { %v2429_v53 = vadd.f32 %v3449_v6, %v4174_v60  ;;  %v3451_v59 = vadd.f32 %v2338_v2, %v1229_v57 }
 0x174   : > { %v3342_v55 = vpop.f32.mrb[28].mxu1  ;;  %v2432_v58 = vadd.f32 %v3450_v36, %v4174_v60  ;;  %v3178_v30 = vpack.c.bf16 %v2431_v41, %v2431_v41  ;;  %v2746_v16 = vadd.f32 %v2745_v42, %v2744_v50  ;;  %v2694_v39 = vmul.f32 %v2431_v41, %v2431_v41 }
 0x175   : > { %v1242_v14 = vpop.f32.mrb[29].mxu1  ;;  %v3176_v24 = vpack.c.bf16 %v2429_v53, %v2429_v53  ;;  %v2646_v40 = vsel %vm2598_vm5, %v2429_v53, 0.0  ;;  %v2692_v56 = vmul.f32 %v2429_v53, %v2429_v53  ;;  %v2430_v20 = vadd.f32 %v3451_v59, %v4174_v60 }
 0x176   : > { %v3343_v32 = vpop.f32.mrb[30].mxu1  ;;  %2592 = vst.msk [vmem:[%s4181_s8 + $0x68] sm:$0xf] %vm2565_vm4, %v3178_v30  ;;  %v3179_v21 = vpack.c.bf16 %v2432_v58, %v2432_v58  ;;  %v2647_v10 = vadd.f32 %v2646_v40, %v2645_v0  ;;  %v2650_v34 = vsel %vm2598_vm5, %v2431_v41, 0.0  ;;  %v2695_v4 = vmul.f32 %v2432_v58, %v2432_v58 }
 0x177   : > { %v1245_v9 = vpop.f32.mrb[31].mxu1  ;;  %v3422_v25 = vpop.f32.mrb[28].mxu0  ;;  %2590 = vst.msk [vmem:[%s4181_s8 + $0x60] sm:$0xf] %vm2565_vm4, %v3176_v24  ;;  %v2747_v18 = vsel %vm2598_vm5, %v2692_v56, 0.0  ;;  %v3177_v31 = vpack.c.bf16 %v2430_v20, %v2430_v20  ;;  %v2648_v7 = vsel %vm2598_vm5, %v2430_v20, 0.0  ;;  %v2693_v62 = vmul.f32 %v2430_v20, %v2430_v20 }
 0x178   : > { %v2351_v22 = vpop.f32.mrb[29].mxu0  ;;  %v2748_v45 = vadd.f32 %v2747_v18, %v2746_v16  ;;  %2593 = vst.msk [vmem:[%s4181_s8 + $0x6c] sm:$0xf] %vm2565_vm4, %v3179_v21  ;;  %v3452_v49 = vadd.f32 %v3422_v25, %v3342_v55  ;;  %v2649_v28 = vadd.f32 %v2648_v7, %v2647_v10  ;;  %v2751_v57 = vsel %vm2598_vm5, %v2694_v39, 0.0 }
 0x179   : > { %v3453_v61 = vadd.f32 %v2351_v22, %v1242_v14  ;;  %v3423_v19 = vpop.f32.mrb[30].mxu0  ;;  %2591 = vst.msk [vmem:[%s4181_s8 + $0x64] sm:$0xf] %vm2565_vm4, %v3177_v31  ;;  %v2749_v11 = vsel %vm2598_vm5, %v2693_v62, 0.0  ;;  %v2652_v63 = vsel %vm2598_vm5, %v2432_v58, 0.0  ;;  %v2753_v47 = vsel %vm2598_vm5, %v2695_v4, 0.0 }
 0x17a   : > { %v2354_v54 = vpop.f32.mrb[31].mxu0  ;;  %v2435_v33 = vadd.f32 %v3452_v49, %v4174_v60  ;;  %v3454_v8 = vadd.f32 %v3423_v19, %v3343_v32  ;;  %v2651_v3 = vadd.f32 %v2650_v34, %v2649_v28  ;;  %v2750_v26 = vadd.f32 %v2749_v11, %v2748_v45 }
 0x17b   : > { %v2433_v15 = vadd.f32 %v3453_v61, %v4174_v60  ;;  %v3455_v23 = vadd.f32 %v2354_v54, %v1245_v9 }
 0x17c   : > { %v3182_v27 = vpack.c.bf16 %v2435_v33, %v2435_v33  ;;  %v2752_v1 = vadd.f32 %v2751_v57, %v2750_v26  ;;  %v2653_v35 = vadd.f32 %v2652_v63, %v2651_v3  ;;  %v2436_v13 = vadd.f32 %v3454_v8, %v4174_v60 }
 0x17d   : > { %v3180_v38 = vpack.c.bf16 %v2433_v15, %v2433_v15  ;;  %v2654_v5 = vsel %vm2598_vm5, %v2433_v15, 0.0  ;;  %v2696_v17 = vmul.f32 %v2433_v15, %v2433_v15  ;;  %v2434_v44 = vadd.f32 %v3455_v23, %v4174_v60 }
 0x17e   : > { %2596 = vst.msk [vmem:[%s4181_s8 + $0x78] sm:$0xf] %vm2565_vm4, %v3182_v27  ;;  %v2655_v6 = vadd.f32 %v2654_v5, %v2653_v35  ;;  %v2754_v12 = vadd.f32 %v2753_v47, %v2752_v1  ;;  %v3183_v37 = vpack.c.bf16 %v2436_v13, %v2436_v13  ;;  %v2698_v43 = vmul.f32 %v2435_v33, %v2435_v33 }
 0x17f   : > { %2594 = vst.msk [vmem:[%s4181_s8 + $0x70] sm:$0xf] %vm2565_vm4, %v3180_v38  ;;  %v2755_v48 = vsel %vm2598_vm5, %v2696_v17, 0.0  ;;  %v3181_v36 = vpack.c.bf16 %v2434_v44, %v2434_v44  ;;  %v2656_v2 = vsel %vm2598_vm5, %v2434_v44, 0.0  ;;  %v2697_v52 = vmul.f32 %v2434_v44, %v2434_v44 }
 0x180   : > { %v2756_v46 = vadd.f32 %v2755_v48, %v2754_v12  ;;  %2597 = vst.msk [vmem:[%s4181_s8 + $0x7c] sm:$0xf] %vm2565_vm4, %v3183_v37  ;;  %v2657_v41 = vadd.f32 %v2656_v2, %v2655_v6  ;;  %v2658_v60 = vsel %vm2598_vm5, %v2435_v33, 0.0  ;;  %v2699_v53 = vmul.f32 %v2436_v13, %v2436_v13 }
 0x181   : > { %2595 = vst.msk [vmem:[%s4181_s8 + $0x74] sm:$0xf] %vm2565_vm4, %v3181_v36  ;;  %v2757_v55 = vsel %vm2598_vm5, %v2697_v52, 0.0  ;;  %v2759_v59 = vsel %vm2598_vm5, %v2698_v43, 0.0  ;;  %v2660_v14 = vsel %vm2598_vm5, %v2436_v13, 0.0 }
 0x182   : > { %v2659_v51 = vadd.f32 %v2658_v60, %v2657_v41  ;;  %v2758_v58 = vadd.f32 %v2757_v55, %v2756_v46  ;;  %v2761_v50 = vsel %vm2598_vm5, %v2699_v53, 0.0 }
 0x184   : > { %v2661_v29 = vadd.f32 %v2660_v14, %v2659_v51  ;;  %v2760_v42 = vadd.f32 %v2759_v59, %v2758_v58 }
 0x186   : > { %v2662_v30 = vrot.slane %v2661_v29, 4  ;;  %v2762_v32 = vadd.f32 %v2761_v50, %v2760_v42 }
 0x188   : > { %v2663_v24 = vadd.f32 %v2662_v30, %v2661_v29  ;;  %v2763_v0 = vrot.slane %v2762_v32, 4 }
 0x18a   : > { %v2664_v40 = vrot.slane %v2663_v24, 2  ;;  %v2764_v56 = vadd.f32 %v2763_v0, %v2762_v32 }
 0x18c   : > { %v2665_v9 = vadd.f32 %v2664_v40, %v2663_v24  ;;  %v2765_v16 = vrot.slane %v2764_v56, 2 }
 0x18e   : > { %v2666_v21 = vrot.slane %v2665_v9, 1  ;;  %v2766_v25 = vadd.f32 %v2765_v16, %v2764_v56 }
 0x190   : > { %v2767_v10 = vrot.slane %v2766_v25, 1  ;;  %v2667_v18 = vadd.f32 %v2666_v21, %v2665_v9 }
 0x192   : > { %v2768_v20 = vadd.f32 %v2767_v10, %v2766_v25 }
 0x194   : > { %v2770_v22 = vsel %vm2769_vm6, %v2667_v18, %v2768_v20 }
 0x195   : > { %2772 = vst.msk [vmem:[%s208_s12] sm:$0x3] %vm2771_vm7, %v2770_v22 }
 0x196 PF: > { %s15_s15 = sadd.s32 1, %s3583_s15  }
 0x197   : > { %p12_p4 = scmp.ge.s32.totalorder %s15_s15, 4  }
 0x199   :  { %14 = sbr.rel (!%p12_p4) target bundleno = 1 (0x1), region = 78 }

// kernel: discriminator_forward.6
= control target key start
LH: loop header
LB: loop body
LE: loop exit
PB: predicated region body
PF: predicated region fallthrough
CT: control target
= control target key end

     0   :  { %s1689_s15 = smov 0   ;;  %s1979_s0 = inlined_call_operand.vmem [shape: bf16[2,9,9,128], index: 0, kind: input, shape index: {}]   ;;  %s1980_s1 = inlined_call_operand.vmem [shape: bf16[4,128,64], index: 1, kind: input, shape index: {}]   ;;  %s1981_s2 = inlined_call_operand.vmem [shape: f32[1,64], index: 2, kind: input, shape index: {}]   ;;  %s1982_s3 = inlined_call_operand.vmem [shape: bf16[2,64,64], index: 3, kind: output, shape index: {0}]   ;;  %s1983_s4 = inlined_call_operand.vmem [shape: f32[2,2,64], index: 4, kind: output, shape index: {1}]  }
   0x1 LB: > { %s1290_s16 = sadd.s32 4294967295, %s1662_s15   ;;  %p1294_p0 = scmp.ge.s32.totalorder %s1662_s15, 1  ;;  %s1662_s15 = sphi %s1689_s15, %s15_s15  }
   0x2   : > { %p165_p1 = scmp.lt.s32.totalorder %s1662_s15, 3 }
   0x4   : > { %p166_p2 = pnand %p1294_p0, %p165_p1 }
   0x5   : > { %v1616_v0 = vld [vmem:[%s1980_s1 + $0x40] sm:$0xff] (!%p166_p2)   ;;  %p195_p3 = scmp.lt.s32.totalorder (!%p166_p2), %s1290_s16, 1  ;;  %v1618_v2 = vld [vmem:[%s1980_s1 + $0x48] sm:$0xff] (!%p166_p2)   ;;  %v1620_v4 = vld [vmem:[%s1980_s1 + $0x50] sm:$0xff] (!%p166_p2)   ;;  %vm242_vm0 = vsmask.f32 (!%p166_p2), 3328 }
   0x6   : > { %169 = sbr.rel (%p166_p2) target bundleno = 321 (0x141), region = 32  ;;  %v1617_v1 = vld [vmem:[%s1980_s1 + $0x80] sm:$0xff] (!%p166_p2)   ;;  %1487 = vmatprep.subr.bf16.mxu1 (!%p166_p2), %v1616_v0  ;;  %v1619_v3 = vld [vmem:[%s1980_s1 + $0x88] sm:$0xff] (!%p166_p2)   ;;  %v1621_v5 = vld [vmem:[%s1980_s1 + $0x90] sm:$0xff] (!%p166_p2)   ;;  %vm243_vm1 = vsmask.f32 (!%p166_p2), 7440 }
   0x7   : > { %1535 = vmatprep.subr.bf16.mxu0 (!%p166_p2), %v1617_v1  ;;  %1488 = vmatpush3.bf16.msra.mxu1 (!%p166_p2), %v1616_v0  ;;  %v1622_v6 = vld [vmem:[%s1980_s1 + $0x58] sm:$0xff] (!%p166_p2)   ;;  %v1624_v8 = vld [vmem:[%s1980_s1 + $0x60] sm:$0xff] (!%p166_p2)   ;;  %v1626_v10 = vld [vmem:[%s1980_s1 + $0x68] sm:$0xff] (!%p166_p2)   ;;  %vm1140_vm3 = vcmask (!%p166_p2), 519168   ;;  %vm1149_vm4 = vcmask (!%p166_p2), 523264   ;;  %vm1200_vm5 = vcmask (!%p166_p2), 1040384  }
   0x8   : > { %1536 = vmatpush3.bf16.msra.mxu0 (!%p166_p2), %v1617_v1  ;;  %1489 = vmatprep.subr.bf16.mxu1 (!%p166_p2), %v1618_v2  ;;  %v1623_v7 = vld [vmem:[%s1980_s1 + $0x98] sm:$0xff] (!%p166_p2)   ;;  %v1625_v9 = vld [vmem:[%s1980_s1 + $0xa0] sm:$0xff] (!%p166_p2)   ;;  %v1627_v11 = vld [vmem:[%s1980_s1 + $0xa8] sm:$0xff] (!%p166_p2)   ;;  %vm1202_vm6 = vcmask (!%p166_p2), 517120  }
   0x9   : > { %1537 = vmatprep.subr.bf16.mxu0 (!%p166_p2), %v1619_v3  ;;  %v1628_v20 = vld [vmem:[%s1980_s1 + $0x70] sm:$0xff] (!%p166_p2)   ;;  %vm1761_vm2 = vmor (!%p166_p2), %vm242_vm0, %vm243_vm1  ;;  %v1630_v32 = vld [vmem:[%s1980_s1 + $0x78] sm:$0xff] (!%p166_p2)  }
   0xa   : > { %v1629_v21 = vld [vmem:[%s1980_s1 + $0xb0] sm:$0xff] (!%p166_p2)   ;;  %v1631_v35 = vld [vmem:[%s1980_s1 + $0xb8] sm:$0xff] (!%p166_p2)   ;;  %v1632_v52 = vld [vmem:[%s1980_s1] sm:$0xff] (!%p166_p2)  }
   0xb   : > { %1490 = vmatpush3.bf16.msra.mxu1 (!%p166_p2), %v1618_v2  ;;  %v1634_v58 = vld [vmem:[%s1980_s1 + $0xc0] sm:$0xff] (!%p166_p2)   ;;  %v1637_v2 = vld [vmem:[%s1980_s1 + $0xc8] sm:$0xff] (!%p166_p2)  }
   0xc   : > { %1538 = vmatpush3.bf16.msra.mxu0 (!%p166_p2), %v1619_v3  ;;  %1491 = vmatprep.subr.bf16.mxu1 (!%p166_p2), %v1620_v4 }
   0xd   : > { %s1987_s16 = smov (!%p195_p3, %s1290_s16), 1  ;;  %1539 = vmatprep.subr.bf16.mxu0 %v1621_v5 }
   0xe   : > { %s1607_s7 = smul.u32 72, %s1987_s16  ;;  %s1430_s13 = sshll.u32 %s1987_s16, 5 }
   0xf   : > { %1492 = vmatpush3.bf16.msra.mxu1 %v1620_v4  ;;  %v1636_v4 = vld [vmem:[%s1980_s1 + $0x8] sm:$0xff]   ;;  %s1931_s19 = scalar_lea.vmem %s1982_s3, %s1430_s13  ;;  %s1298_s20 = sshll.u32 %s1987_s16, 1 }
  0x10   : > { %1540 = vmatpush3.bf16.msra.mxu0 %v1621_v5  ;;  %1493 = vmatprep.subr.bf16.mxu1 %v1622_v6  ;;  %s1733_s14 = scalar_lea.vmem %s1979_s0, %s1607_s7  ;;  %v1638_v5 = vld [vmem:[%s1980_s1 + $0x10] sm:$0xff]   ;;  %s208_s23 = scalar_lea.vmem %s1983_s4, %s1298_s20 }
  0x11   : > { %1541 = vmatprep.subr.bf16.mxu0 %v1623_v7  ;;  %v1742_v12 = vld [vmem:[%s1733_s14] sm:$0xf]  ;;  %v1745_v13 = vld [vmem:[%s1733_s14 + $0x8] sm:$0xf]  ;;  %v234_v14 = vld [vmem:[%s1733_s14 + $0x4] sm:$0x1] }
  0x12   : > { %v235_v15 = vld [vmem:[%s1733_s14 + $0xc] sm:$0x1]  ;;  %v246_v16 = vshrl.u32 %v1742_v12, 16  ;;  %v249_v17 = vshll.u32 %v1742_v12, 16  ;;  %v255_v18 = vshll.u32 %v234_v14, 16  ;;  %v260_v19 = vshrl.u32 %v1745_v13, 16 }
  0x13   : > { %1494 = vmatpush3.bf16.msra.mxu1 %v1622_v6  ;;  %v263_v22 = vshll.u32 %v1745_v13, 16  ;;  %v269_v23 = vshll.u32 %v235_v15, 16  ;;  %v1633_v31 = vld [vmem:[%s1733_s14 + $0x8] ss:$8 sps:$4 sm:$0xff]   ;;  %v1776_v37 = vld [vmem:[%s1733_s14 + $0x18] sm:$0xf] }
  0x14   : > { %1542 = vmatpush3.bf16.msra.mxu0 %v1623_v7  ;;  %1495 = vmatprep.subr.bf16.mxu1 %v1624_v8  ;;  %v248_v24 = vrot.slane %v246_v16, 4  ;;  %v251_v25 = vrot.slane %v249_v17, 5  ;;  %v257_v26 = vrot.slane %v255_v18, 5  ;;  %v262_v27 = vrot.slane %v260_v19, 4  ;;  %v1770_v34 = vld [vmem:[%s1733_s14 + $0x10] sm:$0xf] }
  0x15   : > { %1543 = vmatprep.subr.bf16.mxu0 %v1625_v9  ;;  %v265_v29 = vrot.slane %v263_v22, 5  ;;  %v271_v30 = vrot.slane %v269_v23, 5  ;;  %1551 = vmatprep.mubr.bf16.mxu0 %v1633_v31  ;;  %v236_v38 = vld [vmem:[%s1733_s14 + $0x14] sm:$0x1]  ;;  %v237_v39 = vld [vmem:[%s1733_s14 + $0x1c] sm:$0x1] }
  0x16   : > { %v252_v33 = vor.u32 %v251_v25, %v248_v24  ;;  %v274_v41 = vshrl.u32 %v1770_v34, 16  ;;  %v277_v42 = vshll.u32 %v1770_v34, 16  ;;  %v283_v43 = vshll.u32 %v236_v38, 16  ;;  %v1635_v61 = vld [vmem:[%s1733_s14 + $0x18] ss:$8 sps:$4 sm:$0xff]   ;;  %v1639_v6 = vld [vmem:[%s1980_s1 + $0xd0] sm:$0xff]  }
  0x17   : > { %1496 = vmatpush3.bf16.msra.mxu1 %v1624_v8  ;;  %v266_v36 = vor.u32 %v265_v29, %v262_v27  ;;  %v288_v45 = vshrl.u32 %v1776_v37, 16  ;;  %v291_v46 = vshll.u32 %v1776_v37, 16  ;;  %v297_v47 = vshll.u32 %v237_v39, 16  ;;  %v1812_v7 = vld [vmem:[%s1733_s14 + $0x20] sm:$0xf]  ;;  %v1641_v17 = vld [vmem:[%s1980_s1 + $0xd8] sm:$0xff]  }
  0x18   : > { %1544 = vmatpush3.bf16.msra.mxu0 %v1625_v9  ;;  %1497 = vmatprep.subr.bf16.mxu1 %v1626_v10  ;;  %v253_v40 = vrot.slane %v252_v33, 4  ;;  %v276_v49 = vrot.slane %v274_v41, 4  ;;  %v279_v50 = vrot.slane %v277_v42, 5  ;;  %v285_v53 = vrot.slane %v283_v43, 5  ;;  %v1815_v8 = vld [vmem:[%s1733_s14 + $0x28] sm:$0xf] }
  0x19   : > { %1545 = vmatprep.subr.bf16.mxu0 %v1627_v11  ;;  %v267_v44 = vrot.slane %v266_v36, 4  ;;  %v290_v54 = vrot.slane %v288_v45, 4  ;;  %v293_v55 = vrot.slane %v291_v46, 5  ;;  %v299_v60 = vrot.slane %v297_v47, 5  ;;  %v238_v9 = vld [vmem:[%s1733_s14 + $0x24] sm:$0x1] }
  0x1a   : > { %v258_v48 = vsel %vm1761_vm2, %v253_v40, %v257_v26  ;;  %v280_v57 = vor.u32 %v279_v50, %v276_v49  ;;  %v305_v14 = vshll.u32 %v1812_v7, 16  ;;  %v311_v15 = vshll.u32 %v238_v9, 16  ;;  %v1646_v25 = vld [vmem:[%s1733_s14 + $0x28] ss:$8 sps:$4 sm:$0xff]   ;;  %v241_v33 = vld [vmem:[%s1733_s14 + $0x3c] sm:$0x1] }
  0x1b   : > { %1498 = vmatpush3.bf16.msra.mxu1 %v1626_v10  ;;  %v272_v51 = vsel %vm1761_vm2, %v267_v44, %v271_v30  ;;  %v294_v59 = vor.u32 %v293_v55, %v290_v54  ;;  %v239_v10 = vld [vmem:[%s1733_s14 + $0x2c] sm:$0x1]  ;;  %v316_v16 = vshrl.u32 %v1815_v8, 16  ;;  %v319_v18 = vshll.u32 %v1815_v8, 16  ;;  %v1831_v29 = vld [vmem:[%s1733_s14 + $0x30] sm:$0xf] }
  0x1c   : > { %1546 = vmatpush3.bf16.msra.mxu0 %v1627_v11  ;;  %1499 = vmatprep.subr.bf16.mxu1 %v1628_v20  ;;  %v1315_v56 = vcombine.low %v258_v48, %v272_v51  ;;  %v281_v62 = vrot.slane %v280_v57, 4  ;;  %v302_v11 = vshrl.u32 %v1812_v7, 16  ;;  %v325_v19 = vshll.u32 %v239_v10, 16  ;;  %v1834_v30 = vld [vmem:[%s1733_s14 + $0x38] sm:$0xf]  ;;  %v1642_v42 = vld [vmem:[%s1980_s1 + $0x20] sm:$0xff]  }
  0x1d   : > { %1547 = vmatprep.subr.bf16.mxu0 %v1629_v21  ;;  %v295_v63 = vrot.slane %v294_v59, 4  ;;  %v307_v22 = vrot.slane %v305_v14, 5  ;;  %v313_v23 = vrot.slane %v311_v15, 5  ;;  %v318_v24 = vrot.slane %v316_v16, 4  ;;  %v1643_v47 = vld [vmem:[%s1980_s1 + $0xe0] sm:$0xff]   ;;  %v1647_v15 = vld [vmem:[%s1980_s1 + $0x30] sm:$0xff]  }
  0x1e   : > { %1503 = vmatprep.mubr.bf16.mxu1 %v1315_v56  ;;  %v286_v0 = vsel %vm1761_vm2, %v281_v62, %v285_v53  ;;  %v321_v26 = vrot.slane %v319_v18, 5  ;;  %v327_v27 = vrot.slane %v325_v19, 5  ;;  %v333_v36 = vshll.u32 %v1831_v29, 16  ;;  %v1648_v55 = vld [vmem:[%s1733_s14 + $0x38] ss:$8 sps:$4 sm:$0xff]   ;;  %v1649_v16 = vld [vmem:[%s1980_s1 + $0xf0] sm:$0xff]  }
  0x1f   : > { %1500 = vmatpush3.bf16.msra.mxu1 %v1628_v20  ;;  %v300_v1 = vsel %vm1761_vm2, %v295_v63, %v299_v60  ;;  %v1640_v20 = vld [vmem:[%s1980_s1 + $0x18] sm:$0xff]   ;;  %v344_v40 = vshrl.u32 %v1834_v30, 16  ;;  %v347_v41 = vshll.u32 %v1834_v30, 16  ;;  %v353_v46 = vshll.u32 %v241_v33, 16 }
  0x20   : > { %1548 = vmatpush3.bf16.msra.mxu0 %v1629_v21  ;;  %1501 = vmatprep.subr.bf16.mxu1 %v1630_v32  ;;  %v1316_v3 = vcombine.low %v286_v0, %v300_v1  ;;  %v304_v21 = vrot.slane %v302_v11, 4  ;;  %v322_v38 = vor.u32 %v321_v26, %v318_v24  ;;  %v335_v45 = vrot.slane %v333_v36, 5  ;;  %v1375_v0 = vld [vmem:[%s1733_s14 + $0x8] sm:$0xf]  ;;  %v1379_v11 = vld [vmem:[%s1733_s14 + $0x18] sm:$0xf] }
  0x21   : > { %1549 = vmatprep.subr.bf16.mxu0 %v1631_v35  ;;  %v346_v49 = vrot.slane %v344_v40, 4  ;;  %v349_v50 = vrot.slane %v347_v41, 5  ;;  %v355_v54 = vrot.slane %v353_v46, 5  ;;  %v1327_v63 = vcombine.low %v1742_v12, %v1745_v13  ;;  %v1381_v24 = vld [vmem:[%s1733_s14 + $0x20] sm:$0xf]  ;;  %v1651_v41 = vld [vmem:[%s1980_s1 + $0xf8] sm:$0xff]  }
  0x22   : > { %v308_v31 = vor.u32 %v307_v22, %v304_v21  ;;  %v323_v48 = vrot.slane %v322_v38, 4  ;;  %v828_v12 = vshrl.u32 %v1375_v0, 16  ;;  %v831_v13 = vshll.u32 %v1375_v0, 16  ;;  %v1383_v40 = vld [vmem:[%s1733_s14 + $0x28] sm:$0xf] }
  0x23   : > { %1502 = vmatpush3.bf16.msra.mxu1 %v1630_v32  ;;  %v240_v32 = vld [vmem:[%s1733_s14 + $0x34] sm:$0x1]  ;;  %v350_v57 = vor.u32 %v349_v50, %v346_v49  ;;  %v859_v33 = vshll.u32 %v1379_v11, 16  ;;  %v1384_v46 = vld [vmem:[%s1733_s14 + $0x2c] sm:$0x1] }
  0x24   : > { %1550 = vmatpush3.bf16.msra.mxu0 %v1631_v35  ;;  %1511 = vmatprep.subr.bf16.mxu1 %v1632_v52  ;;  %v330_v35 = vshrl.u32 %v1831_v29, 16  ;;  %v339_v39 = vshll.u32 %v240_v32, 16  ;;  %v309_v43 = vrot.slane %v308_v31, 4  ;;  %v328_v56 = vsel %vm1761_vm2, %v323_v48, %v327_v27  ;;  %v1382_v32 = vld [vmem:[%s1733_s14 + $0x24] sm:$0x1] }
  0x25   : > { %1559 = vmatprep.subr.bf16.mxu0 %v1634_v58  ;;  %v351_v62 = vrot.slane %v350_v57, 4  ;;  %v830_v21 = vrot.slane %v828_v12, 4  ;;  %v833_v22 = vrot.slane %v831_v13, 5  ;;  %v1385_v50 = vld [vmem:[%s1733_s14 + $0x30] sm:$0xf] }
  0x26   : > { %1504 = vmatmul.mubr.bf16.vlgmr.msra.gmra.mrb[0].mxu1 %v1316_v3  ;;  %v332_v44 = vrot.slane %v330_v35, 4  ;;  %v314_v51 = vsel %vm1761_vm2, %v309_v43, %v313_v23  ;;  %v341_v53 = vrot.slane %v339_v39, 5  ;;  %v1377_v3 = vld [vmem:[%s1733_s14 + $0x10] sm:$0xf]  ;;  %v870_v39 = vshrl.u32 %v1381_v24, 16 }
  0x27   : > { %1552 = vmatmul.mubr.bf16.vlgmr.msra.gmra.mrb[0].mxu0 %v1635_v61  ;;  %1512 = vmatpush3.bf16.msra.mxu1 %v1632_v52  ;;  %v1317_v59 = vcombine.low %v314_v51, %v328_v56  ;;  %v1645_v61 = vld [vmem:[%s1980_s1 + $0xe8] sm:$0xff]   ;;  %v356_v9 = vsel %vm1761_vm2, %v351_v62, %v355_v54  ;;  %v845_v18 = vshll.u32 %v1377_v3, 16  ;;  %v834_v35 = vor.u32 %v833_v22, %v830_v21 }
  0x28   : > { %1560 = vmatpush3.bf16.msra.mxu0 %v1634_v58  ;;  %1513 = vmatprep.subr.bf16.mxu1 %v1636_v4  ;;  %v336_v52 = vor.u32 %v335_v45, %v332_v44  ;;  %v1644_v58 = vld [vmem:[%s1980_s1 + $0x28] sm:$0xff]   ;;  %v861_v43 = vrot.slane %v859_v33, 5  ;;  %v873_v44 = vshll.u32 %v1381_v24, 16  ;;  %v879_v45 = vshll.u32 %v1382_v32, 16 }
  0x29   : > { %1561 = vmatprep.subr.bf16.mxu0 %v1637_v2  ;;  %1555 = vmatprep.mubr.bf16.mxu0 %v1646_v25  ;;  %v856_v25 = vshrl.u32 %v1379_v11, 16  ;;  %v847_v27 = vrot.slane %v845_v18, 5  ;;  %v872_v49 = vrot.slane %v870_v39, 4  ;;  %v884_v51 = vshrl.u32 %v1383_v40, 16 }
  0x2a   : > { %v337_v60 = vrot.slane %v336_v52, 4  ;;  %1507 = vmatprep.mubr.bf16.mxu1 %v1317_v59  ;;  %v1650_v52 = vld [vmem:[%s1980_s1 + $0x38] sm:$0xff]   ;;  %v881_v56 = vrot.slane %v879_v45, 5  ;;  %v901_v13 = vshll.u32 %v1385_v50, 16 }
  0x2b   : > { %1514 = vmatpush3.bf16.msra.mxu1 %v1636_v4  ;;  %v1378_v4 = vld [vmem:[%s1733_s14 + $0x14] sm:$0x1]  ;;  %v858_v36 = vrot.slane %v856_v25, 4  ;;  %v886_v59 = vrot.slane %v884_v51, 4 }
  0x2c   : > { %1562 = vmatpush3.bf16.msra.mxu0 %v1637_v2  ;;  %1515 = vmatprep.subr.bf16.mxu1 %v1638_v5  ;;  %v342_v1 = vsel %vm1761_vm2, %v337_v60, %v341_v53  ;;  %v1376_v2 = vld [vmem:[%s1733_s14 + $0xc] sm:$0x1]  ;;  %v851_v19 = vshll.u32 %v1378_v4, 16  ;;  %v887_v60 = vshll.u32 %v1383_v40, 16 }
  0x2d   : > { %1563 = vmatprep.subr.bf16.mxu0 %v1639_v6  ;;  %v837_v10 = vshll.u32 %v1376_v2, 16  ;;  %v1318_v14 = vcombine.low %v342_v1, %v356_v9  ;;  %v862_v54 = vor.u32 %v861_v43, %v858_v36  ;;  %v898_v1 = vshrl.u32 %v1385_v50, 16  ;;  %v1387_v2 = vld [vmem:[%s1733_s14 + $0x38] sm:$0xf]  ;;  %v1924_v50 = vld [vmem:[%s1981_s2] ss:$0 sm:$0xff] }
  0x2e   : > { %v853_v31 = vrot.slane %v851_v19, 5  ;;  %v889_v9 = vrot.slane %v887_v60, 5  ;;  %v903_v19 = vrot.slane %v901_v13, 5  ;;  %v915_v21 = vshll.u32 %v1387_v2, 16 }
  0x2f   : > { %1516 = vmatpush3.bf16.msra.mxu1 %v1638_v5  ;;  %v1328_v5 = vcombine.low %v1770_v34, %v1776_v37  ;;  %1556 = vmatmul.mubr.bf16.gmra.mrb[4].mxu0 %v1648_v55  ;;  %v839_v23 = vrot.slane %v837_v10, 5  ;;  %v875_v55 = vrot.slane %v873_v44, 5  ;;  %v1389_v10 = vld [vmem:[%s1733_s14 + $0x40] sm:$0xf]  ;;  %v1330_v34 = vcombine.low %v1831_v29, %v1834_v30 }
  0x30   : > { %1564 = vmatpush3.bf16.msra.mxu0 %v1639_v6  ;;  %1517 = vmatprep.subr.bf16.mxu1 %v1640_v20  ;;  %v1329_v6 = vcombine.low %v1812_v7, %v1815_v8  ;;  %v890_v18 = vor.u32 %v889_v9, %v886_v59  ;;  %v926_v25 = vshrl.u32 %v1389_v10, 16  ;;  %v917_v33 = vrot.slane %v915_v21, 5 }
  0x31   : > { %1565 = vmatprep.subr.bf16.mxu0 %v1641_v17  ;;  %1508 = vmatmul.mubr.bf16.gmra.mrb[4].mxu1 %v1318_v14  ;;  %v876_v0 = vor.u32 %v875_v55, %v872_v49  ;;  %v929_v36 = vshll.u32 %v1389_v10, 16 }
  0x32   : > { %1527 = vmatprep.mubr.bf16.mxu1 %v1327_v63  ;;  %v863_v63 = vrot.slane %v862_v54, 4 }
  0x33   : > { %1518 = vmatpush3.bf16.msra.mxu1 %v1640_v20  ;;  %v1380_v20 = vld [vmem:[%s1733_s14 + $0x1c] sm:$0x1]  ;;  %v877_v14 = vrot.slane %v876_v0, 4  ;;  %v931_v43 = vrot.slane %v929_v36, 5 }
  0x34   : > { %1566 = vmatpush3.bf16.msra.mxu0 %v1641_v17  ;;  %1519 = vmatprep.subr.bf16.mxu1 %v1642_v42  ;;  %v842_v17 = vshrl.u32 %v1377_v3, 16  ;;  %v865_v38 = vshll.u32 %v1380_v20, 16  ;;  %v1388_v3 = vld [vmem:[%s1733_s14 + $0x3c] sm:$0x1]  ;;  %v912_v20 = vshrl.u32 %v1387_v2, 16 }
  0x35   : > { %1567 = vmatprep.subr.bf16.mxu0 %v1643_v47  ;;  %v921_v24 = vshll.u32 %v1388_v3, 16 }
  0x36   : > { %v844_v26 = vrot.slane %v842_v17, 4  ;;  %v867_v48 = vrot.slane %v865_v38, 5  ;;  %v914_v32 = vrot.slane %v912_v20, 4 }
  0x37   : > { %1520 = vmatpush3.bf16.msra.mxu1 %v1642_v42 }
  0x38   : > { %1568 = vmatpush3.bf16.msra.mxu0 %v1643_v47  ;;  %1521 = vmatprep.subr.bf16.mxu1 %v1644_v58  ;;  %v848_v42 = vor.u32 %v847_v27, %v844_v26  ;;  %v835_v47 = vrot.slane %v834_v35, 4  ;;  %v868_v11 = vsel %vm1761_vm2, %v863_v63, %v867_v48  ;;  %v891_v27 = vrot.slane %v890_v18, 4 }
  0x39   : > { %1569 = vmatprep.subr.bf16.mxu0 %v1645_v61  ;;  %v928_v35 = vrot.slane %v926_v25, 4 }
  0x3a   : > { %v849_v53 = vrot.slane %v848_v42, 4  ;;  %v840_v57 = vsel %vm1761_vm2, %v835_v47, %v839_v23  ;;  %v1390_v23 = vld [vmem:[%s1733_s14 + $0x44] sm:$0x1]  ;;  %v923_v42 = vrot.slane %v921_v24, 5 }
  0x3b   : > { %1522 = vmatpush3.bf16.msra.mxu1 %v1644_v58  ;;  %v1386_v58 = vld [vmem:[%s1733_s14 + $0x34] sm:$0x1]  ;;  %v935_v40 = vshll.u32 %v1390_v23, 16  ;;  %v932_v47 = vor.u32 %v931_v43, %v928_v35 }
  0x3c   : > { %1570 = vmatpush3.bf16.msra.mxu0 %v1645_v61  ;;  %1523 = vmatprep.subr.bf16.mxu1 %v1647_v15  ;;  %v893_v61 = vshll.u32 %v1384_v46, 16  ;;  %v854_v62 = vsel %vm1761_vm2, %v849_v53, %v853_v31  ;;  %v907_v17 = vshll.u32 %v1386_v58, 16 }
  0x3d   : > { %1571 = vmatprep.subr.bf16.mxu0 %v1649_v16  ;;  %v1407_v4 = vcombine.low %v840_v57, %v854_v62  ;;  %v937_v48 = vrot.slane %v935_v40, 5 }
  0x3e   : > { %v895_v12 = vrot.slane %v893_v61, 5  ;;  %v909_v22 = vrot.slane %v907_v17, 5 }
  0x3f   : > { %1524 = vmatpush3.bf16.msra.mxu1 %v1647_v15  ;;  %1575 = vmatprep.mubr.bf16.mxu0 %v1407_v4  ;;  %v882_v15 = vsel %vm1761_vm2, %v877_v14, %v881_v56 }
  0x40   : > { %1572 = vmatpush3.bf16.msra.mxu0 %v1649_v16  ;;  %1525 = vmatprep.subr.bf16.mxu1 %v1650_v52  ;;  %v900_v16 = vrot.slane %v898_v1, 4  ;;  %v1408_v26 = vcombine.low %v868_v11, %v882_v15  ;;  %v896_v38 = vsel %vm1761_vm2, %v891_v27, %v895_v12 }
  0x41   : > { %1573 = vmatprep.subr.bf16.mxu0 %v1651_v41 }
  0x42   : > { %v904_v31 = vor.u32 %v903_v19, %v900_v16 }
  0x43   : > { %1526 = vmatpush3.bf16.msra.mxu1 %v1650_v52 }
  0x44   : > { %1574 = vmatpush3.bf16.msra.mxu0 %v1651_v41  ;;  %v905_v39 = vrot.slane %v904_v31, 4  ;;  %v918_v41 = vor.u32 %v917_v33, %v914_v32 }
  0x46   : > { %1528 = vmatmul.mubr.bf16.vlgmr.msra.gmra.mrb[0].mxu1 %v1328_v5  ;;  %v910_v44 = vsel %vm1761_vm2, %v905_v39, %v909_v22  ;;  %v919_v46 = vrot.slane %v918_v41, 4  ;;  %v933_v5 = vrot.slane %v932_v47, 4 }
  0x47   : > { %1576 = vmatmul.mubr.bf16.vlgmr.msra.gmra.mrb[0].mxu0 %v1408_v26  ;;  %1531 = vmatprep.mubr.bf16.mxu1 %v1329_v6  ;;  %v1409_v45 = vcombine.low %v896_v38, %v910_v44 }
  0x48   : > { %v924_v37 = vsel %vm1761_vm2, %v919_v46, %v923_v42  ;;  %v938_v7 = vsel %vm1761_vm2, %v933_v5, %v937_v48 }
  0x49   : > { %1579 = vmatprep.mubr.bf16.mxu0 %v1409_v45  ;;  %v1410_v8 = vcombine.low %v924_v37, %v938_v7 }
  0x4e   : > { %1532 = vmatmul.mubr.bf16.gmra.mrb[4].mxu1 %v1330_v34 }
  0x4f   : > { %1580 = vmatmul.mubr.bf16.gmra.mrb[4].mxu0 %v1410_v8 }
 0x119   : > { %v1529_v49 = vpop.f32.mrb[0].mxu1 }
 0x11a   : > { %v1577_v6 = vpop.f32.mrb[0].mxu0  ;;  %v609_v30 = vpop.f32.mrb[1].mxu1 }
 0x11b   : > { %v1054_v51 = vpop.f32.mrb[1].mxu0  ;;  %v1583_v29 = vadd.f32 %v1577_v6, %v1529_v49  ;;  %v1530_v54 = vpop.f32.mrb[2].mxu1 }
 0x11c   : > { %v1578_v52 = vpop.f32.mrb[2].mxu0  ;;  %v1584_v53 = vadd.f32 %v1054_v51, %v609_v30  ;;  %v612_v57 = vpop.f32.mrb[3].mxu1 }
 0x11d   : > { %v1057_v55 = vpop.f32.mrb[3].mxu0  ;;  %v1102_v28 = vadd.f32 %v1583_v29, %v1924_v50  ;;  %v1585_v56 = vadd.f32 %v1578_v52, %v1530_v54 }
 0x11e   : > { %v1100_v58 = vadd.f32 %v1584_v53, %v1924_v50  ;;  %v1586_v59 = vadd.f32 %v1057_v55, %v612_v57 }
 0x11f   : > { %v1433_v60 = vpack.c.bf16 %v1102_v28, %v1102_v28  ;;  %v1103_v61 = vadd.f32 %v1585_v56, %v1924_v50  ;;  %v1173_v1 = vmul.f32 %v1102_v28, %v1102_v28  ;;  %v1153_v10 = vsel %vm1149_vm4, %v1102_v28, 0.0 }
 0x120   : > { %v1431_v62 = vpack.c.bf16 %v1100_v58, %v1100_v58  ;;  %v1171_v63 = vmul.f32 %v1100_v58, %v1100_v58  ;;  %v1101_v0 = vadd.f32 %v1586_v59, %v1924_v50  ;;  %v1150_v3 = vsel %vm1149_vm4, %v1100_v58, 0.0 }
 0x121   : > { %1143 = vst.msk [vmem:[%s1931_s19 + $0x8] sm:$0xf] %vm1140_vm3, %v1433_v60  ;;  %v1434_v2 = vpack.c.bf16 %v1103_v61, %v1103_v61  ;;  %v1533_v13 = vpop.f32.mrb[4].mxu1  ;;  %v1174_v18 = vmul.f32 %v1103_v61, %v1103_v61  ;;  %v1182_v27 = vsel %vm1149_vm4, %v1173_v1, 0.0  ;;  %v1155_v31 = vsel %vm1149_vm4, %v1103_v61, 0.0 }
 0x122   : > { %1141 = vst.msk [vmem:[%s1931_s19] sm:$0xf] %vm1140_vm3, %v1431_v62  ;;  %v1432_v4 = vpack.c.bf16 %v1101_v0, %v1101_v0  ;;  %v1151_v9 = vsel %vm1149_vm4, %v1101_v0, 0.0  ;;  %v1172_v12 = vmul.f32 %v1101_v0, %v1101_v0  ;;  %v1581_v14 = vpop.f32.mrb[4].mxu0  ;;  %v625_v16 = vpop.f32.mrb[5].mxu1  ;;  %v1179_v17 = vsel %vm1149_vm4, %v1171_v63, 0.0 }
 0x123   : > { %1144 = vst.msk [vmem:[%s1931_s19 + $0xc] sm:$0xf] %vm1140_vm3, %v1434_v2  ;;  %v1152_v11 = vadd.f32 %v1151_v9, %v1150_v3  ;;  %v1587_v20 = vadd.f32 %v1581_v14, %v1533_v13  ;;  %v1070_v21 = vpop.f32.mrb[5].mxu0  ;;  %v1534_v15 = vpop.f32.mrb[6].mxu1  ;;  %v1184_v41 = vsel %vm1149_vm4, %v1174_v18, 0.0 }
 0x124   : > { %1142 = vst.msk [vmem:[%s1931_s19 + $0x4] sm:$0xf] %vm1140_vm3, %v1432_v4  ;;  %v1180_v19 = vsel %vm1149_vm4, %v1172_v12, 0.0  ;;  %v1588_v24 = vadd.f32 %v1070_v21, %v625_v16  ;;  %v1582_v25 = vpop.f32.mrb[6].mxu0  ;;  %v628_v26 = vpop.f32.mrb[7].mxu1 }
 0x125   : > { %v1154_v22 = vadd.f32 %v1153_v10, %v1152_v11  ;;  %v1181_v23 = vadd.f32 %v1180_v19, %v1179_v17  ;;  %v1106_v32 = vadd.f32 %v1587_v20, %v1924_v50  ;;  %v1589_v33 = vadd.f32 %v1582_v25, %v1534_v15  ;;  %v1073_v35 = vpop.f32.mrb[7].mxu0 }
 0x126   : > { %v1104_v38 = vadd.f32 %v1588_v24, %v1924_v50  ;;  %v1590_v40 = vadd.f32 %v1073_v35, %v628_v26 }
 0x127   : > { %v1183_v36 = vadd.f32 %v1182_v27, %v1181_v23  ;;  %v1156_v39 = vadd.f32 %v1155_v31, %v1154_v22  ;;  %v1437_v42 = vpack.c.bf16 %v1106_v32, %v1106_v32  ;;  %v1107_v43 = vadd.f32 %v1589_v33, %v1924_v50 }
 0x128   : > { %v1435_v44 = vpack.c.bf16 %v1104_v38, %v1104_v38  ;;  %v1157_v45 = vsel %vm1149_vm4, %v1104_v38, 0.0  ;;  %v1175_v46 = vmul.f32 %v1104_v38, %v1104_v38  ;;  %v1105_v5 = vadd.f32 %v1590_v40, %v1924_v50 }
 0x129   : > { %v1185_v47 = vadd.f32 %v1184_v41, %v1183_v36  ;;  %1147 = vst.msk [vmem:[%s1931_s19 + $0x18] sm:$0xf] %vm1140_vm3, %v1437_v42  ;;  %v1158_v48 = vadd.f32 %v1157_v45, %v1156_v39  ;;  %v1438_v34 = vpack.c.bf16 %v1107_v43, %v1107_v43  ;;  %v1177_v8 = vmul.f32 %v1106_v32, %v1106_v32 }
 0x12a   : > { %1145 = vst.msk [vmem:[%s1931_s19 + $0x10] sm:$0xf] %vm1140_vm3, %v1435_v44  ;;  %v1186_v37 = vsel %vm1149_vm4, %v1175_v46, 0.0  ;;  %v1436_v6 = vpack.c.bf16 %v1105_v5, %v1105_v5  ;;  %v1159_v49 = vsel %vm1149_vm4, %v1105_v5, 0.0  ;;  %v1176_v51 = vmul.f32 %v1105_v5, %v1105_v5 }
 0x12b   : > { %v1187_v7 = vadd.f32 %v1186_v37, %v1185_v47  ;;  %1148 = vst.msk [vmem:[%s1931_s19 + $0x1c] sm:$0xf] %vm1140_vm3, %v1438_v34  ;;  %v1160_v29 = vadd.f32 %v1159_v49, %v1158_v48  ;;  %v1161_v30 = vsel %vm1149_vm4, %v1106_v32, 0.0  ;;  %v1178_v52 = vmul.f32 %v1107_v43, %v1107_v43 }
 0x12c   : > { %1146 = vst.msk [vmem:[%s1931_s19 + $0x14] sm:$0xf] %vm1140_vm3, %v1436_v6  ;;  %v1188_v53 = vsel %vm1149_vm4, %v1176_v51, 0.0  ;;  %v1190_v50 = vsel %vm1149_vm4, %v1177_v8, 0.0  ;;  %v1163_v28 = vsel %vm1149_vm4, %v1107_v43, 0.0 }
 0x12d   : > { %v1162_v54 = vadd.f32 %v1161_v30, %v1160_v29  ;;  %v1189_v55 = vadd.f32 %v1188_v53, %v1187_v7  ;;  %v1192_v58 = vsel %vm1149_vm4, %v1178_v52, 0.0 }
 0x12f   : > { %v1164_v56 = vadd.f32 %v1163_v28, %v1162_v54  ;;  %v1191_v57 = vadd.f32 %v1190_v50, %v1189_v55 }
 0x131   : > { %v1165_v59 = vrot.slane %v1164_v56, 4  ;;  %v1193_v60 = vadd.f32 %v1192_v58, %v1191_v57 }
 0x133   : > { %v1166_v61 = vadd.f32 %v1165_v59, %v1164_v56  ;;  %v1194_v62 = vrot.slane %v1193_v60, 4 }
 0x135   : > { %v1167_v63 = vrot.slane %v1166_v61, 2  ;;  %v1195_v0 = vadd.f32 %v1194_v62, %v1193_v60 }
 0x137   : > { %v1168_v1 = vadd.f32 %v1167_v63, %v1166_v61  ;;  %v1196_v2 = vrot.slane %v1195_v0, 2 }
 0x139   : > { %v1169_v3 = vrot.slane %v1168_v1, 1  ;;  %v1197_v4 = vadd.f32 %v1196_v2, %v1195_v0 }
 0x13b   : > { %v1198_v9 = vrot.slane %v1197_v4, 1  ;;  %v1170_v12 = vadd.f32 %v1169_v3, %v1168_v1 }
 0x13d   : > { %v1199_v13 = vadd.f32 %v1198_v9, %v1197_v4 }
 0x13f   : > { %v1201_v10 = vsel %vm1200_vm5, %v1170_v12, %v1199_v13 }
 0x140   : > { %1203 = vst.msk [vmem:[%s208_s23] sm:$0x3] %vm1202_vm6, %v1201_v10 }
 0x141 PF: > { %s15_s15 = sadd.s32 1, %s1662_s15  }
 0x142   : > { %p12_p4 = scmp.ge.s32.totalorder %s15_s15, 4  }
 0x144   :  { %14 = sbr.rel (!%p12_p4) target bundleno = 1 (0x1), region = 78 }

// kernel: discriminator_forward.7
= control target key start
LH: loop header
LB: loop body
LE: loop exit
PB: predicated region body
PF: predicated region fallthrough
CT: control target
= control target key end

     0   :  { %s1771_s15 = smov 0   ;;  %s2063_s0 = inlined_call_operand.vmem [shape: bf16[2,5,5,256], index: 0, kind: input, shape index: {}]   ;;  %s2064_s1 = inlined_call_operand.vmem [shape: bf16[4,256,128], index: 1, kind: input, shape index: {}]   ;;  %s2065_s2 = inlined_call_operand.vmem [shape: f32[1,128], index: 2, kind: input, shape index: {}]   ;;  %s2066_s3 = inlined_call_operand.vmem [shape: bf16[2,16,128], index: 3, kind: output, shape index: {0}]   ;;  %s2067_s4 = inlined_call_operand.vmem [shape: f32[2,2,128], index: 4, kind: output, shape index: {1}]  }
   0x1 LB: > { %s1369_s16 = sadd.s32 4294967295, %s1743_s15   ;;  %p1373_p0 = scmp.ge.s32.totalorder %s1743_s15, 1  ;;  %s1743_s15 = sphi %s1771_s15, %s15_s15  }
   0x2   : > { %p165_p1 = scmp.lt.s32.totalorder %s1743_s15, 3 }
   0x4   : > { %p166_p2 = pnand %p1373_p0, %p165_p1 }
   0x5   : > { %v1673_v0 = vld [vmem:[%s2064_s1 + $0xc0] sm:$0xff] (!%p166_p2)   ;;  %v1677_v4 = vld [vmem:[%s2064_s1 + $0xc8] sm:$0xff] (!%p166_p2)   ;;  %v1681_v8 = vld [vmem:[%s2064_s1 + $0xd0] sm:$0xff] (!%p166_p2)   ;;  %p195_p3 = scmp.lt.s32.totalorder (!%p166_p2), %s1369_s16, 1  ;;  %vm318_vm0 = vsmask.f32 (!%p166_p2), 1280  ;;  %v419_v39 = vlaneseq (!%p166_p2) }
   0x6   : > { %169 = sbr.rel (%p166_p2) target bundleno = 316 (0x13c), region = 32  ;;  %v1674_v1 = vld [vmem:[%s2064_s1 + $0x40] sm:$0xff] (!%p166_p2)   ;;  %1575 = vmatprep.subr.bf16.mxu0 (!%p166_p2), %v1673_v0  ;;  %v1678_v5 = vld [vmem:[%s2064_s1 + $0x48] sm:$0xff] (!%p166_p2)   ;;  %v1682_v9 = vld [vmem:[%s2064_s1 + $0x50] sm:$0xff] (!%p166_p2)   ;;  %vm319_vm1 = vsmask.f32 (!%p166_p2), 3336 }
   0x7   : > { %v1675_v2 = vld [vmem:[%s2064_s1 + $0x80] sm:$0xff] (!%p166_p2)   ;;  %1597 = vmatprep.subr.bf16.mxu1 (!%p166_p2), %v1674_v1  ;;  %v1679_v6 = vld [vmem:[%s2064_s1 + $0x88] sm:$0xff] (!%p166_p2)   ;;  %v1683_v10 = vld [vmem:[%s2064_s1 + $0x90] sm:$0xff] (!%p166_p2)   ;;  %vm321_vm2 = vsmask.f32 (!%p166_p2), 5392  ;;  %vm1280_vm7 = vcmask (!%p166_p2), 1040384  }
   0x8   : > { %v1676_v3 = vld [vmem:[%s2064_s1] sm:$0xff] (!%p166_p2)   ;;  %1576 = vmatpush3.bf16.msra.mxu0 (!%p166_p2), %v1675_v2  ;;  %v1680_v7 = vld [vmem:[%s2064_s1 + $0x8] sm:$0xff] (!%p166_p2)   ;;  %v1684_v11 = vld [vmem:[%s2064_s1 + $0x10] sm:$0xff] (!%p166_p2)   ;;  %vm323_vm4 = vsmask.f32 (!%p166_p2), 7448 }
   0x9   : > { %1598 = vmatpush3.bf16.msra.mxu1 (!%p166_p2), %v1676_v3  ;;  %1577 = vmatprep.subr.bf16.mxu0 (!%p166_p2), %v1677_v4  ;;  %v1685_v12 = vld [vmem:[%s2064_s1 + $0xd8] sm:$0xff] (!%p166_p2)   ;;  %v1689_v16 = vld [vmem:[%s2064_s1 + $0xe0] sm:$0xff] (!%p166_p2)   ;;  %v1693_v20 = vld [vmem:[%s2064_s1 + $0xe8] sm:$0xff] (!%p166_p2)  }
   0xa   : > { %1599 = vmatprep.subr.bf16.mxu1 (!%p166_p2), %v1678_v5  ;;  %v1686_v13 = vld [vmem:[%s2064_s1 + $0x58] sm:$0xff] (!%p166_p2)   ;;  %v1690_v17 = vld [vmem:[%s2064_s1 + $0x60] sm:$0xff] (!%p166_p2)   ;;  %v1694_v21 = vld [vmem:[%s2064_s1 + $0x68] sm:$0xff] (!%p166_p2)  }
   0xb   : > { %v1687_v14 = vld [vmem:[%s2064_s1 + $0x98] sm:$0xff] (!%p166_p2)   ;;  %v1691_v18 = vld [vmem:[%s2064_s1 + $0xa0] sm:$0xff] (!%p166_p2)   ;;  %v1695_v22 = vld [vmem:[%s2064_s1 + $0xa8] sm:$0xff] (!%p166_p2)  }
   0xc   : > { %1578 = vmatpush3.bf16.msra.mxu0 (!%p166_p2), %v1679_v6  ;;  %v1688_v15 = vld [vmem:[%s2064_s1 + $0x18] sm:$0xff] (!%p166_p2)   ;;  %v1692_v19 = vld [vmem:[%s2064_s1 + $0x20] sm:$0xff] (!%p166_p2)   ;;  %v1696_v23 = vld [vmem:[%s2064_s1 + $0x28] sm:$0xff] (!%p166_p2)   ;;  %v420_v6 = vshrl.u32 (!%p166_p2), %v419_v39, 7 }
   0xd   : > { %1600 = vmatpush3.bf16.msra.mxu1 %v1680_v7  ;;  %1579 = vmatprep.subr.bf16.mxu0 %v1681_v8  ;;  %s2073_s16 = smov (!%p195_p3, %s1369_s16), 1  ;;  %v1697_v24 = vld [vmem:[%s2064_s1 + $0xf0] sm:$0xff]   ;;  %v1701_v28 = vld [vmem:[%s2064_s1 + $0xf8] sm:$0xff]   ;;  %vm320_vm3 = vmor %vm318_vm0, %vm319_vm1 }
   0xe   : > { %1601 = vmatprep.subr.bf16.mxu1 %v1682_v9  ;;  %v1698_v25 = vld [vmem:[%s2064_s1 + $0x70] sm:$0xff]   ;;  %s1663_s21 = smul.u32 40, %s2073_s16  ;;  %v1702_v29 = vld [vmem:[%s2064_s1 + $0x78] sm:$0xff]   ;;  %v1705_v44 = vld [vmem:[%s2064_s1 + $0x140] sm:$0xff]   ;;  %s1567_s7 = sshll.u32 %s2073_s16, 3 }
   0xf   : > { %v1699_v26 = vld [vmem:[%s2064_s1 + $0xb0] sm:$0xff]   ;;  %v1703_v30 = vld [vmem:[%s2064_s1 + $0xb8] sm:$0xff]   ;;  %vm1895_vm5 = vmor %vm320_vm3, %vm321_vm2  ;;  %s204_s10 = scalar_lea.vmem %s2066_s3, %s1567_s7  ;;  %s1377_s11 = sshll.u32 %s2073_s16, 1 }
  0x10   : > { %1580 = vmatpush3.bf16.msra.mxu0 %v1683_v10  ;;  %v1700_v27 = vld [vmem:[%s2064_s1 + $0x30] sm:$0xff]   ;;  %s1879_s6 = scalar_lea.vmem %s2063_s0, %s1663_s21  ;;  %v1704_v31 = vld [vmem:[%s2064_s1 + $0x38] sm:$0xff]   ;;  %v1706_v62 = vld [vmem:[%s2064_s1 + $0x1c0] sm:$0xff]   ;;  %v1745_v10 = vmov 1983009808   ;;  %s208_s14 = scalar_lea.vmem %s2067_s4, %s1377_s11 }
  0x11   : > { %1602 = vmatpush3.bf16.msra.mxu1 %v1684_v11  ;;  %1581 = vmatprep.subr.bf16.mxu0 %v1685_v12  ;;  %v1382_v32 = vld.sshfl [vmem:[%s1879_s6] sm:$0x5f pattern:$0x76325410]  ;;  %vm1905_vm6 = vmor %vm1895_vm5, %vm323_vm4  ;;  %v417_v11 = vunpack.c.l.s4 %v1745_v10  ;;  %v1717_v49 = vld [vmem:[%s2064_s1 + $0x158] sm:$0xff]  }
  0x12   : > { %1603 = vmatprep.subr.bf16.mxu1 %v1686_v13  ;;  %v1383_v33 = vld.sshfl [vmem:[%s1879_s6 + $0x8] sm:$0x5f pattern:$0x76325410]  ;;  %v293_v34 = vcombine.high %v1382_v32, %v1382_v32  ;;  %v326_v41 = vshrl.u32 %v1382_v32, 16  ;;  %v329_v42 = vshll.u32 %v1382_v32, 16 }
  0x13   : > { %v1384_v35 = vld.sshfl [vmem:[%s1879_s6 + $0x10] sm:$0x5f pattern:$0x76325410]  ;;  %v301_v36 = vcombine.high %v1383_v33, %v1383_v33  ;;  %v340_v45 = vshrl.u32 %v1383_v33, 16  ;;  %v343_v46 = vshll.u32 %v1383_v33, 16 }
  0x14   : > { %1582 = vmatpush3.bf16.msra.mxu0 %v1687_v14  ;;  %v1385_v37 = vld.sshfl [vmem:[%s1879_s6 + $0x18] sm:$0x5f pattern:$0x76325410]  ;;  %v309_v38 = vcombine.high %v1384_v35, %v1384_v35  ;;  %v335_v43 = vshll.u32 %v293_v34, 16  ;;  %v354_v48 = vshrl.u32 %v1384_v35, 16 }
  0x15   : > { %1604 = vmatpush3.bf16.msra.mxu1 %v1688_v15  ;;  %1583 = vmatprep.subr.bf16.mxu0 %v1689_v16  ;;  %v317_v40 = vcombine.high %v1385_v37, %v1385_v37  ;;  %v349_v47 = vshll.u32 %v301_v36, 16  ;;  %v328_v50 = vrot.slane %v326_v41, 6  ;;  %v331_v51 = vrot.slane %v329_v42, 7  ;;  %v1708_v36 = vld [vmem:[%s2064_s1 + $0x180] sm:$0xff]   ;;  %v1709_v41 = vld [vmem:[%s2064_s1 + $0x148] sm:$0xff]  }
  0x16   : > { %1605 = vmatprep.subr.bf16.mxu1 %v1690_v17  ;;  %v337_v52 = vrot.slane %v335_v43, 7  ;;  %v357_v53 = vshll.u32 %v1384_v35, 16  ;;  %v342_v54 = vrot.slane %v340_v45, 6  ;;  %v345_v55 = vrot.slane %v343_v46, 7  ;;  %v1712_v42 = vld [vmem:[%s2064_s1 + $0x188] sm:$0xff]   ;;  %v1714_v43 = vld [vmem:[%s2064_s1 + $0x1d0] sm:$0xff]  }
  0x17   : > { %v351_v56 = vrot.slane %v349_v47, 7  ;;  %v356_v57 = vrot.slane %v354_v48, 6  ;;  %v332_v58 = vor.u32 %v331_v51, %v328_v50  ;;  %v363_v60 = vshll.u32 %v309_v38, 16  ;;  %v1713_v45 = vld [vmem:[%s2064_s1 + $0x150] sm:$0xff]   ;;  %v1718_v47 = vld [vmem:[%s2064_s1 + $0x1d8] sm:$0xff]   ;;  %v1722_v51 = vld [vmem:[%s2064_s1 + $0x1e0] sm:$0xff]  }
  0x18   : > { %1584 = vmatpush3.bf16.msra.mxu0 %v1691_v18  ;;  %v359_v59 = vrot.slane %v357_v53, 7  ;;  %v368_v61 = vshrl.u32 %v1385_v37, 16  ;;  %v346_v0 = vor.u32 %v345_v55, %v342_v54  ;;  %v371_v1 = vshll.u32 %v1385_v37, 16  ;;  %v1710_v37 = vld [vmem:[%s2064_s1 + $0x1c8] sm:$0xff]   ;;  %v1716_v46 = vld [vmem:[%s2064_s1 + $0x190] sm:$0xff]   ;;  %v1720_v50 = vld [vmem:[%s2064_s1 + $0x198] sm:$0xff]  }
  0x19   : > { %1606 = vmatpush3.bf16.msra.mxu1 %v1692_v19  ;;  %1585 = vmatprep.subr.bf16.mxu0 %v1693_v20  ;;  %v377_v2 = vshll.u32 %v317_v40, 16  ;;  %v333_v3 = vrot.slane %v332_v58, 2  ;;  %v365_v8 = vrot.slane %v363_v60, 7  ;;  %v418_v18 = vunpack.c.0.s8 %v417_v11  ;;  %v1707_v40 = vld [vmem:[%s2064_s1 + $0x100] sm:$0xff]   ;;  %v1715_v48 = vld [vmem:[%s2064_s1 + $0x110] sm:$0xff]   ;;  %v1726_v55 = vld [vmem:[%s2064_s1 + $0x1e8] sm:$0xff]  }
  0x1a   : > { %1607 = vmatprep.subr.bf16.mxu1 %v1694_v21  ;;  %v360_v4 = vor.u32 %v359_v59, %v356_v57  ;;  %v370_v5 = vrot.slane %v368_v61, 6  ;;  %v347_v7 = vrot.slane %v346_v0, 2  ;;  %v373_v9 = vrot.slane %v371_v1, 7  ;;  %v1721_v53 = vld [vmem:[%s2064_s1 + $0x160] sm:$0xff]   ;;  %v1725_v57 = vld [vmem:[%s2064_s1 + $0x168] sm:$0xff]   ;;  %v1730_v60 = vld [vmem:[%s2064_s1 + $0x1f0] sm:$0xff]  }
  0x1b   : > { %v338_v12 = vsel %vm1905_vm6, %v333_v3, %v337_v52  ;;  %v379_v14 = vrot.slane %v377_v2, 7  ;;  %v1378_v15 = vld.sshfl [vmem:[%s1879_s6] sm:$0xf pattern:$0x76325410]  ;;  %v1719_v52 = vld [vmem:[%s2064_s1 + $0x118] sm:$0xff]  }
  0x1c   : > { %1586 = vmatpush3.bf16.msra.mxu0 %v1695_v22  ;;  %v361_v13 = vrot.slane %v360_v4, 2  ;;  %v1914_v16 = vsel %vm1905_vm6, %v347_v7, %v351_v56  ;;  %v374_v17 = vor.u32 %v373_v9, %v370_v5  ;;  %v1917_v19 = vld.sshfl [vmem:[%s1879_s6 + $0x8] sm:$0xf pattern:$0x76325410]  ;;  %v1724_v54 = vld [vmem:[%s2064_s1 + $0x1a0] sm:$0xff]  }
  0x1d   : > { %1608 = vmatpush3.bf16.msra.mxu1 %v1696_v23  ;;  %1587 = vmatprep.subr.bf16.mxu0 %v1697_v24  ;;  %v414_v20 = vcombine.low %v338_v12, %v1914_v16  ;;  %v1921_v21 = vld.sshfl [vmem:[%s1879_s6 + $0x10] sm:$0xf pattern:$0x76325410]  ;;  %v571_v22 = vcombine.low %v1378_v15, %v1917_v19  ;;  %v1723_v56 = vld [vmem:[%s2064_s1 + $0x120] sm:$0xff]   ;;  %v1728_v58 = vld [vmem:[%s2064_s1 + $0x1a8] sm:$0xff]  }
  0x1e   : > { %1609 = vmatprep.subr.bf16.mxu1 %v1698_v25  ;;  %v1926_v23 = vsel %vm1905_vm6, %v361_v13, %v365_v8  ;;  %v375_v24 = vrot.slane %v374_v17, 2  ;;  %v1928_v25 = vsub.s32 %v418_v18, %v420_v6  ;;  %v798_v59 = vcombine.low %v1917_v19, %v1921_v21  ;;  %v1727_v61 = vld [vmem:[%s2064_s1 + $0x128] sm:$0xff]   ;;  %v1457_v0 = vld.sshfl [vmem:[%s1879_s6 + $0x20] sm:$0xf pattern:$0x76325410] }
  0x1f   : > { %v1732_v1 = vld [vmem:[%s2064_s1 + $0x1b0] sm:$0xff]   ;;  %v1513_v4 = vld.sshfl [vmem:[%s1879_s6 + $0x20] sm:$0x5f pattern:$0x76325410]  ;;  %v1734_v5 = vld [vmem:[%s2064_s1 + $0x1f8] sm:$0xff]  }
  0x20   : > { %1588 = vmatpush3.bf16.msra.mxu0 %v1699_v26  ;;  %v1931_v26 = vld.sshfl [vmem:[%s1879_s6 + $0x18] sm:$0xf pattern:$0x76325410]  ;;  %v806_v3 = vrot.slane %v798_v59, %v1928_v25  ;;  %v996_v6 = vcombine.high %v1513_v4, %v1513_v4  ;;  %v1040_v7 = vshrl.u32 %v1513_v4, 16  ;;  %v1043_v8 = vshll.u32 %v1513_v4, 16 }
  0x21   : > { %1610 = vmatpush3.bf16.msra.mxu1 %v1700_v27  ;;  %1589 = vmatprep.subr.bf16.mxu0 %v1701_v28  ;;  %v572_v27 = vcombine.low %v1921_v21, %v1931_v26  ;;  %v1937_v28 = vsel %vm1905_vm6, %v375_v24, %v379_v14  ;;  %v799_v2 = vcombine.low %v1931_v26, %v1457_v0  ;;  %v1731_v9 = vld [vmem:[%s2064_s1 + $0x130] sm:$0xff]   ;;  %v1733_v11 = vld [vmem:[%s2064_s1 + $0x178] sm:$0xff]  }
  0x22   : > { %1611 = vmatprep.subr.bf16.mxu1 %v1702_v29  ;;  %v579_v29 = vrot.slane %v571_v22, %v1928_v25  ;;  %v1042_v12 = vrot.slane %v1040_v7, 6  ;;  %v1045_v13 = vrot.slane %v1043_v8, 7  ;;  %v1049_v14 = vshll.u32 %v996_v6, 16  ;;  %v1736_v15 = vld [vmem:[%s2064_s1 + $0x1b8] sm:$0xff]  }
  0x23   : > { %v586_v32 = vrot.slane %v572_v27, %v1928_v25  ;;  %v813_v10 = vrot.slane %v799_v2, %v1928_v25  ;;  %v1086_v21 = vcombine.low %v1914_v16, %v1926_v23 }
  0x24   : > { %1590 = vmatpush3.bf16.msra.mxu0 %v1703_v30  ;;  %v415_v30 = vcombine.low %v1926_v23, %v1937_v28  ;;  %v1046_v18 = vor.u32 %v1045_v13, %v1042_v12  ;;  %v1051_v19 = vrot.slane %v1049_v14, 7 }
  0x25   : > { %1612 = vmatpush3.bf16.msra.mxu1 %v1704_v31  ;;  %1619 = vmatprep.subr.bf16.mxu0 %v1705_v44  ;;  %v422_v31 = vrot.slane %v414_v20, %v1928_v25  ;;  %v588_v34 = vcombine.high %v579_v29, %v586_v32  ;;  %v587_v35 = vcombine.low %v579_v29, %v586_v32  ;;  %v1711_v44 = vld [vmem:[%s2064_s1 + $0x108] sm:$0xff]   ;;  %v1735_v20 = vld [vmem:[%s2064_s1 + $0x138] sm:$0xff]  }
  0x26   : > { %1641 = vmatprep.subr.bf16.mxu1 %v1706_v62  ;;  %v429_v33 = vrot.slane %v415_v30, %v1928_v25  ;;  %v1729_v62 = vld [vmem:[%s2064_s1 + $0x170] sm:$0xff]   ;;  %v815_v17 = vcombine.high %v806_v3, %v813_v10  ;;  %v1047_v22 = vrot.slane %v1046_v18, 2  ;;  %v814_v26 = vcombine.low %v806_v3, %v813_v10 }
  0x27   : > { %719 = vmatprep.mubr.bf16.mxu1 %v588_v34  ;;  %v1094_v29 = vrot.slane %v1086_v21, %v1928_v25 }
  0x28   : > { %v431_v38 = vcombine.high %v422_v31, %v429_v33  ;;  %v430_v39 = vcombine.low %v422_v31, %v429_v33  ;;  %720 = vmatmul.mubr.bf16.vlgmr.msra.gmra.mrb[0].mxu1 %v587_v35  ;;  %v1052_v24 = vsel %vm1905_vm6, %v1047_v22, %v1051_v19 }
  0x29   : > { %1642 = vmatpush3.bf16.msra.mxu1 %v1708_v36  ;;  %v1087_v27 = vcombine.low %v1937_v28, %v1052_v24 }
  0x2a   : > { %562 = vmatprep.mubr.bf16.mxu0 %v431_v38  ;;  %1643 = vmatprep.subr.bf16.mxu1 %v1710_v37 }
  0x2b   : > { %563 = vmatmul.mubr.bf16.vlgmr.msra.gmra.mrb[0].mxu0 %v430_v39  ;;  %v1101_v30 = vrot.slane %v1087_v27, %v1928_v25 }
  0x2c   : > { %1620 = vmatpush3.bf16.msra.mxu0 %v1707_v40  ;;  %946 = vmatprep.mubr.bf16.mxu0 %v815_v17 }
  0x2d   : > { %1621 = vmatprep.subr.bf16.mxu0 %v1709_v41  ;;  %1644 = vmatpush3.bf16.msra.mxu1 %v1712_v42  ;;  %v1103_v31 = vcombine.high %v1094_v29, %v1101_v30  ;;  %v1102_v32 = vcombine.low %v1094_v29, %v1101_v30 }
  0x2e   : > { %1645 = vmatprep.subr.bf16.mxu1 %v1714_v43 }
  0x2f   : > { %1234 = vmatprep.mubr.bf16.mxu1 %v1103_v31 }
  0x30   : > { %1622 = vmatpush3.bf16.msra.mxu0 %v1711_v44 }
  0x31   : > { %1623 = vmatprep.subr.bf16.mxu0 %v1713_v45  ;;  %1646 = vmatpush3.bf16.msra.mxu1 %v1716_v46 }
  0x32   : > { %1647 = vmatprep.subr.bf16.mxu1 %v1718_v47 }
  0x34   : > { %1624 = vmatpush3.bf16.msra.mxu0 %v1715_v48 }
  0x35   : > { %1625 = vmatprep.subr.bf16.mxu0 %v1717_v49  ;;  %1648 = vmatpush3.bf16.msra.mxu1 %v1720_v50 }
  0x36   : > { %1649 = vmatprep.subr.bf16.mxu1 %v1722_v51 }
  0x38   : > { %1626 = vmatpush3.bf16.msra.mxu0 %v1719_v52 }
  0x39   : > { %1627 = vmatprep.subr.bf16.mxu0 %v1721_v53  ;;  %1650 = vmatpush3.bf16.msra.mxu1 %v1724_v54  ;;  %v1562_v54 = vld [vmem:[%s2065_s2] ss:$0 sm:$0xff] }
  0x3a   : > { %1651 = vmatprep.subr.bf16.mxu1 %v1726_v55 }
  0x3c   : > { %1628 = vmatpush3.bf16.msra.mxu0 %v1723_v56 }
  0x3d   : > { %1629 = vmatprep.subr.bf16.mxu0 %v1725_v57  ;;  %1652 = vmatpush3.bf16.msra.mxu1 %v1728_v58 }
  0x3e   : > { %1653 = vmatprep.subr.bf16.mxu1 %v1730_v60 }
  0x40   : > { %1630 = vmatpush3.bf16.msra.mxu0 %v1727_v61 }
  0x41   : > { %1631 = vmatprep.subr.bf16.mxu0 %v1729_v62  ;;  %1654 = vmatpush3.bf16.msra.mxu1 %v1732_v1 }
  0x42   : > { %1655 = vmatprep.subr.bf16.mxu1 %v1734_v5 }
  0x44   : > { %1632 = vmatpush3.bf16.msra.mxu0 %v1731_v9 }
  0x45   : > { %1633 = vmatprep.subr.bf16.mxu0 %v1733_v11  ;;  %1656 = vmatpush3.bf16.msra.mxu1 %v1736_v15 }
  0x48   : > { %1634 = vmatpush3.bf16.msra.mxu0 %v1735_v20  ;;  %1235 = vmatmul.mubr.bf16.vlgmr.msra.gmra.mrb[4].mxu1 %v1102_v32 }
  0x4b   : > { %947 = vmatmul.mubr.bf16.vlgmr.msra.gmra.mrb[4].mxu0 %v814_v26 }
  0xfb   : > { %v1613_v16 = vpop.f32.mrb[0].mxu1 }
  0xfc   : > { %v1614_v23 = vpop.f32.mrb[1].mxu1 }
  0xfd   : > { %v1615_v34 = vadd.f32 %v1614_v23, %v1613_v16  ;;  %v1616_v35 = vpop.f32.mrb[2].mxu1 }
  0xfe   : > { %v1591_v33 = vpop.f32.mrb[0].mxu0  ;;  %v1617_v36 = vpop.f32.mrb[3].mxu1 }
  0xff   : > { %v1592_v63 = vpop.f32.mrb[1].mxu0  ;;  %v1618_v39 = vadd.f32 %v1617_v36, %v1616_v35 }
 0x100   : > { %v1593_v37 = vadd.f32 %v1592_v63, %v1591_v33  ;;  %v1594_v38 = vpop.f32.mrb[2].mxu0 }
 0x101   : > { %v1595_v28 = vpop.f32.mrb[3].mxu0 }
 0x102   : > { %v722_v40 = vadd.f32 %v1615_v34, %v1593_v37  ;;  %v1596_v41 = vadd.f32 %v1595_v28, %v1594_v38 }
 0x104   : > { %v725_v42 = vadd.f32 %v1618_v39, %v1596_v41 }
 0x11b   : > { %v1657_v47 = vpop.f32.mrb[4].mxu1 }
 0x11c   : > { %v1658_v50 = vpop.f32.mrb[5].mxu1 }
 0x11d   : > { %v1659_v51 = vadd.f32 %v1658_v50, %v1657_v47  ;;  %v1660_v52 = vpop.f32.mrb[6].mxu1 }
 0x11e   : > { %v1635_v25 = vpop.f32.mrb[4].mxu0  ;;  %v1661_v55 = vpop.f32.mrb[7].mxu1 }
 0x11f   : > { %v1636_v43 = vpop.f32.mrb[5].mxu0  ;;  %v1662_v57 = vadd.f32 %v1661_v55, %v1660_v52 }
 0x120   : > { %v1637_v44 = vadd.f32 %v1636_v43, %v1635_v25  ;;  %v1638_v45 = vpop.f32.mrb[6].mxu0 }
 0x121   : > { %v1639_v46 = vpop.f32.mrb[7].mxu0 }
 0x122   : > { %v955_v48 = vadd.f32 %v1637_v44, %v722_v40  ;;  %v1640_v49 = vadd.f32 %v1639_v46, %v1638_v45 }
 0x124   : > { %v956_v53 = vadd.f32 %v1640_v49, %v725_v42  ;;  %v1243_v56 = vadd.f32 %v1659_v51, %v955_v48 }
 0x126   : > { %v1252_v58 = vadd.f32 %v1562_v54, %v1243_v56  ;;  %v1244_v59 = vadd.f32 %v1662_v57, %v956_v53 }
 0x128   : > { %v1253_v60 = vadd.f32 %v1562_v54, %v1244_v59  ;;  %v1271_v61 = vmul.f32 %v1252_v58, %v1252_v58 }
 0x12a   : > { %v1573_v62 = vpack.c.bf16 %v1253_v60, %v1252_v58  ;;  %v1264_v0 = vadd.f32 %v1253_v60, %v1252_v58  ;;  %v1272_v1 = vmul.f32 %v1253_v60, %v1253_v60 }
 0x12c   : > { %1574 = vst [vmem:[%s204_s10] sm:$0xff] %v1573_v62   ;;  %v1265_v2 = vrot.slane %v1264_v0, 4  ;;  %v1273_v3 = vadd.f32 %v1272_v1, %v1271_v61 }
 0x12e   : > { %v1266_v4 = vadd.f32 %v1265_v2, %v1264_v0  ;;  %v1274_v5 = vrot.slane %v1273_v3, 4 }
 0x130   : > { %v1267_v6 = vrot.slane %v1266_v4, 2  ;;  %v1275_v7 = vadd.f32 %v1274_v5, %v1273_v3 }
 0x132   : > { %v1268_v8 = vadd.f32 %v1267_v6, %v1266_v4  ;;  %v1276_v9 = vrot.slane %v1275_v7, 2 }
 0x134   : > { %v1269_v10 = vrot.slane %v1268_v8, 1  ;;  %v1277_v11 = vadd.f32 %v1276_v9, %v1275_v7 }
 0x136   : > { %v1278_v12 = vrot.slane %v1277_v11, 1  ;;  %v1270_v13 = vadd.f32 %v1269_v10, %v1268_v8 }
 0x138   : > { %v1279_v14 = vadd.f32 %v1278_v12, %v1277_v11 }
 0x13a   : > { %v1281_v15 = vsel %vm1280_vm7, %v1270_v13, %v1279_v14 }
 0x13b   : > { %1282 = vst [vmem:[%s208_s14] sm:$0x3] %v1281_v15 }
 0x13c PF: > { %s15_s15 = sadd.s32 1, %s1743_s15  }
 0x13d   : > { %p12_p4 = scmp.ge.s32.totalorder %s15_s15, 4  }
 0x13f   :  { %14 = sbr.rel (!%p12_p4) target bundleno = 1 (0x1), region = 78 }

</bundles_post_ra>
